<compile_context>
chip_gen: v7x
topology: tpu7x:2x2x1
jax: 0.10.0
libtpu: 0.0.40
codegen_flags: <defaults>
</compile_context>

<pallas_src>
import functools

import jax
import jax.numpy as jnp
from jax.experimental import pallas as pl
from jax.experimental.pallas import tpu as pltpu


def _round_up(x, m):
    return ((x + m - 1) // m) * m


# ----------------------------------------------------------------------------
# Pallas kernel 1: full-K matmul with fused per-channel affine + optional ReLU
#   out = relu?((x @ w) * scale + shift)
# ----------------------------------------------------------------------------
def _matmul_affine_kernel(x_ref, w_ref, scale_ref, shift_ref, o_ref,
                          *, apply_relu):
    y = jnp.dot(x_ref[...], w_ref[...], preferred_element_type=jnp.float32)
    y = y * scale_ref[...] + shift_ref[...]
    if apply_relu:
        y = jnp.maximum(y, 0.0)
    o_ref[...] = y.astype(o_ref.dtype)


def matmul_affine(x_bf16, w_bf16, scale, shift, apply_relu, out_dtype):
    """x:(Mp,K) bf16 (Mp % 8 == 0), w:(K,N) bf16 pre-prepared, scale/shift:(1,N) f32."""
    Mp, K = x_bf16.shape
    K2, N = w_bf16.shape
    assert K == K2 and Mp % 8 == 0

    # Shape-adaptive tiles: small-M layers get tm == M (no zero-row padding);
    # full-K blocks collapse the reduction grid to a single step; tn capped at
    # 256 so wide layers keep multiple parallel N blocks.
    tm = 128 if Mp % 128 == 0 else Mp
    tn = N if N < 256 else 256
    assert N % tn == 0
    grid = (Mp // tm, N // tn)

    return pl.pallas_call(
        functools.partial(_matmul_affine_kernel, apply_relu=apply_relu),
        out_shape=jax.ShapeDtypeStruct((Mp, N), out_dtype),
        grid_spec=pltpu.PrefetchScalarGridSpec(
            num_scalar_prefetch=0,
            grid=grid,
            in_specs=[
                pl.BlockSpec((tm, K), lambda i, j: (i, 0)),
                pl.BlockSpec((K, tn), lambda i, j: (0, j)),
                pl.BlockSpec((1, tn), lambda i, j: (0, j)),
                pl.BlockSpec((1, tn), lambda i, j: (0, j)),
            ],
            out_specs=pl.BlockSpec((tm, tn), lambda i, j: (i, j)),
        ),
        compiler_params=pltpu.CompilerParams(
            dimension_semantics=("parallel", "parallel")),
    )(x_bf16, w_bf16, scale, shift)


# ----------------------------------------------------------------------------
# Pallas kernel 2: fully fused bbox head (5 chained matmuls on a 1x1 feature)
#   x:(8,1024)  ->  conv3x3(center tap)+ReLU x4  ->  conv1x1  -> (8,128)
# ----------------------------------------------------------------------------
def _head_kernel(x_ref, w1_ref, b1_ref, w2_ref, b2_ref, w3_ref, b3_ref,
                 w4_ref, b4_ref, w5_ref, b5_ref, o_ref):
    def fc(h, w_ref, b_ref):
        return jnp.dot(h, w_ref[...], preferred_element_type=jnp.float32) + b_ref[...]

    h = x_ref[...]
    h = jnp.maximum(fc(h, w1_ref, b1_ref), 0.0).astype(jnp.bfloat16)
    h = jnp.maximum(fc(h, w2_ref, b2_ref), 0.0).astype(jnp.bfloat16)
    h = jnp.maximum(fc(h, w3_ref, b3_ref), 0.0).astype(jnp.bfloat16)
    h = jnp.maximum(fc(h, w4_ref, b4_ref), 0.0).astype(jnp.bfloat16)
    o_ref[...] = fc(h, w5_ref, b5_ref)  # final 1x1 conv, no ReLU


def head_forward(x_flat_bf16, head_params):
    """x_flat_bf16: (8, 1024) bf16.  Returns (8, 128) f32 (only [:2,:4] valid)."""
    args = [x_flat_bf16]
    in_specs = [pl.BlockSpec(x_flat_bf16.shape, lambda i: (0, 0))]
    for lyr in head_params:
        w, b = lyr["wmat"], lyr["bias"]
        args += [w, b]
        in_specs += [pl.BlockSpec(w.shape, lambda i: (0, 0)),
                     pl.BlockSpec(b.shape, lambda i: (0, 0))]

    return pl.pallas_call(
        _head_kernel,
        out_shape=jax.ShapeDtypeStruct((8, 128), jnp.float32),
        grid_spec=pltpu.PrefetchScalarGridSpec(
            num_scalar_prefetch=0,
            grid=(1,),
            in_specs=in_specs,
            out_specs=pl.BlockSpec((8, 128), lambda i: (0, 0)),
        ),
        compiler_params=pltpu.CompilerParams(
            dimension_semantics=("arbitrary",)),
    )(*args)


# ----------------------------------------------------------------------------
# im2col glue (plain JAX): NHWC -> (N*Ho*Wo, kh*kw*Cin)
# ----------------------------------------------------------------------------
def im2col(x_nhwc, kh, kw, stride, padding):
    N, H, W, C = x_nhwc.shape
    xp = jnp.pad(x_nhwc,
                 ((0, 0), (padding, padding), (padding, padding), (0, 0)))
    Ho = (H + 2 * padding - kh) // stride + 1
    Wo = (W + 2 * padding - kw) // stride + 1
    taps = []
    for di in range(kh):
        for dj in range(kw):
            taps.append(xp[:, di:di + stride * Ho:stride,
                            dj:dj + stride * Wo:stride, :])
    patches = jnp.concatenate(taps, axis=-1)          # (N, Ho, Wo, kh*kw*C)
    return patches.reshape(N * Ho * Wo, kh * kw * C), (N, Ho, Wo)


def conv_block(x_nhwc, layer, *, kh, kw, stride, padding, relu):
    """Conv2d + fused per-channel affine (+ReLU) via im2col + Pallas matmul."""
    wmat = layer["wmat"]                               # (kh*kw*cin, cout) bf16
    cout = wmat.shape[1]
    patches, (N, Ho, Wo) = im2col(x_nhwc, kh, kw, stride, padding)
    M = patches.shape[0]
    Mp = _round_up(M, 8)
    patches = patches.astype(jnp.bfloat16)
    if Mp != M:
        patches = jnp.pad(patches, ((0, Mp - M), (0, 0)))
    out = matmul_affine(patches, wmat, layer["scale"], layer["shift"],
                        relu, jnp.bfloat16)
    return out[:M].reshape(N, Ho, Wo, cout)


# ----------------------------------------------------------------------------
# Deterministic parameter init + one-time weight preparation
# ----------------------------------------------------------------------------
def init_params(key):
    bn_eps = 1e-5
    backbone_cfg = [(3, 64), (64, 128), (128, 256), (256, 512), (512, 1024)]
    head_cfg = [(1024, 512, 3), (512, 256, 3), (256, 128, 3), (128, 64, 3),
                (64, 4, 1)]
    keys = jax.random.split(key, len(backbone_cfg) + len(head_cfg))

    backbone = []
    for i, (cin, cout) in enumerate(backbone_cfg):
        k1, k2, k3, k4 = jax.random.split(keys[i], 4)
        w = jax.random.normal(k1, (cout, cin, 3, 3), jnp.float32) * 0.05
        b = jax.random.normal(k2, (cout,), jnp.float32) * 0.05
        gamma = 1.0 + 0.1 * jax.random.normal(k3, (cout,), jnp.float32)
        beta = 0.1 * jax.random.normal(k4, (cout,), jnp.float32)
        running_mean = jnp.zeros((cout,), jnp.float32)
        running_var = jnp.ones((cout,), jnp.float32)
        # Fold BN (eval mode) + conv bias into a single affine epilogue.
        bn_scale = gamma / jnp.sqrt(running_var + bn_eps)
        bn_shift = beta - running_mean * bn_scale
        eff_scale = bn_scale
        eff_shift = b * bn_scale + bn_shift
        # Prepare once: (cout,cin,3,3) -> (3*3*cin, cout), bf16 (matches im2col
        # tap ordering: kh-major, kw, cin-minor).
        wmat = jnp.transpose(w, (2, 3, 1, 0)).reshape(9 * cin, cout)
        backbone.append(dict(
            wmat=wmat.astype(jnp.bfloat16),
            scale=eff_scale.reshape(1, cout),
            shift=eff_shift.reshape(1, cout)))

    head = []
    for j, (cin, cout, ks) in enumerate(head_cfg):
        k1, k2 = jax.random.split(keys[len(backbone_cfg) + j], 2)
        w = jax.random.normal(k1, (cout, cin, ks, ks), jnp.float32) * 0.05
        b = jax.random.normal(k2, (cout,), jnp.float32) * 0.05
        # Head operates on 1x1 spatial maps with "same" padding, so only the
        # center tap of each kernel ever multiplies nonzero data.
        c = ks // 2
        wmat = jnp.transpose(w[:, :, c, c], (1, 0))    # (cin, cout)
        head.append(dict(wmat=wmat.astype(jnp.bfloat16),
                         bias=b.reshape(1, cout)))

    # Pad the final (64 -> 4) layer out to 128 lanes for a lane-aligned store.
    w_last, b_last = head[-1]["wmat"], head[-1]["bias"]
    head[-1]["wmat"] = jnp.pad(w_last, ((0, 0), (0, 128 - w_last.shape[1])))
    head[-1]["bias"] = jnp.pad(b_last, ((0, 0), (0, 128 - b_last.shape[1])))

    return dict(backbone=backbone, head=head)


# ----------------------------------------------------------------------------
# Full forward pass
# ----------------------------------------------------------------------------
def cropper_net_forward(x_nchw, params):
    x = jnp.transpose(x_nchw, (0, 2, 3, 1)).astype(jnp.bfloat16)  # NCHW -> NHWC

    # Backbone: 5x (conv3x3 s2 p1 + folded BN + ReLU)
    for layer in params["backbone"]:
        x = conv_block(x, layer, kh=3, kw=3, stride=2, padding=1, relu=True)

    # The fused head assumes a 1x1 spatial map (true for 32x32 input: 5x /2).
    assert x.shape[1] == 1 and x.shape[2] == 1, "fused head needs 1x1 features"
    N = x.shape[0]
    feat = x.reshape(N, -1)                           # (N, 1024) bf16
    Mp = _round_up(N, 8)
    feat = jnp.pad(feat, ((0, Mp - N), (0, 0)))       # (8, 1024)

    head_out = head_forward(feat, params["head"])     # (8, 128) f32
    bbox = head_out[:N, :4]                           # AdaptiveAvgPool(1,1) on
    return jax.nn.sigmoid(bbox)                       # 1x1 maps is identity.


if __name__ == "__main__":
    key = jax.random.PRNGKey(0)
    pkey, xkey = jax.random.split(key)
    params = init_params(pkey)

    # Small input: batch=2, channels=3, spatial=32 (32 -> 16 -> 8 -> 4 -> 2 -> 1)
    x = jax.random.normal(xkey, (2, 3, 32, 32), jnp.float32)

    fwd = jax.jit(cropper_net_forward)
    bbox = fwd(x, params)
    bbox = jax.block_until_ready(bbox)

    assert bbox.shape == (2, 4)
    assert bool(jnp.all(jnp.isfinite(bbox)))
    print("KERNEL_OK")
</pallas_src>

<mosaic_0001>
module attributes {stable_mosaic.version = 11 : i64} {
  func.func @_matmul_affine_kernel(%arg0: i32, %arg1: i32, %arg2: memref<128x27xbf16, #tpu.memory_space<vmem>>, %arg3: memref<27x64xbf16, #tpu.memory_space<vmem>>, %arg4: memref<1x64xf32, #tpu.memory_space<vmem>>, %arg5: memref<1x64xf32, #tpu.memory_space<vmem>>, %arg6: memref<128x64xbf16, #tpu.memory_space<vmem>>) attributes {dimension_semantics = [#tpu.dimension_semantics<parallel>, #tpu.dimension_semantics<parallel>], iteration_bounds = array<i64: 4, 1>, scalar_prefetch = 0 : i64, scratch_operands = 0 : i64, tpu.core_type = #tpu.core_type<tc>, window_params = [{transform_indices = @transform_0, window_bounds = array<i64: 128, 27>}, {transform_indices = @transform_1, window_bounds = array<i64: 27, 64>}, {transform_indices = @transform_2, window_bounds = array<i64: 1, 64>}, {transform_indices = @transform_3, window_bounds = array<i64: 1, 64>}, {transform_indices = @transform_4, window_bounds = array<i64: 128, 64>}]} {
    %c0 = arith.constant 0 : index
    %c0_0 = arith.constant 0 : index
    %0 = vector.load %arg2[%c0, %c0_0] : memref<128x27xbf16, #tpu.memory_space<vmem>>, vector<128x27xbf16>
    %c0_1 = arith.constant 0 : index
    %c0_2 = arith.constant 0 : index
    %1 = vector.load %arg3[%c0_1, %c0_2] : memref<27x64xbf16, #tpu.memory_space<vmem>>, vector<27x64xbf16>
    %cst = arith.constant dense<0.000000e+00> : vector<128x64xf32>
    %2 = tpu.matmul %0, %1, %cst {dimension_numbers = #tpu.dot_dimension_numbers<[1], [0], [0], [1], [0, 0, 1, 1], [], []>} : vector<128x27xbf16>, vector<27x64xbf16>, vector<128x64xf32> -> vector<128x64xf32>
    %c0_3 = arith.constant 0 : index
    %c0_4 = arith.constant 0 : index
    %3 = vector.load %arg4[%c0_3, %c0_4] : memref<1x64xf32, #tpu.memory_space<vmem>>, vector<1x64xf32>
    %4 = vector.broadcast %3 : vector<1x64xf32> to vector<128x64xf32>
    %5 = arith.mulf %2, %4 : vector<128x64xf32>
    %c0_5 = arith.constant 0 : index
    %c0_6 = arith.constant 0 : index
    %6 = vector.load %arg5[%c0_5, %c0_6] : memref<1x64xf32, #tpu.memory_space<vmem>>, vector<1x64xf32>
    %7 = vector.broadcast %6 : vector<1x64xf32> to vector<128x64xf32>
    %8 = arith.addf %5, %7 : vector<128x64xf32>
    %cst_7 = arith.constant 0.000000e+00 : f32
    %9 = vector.broadcast %cst_7 : f32 to vector<128x64xf32>
    %10 = arith.maximumf %8, %9 : vector<128x64xf32>
    %11 = arith.truncf %10 : vector<128x64xf32> to vector<128x64xbf16>
    %c0_8 = arith.constant 0 : index
    %c0_9 = arith.constant 0 : index
    %12 = vector.load %arg6[%c0_8, %c0_9] : memref<128x64xbf16, #tpu.memory_space<vmem>>, vector<128x64xbf16>
    tpu.vector_store %arg6[%c0_8, %c0_9], %11 {strides = array<i32>} : memref<128x64xbf16, #tpu.memory_space<vmem>>, vector<128x64xbf16>,
    return
  }
  func.func @transform_0(%arg0: i32, %arg1: i32) -> (i32, i32) {
    %c0_i32 = arith.constant 0 : i32
    %c0_i32_0 = arith.constant 0 : i32
    return %arg0, %c0_i32 : i32, i32
  }
  func.func @transform_1(%arg0: i32, %arg1: i32) -> (i32, i32) {
    %c0_i32 = arith.constant 0 : i32
    %c0_i32_0 = arith.constant 0 : i32
    return %c0_i32, %arg1 : i32, i32
  }
  func.func @transform_2(%arg0: i32, %arg1: i32) -> (i32, i32) {
    %c0_i32 = arith.constant 0 : i32
    %c0_i32_0 = arith.constant 0 : i32
    return %c0_i32, %arg1 : i32, i32
  }
  func.func @transform_3(%arg0: i32, %arg1: i32) -> (i32, i32) {
    %c0_i32 = arith.constant 0 : i32
    %c0_i32_0 = arith.constant 0 : i32
    return %c0_i32, %arg1 : i32, i32
  }
  func.func @transform_4(%arg0: i32, %arg1: i32) -> (i32, i32) {
    %c0_i32 = arith.constant 0 : i32
    return %arg0, %arg1 : i32, i32
  }
}

module attributes {stable_mosaic.version = 11 : i64} {
  func.func @_matmul_affine_kernel(%arg0: i32, %arg1: i32, %arg2: memref<128x576xbf16, #tpu.memory_space<vmem>>, %arg3: memref<576x128xbf16, #tpu.memory_space<vmem>>, %arg4: memref<1x128xf32, #tpu.memory_space<vmem>>, %arg5: memref<1x128xf32, #tpu.memory_space<vmem>>, %arg6: memref<128x128xbf16, #tpu.memory_space<vmem>>) attributes {dimension_semantics = [#tpu.dimension_semantics<parallel>, #tpu.dimension_semantics<parallel>], iteration_bounds = array<i64: 1, 1>, scalar_prefetch = 0 : i64, scratch_operands = 0 : i64, tpu.core_type = #tpu.core_type<tc>, window_params = [{transform_indices = @transform_0, window_bounds = array<i64: 128, 576>}, {transform_indices = @transform_1, window_bounds = array<i64: 576, 128>}, {transform_indices = @transform_2, window_bounds = array<i64: 1, 128>}, {transform_indices = @transform_3, window_bounds = array<i64: 1, 128>}, {transform_indices = @transform_4, window_bounds = array<i64: 128, 128>}]} {
    %c0 = arith.constant 0 : index
    %c0_0 = arith.constant 0 : index
    %0 = vector.load %arg2[%c0, %c0_0] : memref<128x576xbf16, #tpu.memory_space<vmem>>, vector<128x576xbf16>
    %c0_1 = arith.constant 0 : index
    %c0_2 = arith.constant 0 : index
    %1 = vector.load %arg3[%c0_1, %c0_2] : memref<576x128xbf16, #tpu.memory_space<vmem>>, vector<576x128xbf16>
    %cst = arith.constant dense<0.000000e+00> : vector<128x128xf32>
    %2 = tpu.matmul %0, %1, %cst {dimension_numbers = #tpu.dot_dimension_numbers<[1], [0], [0], [1], [0, 0, 1, 1], [], []>} : vector<128x576xbf16>, vector<576x128xbf16>, vector<128x128xf32> -> vector<128x128xf32>
    %c0_3 = arith.constant 0 : index
    %c0_4 = arith.constant 0 : index
    %3 = vector.load %arg4[%c0_3, %c0_4] : memref<1x128xf32, #tpu.memory_space<vmem>>, vector<1x128xf32>
    %4 = vector.broadcast %3 : vector<1x128xf32> to vector<128x128xf32>
    %5 = arith.mulf %2, %4 : vector<128x128xf32>
    %c0_5 = arith.constant 0 : index
    %c0_6 = arith.constant 0 : index
    %6 = vector.load %arg5[%c0_5, %c0_6] : memref<1x128xf32, #tpu.memory_space<vmem>>, vector<1x128xf32>
    %7 = vector.broadcast %6 : vector<1x128xf32> to vector<128x128xf32>
    %8 = arith.addf %5, %7 : vector<128x128xf32>
    %cst_7 = arith.constant 0.000000e+00 : f32
    %9 = vector.broadcast %cst_7 : f32 to vector<128x128xf32>
    %10 = arith.maximumf %8, %9 : vector<128x128xf32>
    %11 = arith.truncf %10 : vector<128x128xf32> to vector<128x128xbf16>
    %c0_8 = arith.constant 0 : index
    %c0_9 = arith.constant 0 : index
    %12 = vector.load %arg6[%c0_8, %c0_9] : memref<128x128xbf16, #tpu.memory_space<vmem>>, vector<128x128xbf16>
    tpu.vector_store %arg6[%c0_8, %c0_9], %11 {strides = array<i32>} : memref<128x128xbf16, #tpu.memory_space<vmem>>, vector<128x128xbf16>,
    return
  }
  func.func @transform_0(%arg0: i32, %arg1: i32) -> (i32, i32) {
    %c0_i32 = arith.constant 0 : i32
    %c0_i32_0 = arith.constant 0 : i32
    return %arg0, %c0_i32 : i32, i32
  }
  func.func @transform_1(%arg0: i32, %arg1: i32) -> (i32, i32) {
    %c0_i32 = arith.constant 0 : i32
    %c0_i32_0 = arith.constant 0 : i32
    return %c0_i32, %arg1 : i32, i32
  }
  func.func @transform_2(%arg0: i32, %arg1: i32) -> (i32, i32) {
    %c0_i32 = arith.constant 0 : i32
    %c0_i32_0 = arith.constant 0 : i32
    return %c0_i32, %arg1 : i32, i32
  }
  func.func @transform_3(%arg0: i32, %arg1: i32) -> (i32, i32) {
    %c0_i32 = arith.constant 0 : i32
    %c0_i32_0 = arith.constant 0 : i32
    return %c0_i32, %arg1 : i32, i32
  }
  func.func @transform_4(%arg0: i32, %arg1: i32) -> (i32, i32) {
    %c0_i32 = arith.constant 0 : i32
    return %arg0, %arg1 : i32, i32
  }
}

module attributes {stable_mosaic.version = 11 : i64} {
  func.func @_matmul_affine_kernel(%arg0: i32, %arg1: i32, %arg2: memref<32x1152xbf16, #tpu.memory_space<vmem>>, %arg3: memref<1152x256xbf16, #tpu.memory_space<vmem>>, %arg4: memref<1x256xf32, #tpu.memory_space<vmem>>, %arg5: memref<1x256xf32, #tpu.memory_space<vmem>>, %arg6: memref<32x256xbf16, #tpu.memory_space<vmem>>) attributes {dimension_semantics = [#tpu.dimension_semantics<parallel>, #tpu.dimension_semantics<parallel>], iteration_bounds = array<i64: 1, 1>, scalar_prefetch = 0 : i64, scratch_operands = 0 : i64, tpu.core_type = #tpu.core_type<tc>, window_params = [{transform_indices = @transform_0, window_bounds = array<i64: 32, 1152>}, {transform_indices = @transform_1, window_bounds = array<i64: 1152, 256>}, {transform_indices = @transform_2, window_bounds = array<i64: 1, 256>}, {transform_indices = @transform_3, window_bounds = array<i64: 1, 256>}, {transform_indices = @transform_4, window_bounds = array<i64: 32, 256>}]} {
    %c0 = arith.constant 0 : index
    %c0_0 = arith.constant 0 : index
    %0 = vector.load %arg2[%c0, %c0_0] : memref<32x1152xbf16, #tpu.memory_space<vmem>>, vector<32x1152xbf16>
    %c0_1 = arith.constant 0 : index
    %c0_2 = arith.constant 0 : index
    %1 = vector.load %arg3[%c0_1, %c0_2] : memref<1152x256xbf16, #tpu.memory_space<vmem>>, vector<1152x256xbf16>
    %cst = arith.constant dense<0.000000e+00> : vector<32x256xf32>
    %2 = tpu.matmul %0, %1, %cst {dimension_numbers = #tpu.dot_dimension_numbers<[1], [0], [0], [1], [0, 0, 1, 1], [], []>} : vector<32x1152xbf16>, vector<1152x256xbf16>, vector<32x256xf32> -> vector<32x256xf32>
    %c0_3 = arith.constant 0 : index
    %c0_4 = arith.constant 0 : index
    %3 = vector.load %arg4[%c0_3, %c0_4] : memref<1x256xf32, #tpu.memory_space<vmem>>, vector<1x256xf32>
    %4 = vector.broadcast %3 : vector<1x256xf32> to vector<32x256xf32>
    %5 = arith.mulf %2, %4 : vector<32x256xf32>
    %c0_5 = arith.constant 0 : index
    %c0_6 = arith.constant 0 : index
    %6 = vector.load %arg5[%c0_5, %c0_6] : memref<1x256xf32, #tpu.memory_space<vmem>>, vector<1x256xf32>
    %7 = vector.broadcast %6 : vector<1x256xf32> to vector<32x256xf32>
    %8 = arith.addf %5, %7 : vector<32x256xf32>
    %cst_7 = arith.constant 0.000000e+00 : f32
    %9 = vector.broadcast %cst_7 : f32 to vector<32x256xf32>
    %10 = arith.maximumf %8, %9 : vector<32x256xf32>
    %11 = arith.truncf %10 : vector<32x256xf32> to vector<32x256xbf16>
    %c0_8 = arith.constant 0 : index
    %c0_9 = arith.constant 0 : index
    %12 = vector.load %arg6[%c0_8, %c0_9] : memref<32x256xbf16, #tpu.memory_space<vmem>>, vector<32x256xbf16>
    tpu.vector_store %arg6[%c0_8, %c0_9], %11 {strides = array<i32>} : memref<32x256xbf16, #tpu.memory_space<vmem>>, vector<32x256xbf16>,
    return
  }
  func.func @transform_0(%arg0: i32, %arg1: i32) -> (i32, i32) {
    %c0_i32 = arith.constant 0 : i32
    %c0_i32_0 = arith.constant 0 : i32
    return %arg0, %c0_i32 : i32, i32
  }
  func.func @transform_1(%arg0: i32, %arg1: i32) -> (i32, i32) {
    %c0_i32 = arith.constant 0 : i32
    %c0_i32_0 = arith.constant 0 : i32
    return %c0_i32, %arg1 : i32, i32
  }
  func.func @transform_2(%arg0: i32, %arg1: i32) -> (i32, i32) {
    %c0_i32 = arith.constant 0 : i32
    %c0_i32_0 = arith.constant 0 : i32
    return %c0_i32, %arg1 : i32, i32
  }
  func.func @transform_3(%arg0: i32, %arg1: i32) -> (i32, i32) {
    %c0_i32 = arith.constant 0 : i32
    %c0_i32_0 = arith.constant 0 : i32
    return %c0_i32, %arg1 : i32, i32
  }
  func.func @transform_4(%arg0: i32, %arg1: i32) -> (i32, i32) {
    %c0_i32 = arith.constant 0 : i32
    return %arg0, %arg1 : i32, i32
  }
}

module attributes {stable_mosaic.version = 11 : i64} {
  func.func @_matmul_affine_kernel(%arg0: i32, %arg1: i32, %arg2: memref<8x2304xbf16, #tpu.memory_space<vmem>>, %arg3: memref<2304x256xbf16, #tpu.memory_space<vmem>>, %arg4: memref<1x256xf32, #tpu.memory_space<vmem>>, %arg5: memref<1x256xf32, #tpu.memory_space<vmem>>, %arg6: memref<8x256xbf16, #tpu.memory_space<vmem>>) attributes {dimension_semantics = [#tpu.dimension_semantics<parallel>, #tpu.dimension_semantics<parallel>], iteration_bounds = array<i64: 1, 2>, scalar_prefetch = 0 : i64, scratch_operands = 0 : i64, tpu.core_type = #tpu.core_type<tc>, window_params = [{transform_indices = @transform_0, window_bounds = array<i64: 8, 2304>}, {transform_indices = @transform_1, window_bounds = array<i64: 2304, 256>}, {transform_indices = @transform_2, window_bounds = array<i64: 1, 256>}, {transform_indices = @transform_3, window_bounds = array<i64: 1, 256>}, {transform_indices = @transform_4, window_bounds = array<i64: 8, 256>}]} {
    %c0 = arith.constant 0 : index
    %c0_0 = arith.constant 0 : index
    %0 = vector.load %arg2[%c0, %c0_0] : memref<8x2304xbf16, #tpu.memory_space<vmem>>, vector<8x2304xbf16>
    %c0_1 = arith.constant 0 : index
    %c0_2 = arith.constant 0 : index
    %1 = vector.load %arg3[%c0_1, %c0_2] : memref<2304x256xbf16, #tpu.memory_space<vmem>>, vector<2304x256xbf16>
    %cst = arith.constant dense<0.000000e+00> : vector<8x256xf32>
    %2 = tpu.matmul %0, %1, %cst {dimension_numbers = #tpu.dot_dimension_numbers<[1], [0], [0], [1], [0, 0, 1, 1], [], []>} : vector<8x2304xbf16>, vector<2304x256xbf16>, vector<8x256xf32> -> vector<8x256xf32>
    %c0_3 = arith.constant 0 : index
    %c0_4 = arith.constant 0 : index
    %3 = vector.load %arg4[%c0_3, %c0_4] : memref<1x256xf32, #tpu.memory_space<vmem>>, vector<1x256xf32>
    %4 = vector.broadcast %3 : vector<1x256xf32> to vector<8x256xf32>
    %5 = arith.mulf %2, %4 : vector<8x256xf32>
    %c0_5 = arith.constant 0 : index
    %c0_6 = arith.constant 0 : index
    %6 = vector.load %arg5[%c0_5, %c0_6] : memref<1x256xf32, #tpu.memory_space<vmem>>, vector<1x256xf32>
    %7 = vector.broadcast %6 : vector<1x256xf32> to vector<8x256xf32>
    %8 = arith.addf %5, %7 : vector<8x256xf32>
    %cst_7 = arith.constant 0.000000e+00 : f32
    %9 = vector.broadcast %cst_7 : f32 to vector<8x256xf32>
    %10 = arith.maximumf %8, %9 : vector<8x256xf32>
    %11 = arith.truncf %10 : vector<8x256xf32> to vector<8x256xbf16>
    %c0_8 = arith.constant 0 : index
    %c0_9 = arith.constant 0 : index
    %12 = vector.load %arg6[%c0_8, %c0_9] : memref<8x256xbf16, #tpu.memory_space<vmem>>, vector<8x256xbf16>
    tpu.vector_store %arg6[%c0_8, %c0_9], %11 {strides = array<i32>} : memref<8x256xbf16, #tpu.memory_space<vmem>>, vector<8x256xbf16>,
    return
  }
  func.func @transform_0(%arg0: i32, %arg1: i32) -> (i32, i32) {
    %c0_i32 = arith.constant 0 : i32
    %c0_i32_0 = arith.constant 0 : i32
    return %arg0, %c0_i32 : i32, i32
  }
  func.func @transform_1(%arg0: i32, %arg1: i32) -> (i32, i32) {
    %c0_i32 = arith.constant 0 : i32
    %c0_i32_0 = arith.constant 0 : i32
    return %c0_i32, %arg1 : i32, i32
  }
  func.func @transform_2(%arg0: i32, %arg1: i32) -> (i32, i32) {
    %c0_i32 = arith.constant 0 : i32
    %c0_i32_0 = arith.constant 0 : i32
    return %c0_i32, %arg1 : i32, i32
  }
  func.func @transform_3(%arg0: i32, %arg1: i32) -> (i32, i32) {
    %c0_i32 = arith.constant 0 : i32
    %c0_i32_0 = arith.constant 0 : i32
    return %c0_i32, %arg1 : i32, i32
  }
  func.func @transform_4(%arg0: i32, %arg1: i32) -> (i32, i32) {
    %c0_i32 = arith.constant 0 : i32
    return %arg0, %arg1 : i32, i32
  }
}

module attributes {stable_mosaic.version = 11 : i64} {
  func.func @_matmul_affine_kernel(%arg0: i32, %arg1: i32, %arg2: memref<8x4608xbf16, #tpu.memory_space<vmem>>, %arg3: memref<4608x256xbf16, #tpu.memory_space<vmem>>, %arg4: memref<1x256xf32, #tpu.memory_space<vmem>>, %arg5: memref<1x256xf32, #tpu.memory_space<vmem>>, %arg6: memref<8x256xbf16, #tpu.memory_space<vmem>>) attributes {dimension_semantics = [#tpu.dimension_semantics<parallel>, #tpu.dimension_semantics<parallel>], iteration_bounds = array<i64: 1, 4>, scalar_prefetch = 0 : i64, scratch_operands = 0 : i64, tpu.core_type = #tpu.core_type<tc>, window_params = [{transform_indices = @transform_0, window_bounds = array<i64: 8, 4608>}, {transform_indices = @transform_1, window_bounds = array<i64: 4608, 256>}, {transform_indices = @transform_2, window_bounds = array<i64: 1, 256>}, {transform_indices = @transform_3, window_bounds = array<i64: 1, 256>}, {transform_indices = @transform_4, window_bounds = array<i64: 8, 256>}]} {
    %c0 = arith.constant 0 : index
    %c0_0 = arith.constant 0 : index
    %0 = vector.load %arg2[%c0, %c0_0] : memref<8x4608xbf16, #tpu.memory_space<vmem>>, vector<8x4608xbf16>
    %c0_1 = arith.constant 0 : index
    %c0_2 = arith.constant 0 : index
    %1 = vector.load %arg3[%c0_1, %c0_2] : memref<4608x256xbf16, #tpu.memory_space<vmem>>, vector<4608x256xbf16>
    %cst = arith.constant dense<0.000000e+00> : vector<8x256xf32>
    %2 = tpu.matmul %0, %1, %cst {dimension_numbers = #tpu.dot_dimension_numbers<[1], [0], [0], [1], [0, 0, 1, 1], [], []>} : vector<8x4608xbf16>, vector<4608x256xbf16>, vector<8x256xf32> -> vector<8x256xf32>
    %c0_3 = arith.constant 0 : index
    %c0_4 = arith.constant 0 : index
    %3 = vector.load %arg4[%c0_3, %c0_4] : memref<1x256xf32, #tpu.memory_space<vmem>>, vector<1x256xf32>
    %4 = vector.broadcast %3 : vector<1x256xf32> to vector<8x256xf32>
    %5 = arith.mulf %2, %4 : vector<8x256xf32>
    %c0_5 = arith.constant 0 : index
    %c0_6 = arith.constant 0 : index
    %6 = vector.load %arg5[%c0_5, %c0_6] : memref<1x256xf32, #tpu.memory_space<vmem>>, vector<1x256xf32>
    %7 = vector.broadcast %6 : vector<1x256xf32> to vector<8x256xf32>
    %8 = arith.addf %5, %7 : vector<8x256xf32>
    %cst_7 = arith.constant 0.000000e+00 : f32
    %9 = vector.broadcast %cst_7 : f32 to vector<8x256xf32>
    %10 = arith.maximumf %8, %9 : vector<8x256xf32>
    %11 = arith.truncf %10 : vector<8x256xf32> to vector<8x256xbf16>
    %c0_8 = arith.constant 0 : index
    %c0_9 = arith.constant 0 : index
    %12 = vector.load %arg6[%c0_8, %c0_9] : memref<8x256xbf16, #tpu.memory_space<vmem>>, vector<8x256xbf16>
    tpu.vector_store %arg6[%c0_8, %c0_9], %11 {strides = array<i32>} : memref<8x256xbf16, #tpu.memory_space<vmem>>, vector<8x256xbf16>,
    return
  }
  func.func @transform_0(%arg0: i32, %arg1: i32) -> (i32, i32) {
    %c0_i32 = arith.constant 0 : i32
    %c0_i32_0 = arith.constant 0 : i32
    return %arg0, %c0_i32 : i32, i32
  }
  func.func @transform_1(%arg0: i32, %arg1: i32) -> (i32, i32) {
    %c0_i32 = arith.constant 0 : i32
    %c0_i32_0 = arith.constant 0 : i32
    return %c0_i32, %arg1 : i32, i32
  }
  func.func @transform_2(%arg0: i32, %arg1: i32) -> (i32, i32) {
    %c0_i32 = arith.constant 0 : i32
    %c0_i32_0 = arith.constant 0 : i32
    return %c0_i32, %arg1 : i32, i32
  }
  func.func @transform_3(%arg0: i32, %arg1: i32) -> (i32, i32) {
    %c0_i32 = arith.constant 0 : i32
    %c0_i32_0 = arith.constant 0 : i32
    return %c0_i32, %arg1 : i32, i32
  }
  func.func @transform_4(%arg0: i32, %arg1: i32) -> (i32, i32) {
    %c0_i32 = arith.constant 0 : i32
    return %arg0, %arg1 : i32, i32
  }
}

module attributes {stable_mosaic.version = 11 : i64} {
  func.func @_head_kernel(%arg0: i32, %arg1: memref<8x1024xbf16, #tpu.memory_space<vmem>>, %arg2: memref<1024x512xbf16, #tpu.memory_space<vmem>>, %arg3: memref<1x512xf32, #tpu.memory_space<vmem>>, %arg4: memref<512x256xbf16, #tpu.memory_space<vmem>>, %arg5: memref<1x256xf32, #tpu.memory_space<vmem>>, %arg6: memref<256x128xbf16, #tpu.memory_space<vmem>>, %arg7: memref<1x128xf32, #tpu.memory_space<vmem>>, %arg8: memref<128x64xbf16, #tpu.memory_space<vmem>>, %arg9: memref<1x64xf32, #tpu.memory_space<vmem>>, %arg10: memref<64x128xbf16, #tpu.memory_space<vmem>>, %arg11: memref<1x128xf32, #tpu.memory_space<vmem>>, %arg12: memref<8x128xf32, #tpu.memory_space<vmem>>) attributes {dimension_semantics = [#tpu.dimension_semantics<arbitrary>], iteration_bounds = array<i64: 1>, scalar_prefetch = 0 : i64, scratch_operands = 0 : i64, tpu.core_type = #tpu.core_type<tc>, window_params = [{pipeline_mode = #tpu.pipeline_mode<synchronous>, transform_indices = @transform_0, window_bounds = array<i64: 8, 1024>}, {pipeline_mode = #tpu.pipeline_mode<synchronous>, transform_indices = @transform_1, window_bounds = array<i64: 1024, 512>}, {pipeline_mode = #tpu.pipeline_mode<synchronous>, transform_indices = @transform_2, window_bounds = array<i64: 1, 512>}, {pipeline_mode = #tpu.pipeline_mode<synchronous>, transform_indices = @transform_3, window_bounds = array<i64: 512, 256>}, {pipeline_mode = #tpu.pipeline_mode<synchronous>, transform_indices = @transform_4, window_bounds = array<i64: 1, 256>}, {pipeline_mode = #tpu.pipeline_mode<synchronous>, transform_indices = @transform_5, window_bounds = array<i64: 256, 128>}, {pipeline_mode = #tpu.pipeline_mode<synchronous>, transform_indices = @transform_6, window_bounds = array<i64: 1, 128>}, {pipeline_mode = #tpu.pipeline_mode<synchronous>, transform_indices = @transform_7, window_bounds = array<i64: 128, 64>}, {pipeline_mode = #tpu.pipeline_mode<synchronous>, transform_indices = @transform_8, window_bounds = array<i64: 1, 64>}, {pipeline_mode = #tpu.pipeline_mode<synchronous>, transform_indices = @transform_9, window_bounds = array<i64: 64, 128>}, {pipeline_mode = #tpu.pipeline_mode<synchronous>, transform_indices = @transform_10, window_bounds = array<i64: 1, 128>}, {pipeline_mode = #tpu.pipeline_mode<synchronous>, transform_indices = @transform_11, window_bounds = array<i64: 8, 128>}]} {
    %c0 = arith.constant 0 : index
    %c0_0 = arith.constant 0 : index
    %0 = vector.load %arg1[%c0, %c0_0] : memref<8x1024xbf16, #tpu.memory_space<vmem>>, vector<8x1024xbf16>
    %c0_1 = arith.constant 0 : index
    %c0_2 = arith.constant 0 : index
    %1 = vector.load %arg2[%c0_1, %c0_2] : memref<1024x512xbf16, #tpu.memory_space<vmem>>, vector<1024x512xbf16>
    %cst = arith.constant dense<0.000000e+00> : vector<8x512xf32>
    %2 = tpu.matmul %0, %1, %cst {dimension_numbers = #tpu.dot_dimension_numbers<[1], [0], [0], [1], [0, 0, 1, 1], [], []>} : vector<8x1024xbf16>, vector<1024x512xbf16>, vector<8x512xf32> -> vector<8x512xf32>
    %c0_3 = arith.constant 0 : index
    %c0_4 = arith.constant 0 : index
    %3 = vector.load %arg3[%c0_3, %c0_4] : memref<1x512xf32, #tpu.memory_space<vmem>>, vector<1x512xf32>
    %4 = vector.broadcast %3 : vector<1x512xf32> to vector<8x512xf32>
    %5 = arith.addf %2, %4 : vector<8x512xf32>
    %cst_5 = arith.constant 0.000000e+00 : f32
    %6 = vector.broadcast %cst_5 : f32 to vector<8x512xf32>
    %7 = arith.maximumf %5, %6 : vector<8x512xf32>
    %8 = arith.truncf %7 : vector<8x512xf32> to vector<8x512xbf16>
    %c0_6 = arith.constant 0 : index
    %c0_7 = arith.constant 0 : index
    %9 = vector.load %arg4[%c0_6, %c0_7] : memref<512x256xbf16, #tpu.memory_space<vmem>>, vector<512x256xbf16>
    %cst_8 = arith.constant dense<0.000000e+00> : vector<8x256xf32>
    %10 = tpu.matmul %8, %9, %cst_8 {dimension_numbers = #tpu.dot_dimension_numbers<[1], [0], [0], [1], [0, 0, 1, 1], [], []>} : vector<8x512xbf16>, vector<512x256xbf16>, vector<8x256xf32> -> vector<8x256xf32>
    %c0_9 = arith.constant 0 : index
    %c0_10 = arith.constant 0 : index
    %11 = vector.load %arg5[%c0_9, %c0_10] : memref<1x256xf32, #tpu.memory_space<vmem>>, vector<1x256xf32>
    %12 = vector.broadcast %11 : vector<1x256xf32> to vector<8x256xf32>
    %13 = arith.addf %10, %12 : vector<8x256xf32>
    %cst_11 = arith.constant 0.000000e+00 : f32
    %14 = vector.broadcast %cst_11 : f32 to vector<8x256xf32>
    %15 = arith.maximumf %13, %14 : vector<8x256xf32>
    %16 = arith.truncf %15 : vector<8x256xf32> to vector<8x256xbf16>
    %c0_12 = arith.constant 0 : index
    %c0_13 = arith.constant 0 : index
    %17 = vector.load %arg6[%c0_12, %c0_13] : memref<256x128xbf16, #tpu.memory_space<vmem>>, vector<256x128xbf16>
    %cst_14 = arith.constant dense<0.000000e+00> : vector<8x128xf32>
    %18 = tpu.matmul %16, %17, %cst_14 {dimension_numbers = #tpu.dot_dimension_numbers<[1], [0], [0], [1], [0, 0, 1, 1], [], []>} : vector<8x256xbf16>, vector<256x128xbf16>, vector<8x128xf32> -> vector<8x128xf32>
    %c0_15 = arith.constant 0 : index
    %c0_16 = arith.constant 0 : index
    %19 = vector.load %arg7[%c0_15, %c0_16] : memref<1x128xf32, #tpu.memory_space<vmem>>, vector<1x128xf32>
    %20 = vector.broadcast %19 : vector<1x128xf32> to vector<8x128xf32>
    %21 = arith.addf %18, %20 : vector<8x128xf32>
    %cst_17 = arith.constant 0.000000e+00 : f32
    %22 = vector.broadcast %cst_17 : f32 to vector<8x128xf32>
    %23 = arith.maximumf %21, %22 : vector<8x128xf32>
    %24 = arith.truncf %23 : vector<8x128xf32> to vector<8x128xbf16>
    %c0_18 = arith.constant 0 : index
    %c0_19 = arith.constant 0 : index
    %25 = vector.load %arg8[%c0_18, %c0_19] : memref<128x64xbf16, #tpu.memory_space<vmem>>, vector<128x64xbf16>
    %cst_20 = arith.constant dense<0.000000e+00> : vector<8x64xf32>
    %26 = tpu.matmul %24, %25, %cst_20 {dimension_numbers = #tpu.dot_dimension_numbers<[1], [0], [0], [1], [0, 0, 1, 1], [], []>} : vector<8x128xbf16>, vector<128x64xbf16>, vector<8x64xf32> -> vector<8x64xf32>
    %c0_21 = arith.constant 0 : index
    %c0_22 = arith.constant 0 : index
    %27 = vector.load %arg9[%c0_21, %c0_22] : memref<1x64xf32, #tpu.memory_space<vmem>>, vector<1x64xf32>
    %28 = vector.broadcast %27 : vector<1x64xf32> to vector<8x64xf32>
    %29 = arith.addf %26, %28 : vector<8x64xf32>
    %cst_23 = arith.constant 0.000000e+00 : f32
    %30 = vector.broadcast %cst_23 : f32 to vector<8x64xf32>
    %31 = arith.maximumf %29, %30 : vector<8x64xf32>
    %32 = arith.truncf %31 : vector<8x64xf32> to vector<8x64xbf16>
    %c0_24 = arith.constant 0 : index
    %c0_25 = arith.constant 0 : index
    %33 = vector.load %arg10[%c0_24, %c0_25] : memref<64x128xbf16, #tpu.memory_space<vmem>>, vector<64x128xbf16>
    %cst_26 = arith.constant dense<0.000000e+00> : vector<8x128xf32>
    %34 = tpu.matmul %32, %33, %cst_26 {dimension_numbers = #tpu.dot_dimension_numbers<[1], [0], [0], [1], [0, 0, 1, 1], [], []>} : vector<8x64xbf16>, vector<64x128xbf16>, vector<8x128xf32> -> vector<8x128xf32>
    %c0_27 = arith.constant 0 : index
    %c0_28 = arith.constant 0 : index
    %35 = vector.load %arg11[%c0_27, %c0_28] : memref<1x128xf32, #tpu.memory_space<vmem>>, vector<1x128xf32>
    %36 = vector.broadcast %35 : vector<1x128xf32> to vector<8x128xf32>
    %37 = arith.addf %34, %36 : vector<8x128xf32>
    %c0_29 = arith.constant 0 : index
    %c0_30 = arith.constant 0 : index
    %38 = vector.load %arg12[%c0_29, %c0_30] : memref<8x128xf32, #tpu.memory_space<vmem>>, vector<8x128xf32>
    tpu.vector_store %arg12[%c0_29, %c0_30], %37 {strides = array<i32>} : memref<8x128xf32, #tpu.memory_space<vmem>>, vector<8x128xf32>,
    return
  }
  func.func @transform_0(%arg0: i32) -> (i32, i32) {
    %c0_i32 = arith.constant 0 : i32
    %c0_i32_0 = arith.constant 0 : i32
    %c0_i32_1 = arith.constant 0 : i32
    return %c0_i32, %c0_i32_0 : i32, i32
  }
  func.func @transform_1(%arg0: i32) -> (i32, i32) {
    %c0_i32 = arith.constant 0 : i32
    %c0_i32_0 = arith.constant 0 : i32
    %c0_i32_1 = arith.constant 0 : i32
    return %c0_i32, %c0_i32_0 : i32, i32
  }
  func.func @transform_2(%arg0: i32) -> (i32, i32) {
    %c0_i32 = arith.constant 0 : i32
    %c0_i32_0 = arith.constant 0 : i32
    %c0_i32_1 = arith.constant 0 : i32
    return %c0_i32, %c0_i32_0 : i32, i32
  }
  func.func @transform_3(%arg0: i32) -> (i32, i32) {
    %c0_i32 = arith.constant 0 : i32
    %c0_i32_0 = arith.constant 0 : i32
    %c0_i32_1 = arith.constant 0 : i32
    return %c0_i32, %c0_i32_0 : i32, i32
  }
  func.func @transform_4(%arg0: i32) -> (i32, i32) {
    %c0_i32 = arith.constant 0 : i32
    %c0_i32_0 = arith.constant 0 : i32
    %c0_i32_1 = arith.constant 0 : i32
    return %c0_i32, %c0_i32_0 : i32, i32
  }
  func.func @transform_5(%arg0: i32) -> (i32, i32) {
    %c0_i32 = arith.constant 0 : i32
    %c0_i32_0 = arith.constant 0 : i32
    %c0_i32_1 = arith.constant 0 : i32
    return %c0_i32, %c0_i32_0 : i32, i32
  }
  func.func @transform_6(%arg0: i32) -> (i32, i32) {
    %c0_i32 = arith.constant 0 : i32
    %c0_i32_0 = arith.constant 0 : i32
    %c0_i32_1 = arith.constant 0 : i32
    return %c0_i32, %c0_i32_0 : i32, i32
  }
  func.func @transform_7(%arg0: i32) -> (i32, i32) {
    %c0_i32 = arith.constant 0 : i32
    %c0_i32_0 = arith.constant 0 : i32
    %c0_i32_1 = arith.constant 0 : i32
    return %c0_i32, %c0_i32_0 : i32, i32
  }
  func.func @transform_8(%arg0: i32) -> (i32, i32) {
    %c0_i32 = arith.constant 0 : i32
    %c0_i32_0 = arith.constant 0 : i32
    %c0_i32_1 = arith.constant 0 : i32
    return %c0_i32, %c0_i32_0 : i32, i32
  }
  func.func @transform_9(%arg0: i32) -> (i32, i32) {
    %c0_i32 = arith.constant 0 : i32
    %c0_i32_0 = arith.constant 0 : i32
    %c0_i32_1 = arith.constant 0 : i32
    return %c0_i32, %c0_i32_0 : i32, i32
  }
  func.func @transform_10(%arg0: i32) -> (i32, i32) {
    %c0_i32 = arith.constant 0 : i32
    %c0_i32_0 = arith.constant 0 : i32
    %c0_i32_1 = arith.constant 0 : i32
    return %c0_i32, %c0_i32_0 : i32, i32
  }
  func.func @transform_11(%arg0: i32) -> (i32, i32) {
    %c0_i32 = arith.constant 0 : i32
    %c0_i32_0 = arith.constant 0 : i32
    %c0_i32_1 = arith.constant 0 : i32
    return %c0_i32, %c0_i32_0 : i32, i32
  }
}

</mosaic_0001>

<bundles_post_ra>
// kernel: cropper_net_forward.6
= control target key start
LH: loop header
LB: loop body
LE: loop exit
PB: predicated region body
PF: predicated region fallthrough
CT: control target
= control target key end

     0   :  { %9 = vsyncpa [#allocation3], 0  ;;  %s1277_s0 = inlined_call_operand.vmem [shape: bf16[512,27], index: 0, kind: input, shape index: {}]   ;;  %s1278_s1 = inlined_call_operand.hbm [shape: bf16[27,64], index: 1, kind: input, shape index: {}]   ;;  %s1279_s2 = inlined_call_operand.hbm [shape: f32[1,64], index: 2, kind: input, shape index: {}]   ;;  %s1280_s3 = inlined_call_operand.hbm [shape: f32[1,64], index: 3, kind: input, shape index: {}]   ;;  %s1281_s4 = inlined_call_operand.vmem [shape: bf16[512,64], index: 4, kind: output, shape index: {}]  }
   0x1   :  { %10 = vsyncpa [#allocation5], 0  ;;  %s1056_s15 = smov 0   ;;  %s1058_s16 = smov 0  }
   0x2   :  { %s1060_s17 = smov 0  }
   0x3 LB: > { %s1025_s18 = smov [#allocation4]   ;;  %s738_s20 = sadd.s32 4294967295, %s1023_s17   ;;  %s1023_s17 = sphi %s1060_s17, %s16_s17   ;;  %s1019_s16 = sphi %s1058_s16, %s1294_s16   ;;  %s1015_s15 = sphi %s1056_s15, %s1293_s15  }
   0x4   : > { %s195_s19 = sshll.u32 %s1025_s18, 4  ;;  %p740_p0 = scmp.ge.s32.totalorder %s1023_s17, 1  ;;  %s196_s19 = int_to_ptr.vmem [resolvable:$true] %s195_s19 }
   0x5   : > { %p165_p1 = scmp.lt.s32.totalorder %s1023_s17, 5  ;;  %p1074_p2 = scmp.eq.s32.totalorder %s738_s20, 0 }
   0x6   : > { %s28_s23 = sadd.s32 1, %s1019_s16  ;;  %s1026_s26 = smov [#allocation2]  }
   0x7   : > { %s1285_s21 = scalar_select %p1074_p2, 1, 0 }
   0x8   : > { %p1078_p3 = pnand %p740_p0, %p165_p1  ;;  %p1091_p6 = scmp.ge.s32.totalorder %s28_s23, 4 }
   0x9   : > { %s179_s27 = sshll.u32 %s1026_s26, 4  ;;  %s909_s30 = scalar_lea.hbm %s1279_s2, 16  ;;  %s1095_s27 = int_to_ptr.vmem [resolvable:$true] %s179_s27 }
   0xa   : > { %s1286_s22 = scalar_select %p1078_p3, 1, 0 }
   0xb   : > { %p853_p4 = pneg %p1078_p3  ;;  %p910_p7 = scmp.ne.s32.totalorder %s1279_s2, %s909_s30 }
   0xc   : > { %s1288_s25 = scalar_select %p1091_p6, 1, 0 }
   0xd   : > { %p1087_p5 = pnand %p1074_p2, %p853_p4  ;;  %p916_p11 = scmp.lt.u32.totalorder %s909_s30, %s1279_s2 }
   0xf   : > { %p1105_p8 = pneg %p1087_p5 }
  0x11   : > { %p912_p9 = pnand %p1105_p8, %p910_p7 }
  0x13   : > { %p913_p10 = pneg %p912_p9 }
  0x15   : > { %p918_p12 = pnand %p916_p11, %p913_p10 }
  0x17   : > { %921 = shalt.err (!%p918_p12)
}
  0x18   : > { %s922_s10 = scalar_lea.vmem %s196_s19, 16  ;;  %s929_s11 = scalar_lea.vmem %s196_s19, 32 }
  0x19   : > { %p923_p13 = scmp.ne.s32.totalorder %s196_s19, %s922_s10  ;;  %p930_p4 = scmp.lt.s32.totalorder %s196_s19, %s196_s19 }
  0x1a   : > { %p931_p2 = scmp.lt.s32.totalorder %s929_s11, %s922_s10 }
  0x1b   : > { %p925_p0 = pnand %p923_p13, %p1105_p8 }
  0x1c   : > { %p932_p3 = por %p931_p2, %p930_p4 }
  0x1d   : > { %p926_p1 = pneg %p925_p0 }
  0x1f   : > { %p933_p6 = pnand %p932_p3, %p926_p1 }
  0x21   : > { %936 = shalt.err (!%p933_p6)
}
  0x22   : > { %859 = dma.hbm_to_vmem [thread:$0]  (!%p1087_p5), %s1279_s2, 16, %s196_s19, [#allocation5]  }
  0x23   : > { %p1290_p7 = scmp.ne.s32.totalorder %s1288_s25, 0  ;;  %s937_s20 = scalar_lea.hbm %s1278_s1, 256 }
  0x24   : > { %p938_p2 = scmp.ne.s32.totalorder %s1278_s1, %s937_s20  ;;  %p944_p9 = scmp.lt.u32.totalorder %s937_s20, %s1278_s1 }
  0x25   : > { %s1296_s23 = smov (%p1290_p7, %s28_s23), 0 }
  0x26   : > { %p940_p3 = pnand %p938_p2, %p1105_p8 }
  0x28   : > { %p941_p6 = pneg %p940_p3 }
  0x2a   : > { %p946_p10 = pnand %p944_p9, %p941_p6 }
  0x2c   : > { %949 = shalt.err (!%p946_p10)
}
  0x2d   : > { %s950_s19 = scalar_lea.vmem %s1095_s27, 256  ;;  %p958_p0 = scmp.lt.s32.totalorder %s1095_s27, %s1095_s27 }
  0x2e   : > { %p951_p11 = scmp.ne.s32.totalorder %s1095_s27, %s950_s19  ;;  %p959_p1 = scmp.lt.s32.totalorder %s950_s19, %s950_s19 }
  0x30   : > { %p953_p12 = pnand %p951_p11, %p1105_p8  ;;  %p960_p4 = por %p959_p1, %p958_p0 }
  0x32   : > { %p954_p13 = pneg %p953_p12 }
  0x34   : > { %p961_p7 = pnand %p960_p4, %p954_p13 }
  0x36   : > { %964 = shalt.err (!%p961_p7)
}
  0x37   : > { %s1027_s25 = smov 64   ;;  %s1028_s5 = smov 4  }
  0x38   : > { %856 = dma.hbm_to_vmem [thread:$0]  (!%p1087_p5), %s1278_s1, 256, %s1095_s27, [#allocation3], %s1027_s25, %s1027_s25, %s1028_s5  }
  0x39   : > { %s1029_s9 = smov [#allocation6]   ;;  %s965_s13 = scalar_lea.hbm %s1280_s3, 16 }
  0x3a   : > { %s208_s10 = sshll.u32 %s1029_s9, 4  ;;  %p966_p2 = scmp.ne.s32.totalorder %s1280_s3, %s965_s13  ;;  %s209_s10 = int_to_ptr.vmem [resolvable:$true] %s208_s10 }
  0x3b   : > { %p972_p9 = scmp.lt.u32.totalorder %s965_s13, %s1280_s3 }
  0x3c   : > { %p968_p3 = pnand %p966_p2, %p1105_p8 }
  0x3e   : > { %p969_p6 = pneg %p968_p3 }
  0x40   : > { %p974_p10 = pnand %p972_p9, %p969_p6 }
  0x42   : > { %977 = shalt.err (!%p974_p10)
}
  0x43   : > { %s978_s27 = scalar_lea.vmem %s209_s10, 16  ;;  %s985_s28 = scalar_lea.vmem %s209_s10, 32 }
  0x44   : > { %p979_p11 = scmp.ne.s32.totalorder %s209_s10, %s978_s27  ;;  %p986_p0 = scmp.lt.s32.totalorder %s209_s10, %s209_s10 }
  0x45   : > { %p987_p1 = scmp.lt.s32.totalorder %s985_s28, %s978_s27 }
  0x46   : > { %p981_p12 = pnand %p979_p11, %p1105_p8 }
  0x47   : > { %p988_p4 = por %p987_p1, %p986_p0 }
  0x48   : > { %p982_p13 = pneg %p981_p12 }
  0x4a   : > { %p989_p7 = pnand %p988_p4, %p982_p13 }
  0x4c   : > { %992 = shalt.err (!%p989_p7)
}
  0x4d   : > { %862 = dma.hbm_to_vmem [thread:$0]  (!%p1087_p5), %s1280_s3, 16, %s209_s10, [#allocation5]  }
  0x4e   : > { %p1291_p2 = scmp.ne.s32.totalorder %s1286_s22, 0 }
  0x4f   : > { %p1292_p3 = scmp.ne.s32.totalorder (!%p1291_p2), %s1285_s21, 0 }
  0x50   : > { %230 = sbr.rel (%p1291_p2) target bundleno = 334 (0x14e), region = 36 }
  0x57   : > { %1006 = dma.done.wait (%p1292_p3), [#allocation3], 256  }
  0x58   : > { %1008 = vsyncadd (%p1292_p3), [#allocation3], 4294967040 }
  0x59   : > { %1010 = dma.done.wait (%p1292_p3), [#allocation5], 32  }
  0x5a   : > { %1012 = vsyncadd (%p1292_p3), [#allocation5], 4294967264  ;;  %s749_s24 = sshll.u32 %s1015_s15, 4  ;;  %vm379_vm0 = vcmask 1044480   ;;  %vm380_vm1 = vcmask 1045504   ;;  %v1030_v0 = vmov 65535  }
  0x5b   : > { %p268_p8 = scmp.lt.s32.totalorder %s749_s24, 63  ;;  %v381_v1 = vsel %vm379_vm0, 4294967295, %v1030_v0  ;;  %vm354_vm2 = vcmask 220160   ;;  %v899_v2 = vld [vmem:[#allocation2] sm:$0xff]   ;;  %v900_v4 = vld [vmem:[#allocation2 + $0x8] sm:$0x3f]  }
  0x5c   : > { %v382_v3 = vsel %vm380_vm1, %v381_v1, 0  ;;  %817 = vmatprep.subr.bf16.mxu0 %v899_v2  ;;  %837 = vmatprep.subr.bf16.mxu1 %v899_v2  ;;  %v1193_v14 = vld [vmem:[#allocation4] ss:$0 sm:$0xff]  ;;  %v1195_v16 = vld [vmem:[#allocation6] ss:$0 sm:$0xff]  ;;  %vm609_vm3 = vcmask 519168  }
  0x5d   : > { %s1298_s24 = smov (!%p268_p8, %s749_s24), 63  ;;  %818 = vmatpush3.bf16.msra.mxu0 %v899_v2  ;;  %839 = vmatpush3.bf16.msra.mxu1 %v899_v2  ;;  %v384_v6 = vand.u32 %v900_v4, %v382_v3 }
  0x5e   : > { %s750_s22 = sshll.u32 %s1298_s24, 2 }
  0x5f   : > { %s271_s25 = scalar_lea.vmem %s1277_s0, %s750_s22  ;;  %819 = vmatprep.subr.bf16.mxu0 %v384_v6  ;;  %838 = vmatprep.subr.bf16.mxu1 %v384_v6  ;;  %s1216_s5 = scalar_lea.vmem %s1281_s4, %s750_s22 }
  0x60   : > { %v901_v5 = vld [vmem:[%s271_s25] sm:$0xff]   ;;  %v903_v8 = vld [vmem:[%s271_s25 + $0x8] sm:$0xff]   ;;  %v905_v10 = vld [vmem:[%s271_s25 + $0x10] sm:$0xff]  }
  0x61   : > { %v902_v7 = vld [vmem:[%s271_s25 + $0x20] sm:$0xff]   ;;  %821 = vmatprep.mubr.msk.bf16.mxu0 %vm354_vm2, %v901_v5  ;;  %v904_v9 = vld [vmem:[%s271_s25 + $0x28] sm:$0xff]   ;;  %820 = vmatpush3.bf16.msra.mxu0 %v384_v6  ;;  %v906_v11 = vld [vmem:[%s271_s25 + $0x30] sm:$0xff]  }
  0x62   : > { %829 = vmatprep.mubr.msk.bf16.mxu1 %vm354_vm2, %v902_v7  ;;  %840 = vmatpush3.bf16.msra.mxu1 %v384_v6  ;;  %v907_v12 = vld [vmem:[%s271_s25 + $0x18] sm:$0xff]  }
  0x63   : > { %v908_v13 = vld [vmem:[%s271_s25 + $0x38] sm:$0xff]  }
  0x64   : > { %822 = vmatmul.mubr.msk.bf16.vlgmr.msra.gmra.mrb[0].mxu0 %vm354_vm2, %v903_v8 }
  0x65   : > { %830 = vmatmul.mubr.msk.bf16.vlgmr.msra.gmra.mrb[0].mxu1 %vm354_vm2, %v904_v9  ;;  %825 = vmatprep.mubr.msk.bf16.mxu0 %vm354_vm2, %v905_v10 }
  0x66   : > { %833 = vmatprep.mubr.msk.bf16.mxu1 %vm354_vm2, %v906_v11 }
  0x6c   : > { %826 = vmatmul.mubr.msk.bf16.gmra.mrb[4].mxu0 %vm354_vm2, %v907_v12 }
  0x6d   : > { %834 = vmatmul.mubr.msk.bf16.gmra.mrb[4].mxu1 %vm354_vm2, %v908_v13 }
 0x137   : > { %v823_v15 = vpop.f32.mrb[0].mxu0 }
 0x138   : > { %v831_v17 = vpop.f32.mrb[0].mxu1  ;;  %v492_v18 = vmul.f32 %v823_v15, %v1193_v14  ;;  %v420_v20 = vpop.f32.mrb[1].mxu0 }
 0x139   : > { %v500_v19 = vmul.f32 %v831_v17, %v1193_v14  ;;  %v452_v21 = vpop.f32.mrb[1].mxu1  ;;  %v490_v22 = vmul.f32 %v1193_v14, %v420_v20  ;;  %v824_v24 = vpop.f32.mrb[2].mxu0 }
 0x13a   : > { %v498_v23 = vmul.f32 %v1193_v14, %v452_v21  ;;  %v832_v25 = vpop.f32.mrb[2].mxu1  ;;  %v515_v26 = vadd.f32 %v1195_v16, %v492_v18  ;;  %v493_v28 = vmul.f32 %v824_v24, %v1193_v14  ;;  %v423_v30 = vpop.f32.mrb[3].mxu0 }
 0x13b   : > { %v523_v27 = vadd.f32 %v1195_v16, %v500_v19  ;;  %v501_v29 = vmul.f32 %v832_v25, %v1193_v14  ;;  %v455_v31 = vpop.f32.mrb[3].mxu1  ;;  %v513_v32 = vadd.f32 %v1195_v16, %v490_v22  ;;  %v491_v34 = vmul.f32 %v1193_v14, %v423_v30 }
 0x13c   : > { %v521_v33 = vadd.f32 %v1195_v16, %v498_v23  ;;  %v499_v35 = vmul.f32 %v1193_v14, %v455_v31  ;;  %v531_v36 = vmax.f32 %v515_v26, 0.0  ;;  %v516_v38 = vadd.f32 %v1195_v16, %v493_v28 }
 0x13d   : > { %v539_v37 = vmax.f32 %v523_v27, 0.0  ;;  %v524_v39 = vadd.f32 %v1195_v16, %v501_v29  ;;  %v529_v40 = vmax.f32 %v513_v32, 0.0  ;;  %v514_v42 = vadd.f32 %v1195_v16, %v491_v34 }
 0x13e   : > { %v537_v41 = vmax.f32 %v521_v33, 0.0  ;;  %v522_v43 = vadd.f32 %v1195_v16, %v499_v35  ;;  %v793_v44 = vpack.c.bf16 %v531_v36, %v531_v36  ;;  %v532_v46 = vmax.f32 %v516_v38, 0.0 }
 0x13f   : > { %v801_v45 = vpack.c.bf16 %v539_v37, %v539_v37  ;;  %v540_v47 = vmax.f32 %v524_v39, 0.0  ;;  %v791_v48 = vpack.c.bf16 %v529_v40, %v529_v40  ;;  %v530_v50 = vmax.f32 %v514_v42, 0.0  ;;  %v827_v52 = vpop.f32.mrb[4].mxu0 }
 0x140   : > { %v799_v49 = vpack.c.bf16 %v537_v41, %v537_v41  ;;  %v538_v51 = vmax.f32 %v522_v43, 0.0  ;;  %v835_v53 = vpop.f32.mrb[4].mxu1  ;;  %612 = vst.msk [vmem:[%s1216_s5 + $0x8] sm:$0xf] %vm609_vm3, %v793_v44  ;;  %v794_v54 = vpack.c.bf16 %v532_v46, %v532_v46  ;;  %v496_v56 = vmul.f32 %v827_v52, %v1193_v14  ;;  %v436_v58 = vpop.f32.mrb[5].mxu0 }
 0x141   : > { %620 = vst.msk [vmem:[%s1216_s5 + $0x28] sm:$0xf] %vm609_vm3, %v801_v45  ;;  %v802_v55 = vpack.c.bf16 %v540_v47, %v540_v47  ;;  %v504_v57 = vmul.f32 %v835_v53, %v1193_v14  ;;  %v468_v59 = vpop.f32.mrb[5].mxu1  ;;  %610 = vst.msk [vmem:[%s1216_s5] sm:$0xf] %vm609_vm3, %v791_v48  ;;  %v792_v60 = vpack.c.bf16 %v530_v50, %v530_v50  ;;  %v828_v0 = vpop.f32.mrb[6].mxu0 }
 0x142   : > { %618 = vst.msk [vmem:[%s1216_s5 + $0x20] sm:$0xf] %vm609_vm3, %v799_v49  ;;  %v800_v61 = vpack.c.bf16 %v538_v51, %v538_v51  ;;  %v494_v62 = vmul.f32 %v1193_v14, %v436_v58  ;;  %v502_v63 = vmul.f32 %v1193_v14, %v468_v59  ;;  %v836_v1 = vpop.f32.mrb[6].mxu1  ;;  %613 = vst.msk [vmem:[%s1216_s5 + $0xc] sm:$0xf] %vm609_vm3, %v794_v54  ;;  %v439_v6 = vpop.f32.mrb[7].mxu0 }
 0x143   : > { %621 = vst.msk [vmem:[%s1216_s5 + $0x2c] sm:$0xf] %vm609_vm3, %v802_v55  ;;  %v519_v2 = vadd.f32 %v1195_v16, %v496_v56  ;;  %v527_v3 = vadd.f32 %v1195_v16, %v504_v57  ;;  %v497_v4 = vmul.f32 %v828_v0, %v1193_v14  ;;  %v505_v5 = vmul.f32 %v836_v1, %v1193_v14  ;;  %v471_v7 = vpop.f32.mrb[7].mxu1 }
 0x144   : > { %611 = vst.msk [vmem:[%s1216_s5 + $0x4] sm:$0xf] %vm609_vm3, %v792_v60  ;;  %619 = vst.msk [vmem:[%s1216_s5 + $0x24] sm:$0xf] %vm609_vm3, %v800_v61  ;;  %v517_v8 = vadd.f32 %v1195_v16, %v494_v62  ;;  %v525_v9 = vadd.f32 %v1195_v16, %v502_v63  ;;  %v495_v10 = vmul.f32 %v1193_v14, %v439_v6 }
 0x145   : > { %v503_v11 = vmul.f32 %v1193_v14, %v471_v7  ;;  %v535_v12 = vmax.f32 %v519_v2, 0.0  ;;  %v543_v13 = vmax.f32 %v527_v3, 0.0  ;;  %v520_v15 = vadd.f32 %v1195_v16, %v497_v4 }
 0x146   : > { %v528_v17 = vadd.f32 %v1195_v16, %v505_v5  ;;  %v533_v18 = vmax.f32 %v517_v8, 0.0  ;;  %v541_v19 = vmax.f32 %v525_v9, 0.0  ;;  %v518_v20 = vadd.f32 %v1195_v16, %v495_v10 }
 0x147   : > { %v526_v21 = vadd.f32 %v1195_v16, %v503_v11  ;;  %v797_v22 = vpack.c.bf16 %v535_v12, %v535_v12  ;;  %v805_v23 = vpack.c.bf16 %v543_v13, %v543_v13  ;;  %v536_v14 = vmax.f32 %v520_v15, 0.0 }
 0x148   : > { %v544_v24 = vmax.f32 %v528_v17, 0.0  ;;  %v795_v25 = vpack.c.bf16 %v533_v18, %v533_v18  ;;  %v803_v26 = vpack.c.bf16 %v541_v19, %v541_v19  ;;  %v534_v27 = vmax.f32 %v518_v20, 0.0 }
 0x149   : > { %v542_v28 = vmax.f32 %v526_v21, 0.0  ;;  %616 = vst.msk [vmem:[%s1216_s5 + $0x18] sm:$0xf] %vm609_vm3, %v797_v22  ;;  %624 = vst.msk [vmem:[%s1216_s5 + $0x38] sm:$0xf] %vm609_vm3, %v805_v23  ;;  %v798_v29 = vpack.c.bf16 %v536_v14, %v536_v14 }
 0x14a   : > { %v806_v30 = vpack.c.bf16 %v544_v24, %v544_v24  ;;  %614 = vst.msk [vmem:[%s1216_s5 + $0x10] sm:$0xf] %vm609_vm3, %v795_v25  ;;  %622 = vst.msk [vmem:[%s1216_s5 + $0x30] sm:$0xf] %vm609_vm3, %v803_v26  ;;  %v796_v16 = vpack.c.bf16 %v534_v27, %v534_v27 }
 0x14b   : > { %v804_v31 = vpack.c.bf16 %v542_v28, %v542_v28  ;;  %617 = vst.msk [vmem:[%s1216_s5 + $0x1c] sm:$0xf] %vm609_vm3, %v798_v29 }
 0x14c   : > { %625 = vst.msk [vmem:[%s1216_s5 + $0x3c] sm:$0xf] %vm609_vm3, %v806_v30  ;;  %615 = vst.msk [vmem:[%s1216_s5 + $0x14] sm:$0xf] %vm609_vm3, %v796_v16 }
 0x14d   : > { %623 = vst.msk [vmem:[%s1216_s5 + $0x34] sm:$0xf] %vm609_vm3, %v804_v31 }
 0x14e PF: > { %s16_s17 = sadd.s32 1, %s1023_s17   ;;  %s1293_s15 = smov %s1019_s16 }
 0x14f   : > { %p13_p5 = scmp.ge.s32.totalorder %s16_s17, 6   ;;  %s1294_s16 = smov %s1296_s23 }
 0x151   :  { %15 = sbr.rel (!%p13_p5) target bundleno = 3 (0x3), region = 82 }
 0x158   :  { %654 = vsyncpa [#allocation3], 1 }
 0x159   :  { %656 = vsyncpa [#allocation3 + $0x1], 1 }
 0x15a   :  { %657 = vsyncpa [#allocation5], 1 }

// kernel: cropper_net_forward.7
= control target key start
LH: loop header
LB: loop body
LE: loop exit
PB: predicated region body
PF: predicated region fallthrough
CT: control target
= control target key end

     0   :  { %9 = vsyncpa [#allocation3], 0  ;;  %s1856_s0 = inlined_call_operand.vmem [shape: bf16[128,576], index: 0, kind: input, shape index: {}]   ;;  %s1857_s1 = inlined_call_operand.hbm [shape: bf16[576,128], index: 1, kind: input, shape index: {}]   ;;  %s1858_s2 = inlined_call_operand.hbm [shape: f32[1,128], index: 2, kind: input, shape index: {}]   ;;  %s1859_s3 = inlined_call_operand.hbm [shape: f32[1,128], index: 3, kind: input, shape index: {}]   ;;  %s1860_s4 = inlined_call_operand.vmem [shape: bf16[128,128], index: 4, kind: output, shape index: {}]  }
   0x1   :  { %10 = vsyncpa [#allocation5], 0  ;;  %s1559_s15 = smov [#allocation4]   ;;  %s1560_s17 = smov [#allocation2]  }
   0x2   :  { %s31_s16 = sshll.u32 %s1559_s15, 4  ;;  %s18_s18 = sshll.u32 %s1560_s17, 4  ;;  %s32_s16 = int_to_ptr.vmem [resolvable:$true] %s31_s16  ;;  %s1589_s18 = int_to_ptr.vmem [resolvable:$true] %s18_s18 }
   0x3   :  { %s1489_s21 = scalar_lea.hbm %s1858_s2, 16 }
   0x4   :  { %p1490_p0 = scmp.ne.s32.totalorder %s1858_s2, %s1489_s21  ;;  %p1493_p1 = scmp.lt.u32.totalorder %s1489_s21, %s1858_s2 }
   0x6   :  { %p1495_p2 = pnand %p1493_p1, %p1490_p0 }
   0x8   :  { %1498 = shalt.err (!%p1495_p2)
}
   0x9   :  { %s1499_s26 = scalar_lea.vmem %s32_s16, 16  ;;  %s1503_s27 = scalar_lea.vmem %s32_s16, 32 }
   0xa   :  { %p1500_p3 = scmp.ne.s32.totalorder %s32_s16, %s1499_s26  ;;  %p1504_p4 = scmp.lt.s32.totalorder %s32_s16, %s32_s16 }
   0xb   :  { %p1505_p5 = scmp.lt.s32.totalorder %s1503_s27, %s1499_s26 }
   0xd   :  { %p1506_p6 = por %p1505_p5, %p1504_p4 }
   0xf   :  { %p1507_p7 = pnand %p1506_p6, %p1500_p3 }
  0x11   :  { %1510 = shalt.err (!%p1507_p7)
}
  0x12   :  { %34 = dma.hbm_to_vmem [thread:$0]  %s1858_s2, 16, %s32_s16, [#allocation5]  }
  0x13   :  { %s1511_s6 = scalar_lea.hbm %s1857_s1, 4608 }
  0x14   :  { %p1512_p8 = scmp.ne.s32.totalorder %s1857_s1, %s1511_s6  ;;  %p1515_p9 = scmp.lt.u32.totalorder %s1511_s6, %s1857_s1 }
  0x16   :  { %p1517_p10 = pnand %p1515_p9, %p1512_p8 }
  0x18   :  { %1520 = shalt.err (!%p1517_p10)
}
  0x19   :  { %s1521_s11 = scalar_lea.vmem %s1589_s18, 4608  ;;  %p1526_p12 = scmp.lt.s32.totalorder %s1589_s18, %s1589_s18 }
  0x1a   :  { %p1522_p11 = scmp.ne.s32.totalorder %s1589_s18, %s1521_s11  ;;  %p1527_p13 = scmp.lt.s32.totalorder %s1521_s11, %s1521_s11 }
  0x1c   :  { %p1528_p0 = por %p1527_p13, %p1526_p12 }
  0x1e   :  { %p1529_p1 = pnand %p1528_p0, %p1522_p11 }
  0x20   :  { %1532 = shalt.err (!%p1529_p1)
}
  0x21   :  { %s1561_s2 = smov 64   ;;  %s1562_s12 = smov 4  }
  0x22   :  { %24 = dma.hbm_to_vmem [thread:$0]  %s1857_s1, 4608, %s1589_s18, [#allocation3], %s1561_s2, %s1561_s2, %s1562_s12  }
  0x23   :  { %s1563_s15 = smov [#allocation6]   ;;  %s1533_s20 = scalar_lea.hbm %s1859_s3, 16 }
  0x24   :  { %s41_s16 = sshll.u32 %s1563_s15, 4  ;;  %p1534_p2 = scmp.ne.s32.totalorder %s1859_s3, %s1533_s20  ;;  %s42_s16 = int_to_ptr.vmem [resolvable:$true] %s41_s16 }
  0x25   :  { %p1537_p3 = scmp.lt.u32.totalorder %s1533_s20, %s1859_s3 }
  0x27   :  { %p1539_p4 = pnand %p1537_p3, %p1534_p2 }
  0x29   :  { %1542 = shalt.err (!%p1539_p4)
}
  0x2a   :  { %s1543_s25 = scalar_lea.vmem %s42_s16, 16  ;;  %s1547_s1 = scalar_lea.vmem %s42_s16, 32 }
  0x2b   :  { %p1544_p5 = scmp.ne.s32.totalorder %s42_s16, %s1543_s25  ;;  %p1548_p6 = scmp.lt.s32.totalorder %s42_s16, %s42_s16 }
  0x2c   :  { %p1549_p7 = scmp.lt.s32.totalorder %s1547_s1, %s1543_s25 }
  0x2e   :  { %p1550_p8 = por %p1549_p7, %p1548_p6 }
  0x30   :  { %p1551_p9 = pnand %p1550_p8, %p1544_p5 }
  0x32   :  { %1554 = shalt.err (!%p1551_p9)
}
  0x33   :  { %44 = dma.hbm_to_vmem [thread:$0]  %s1859_s3, 16, %s42_s16, [#allocation5]  }
  0x34   :  { %1555 = dma.done.wait [#allocation3], 4608  }
  0x35   :  { %1556 = vsyncadd [#allocation3], 4294962688 }
  0x36   :  { %1557 = dma.done.wait [#allocation5], 32  }
  0x37   :  { %1558 = vsyncadd [#allocation5], 4294967264  ;;  %v1397_v0 = vld [vmem:[#allocation2 + $0x40] sm:$0xff]   ;;  %v1401_v4 = vld [vmem:[#allocation2 + $0x48] sm:$0xff]   ;;  %vm591_vm0 = vcmask 523264  }
  0x38   :  { %v1398_v1 = vld [vmem:[#allocation2 + $0xc0] sm:$0xff]   ;;  %1220 = vmatprep.subr.bf16.mxu0 %v1397_v0  ;;  %v1402_v5 = vld [vmem:[#allocation2 + $0xc8] sm:$0xff]   ;;  %v1405_v8 = vld [vmem:[#allocation2 + $0x50] sm:$0xff]  }
  0x39   :  { %v1399_v2 = vld [vmem:[#allocation2] sm:$0xff]   ;;  %1284 = vmatprep.subr.bf16.mxu1 %v1398_v1  ;;  %v1403_v6 = vld [vmem:[#allocation2 + $0x8] sm:$0xff]   ;;  %v1406_v9 = vld [vmem:[#allocation2 + $0xd0] sm:$0xff]  }
  0x3a   :  { %v1400_v3 = vld [vmem:[#allocation2 + $0x80] sm:$0xff]   ;;  %1221 = vmatpush3.bf16.msra.mxu0 %v1399_v2  ;;  %v1404_v7 = vld [vmem:[#allocation2 + $0x88] sm:$0xff]   ;;  %v1407_v10 = vld [vmem:[#allocation2 + $0x10] sm:$0xff]  }
  0x3b   :  { %1285 = vmatpush3.bf16.msra.mxu1 %v1400_v3  ;;  %1222 = vmatprep.subr.bf16.mxu0 %v1401_v4  ;;  %v1408_v11 = vld [vmem:[#allocation2 + $0x90] sm:$0xff]   ;;  %v1409_v12 = vld [vmem:[#allocation2 + $0x58] sm:$0xff]   ;;  %v1413_v16 = vld [vmem:[#allocation2 + $0x60] sm:$0xff]  }
  0x3c   :  { %1286 = vmatprep.subr.bf16.mxu1 %v1402_v5  ;;  %v1410_v13 = vld [vmem:[#allocation2 + $0xd8] sm:$0xff]   ;;  %v1414_v17 = vld [vmem:[#allocation2 + $0xe0] sm:$0xff]   ;;  %v1417_v20 = vld [vmem:[#allocation2 + $0x68] sm:$0xff]  }
  0x3d   :  { %v1411_v14 = vld [vmem:[#allocation2 + $0x18] sm:$0xff]   ;;  %v1415_v18 = vld [vmem:[#allocation2 + $0x20] sm:$0xff]   ;;  %v1418_v21 = vld [vmem:[#allocation2 + $0xe8] sm:$0xff]  }
  0x3e   :  { %1223 = vmatpush3.bf16.msra.mxu0 %v1403_v6  ;;  %v1412_v15 = vld [vmem:[#allocation2 + $0x98] sm:$0xff]   ;;  %v1416_v19 = vld [vmem:[#allocation2 + $0xa0] sm:$0xff]   ;;  %v1419_v22 = vld [vmem:[#allocation2 + $0x28] sm:$0xff]  }
  0x3f   :  { %1287 = vmatpush3.bf16.msra.mxu1 %v1404_v7  ;;  %1224 = vmatprep.subr.bf16.mxu0 %v1405_v8  ;;  %v1420_v23 = vld [vmem:[#allocation2 + $0xa8] sm:$0xff]   ;;  %v1421_v24 = vld [vmem:[#allocation2 + $0x70] sm:$0xff]   ;;  %v1425_v28 = vld [vmem:[#allocation2 + $0x78] sm:$0xff]  }
  0x40   :  { %1288 = vmatprep.subr.bf16.mxu1 %v1406_v9  ;;  %v1422_v25 = vld [vmem:[#allocation2 + $0xf0] sm:$0xff]   ;;  %v1426_v29 = vld [vmem:[#allocation2 + $0xf8] sm:$0xff]   ;;  %v1434_v35 = vld [vmem:[%s1856_s0 + $0xc] ss:$20 sps:$4 sm:$0xff]  }
  0x41   :  { %v1423_v26 = vld [vmem:[#allocation2 + $0x30] sm:$0xff]   ;;  %v1427_v30 = vld [vmem:[#allocation2 + $0x38] sm:$0xff]   ;;  %v1435_v36 = vld [vmem:[#allocation2 + $0x100] sm:$0xff]   ;;  %745 = vmatprep.mubr.bf16.mxu1 %v1434_v35 }
  0x42   :  { %1225 = vmatpush3.bf16.msra.mxu0 %v1407_v10  ;;  %v1424_v27 = vld [vmem:[#allocation2 + $0xb0] sm:$0xff]   ;;  %v1428_v31 = vld [vmem:[#allocation2 + $0xb8] sm:$0xff]   ;;  %v1436_v37 = vld [vmem:[%s1856_s0 + $0x2c] ss:$20 sps:$4 sm:$0xff]  }
  0x43   :  { %1289 = vmatpush3.bf16.msra.mxu1 %v1408_v11  ;;  %1226 = vmatprep.subr.bf16.mxu0 %v1409_v12  ;;  %v1429_v32 = vld [vmem:[%s1856_s0] ss:$20 sps:$4 sm:$0xff]   ;;  %v1431_v33 = vld [vmem:[%s1856_s0 + $0x4] ss:$20 sps:$4 sm:$0xff]   ;;  %v1432_v34 = vld [vmem:[%s1856_s0 + $0x8] ss:$20 sps:$4 sm:$0xff]  }
  0x44   :  { %1290 = vmatprep.subr.bf16.mxu1 %v1410_v13  ;;  %648 = vmatprep.mubr.bf16.mxu0 %v1431_v33  ;;  %v1438_v38 = vld [vmem:[%s1856_s0 + $0x34] ss:$20 sps:$4 sm:$0xff]   ;;  %v1441_v40 = vld [vmem:[%s1856_s0 + $0x30] ss:$20 sps:$4 sm:$0xff]   ;;  %v1447_v45 = vld [vmem:[%s1856_s0 + $0x58] ss:$20 sps:$4 sm:$0xff]  }
  0x45   :  { %v1440_v39 = vld [vmem:[%s1856_s0 + $0x28] ss:$20 sps:$4 sm:$0xff]   ;;  %v1446_v44 = vld [vmem:[%s1856_s0 + $0x50] ss:$20 sps:$4 sm:$0xff]   ;;  %v1453_v50 = vld [vmem:[%s1856_s0 + $0x78] ss:$20 sps:$4 sm:$0xff]  }
  0x46   :  { %1227 = vmatpush3.bf16.msra.mxu0 %v1411_v14  ;;  %v1442_v41 = vld [vmem:[%s1856_s0 + $0x54] ss:$20 sps:$4 sm:$0xff]   ;;  %v1444_v43 = vld [vmem:[%s1856_s0 + $0x5c] ss:$20 sps:$4 sm:$0xff]   ;;  %v1451_v48 = vld [vmem:[%s1856_s0 + $0x84] ss:$20 sps:$4 sm:$0xff]  }
  0x47   :  { %1291 = vmatpush3.bf16.msra.mxu1 %v1412_v15  ;;  %1228 = vmatprep.subr.bf16.mxu0 %v1413_v16  ;;  %v1448_v42 = vld [vmem:[#allocation2 + $0x108] sm:$0xff]   ;;  %v1461_v46 = vld [vmem:[#allocation2 + $0x110] sm:$0xff]   ;;  %v1474_v49 = vld [vmem:[#allocation2 + $0x118] sm:$0xff]  }
  0x48   :  { %1292 = vmatprep.subr.bf16.mxu1 %v1414_v17  ;;  %v1449_v47 = vld [vmem:[%s1856_s0 + $0x7c] ss:$20 sps:$4 sm:$0xff]   ;;  %v1454_v51 = vld [vmem:[%s1856_s0 + $0x80] ss:$20 sps:$4 sm:$0xff]   ;;  %v1455_v52 = vld [vmem:[%s1856_s0 + $0xa4] ss:$20 sps:$4 sm:$0xff]  }
  0x49   :  { %v1457_v53 = vld [vmem:[%s1856_s0 + $0xac] ss:$20 sps:$4 sm:$0xff]   ;;  %v1460_v55 = vld [vmem:[%s1856_s0 + $0xa8] ss:$20 sps:$4 sm:$0xff]   ;;  %v1467_v59 = vld [vmem:[%s1856_s0 + $0xd0] ss:$20 sps:$4 sm:$0xff]  }
  0x4a   :  { %1229 = vmatpush3.bf16.msra.mxu0 %v1415_v18  ;;  %v1459_v54 = vld [vmem:[%s1856_s0 + $0xa0] ss:$20 sps:$4 sm:$0xff]   ;;  %v1466_v58 = vld [vmem:[%s1856_s0 + $0xc8] ss:$20 sps:$4 sm:$0xff]   ;;  %v1472_v62 = vld [vmem:[%s1856_s0 + $0xf0] ss:$20 sps:$4 sm:$0xff]  }
  0x4b   :  { %1293 = vmatpush3.bf16.msra.mxu1 %v1416_v19  ;;  %1230 = vmatprep.subr.bf16.mxu0 %v1417_v20  ;;  %v1462_v56 = vld [vmem:[%s1856_s0 + $0xcc] ss:$20 sps:$4 sm:$0xff]   ;;  %v1464_v57 = vld [vmem:[%s1856_s0 + $0xd4] ss:$20 sps:$4 sm:$0xff]   ;;  %v1470_v61 = vld [vmem:[%s1856_s0 + $0xfc] ss:$20 sps:$4 sm:$0xff]  }
  0x4c   :  { %1294 = vmatprep.subr.bf16.mxu1 %v1418_v21  ;;  %v1468_v60 = vld [vmem:[%s1856_s0 + $0xf4] ss:$20 sps:$4 sm:$0xff]   ;;  %v1473_v63 = vld [vmem:[%s1856_s0 + $0xf8] ss:$20 sps:$4 sm:$0xff]   ;;  %v1475_v0 = vld [vmem:[%s1856_s0 + $0x11c] ss:$20 sps:$4 sm:$0xff]  }
  0x4d   :  { %v1477_v1 = vld [vmem:[%s1856_s0 + $0x124] ss:$20 sps:$4 sm:$0xff]   ;;  %v1480_v3 = vld [vmem:[%s1856_s0 + $0x120] ss:$20 sps:$4 sm:$0xff]   ;;  %v1487_v10 = vld [vmem:[%s1856_s0 + $0x88] ss:$20 sps:$4 sm:$0xff]  }
  0x4e   :  { %1231 = vmatpush3.bf16.msra.mxu0 %v1419_v22  ;;  %v1479_v2 = vld [vmem:[%s1856_s0 + $0x118] ss:$20 sps:$4 sm:$0xff]   ;;  %v1481_v4 = vld [vmem:[%s1856_s0 + $0x10] ss:$20 sps:$4 sm:$0xff]   ;;  %v1485_v8 = vld [vmem:[%s1856_s0 + $0x60] ss:$20 sps:$4 sm:$0xff]  }
  0x4f   :  { %1295 = vmatpush3.bf16.msra.mxu1 %v1420_v23  ;;  %1232 = vmatprep.subr.bf16.mxu0 %v1421_v24  ;;  %v1482_v5 = vld [vmem:[%s1856_s0 + $0xb0] ss:$20 sps:$4 sm:$0xff]   ;;  %v1483_v6 = vld [vmem:[%s1856_s0 + $0x38] ss:$20 sps:$4 sm:$0xff]   ;;  %v1486_v9 = vld [vmem:[%s1856_s0 + $0x100] ss:$20 sps:$4 sm:$0xff]  }
  0x50   :  { %1296 = vmatprep.subr.bf16.mxu1 %v1422_v25  ;;  %v1484_v7 = vld [vmem:[%s1856_s0 + $0xd8] ss:$20 sps:$4 sm:$0xff]   ;;  %v1488_v11 = vld [vmem:[%s1856_s0 + $0x128] ss:$20 sps:$4 sm:$0xff]  }
  0x52   :  { %1233 = vmatpush3.bf16.msra.mxu0 %v1423_v26 }
  0x53   :  { %1297 = vmatpush3.bf16.msra.mxu1 %v1424_v27  ;;  %1234 = vmatprep.subr.bf16.mxu0 %v1425_v28 }
  0x54   :  { %1298 = vmatprep.subr.bf16.mxu1 %v1426_v29 }
  0x56   :  { %1235 = vmatpush3.bf16.msra.mxu0 %v1427_v30 }
  0x57   :  { %1299 = vmatpush3.bf16.msra.mxu1 %v1428_v31  ;;  %1360 = vmatprep.subr.bf16.mxu0 %v1435_v36 }
  0x58   :  { %1384 = vmatprep.subr.bf16.mxu1 %v1435_v36 }
  0x59   :  { %649 = vmatmul.mubr.bf16.vlgmr.msra.gmra.mrb[0].mxu0 %v1429_v32 }
  0x5a   :  { %746 = vmatmul.mubr.bf16.vlgmr.msra.gmra.mrb[0].mxu1 %v1432_v34  ;;  %1361 = vmatpush3.bf16.msra.mxu0 %v1435_v36 }
  0x5b   :  { %1388 = vmatpush3.bf16.msra.mxu1 %v1435_v36  ;;  %656 = vmatprep.mubr.bf16.mxu0 %v1436_v37 }
  0x5c   :  { %753 = vmatprep.mubr.bf16.mxu1 %v1438_v38  ;;  %1362 = vmatprep.subr.bf16.mxu0 %v1448_v42 }
  0x5d   :  { %1385 = vmatprep.subr.bf16.mxu1 %v1448_v42 }
  0x5e   :  { %1363 = vmatpush3.bf16.msra.mxu0 %v1448_v42 }
  0x5f   :  { %1389 = vmatpush3.bf16.msra.mxu1 %v1448_v42  ;;  %1364 = vmatprep.subr.bf16.mxu0 %v1461_v46 }
  0x60   :  { %1386 = vmatprep.subr.bf16.mxu1 %v1461_v46 }
  0x61   :  { %657 = vmatmul.mubr.bf16.gmra.mrb[4].mxu0 %v1440_v39 }
  0x62   :  { %754 = vmatmul.mubr.bf16.gmra.mrb[4].mxu1 %v1441_v40  ;;  %664 = vmatprep.mubr.bf16.mxu0 %v1442_v41 }
  0x63   :  { %761 = vmatprep.mubr.bf16.mxu1 %v1444_v43  ;;  %1365 = vmatpush3.bf16.msra.mxu0 %v1461_v46 }
  0x64   :  { %1390 = vmatpush3.bf16.msra.mxu1 %v1461_v46  ;;  %1366 = vmatprep.subr.bf16.mxu0 %v1474_v49 }
  0x65   :  { %1387 = vmatprep.subr.bf16.mxu1 %v1474_v49 }
  0x67   :  { %1367 = vmatpush3.bf16.msra.mxu0 %v1474_v49 }
  0x68   :  { %1391 = vmatpush3.bf16.msra.mxu1 %v1474_v49 }
  0x69   :  { %665 = vmatmul.mubr.bf16.gmra.mrb[8].mxu0 %v1446_v44 }
  0x6a   :  { %762 = vmatmul.mubr.bf16.gmra.mrb[8].mxu1 %v1447_v45  ;;  %672 = vmatprep.mubr.bf16.mxu0 %v1449_v47 }
  0x6b   :  { %769 = vmatprep.mubr.bf16.mxu1 %v1451_v48 }
  0x71   :  { %673 = vmatmul.mubr.bf16.gmra.mrb[12].mxu0 %v1453_v50 }
  0x72   :  { %770 = vmatmul.mubr.bf16.gmra.mrb[12].mxu1 %v1454_v51  ;;  %680 = vmatprep.mubr.bf16.mxu0 %v1455_v52 }
  0x73   :  { %777 = vmatprep.mubr.bf16.mxu1 %v1457_v53 }
  0x79   :  { %681 = vmatmul.mubr.bf16.gmra.mrb[16].mxu0 %v1459_v54 }
  0x7a   :  { %778 = vmatmul.mubr.bf16.gmra.mrb[16].mxu1 %v1460_v55  ;;  %688 = vmatprep.mubr.bf16.mxu0 %v1462_v56 }
  0x7b   :  { %785 = vmatprep.mubr.bf16.mxu1 %v1464_v57 }
  0x81   :  { %689 = vmatmul.mubr.bf16.gmra.mrb[20].mxu0 %v1466_v58 }
  0x82   :  { %786 = vmatmul.mubr.bf16.gmra.mrb[20].mxu1 %v1467_v59  ;;  %696 = vmatprep.mubr.bf16.mxu0 %v1468_v60 }
  0x83   :  { %793 = vmatprep.mubr.bf16.mxu1 %v1470_v61 }
  0x89   :  { %697 = vmatmul.mubr.bf16.gmra.mrb[24].mxu0 %v1472_v62 }
  0x8a   :  { %794 = vmatmul.mubr.bf16.gmra.mrb[24].mxu1 %v1473_v63  ;;  %704 = vmatprep.mubr.bf16.mxu0 %v1475_v0 }
  0x8b   :  { %801 = vmatprep.mubr.bf16.mxu1 %v1477_v1 }
  0x91   :  { %705 = vmatmul.mubr.bf16.gmra.mrb[28].mxu0 %v1479_v2 }
  0x92   :  { %802 = vmatmul.mubr.bf16.gmra.mrb[28].mxu1 %v1480_v3  ;;  %1368 = vmatprep.mubr.msk.bf16.mxu0 %vm591_vm0, %v1481_v4 }
  0x93   :  { %1376 = vmatprep.mubr.msk.bf16.mxu1 %vm591_vm0, %v1482_v5 }
  0x99   :  { %1369 = vmatmul.mubr.msk.bf16.vlgmr.msra.gmra.mrb[32].mxu0 %vm591_vm0, %v1483_v6 }
  0x9a   :  { %1377 = vmatmul.mubr.msk.bf16.vlgmr.msra.gmra.mrb[32].mxu1 %vm591_vm0, %v1484_v7  ;;  %1372 = vmatprep.mubr.msk.bf16.mxu0 %vm591_vm0, %v1485_v8 }
  0x9b   :  { %1380 = vmatprep.mubr.msk.bf16.mxu1 %vm591_vm0, %v1486_v9 }
  0xa1   :  { %1373 = vmatmul.mubr.msk.bf16.gmra.mrb[36].mxu0 %vm591_vm0, %v1487_v10 }
  0xa2   :  { %1381 = vmatmul.mubr.msk.bf16.gmra.mrb[36].mxu1 %vm591_vm0, %v1488_v11 }
 0x12c   :  { %v1236_v12 = vpop.f32.mrb[0].mxu0 }
 0x12d   :  { %v1300_v13 = vpop.f32.mrb[0].mxu1  ;;  %v1237_v14 = vpop.f32.mrb[1].mxu0 }
 0x12e   :  { %v1238_v15 = vadd.f32 %v1237_v14, %v1236_v12  ;;  %v1301_v16 = vpop.f32.mrb[1].mxu1  ;;  %v1239_v17 = vpop.f32.mrb[2].mxu0 }
 0x12f   :  { %v1302_v18 = vadd.f32 %v1301_v16, %v1300_v13  ;;  %v1303_v19 = vpop.f32.mrb[2].mxu1  ;;  %v1240_v20 = vpop.f32.mrb[3].mxu0 }
 0x130   :  { %v1241_v21 = vadd.f32 %v1240_v20, %v1239_v17  ;;  %v1304_v22 = vpop.f32.mrb[3].mxu1 }
 0x131   :  { %v1305_v23 = vadd.f32 %v1304_v22, %v1303_v19  ;;  %v1760_v24 = vadd.f32 %v1302_v18, %v1238_v15 }
 0x133   :  { %v1762_v25 = vadd.f32 %v1305_v23, %v1241_v21 }
 0x134   :  { %v1242_v26 = vpop.f32.mrb[4].mxu0 }
 0x135   :  { %v1306_v27 = vpop.f32.mrb[4].mxu1  ;;  %v1243_v28 = vpop.f32.mrb[5].mxu0 }
 0x136   :  { %v1244_v29 = vadd.f32 %v1243_v28, %v1242_v26  ;;  %v1307_v30 = vpop.f32.mrb[5].mxu1  ;;  %v1245_v31 = vpop.f32.mrb[6].mxu0 }
 0x137   :  { %v1308_v32 = vadd.f32 %v1307_v30, %v1306_v27  ;;  %v1309_v33 = vpop.f32.mrb[6].mxu1  ;;  %v1246_v34 = vpop.f32.mrb[7].mxu0 }
 0x138   :  { %v1247_v35 = vadd.f32 %v1246_v34, %v1245_v31  ;;  %v1310_v36 = vpop.f32.mrb[7].mxu1 }
 0x139   :  { %v1311_v37 = vadd.f32 %v1310_v36, %v1309_v33  ;;  %v1764_v38 = vadd.f32 %v1308_v32, %v1244_v29 }
 0x13b   :  { %v1766_v39 = vadd.f32 %v1311_v37, %v1247_v35 }
 0x13c   :  { %v1248_v40 = vpop.f32.mrb[8].mxu0 }
 0x13d   :  { %v1312_v41 = vpop.f32.mrb[8].mxu1  ;;  %v1249_v42 = vpop.f32.mrb[9].mxu0 }
 0x13e   :  { %v1250_v43 = vadd.f32 %v1249_v42, %v1248_v40  ;;  %v1313_v44 = vpop.f32.mrb[9].mxu1  ;;  %v1251_v45 = vpop.f32.mrb[10].mxu0 }
 0x13f   :  { %v1314_v46 = vadd.f32 %v1313_v44, %v1312_v41  ;;  %v1315_v47 = vpop.f32.mrb[10].mxu1  ;;  %v1252_v48 = vpop.f32.mrb[11].mxu0 }
 0x140   :  { %v1253_v49 = vadd.f32 %v1252_v48, %v1251_v45  ;;  %v1316_v50 = vpop.f32.mrb[11].mxu1 }
 0x141   :  { %v1317_v51 = vadd.f32 %v1316_v50, %v1315_v47  ;;  %v1768_v52 = vadd.f32 %v1314_v46, %v1250_v43 }
 0x143   :  { %v1770_v53 = vadd.f32 %v1317_v51, %v1253_v49 }
 0x144   :  { %v1254_v54 = vpop.f32.mrb[12].mxu0 }
 0x145   :  { %v1318_v55 = vpop.f32.mrb[12].mxu1  ;;  %v1255_v56 = vpop.f32.mrb[13].mxu0 }
 0x146   :  { %v1256_v57 = vadd.f32 %v1255_v56, %v1254_v54  ;;  %v1319_v58 = vpop.f32.mrb[13].mxu1  ;;  %v1257_v59 = vpop.f32.mrb[14].mxu0 }
 0x147   :  { %v1320_v60 = vadd.f32 %v1319_v58, %v1318_v55  ;;  %v1321_v61 = vpop.f32.mrb[14].mxu1  ;;  %v1258_v62 = vpop.f32.mrb[15].mxu0 }
 0x148   :  { %v1259_v63 = vadd.f32 %v1258_v62, %v1257_v59  ;;  %v1322_v0 = vpop.f32.mrb[15].mxu1 }
 0x149   :  { %v1323_v1 = vadd.f32 %v1322_v0, %v1321_v61  ;;  %v1772_v2 = vadd.f32 %v1320_v60, %v1256_v57 }
 0x14b   :  { %v1774_v3 = vadd.f32 %v1323_v1, %v1259_v63 }
 0x14c   :  { %v1260_v4 = vpop.f32.mrb[16].mxu0 }
 0x14d   :  { %v1324_v5 = vpop.f32.mrb[16].mxu1  ;;  %v1261_v6 = vpop.f32.mrb[17].mxu0 }
 0x14e   :  { %v1262_v7 = vadd.f32 %v1261_v6, %v1260_v4  ;;  %v1325_v8 = vpop.f32.mrb[17].mxu1  ;;  %v1263_v9 = vpop.f32.mrb[18].mxu0 }
 0x14f   :  { %v1326_v10 = vadd.f32 %v1325_v8, %v1324_v5  ;;  %v1327_v11 = vpop.f32.mrb[18].mxu1  ;;  %v1264_v12 = vpop.f32.mrb[19].mxu0  ;;  %v1784_v5 = vld [vmem:[#allocation4] ss:$0 sm:$0xff] }
 0x150   :  { %v1265_v13 = vadd.f32 %v1264_v12, %v1263_v9  ;;  %v1328_v14 = vpop.f32.mrb[19].mxu1  ;;  %v1787_v9 = vld [vmem:[#allocation6] ss:$0 sm:$0xff] }
 0x151   :  { %v1329_v15 = vadd.f32 %v1328_v14, %v1327_v11  ;;  %v780_v16 = vadd.f32 %v1326_v10, %v1262_v7 }
 0x153   :  { %v1776_v17 = vadd.f32 %v1329_v15, %v1265_v13 }
 0x154   :  { %v1266_v18 = vpop.f32.mrb[20].mxu0 }
 0x155   :  { %v1330_v19 = vpop.f32.mrb[20].mxu1  ;;  %v1267_v20 = vpop.f32.mrb[21].mxu0 }
 0x156   :  { %v1268_v21 = vadd.f32 %v1267_v20, %v1266_v18  ;;  %v1331_v22 = vpop.f32.mrb[21].mxu1  ;;  %v1269_v23 = vpop.f32.mrb[22].mxu0 }
 0x157   :  { %v1332_v26 = vadd.f32 %v1331_v22, %v1330_v19  ;;  %v1333_v27 = vpop.f32.mrb[22].mxu1  ;;  %v1270_v28 = vpop.f32.mrb[23].mxu0 }
 0x158   :  { %v1271_v29 = vadd.f32 %v1270_v28, %v1269_v23  ;;  %v1334_v30 = vpop.f32.mrb[23].mxu1 }
 0x159   :  { %v1335_v31 = vadd.f32 %v1334_v30, %v1333_v27  ;;  %v788_v32 = vadd.f32 %v1332_v26, %v1268_v21 }
 0x15b   :  { %v791_v33 = vadd.f32 %v1335_v31, %v1271_v29 }
 0x15c   :  { %v1272_v34 = vpop.f32.mrb[24].mxu0 }
 0x15d   :  { %v1336_v35 = vpop.f32.mrb[24].mxu1  ;;  %v1273_v36 = vpop.f32.mrb[25].mxu0 }
 0x15e   :  { %v1274_v37 = vadd.f32 %v1273_v36, %v1272_v34  ;;  %v1337_v40 = vpop.f32.mrb[25].mxu1  ;;  %v1275_v41 = vpop.f32.mrb[26].mxu0 }
 0x15f   :  { %v1338_v42 = vadd.f32 %v1337_v40, %v1336_v35  ;;  %v1339_v43 = vpop.f32.mrb[26].mxu1  ;;  %v1276_v44 = vpop.f32.mrb[27].mxu0 }
 0x160   :  { %v1277_v45 = vadd.f32 %v1276_v44, %v1275_v41  ;;  %v1340_v46 = vpop.f32.mrb[27].mxu1 }
 0x161   :  { %v1341_v47 = vadd.f32 %v1340_v46, %v1339_v43  ;;  %v1778_v48 = vadd.f32 %v1338_v42, %v1274_v37 }
 0x163   :  { %v1780_v49 = vadd.f32 %v1341_v47, %v1277_v45 }
 0x164   :  { %v1278_v50 = vpop.f32.mrb[28].mxu0 }
 0x165   :  { %v1342_v51 = vpop.f32.mrb[28].mxu1  ;;  %v1279_v54 = vpop.f32.mrb[29].mxu0 }
 0x166   :  { %v1280_v55 = vadd.f32 %v1279_v54, %v1278_v50  ;;  %v1343_v56 = vpop.f32.mrb[29].mxu1  ;;  %v1281_v57 = vpop.f32.mrb[30].mxu0 }
 0x167   :  { %v1344_v58 = vadd.f32 %v1343_v56, %v1342_v51  ;;  %v1345_v59 = vpop.f32.mrb[30].mxu1  ;;  %v1282_v60 = vpop.f32.mrb[31].mxu0 }
 0x168   :  { %v1283_v61 = vadd.f32 %v1282_v60, %v1281_v57  ;;  %v1346_v62 = vpop.f32.mrb[31].mxu1 }
 0x169   :  { %v1347_v63 = vadd.f32 %v1346_v62, %v1345_v59  ;;  %v804_v0 = vadd.f32 %v1344_v58, %v1280_v55 }
 0x16b   :  { %v1782_v1 = vadd.f32 %v1347_v63, %v1283_v61 }
 0x16c   :  { %v1370_v4 = vpop.f32.mrb[32].mxu0 }
 0x16d   :  { %v853_v6 = vadd.f32 %v1370_v4, %v1764_v38  ;;  %v1378_v7 = vpop.f32.mrb[32].mxu1  ;;  %v844_v8 = vpop.f32.mrb[33].mxu0 }
 0x16e   :  { %v885_v10 = vadd.f32 %v1378_v7, %v788_v32  ;;  %v845_v11 = vadd.f32 %v844_v8, %v1760_v24  ;;  %v876_v12 = vpop.f32.mrb[33].mxu1  ;;  %v1371_v13 = vpop.f32.mrb[34].mxu0 }
 0x16f   :  { %v916_v14 = vmul.f32 %v1784_v5, %v853_v6  ;;  %v877_v15 = vadd.f32 %v876_v12, %v780_v16  ;;  %v856_v18 = vadd.f32 %v1371_v13, %v1766_v39  ;;  %v1379_v19 = vpop.f32.mrb[34].mxu1  ;;  %v847_v20 = vpop.f32.mrb[35].mxu0 }
 0x170   :  { %v924_v21 = vmul.f32 %v1784_v5, %v885_v10  ;;  %v914_v38 = vmul.f32 %v1784_v5, %v845_v11  ;;  %v888_v22 = vadd.f32 %v1379_v19, %v791_v33  ;;  %v848_v23 = vadd.f32 %v847_v20, %v1762_v25  ;;  %v879_v26 = vpop.f32.mrb[35].mxu1 }
 0x171   :  { %v939_v27 = vadd.f32 %v1787_v9, %v916_v14  ;;  %v922_v24 = vmul.f32 %v1784_v5, %v877_v15  ;;  %v917_v28 = vmul.f32 %v1784_v5, %v856_v18  ;;  %v880_v16 = vadd.f32 %v879_v26, %v1776_v17 }
 0x172   :  { %v947_v39 = vadd.f32 %v1787_v9, %v924_v21  ;;  %v937_v29 = vadd.f32 %v1787_v9, %v914_v38  ;;  %v925_v30 = vmul.f32 %v1784_v5, %v888_v22  ;;  %v915_v31 = vmul.f32 %v1784_v5, %v848_v23 }
 0x173   :  { %v955_v32 = vmax.f32 %v939_v27, 0.0  ;;  %v945_v25 = vadd.f32 %v1787_v9, %v922_v24  ;;  %v940_v33 = vadd.f32 %v1787_v9, %v917_v28  ;;  %v923_v34 = vmul.f32 %v1784_v5, %v880_v16 }
 0x174   :  { %v963_v35 = vmax.f32 %v947_v39, 0.0  ;;  %v953_v36 = vmax.f32 %v937_v29, 0.0  ;;  %v948_v37 = vadd.f32 %v1787_v9, %v925_v30  ;;  %v938_v17 = vadd.f32 %v1787_v9, %v915_v31  ;;  %v1374_v40 = vpop.f32.mrb[36].mxu0 }
 0x175   :  { %v961_v41 = vmax.f32 %v945_v25, 0.0  ;;  %v956_v42 = vmax.f32 %v940_v33, 0.0  ;;  %v946_v43 = vadd.f32 %v1787_v9, %v923_v34  ;;  %v869_v44 = vadd.f32 %v1374_v40, %v1772_v2  ;;  %v1382_v45 = vpop.f32.mrb[36].mxu1  ;;  %v860_v46 = vpop.f32.mrb[37].mxu0 }
 0x176   :  { %v964_v47 = vmax.f32 %v948_v37, 0.0  ;;  %v954_v50 = vmax.f32 %v938_v17, 0.0  ;;  %v901_v51 = vadd.f32 %v1382_v45, %v804_v0  ;;  %v861_v54 = vadd.f32 %v860_v46, %v1768_v52  ;;  %v892_v55 = vpop.f32.mrb[37].mxu1  ;;  %v1375_v56 = vpop.f32.mrb[38].mxu0 }
 0x177   :  { %v1181_v57 = vpack.c.bf16 %v956_v42, %v955_v32  ;;  %v962_v58 = vmax.f32 %v946_v43, 0.0  ;;  %v920_v59 = vmul.f32 %v1784_v5, %v869_v44  ;;  %v893_v60 = vadd.f32 %v892_v55, %v1778_v48  ;;  %v1383_v61 = vpop.f32.mrb[38].mxu1  ;;  %v863_v62 = vpop.f32.mrb[39].mxu0 }
 0x178   :  { %v1201_v63 = vpack.c.bf16 %v964_v47, %v963_v35  ;;  %v1176_v4 = vpack.c.bf16 %v954_v50, %v953_v36  ;;  %v928_v2 = vmul.f32 %v1784_v5, %v901_v51  ;;  %v918_v6 = vmul.f32 %v1784_v5, %v861_v54  ;;  %v895_v7 = vpop.f32.mrb[39].mxu1 }
 0x179   :  { %1213 = vst [vmem:[%s1860_s4 + $0x8] sm:$0xff] %v1181_v57   ;;  %v1196_v52 = vpack.c.bf16 %v962_v58, %v961_v41  ;;  %v926_v0 = vmul.f32 %v1784_v5, %v893_v60  ;;  %v872_v8 = vadd.f32 %v1375_v56, %v1774_v3  ;;  %v904_v48 = vadd.f32 %v1383_v61, %v1782_v1 }
 0x17a   :  { %1217 = vst [vmem:[%s1860_s4 + $0x28] sm:$0xff] %v1201_v63   ;;  %1177 = vst [vmem:[%s1860_s4] sm:$0xff] %v1176_v4   ;;  %v864_v10 = vadd.f32 %v863_v62, %v1770_v53  ;;  %v943_v11 = vadd.f32 %v1787_v9, %v920_v59  ;;  %v896_v12 = vadd.f32 %v895_v7, %v1780_v49 }
 0x17b   :  { %1216 = vst [vmem:[%s1860_s4 + $0x20] sm:$0xff] %v1196_v52   ;;  %v921_v3 = vmul.f32 %v1784_v5, %v872_v8  ;;  %v951_v13 = vadd.f32 %v1787_v9, %v928_v2  ;;  %v941_v14 = vadd.f32 %v1787_v9, %v918_v6  ;;  %v929_v15 = vmul.f32 %v1784_v5, %v904_v48 }
 0x17c   :  { %v919_v1 = vmul.f32 %v1784_v5, %v864_v10  ;;  %v949_v53 = vadd.f32 %v1787_v9, %v926_v0  ;;  %v927_v19 = vmul.f32 %v1784_v5, %v896_v12  ;;  %v959_v38 = vmax.f32 %v943_v11, 0.0 }
 0x17d   :  { %v944_v18 = vadd.f32 %v1787_v9, %v921_v3  ;;  %v952_v20 = vadd.f32 %v1787_v9, %v929_v15  ;;  %v967_v23 = vmax.f32 %v951_v13, 0.0  ;;  %v957_v26 = vmax.f32 %v941_v14, 0.0 }
 0x17e   :  { %v942_v21 = vadd.f32 %v1787_v9, %v919_v1  ;;  %v950_v22 = vadd.f32 %v1787_v9, %v927_v19  ;;  %v965_v28 = vmax.f32 %v949_v53, 0.0 }
 0x17f   :  { %v960_v49 = vmax.f32 %v944_v18, 0.0  ;;  %v968_v27 = vmax.f32 %v952_v20, 0.0 }
 0x180   :  { %v958_v24 = vmax.f32 %v942_v21, 0.0  ;;  %v966_v39 = vmax.f32 %v950_v22, 0.0 }
 0x181   :  { %v1191_v16 = vpack.c.bf16 %v960_v49, %v959_v38  ;;  %v1211_v29 = vpack.c.bf16 %v968_v27, %v967_v23 }
 0x182   :  { %v1186_v30 = vpack.c.bf16 %v958_v24, %v957_v26  ;;  %v1206_v5 = vpack.c.bf16 %v966_v39, %v965_v28 }
 0x183   :  { %1215 = vst [vmem:[%s1860_s4 + $0x18] sm:$0xff] %v1191_v16   ;;  %1219 = vst [vmem:[%s1860_s4 + $0x38] sm:$0xff] %v1211_v29  }
 0x184   :  { %1214 = vst [vmem:[%s1860_s4 + $0x10] sm:$0xff] %v1186_v30   ;;  %1218 = vst [vmem:[%s1860_s4 + $0x30] sm:$0xff] %v1206_v5  }
 0x185   :  { %1053 = vsyncpa [#allocation3], 1 }
 0x186   :  { %1054 = vsyncpa [#allocation5], 1 }

// kernel: cropper_net_forward.8
= control target key start
LH: loop header
LB: loop body
LE: loop exit
PB: predicated region body
PF: predicated region fallthrough
CT: control target
= control target key end

     0   :  { %9 = vsyncpa [#allocation3], 0  ;;  %s2054_s0 = inlined_call_operand.vmem [shape: bf16[32,1152], index: 0, kind: input, shape index: {}]   ;;  %s2055_s1 = inlined_call_operand.hbm [shape: bf16[1152,256], index: 1, kind: input, shape index: {}]   ;;  %s2056_s2 = inlined_call_operand.hbm [shape: f32[1,256], index: 2, kind: input, shape index: {}]   ;;  %s2057_s3 = inlined_call_operand.hbm [shape: f32[1,256], index: 3, kind: input, shape index: {}]   ;;  %s2058_s4 = inlined_call_operand.vmem [shape: bf16[32,256], index: 4, kind: output, shape index: {}]  }
   0x1   :  { %10 = vsyncpa [#allocation5], 0  ;;  %s1914_s15 = smov [#allocation4]   ;;  %s1915_s17 = smov [#allocation2]  }
   0x2   :  { %s31_s16 = sshll.u32 %s1914_s15, 4  ;;  %s18_s18 = sshll.u32 %s1915_s17, 4  ;;  %s32_s16 = int_to_ptr.vmem [resolvable:$true] %s31_s16  ;;  %s1945_s18 = int_to_ptr.vmem [resolvable:$true] %s18_s18 }
   0x3   :  { %s1844_s21 = scalar_lea.hbm %s2056_s2, 32 }
   0x4   :  { %p1845_p0 = scmp.ne.s32.totalorder %s2056_s2, %s1844_s21  ;;  %p1848_p1 = scmp.lt.u32.totalorder %s1844_s21, %s2056_s2 }
   0x6   :  { %p1850_p2 = pnand %p1848_p1, %p1845_p0 }
   0x8   :  { %1853 = shalt.err (!%p1850_p2)
}
   0x9   :  { %s1854_s26 = scalar_lea.vmem %s32_s16, 32  ;;  %p1859_p4 = scmp.lt.s32.totalorder %s32_s16, %s32_s16 }
   0xa   :  { %p1855_p3 = scmp.ne.s32.totalorder %s32_s16, %s1854_s26  ;;  %p1860_p5 = scmp.lt.s32.totalorder %s1854_s26, %s1854_s26 }
   0xc   :  { %p1861_p6 = por %p1860_p5, %p1859_p4 }
   0xe   :  { %p1862_p7 = pnand %p1861_p6, %p1855_p3 }
  0x10   :  { %1865 = shalt.err (!%p1862_p7)
}
  0x11   :  { %34 = dma.hbm_to_vmem [thread:$0]  %s2056_s2, 32, %s32_s16, [#allocation5]  }
  0x12   :  { %s1866_s5 = scalar_lea.hbm %s2055_s1, 18432 }
  0x13   :  { %p1867_p8 = scmp.ne.s32.totalorder %s2055_s1, %s1866_s5  ;;  %p1870_p9 = scmp.lt.u32.totalorder %s1866_s5, %s2055_s1 }
  0x15   :  { %p1872_p10 = pnand %p1870_p9, %p1867_p8 }
  0x17   :  { %1875 = shalt.err (!%p1872_p10)
}
  0x18   :  { %s1876_s10 = scalar_lea.vmem %s1945_s18, 18432  ;;  %p1881_p12 = scmp.lt.s32.totalorder %s1945_s18, %s1945_s18 }
  0x19   :  { %p1877_p11 = scmp.ne.s32.totalorder %s1945_s18, %s1876_s10  ;;  %p1882_p13 = scmp.lt.s32.totalorder %s1876_s10, %s1876_s10 }
  0x1b   :  { %p1883_p0 = por %p1882_p13, %p1881_p12 }
  0x1d   :  { %p1884_p1 = pnand %p1883_p0, %p1877_p11 }
  0x1f   :  { %1887 = shalt.err (!%p1884_p1)
}
  0x20   :  { %s1916_s2 = smov 128   ;;  %s1917_s11 = smov 8  }
  0x21   :  { %24 = dma.hbm_to_vmem [thread:$0]  %s2055_s1, 18432, %s1945_s18, [#allocation3], %s1916_s2, %s1916_s2, %s1917_s11  }
  0x22   :  { %s1918_s14 = smov [#allocation6]   ;;  %s1888_s19 = scalar_lea.hbm %s2057_s3, 32 }
  0x23   :  { %s41_s15 = sshll.u32 %s1918_s14, 4  ;;  %p1889_p2 = scmp.ne.s32.totalorder %s2057_s3, %s1888_s19  ;;  %s42_s15 = int_to_ptr.vmem [resolvable:$true] %s41_s15 }
  0x24   :  { %p1892_p3 = scmp.lt.u32.totalorder %s1888_s19, %s2057_s3 }
  0x26   :  { %p1894_p4 = pnand %p1892_p3, %p1889_p2 }
  0x28   :  { %1897 = shalt.err (!%p1894_p4)
}
  0x29   :  { %s1898_s24 = scalar_lea.vmem %s42_s15, 32  ;;  %p1903_p6 = scmp.lt.s32.totalorder %s42_s15, %s42_s15 }
  0x2a   :  { %p1899_p5 = scmp.ne.s32.totalorder %s42_s15, %s1898_s24  ;;  %p1904_p7 = scmp.lt.s32.totalorder %s1898_s24, %s1898_s24 }
  0x2c   :  { %p1905_p8 = por %p1904_p7, %p1903_p6 }
  0x2e   :  { %p1906_p9 = pnand %p1905_p8, %p1899_p5 }
  0x30   :  { %1909 = shalt.err (!%p1906_p9)
}
  0x31   :  { %44 = dma.hbm_to_vmem [thread:$0]  %s2057_s3, 32, %s42_s15, [#allocation5]  }
  0x32   :  { %1910 = dma.done.wait [#allocation3], 18432  }
  0x33   :  { %1911 = vsyncadd [#allocation3], 4294948864 }
  0x34   :  { %1912 = dma.done.wait [#allocation5], 64  }
  0x35   :  { %1913 = vsyncadd [#allocation5], 4294967232  ;;  %v1602_v0 = vld [vmem:[#allocation2 + $0x4] ss:$8 sps:$4 sm:$0xff]   ;;  %v1606_v2 = vld [vmem:[#allocation2] ss:$8 sps:$4 sm:$0xff]  }
  0x36   :  { %v1604_v1 = vld [vmem:[#allocation2 + $0x204] ss:$8 sps:$4 sm:$0xff]   ;;  %1031 = vmatprep.subr.bf16.mxu1 %v1602_v0  ;;  %v1607_v3 = vld [vmem:[#allocation2 + $0x200] ss:$8 sps:$4 sm:$0xff]   ;;  %v1608_v4 = vld [vmem:[#allocation2 + $0x14] ss:$8 sps:$4 sm:$0xff]  }
  0x37   :  { %1137 = vmatprep.subr.bf16.mxu0 %v1604_v1  ;;  %1032 = vmatpush1.bf16.msra.mxu1 %v1606_v2  ;;  %v1610_v5 = vld [vmem:[#allocation2 + $0x214] ss:$8 sps:$4 sm:$0xff]   ;;  %v1612_v6 = vld [vmem:[#allocation2 + $0x10] ss:$8 sps:$4 sm:$0xff]   ;;  %v1614_v8 = vld [vmem:[#allocation2 + $0x24] ss:$8 sps:$4 sm:$0xff]  }
  0x38   :  { %1138 = vmatpush1.bf16.msra.mxu0 %v1607_v3  ;;  %1033 = vmatprep.subr.bf16.mxu1 %v1608_v4  ;;  %v1613_v7 = vld [vmem:[#allocation2 + $0x210] ss:$8 sps:$4 sm:$0xff]   ;;  %v1616_v9 = vld [vmem:[#allocation2 + $0x224] ss:$8 sps:$4 sm:$0xff]   ;;  %v1618_v10 = vld [vmem:[#allocation2 + $0x20] ss:$8 sps:$4 sm:$0xff]  }
  0x39   :  { %1139 = vmatprep.subr.bf16.mxu0 %v1610_v5  ;;  %v1619_v11 = vld [vmem:[#allocation2 + $0x220] ss:$8 sps:$4 sm:$0xff]   ;;  %v1620_v12 = vld [vmem:[#allocation2 + $0x34] ss:$8 sps:$4 sm:$0xff]   ;;  %v1624_v14 = vld [vmem:[#allocation2 + $0x30] ss:$8 sps:$4 sm:$0xff]  }
  0x3a   :  { %v1622_v13 = vld [vmem:[#allocation2 + $0x234] ss:$8 sps:$4 sm:$0xff]   ;;  %v1625_v15 = vld [vmem:[#allocation2 + $0x230] ss:$8 sps:$4 sm:$0xff]   ;;  %v1626_v16 = vld [vmem:[#allocation2 + $0x44] ss:$8 sps:$4 sm:$0xff]  }
  0x3b   :  { %1034 = vmatpush1.bf16.msra.mxu1 %v1612_v6  ;;  %v1628_v17 = vld [vmem:[#allocation2 + $0x244] ss:$8 sps:$4 sm:$0xff]   ;;  %v1630_v18 = vld [vmem:[#allocation2 + $0x40] ss:$8 sps:$4 sm:$0xff]   ;;  %v1632_v20 = vld [vmem:[#allocation2 + $0x54] ss:$8 sps:$4 sm:$0xff]  }
  0x3c   :  { %1140 = vmatpush1.bf16.msra.mxu0 %v1613_v7  ;;  %1035 = vmatprep.subr.bf16.mxu1 %v1614_v8  ;;  %v1631_v19 = vld [vmem:[#allocation2 + $0x240] ss:$8 sps:$4 sm:$0xff]   ;;  %v1634_v21 = vld [vmem:[#allocation2 + $0x254] ss:$8 sps:$4 sm:$0xff]   ;;  %v1636_v22 = vld [vmem:[#allocation2 + $0x50] ss:$8 sps:$4 sm:$0xff]  }
  0x3d   :  { %1141 = vmatprep.subr.bf16.mxu0 %v1616_v9  ;;  %v1637_v23 = vld [vmem:[#allocation2 + $0x250] ss:$8 sps:$4 sm:$0xff]   ;;  %v1638_v24 = vld [vmem:[#allocation2 + $0x64] ss:$8 sps:$4 sm:$0xff]   ;;  %v1642_v26 = vld [vmem:[#allocation2 + $0x60] ss:$8 sps:$4 sm:$0xff]  }
  0x3e   :  { %v1640_v25 = vld [vmem:[#allocation2 + $0x264] ss:$8 sps:$4 sm:$0xff]   ;;  %v1643_v27 = vld [vmem:[#allocation2 + $0x260] ss:$8 sps:$4 sm:$0xff]   ;;  %v1644_v28 = vld [vmem:[#allocation2 + $0x74] ss:$8 sps:$4 sm:$0xff]  }
  0x3f   :  { %1036 = vmatpush1.bf16.msra.mxu1 %v1618_v10  ;;  %v1646_v29 = vld [vmem:[#allocation2 + $0x274] ss:$8 sps:$4 sm:$0xff]   ;;  %v1648_v30 = vld [vmem:[#allocation2 + $0x70] ss:$8 sps:$4 sm:$0xff]   ;;  %v1650_v32 = vld [vmem:[#allocation2 + $0x84] ss:$8 sps:$4 sm:$0xff]  }
  0x40   :  { %1142 = vmatpush1.bf16.msra.mxu0 %v1619_v11  ;;  %1037 = vmatprep.subr.bf16.mxu1 %v1620_v12  ;;  %v1649_v31 = vld [vmem:[#allocation2 + $0x270] ss:$8 sps:$4 sm:$0xff]   ;;  %v1652_v33 = vld [vmem:[#allocation2 + $0x284] ss:$8 sps:$4 sm:$0xff]   ;;  %v1654_v34 = vld [vmem:[#allocation2 + $0x80] ss:$8 sps:$4 sm:$0xff]  }
  0x41   :  { %1143 = vmatprep.subr.bf16.mxu0 %v1622_v13  ;;  %v1655_v35 = vld [vmem:[#allocation2 + $0x280] ss:$8 sps:$4 sm:$0xff]   ;;  %v1656_v36 = vld [vmem:[#allocation2 + $0x94] ss:$8 sps:$4 sm:$0xff]   ;;  %v1660_v38 = vld [vmem:[#allocation2 + $0x90] ss:$8 sps:$4 sm:$0xff]  }
  0x42   :  { %v1658_v37 = vld [vmem:[#allocation2 + $0x294] ss:$8 sps:$4 sm:$0xff]   ;;  %v1661_v39 = vld [vmem:[#allocation2 + $0x290] ss:$8 sps:$4 sm:$0xff]   ;;  %v1662_v40 = vld [vmem:[#allocation2 + $0xa4] ss:$8 sps:$4 sm:$0xff]  }
  0x43   :  { %1038 = vmatpush1.bf16.msra.mxu1 %v1624_v14  ;;  %v1664_v41 = vld [vmem:[#allocation2 + $0x2a4] ss:$8 sps:$4 sm:$0xff]   ;;  %v1666_v42 = vld [vmem:[#allocation2 + $0xa0] ss:$8 sps:$4 sm:$0xff]   ;;  %v1668_v44 = vld [vmem:[#allocation2 + $0xb4] ss:$8 sps:$4 sm:$0xff]  }
  0x44   :  { %1144 = vmatpush1.bf16.msra.mxu0 %v1625_v15  ;;  %1039 = vmatprep.subr.bf16.mxu1 %v1626_v16  ;;  %v1667_v43 = vld [vmem:[#allocation2 + $0x2a0] ss:$8 sps:$4 sm:$0xff]   ;;  %v1670_v45 = vld [vmem:[#allocation2 + $0x2b4] ss:$8 sps:$4 sm:$0xff]   ;;  %v1672_v46 = vld [vmem:[#allocation2 + $0xb0] ss:$8 sps:$4 sm:$0xff]  }
  0x45   :  { %1145 = vmatprep.subr.bf16.mxu0 %v1628_v17  ;;  %v1673_v47 = vld [vmem:[#allocation2 + $0x2b0] ss:$8 sps:$4 sm:$0xff]   ;;  %v1700_v48 = vld [vmem:[%s2054_s0 + $0x4] ss:$36 sps:$4 sm:$0xff]   ;;  %v1680_v54 = vld [vmem:[#allocation2 + $0xd4] ss:$8 sps:$4 sm:$0xff]  }
  0x46   :  { %v1674_v49 = vld [vmem:[#allocation2 + $0xc4] ss:$8 sps:$4 sm:$0xff]   ;;  %1063 = vmatprep.mubr.bf16.mxu1 %v1700_v48  ;;  %v1706_v51 = vld [vmem:[%s2054_s0 + $0x14] ss:$36 sps:$4 sm:$0xff]   ;;  %v1678_v52 = vld [vmem:[#allocation2 + $0xc0] ss:$8 sps:$4 sm:$0xff]  }
  0x47   :  { %1040 = vmatpush1.bf16.msra.mxu1 %v1630_v18  ;;  %v1676_v50 = vld [vmem:[#allocation2 + $0x2c4] ss:$8 sps:$4 sm:$0xff]   ;;  %v1679_v53 = vld [vmem:[#allocation2 + $0x2c0] ss:$8 sps:$4 sm:$0xff]   ;;  %v1682_v55 = vld [vmem:[#allocation2 + $0x2d4] ss:$8 sps:$4 sm:$0xff]   ;;  %1169 = vmatprep.mubr.bf16.mxu0 %v1706_v51 }
  0x48   :  { %1146 = vmatpush1.bf16.msra.mxu0 %v1631_v19  ;;  %1041 = vmatprep.subr.bf16.mxu1 %v1632_v20  ;;  %v1684_v56 = vld [vmem:[#allocation2 + $0xd0] ss:$8 sps:$4 sm:$0xff]   ;;  %v1686_v58 = vld [vmem:[#allocation2 + $0xe4] ss:$8 sps:$4 sm:$0xff]   ;;  %v1690_v60 = vld [vmem:[#allocation2 + $0xe0] ss:$8 sps:$4 sm:$0xff]  }
  0x49   :  { %1147 = vmatprep.subr.bf16.mxu0 %v1634_v21  ;;  %v1685_v57 = vld [vmem:[#allocation2 + $0x2d0] ss:$8 sps:$4 sm:$0xff]   ;;  %v1688_v59 = vld [vmem:[#allocation2 + $0x2e4] ss:$8 sps:$4 sm:$0xff]   ;;  %v1691_v61 = vld [vmem:[#allocation2 + $0x2e0] ss:$8 sps:$4 sm:$0xff]  }
  0x4a   :  { %v1692_v62 = vld [vmem:[#allocation2 + $0xf4] ss:$8 sps:$4 sm:$0xff]   ;;  %v1696_v0 = vld [vmem:[#allocation2 + $0xf0] ss:$8 sps:$4 sm:$0xff]   ;;  %v1703_v2 = vld [vmem:[#allocation2 + $0x104] ss:$8 sps:$4 sm:$0xff]  }
  0x4b   :  { %1042 = vmatpush1.bf16.msra.mxu1 %v1636_v22  ;;  %v1694_v63 = vld [vmem:[#allocation2 + $0x2f4] ss:$8 sps:$4 sm:$0xff]   ;;  %v1697_v1 = vld [vmem:[#allocation2 + $0x2f0] ss:$8 sps:$4 sm:$0xff]   ;;  %v1709_v3 = vld [vmem:[#allocation2 + $0x304] ss:$8 sps:$4 sm:$0xff]  }
  0x4c   :  { %1148 = vmatpush1.bf16.msra.mxu0 %v1637_v23  ;;  %1043 = vmatprep.subr.bf16.mxu1 %v1638_v24  ;;  %v1698_v4 = vld [vmem:[%s2054_s0] ss:$36 sps:$4 sm:$0xff]   ;;  %v1704_v6 = vld [vmem:[%s2054_s0 + $0x10] ss:$36 sps:$4 sm:$0xff]  }
  0x4d   :  { %1149 = vmatprep.subr.bf16.mxu0 %v1640_v25  ;;  %v1701_v5 = vld [vmem:[#allocation2 + $0x100] ss:$8 sps:$4 sm:$0xff]   ;;  %v1712_v8 = vld [vmem:[#allocation2 + $0x114] ss:$8 sps:$4 sm:$0xff]   ;;  %v1710_v10 = vld [vmem:[#allocation2 + $0x110] ss:$8 sps:$4 sm:$0xff]  }
  0x4e   :  { %v1707_v7 = vld [vmem:[#allocation2 + $0x300] ss:$8 sps:$4 sm:$0xff]   ;;  %v1715_v9 = vld [vmem:[#allocation2 + $0x314] ss:$8 sps:$4 sm:$0xff]   ;;  %v1713_v11 = vld [vmem:[#allocation2 + $0x310] ss:$8 sps:$4 sm:$0xff]  }
  0x4f   :  { %1044 = vmatpush1.bf16.msra.mxu1 %v1642_v26  ;;  %v1718_v12 = vld [vmem:[#allocation2 + $0x124] ss:$8 sps:$4 sm:$0xff]   ;;  %v1716_v14 = vld [vmem:[#allocation2 + $0x120] ss:$8 sps:$4 sm:$0xff]   ;;  %v1724_v16 = vld [vmem:[#allocation2 + $0x134] ss:$8 sps:$4 sm:$0xff]  }
  0x50   :  { %1150 = vmatpush1.bf16.msra.mxu0 %v1643_v27  ;;  %1045 = vmatprep.subr.bf16.mxu1 %v1644_v28  ;;  %v1721_v13 = vld [vmem:[#allocation2 + $0x324] ss:$8 sps:$4 sm:$0xff]   ;;  %v1719_v15 = vld [vmem:[#allocation2 + $0x320] ss:$8 sps:$4 sm:$0xff]   ;;  %v1727_v17 = vld [vmem:[#allocation2 + $0x334] ss:$8 sps:$4 sm:$0xff]  }
  0x51   :  { %1151 = vmatprep.subr.bf16.mxu0 %v1646_v29  ;;  %v1722_v18 = vld [vmem:[#allocation2 + $0x130] ss:$8 sps:$4 sm:$0xff]   ;;  %v1730_v20 = vld [vmem:[#allocation2 + $0x144] ss:$8 sps:$4 sm:$0xff]   ;;  %v1728_v22 = vld [vmem:[#allocation2 + $0x140] ss:$8 sps:$4 sm:$0xff]  }
  0x52   :  { %v1725_v19 = vld [vmem:[#allocation2 + $0x330] ss:$8 sps:$4 sm:$0xff]   ;;  %v1733_v21 = vld [vmem:[#allocation2 + $0x344] ss:$8 sps:$4 sm:$0xff]   ;;  %v1731_v23 = vld [vmem:[#allocation2 + $0x340] ss:$8 sps:$4 sm:$0xff]  }
  0x53   :  { %1046 = vmatpush1.bf16.msra.mxu1 %v1648_v30  ;;  %v1736_v24 = vld [vmem:[#allocation2 + $0x154] ss:$8 sps:$4 sm:$0xff]   ;;  %v1734_v26 = vld [vmem:[#allocation2 + $0x150] ss:$8 sps:$4 sm:$0xff]   ;;  %v1742_v28 = vld [vmem:[#allocation2 + $0x164] ss:$8 sps:$4 sm:$0xff]  }
  0x54   :  { %1152 = vmatpush1.bf16.msra.mxu0 %v1649_v31  ;;  %1047 = vmatprep.subr.bf16.mxu1 %v1650_v32  ;;  %v1739_v25 = vld [vmem:[#allocation2 + $0x354] ss:$8 sps:$4 sm:$0xff]   ;;  %v1737_v27 = vld [vmem:[#allocation2 + $0x350] ss:$8 sps:$4 sm:$0xff]   ;;  %v1792_v31 = vld [vmem:[%s2054_s0 + $0x48] ss:$36 sps:$4 sm:$0xff]  }
  0x55   :  { %1153 = vmatprep.subr.bf16.mxu0 %v1652_v33  ;;  %v1788_v29 = vld [vmem:[%s2054_s0 + $0x4c] ss:$36 sps:$4 sm:$0xff]   ;;  %v1790_v30 = vld [vmem:[%s2054_s0 + $0x5c] ss:$36 sps:$4 sm:$0xff]  }
  0x56   :  { %v1745_v32 = vld [vmem:[#allocation2 + $0x364] ss:$8 sps:$4 sm:$0xff]   ;;  %v1796_v33 = vld [vmem:[%s2054_s0 + $0x58] ss:$36 sps:$4 sm:$0xff]  }
  0x57   :  { %1048 = vmatpush1.bf16.msra.mxu1 %v1654_v34  ;;  %v1740_v34 = vld [vmem:[#allocation2 + $0x160] ss:$8 sps:$4 sm:$0xff]   ;;  %v1758_v48 = vld [vmem:[#allocation2 + $0x190] ss:$8 sps:$4 sm:$0xff]   ;;  %v1769_v51 = vld [vmem:[#allocation2 + $0x3a4] ss:$8 sps:$4 sm:$0xff]  }
  0x58   :  { %1154 = vmatpush1.bf16.msra.mxu0 %v1655_v35  ;;  %1049 = vmatprep.subr.bf16.mxu1 %v1656_v36  ;;  %v1743_v35 = vld [vmem:[#allocation2 + $0x360] ss:$8 sps:$4 sm:$0xff]   ;;  %v1748_v36 = vld [vmem:[#allocation2 + $0x174] ss:$8 sps:$4 sm:$0xff]  }
  0x59   :  { %1155 = vmatprep.subr.bf16.mxu0 %v1658_v37  ;;  %v1751_v37 = vld [vmem:[#allocation2 + $0x374] ss:$8 sps:$4 sm:$0xff]  }
  0x5b   :  { %1050 = vmatpush1.bf16.msra.mxu1 %v1660_v38  ;;  %v1746_v38 = vld [vmem:[#allocation2 + $0x170] ss:$8 sps:$4 sm:$0xff]  }
  0x5c   :  { %1156 = vmatpush1.bf16.msra.mxu0 %v1661_v39  ;;  %1051 = vmatprep.subr.bf16.mxu1 %v1662_v40  ;;  %v1749_v39 = vld [vmem:[#allocation2 + $0x370] ss:$8 sps:$4 sm:$0xff]   ;;  %v1754_v40 = vld [vmem:[#allocation2 + $0x184] ss:$8 sps:$4 sm:$0xff]  }
  0x5d   :  { %1157 = vmatprep.subr.bf16.mxu0 %v1664_v41  ;;  %v1808_v41 = vld [vmem:[%s2054_s0 + $0xc] ss:$36 sps:$4 sm:$0xff]  }
  0x5f   :  { %1052 = vmatpush1.bf16.msra.mxu1 %v1666_v42  ;;  %v1757_v42 = vld [vmem:[#allocation2 + $0x384] ss:$8 sps:$4 sm:$0xff]  }
  0x60   :  { %1158 = vmatpush1.bf16.msra.mxu0 %v1667_v43  ;;  %1053 = vmatprep.subr.bf16.mxu1 %v1668_v44  ;;  %v1811_v43 = vld [vmem:[%s2054_s0 + $0x1c] ss:$36 sps:$4 sm:$0xff]  }
  0x61   :  { %1159 = vmatprep.subr.bf16.mxu0 %v1670_v45  ;;  %v1752_v44 = vld [vmem:[#allocation2 + $0x180] ss:$8 sps:$4 sm:$0xff]  }
  0x62   :  { %v1755_v45 = vld [vmem:[#allocation2 + $0x380] ss:$8 sps:$4 sm:$0xff]  }
  0x63   :  { %1054 = vmatpush1.bf16.msra.mxu1 %v1672_v46  ;;  %v1760_v46 = vld [vmem:[#allocation2 + $0x194] ss:$8 sps:$4 sm:$0xff]  }
  0x64   :  { %1160 = vmatpush1.bf16.msra.mxu0 %v1673_v47  ;;  %1055 = vmatprep.subr.bf16.mxu1 %v1674_v49  ;;  %v1763_v47 = vld [vmem:[#allocation2 + $0x394] ss:$8 sps:$4 sm:$0xff]   ;;  %v1761_v49 = vld [vmem:[#allocation2 + $0x390] ss:$8 sps:$4 sm:$0xff]  }
  0x65   :  { %1161 = vmatprep.subr.bf16.mxu0 %v1676_v50  ;;  %v1766_v50 = vld [vmem:[#allocation2 + $0x1a4] ss:$8 sps:$4 sm:$0xff]  }
  0x67   :  { %1056 = vmatpush1.bf16.msra.mxu1 %v1678_v52  ;;  %v1764_v52 = vld [vmem:[#allocation2 + $0x1a0] ss:$8 sps:$4 sm:$0xff]  }
  0x68   :  { %1162 = vmatpush1.bf16.msra.mxu0 %v1679_v53  ;;  %1057 = vmatprep.subr.bf16.mxu1 %v1680_v54  ;;  %v1767_v53 = vld [vmem:[#allocation2 + $0x3a0] ss:$8 sps:$4 sm:$0xff]   ;;  %v1772_v54 = vld [vmem:[#allocation2 + $0x1b4] ss:$8 sps:$4 sm:$0xff]  }
  0x69   :  { %1163 = vmatprep.subr.bf16.mxu0 %v1682_v55  ;;  %v1775_v55 = vld [vmem:[#allocation2 + $0x3b4] ss:$8 sps:$4 sm:$0xff]  }
  0x6b   :  { %1058 = vmatpush1.bf16.msra.mxu1 %v1684_v56  ;;  %v1770_v56 = vld [vmem:[#allocation2 + $0x1b0] ss:$8 sps:$4 sm:$0xff]  }
  0x6c   :  { %1164 = vmatpush1.bf16.msra.mxu0 %v1685_v57  ;;  %1059 = vmatprep.subr.bf16.mxu1 %v1686_v58  ;;  %v1773_v57 = vld [vmem:[#allocation2 + $0x3b0] ss:$8 sps:$4 sm:$0xff]   ;;  %v1778_v58 = vld [vmem:[#allocation2 + $0x1c4] ss:$8 sps:$4 sm:$0xff]  }
  0x6d   :  { %1165 = vmatprep.subr.bf16.mxu0 %v1688_v59  ;;  %v1781_v59 = vld [vmem:[#allocation2 + $0x3c4] ss:$8 sps:$4 sm:$0xff]  }
  0x6f   :  { %1060 = vmatpush1.bf16.msra.mxu1 %v1690_v60  ;;  %v1776_v60 = vld [vmem:[#allocation2 + $0x1c0] ss:$8 sps:$4 sm:$0xff]  }
  0x70   :  { %1166 = vmatpush1.bf16.msra.mxu0 %v1691_v61  ;;  %1061 = vmatprep.subr.bf16.mxu1 %v1692_v62  ;;  %v1779_v61 = vld [vmem:[#allocation2 + $0x3c0] ss:$8 sps:$4 sm:$0xff]   ;;  %v1784_v62 = vld [vmem:[#allocation2 + $0x1d4] ss:$8 sps:$4 sm:$0xff]  }
  0x71   :  { %1167 = vmatprep.subr.bf16.mxu0 %v1694_v63  ;;  %v1787_v63 = vld [vmem:[#allocation2 + $0x3d4] ss:$8 sps:$4 sm:$0xff]  }
  0x73   :  { %1062 = vmatpush1.bf16.msra.mxu1 %v1696_v0  ;;  %v1782_v0 = vld [vmem:[#allocation2 + $0x1d0] ss:$8 sps:$4 sm:$0xff]  }
  0x74   :  { %1168 = vmatpush1.bf16.msra.mxu0 %v1697_v1  ;;  %1084 = vmatprep.subr.bf16.mxu1 %v1703_v2  ;;  %v1785_v1 = vld [vmem:[#allocation2 + $0x3d0] ss:$8 sps:$4 sm:$0xff]   ;;  %v1795_v2 = vld [vmem:[#allocation2 + $0x1e4] ss:$8 sps:$4 sm:$0xff]  }
  0x75   :  { %1190 = vmatprep.subr.bf16.mxu0 %v1709_v3  ;;  %v1799_v3 = vld [vmem:[#allocation2 + $0x3e4] ss:$8 sps:$4 sm:$0xff]  }
  0x76   :  { %1064 = vmatmul.mubr.bf16.vlgmr.msra.gmra.mrb[0].mxu1 %v1698_v4  ;;  %v1793_v4 = vld [vmem:[#allocation2 + $0x1e0] ss:$8 sps:$4 sm:$0xff]  }
  0x77   :  { %1170 = vmatmul.mubr.bf16.vlgmr.msra.gmra.mrb[0].mxu0 %v1704_v6  ;;  %1085 = vmatpush1.bf16.msra.mxu1 %v1701_v5  ;;  %v1797_v5 = vld [vmem:[#allocation2 + $0x3e0] ss:$8 sps:$4 sm:$0xff]   ;;  %v1802_v6 = vld [vmem:[#allocation2 + $0x1f4] ss:$8 sps:$4 sm:$0xff]  }
  0x78   :  { %1191 = vmatpush1.bf16.msra.mxu0 %v1707_v7  ;;  %1086 = vmatprep.subr.bf16.mxu1 %v1712_v8  ;;  %v1805_v7 = vld [vmem:[#allocation2 + $0x3f4] ss:$8 sps:$4 sm:$0xff]   ;;  %v1800_v8 = vld [vmem:[#allocation2 + $0x1f0] ss:$8 sps:$4 sm:$0xff]  }
  0x79   :  { %1192 = vmatprep.subr.bf16.mxu0 %v1715_v9  ;;  %1073 = vmatprep.mubr.bf16.mxu1 %v1788_v29  ;;  %v1803_v9 = vld [vmem:[#allocation2 + $0x3f0] ss:$8 sps:$4 sm:$0xff]   ;;  %v1838_v29 = vld [vmem:[#allocation2 + $0x464] ss:$8 sps:$4 sm:$0xff]  }
  0x7a   :  { %1179 = vmatprep.mubr.bf16.mxu0 %v1790_v30  ;;  %v1836_v30 = vld [vmem:[#allocation2 + $0x460] ss:$8 sps:$4 sm:$0xff]  }
  0x7b   :  { %1087 = vmatpush1.bf16.msra.mxu1 %v1710_v10  ;;  %v1814_v10 = vld [vmem:[#allocation2 + $0x404] ss:$8 sps:$4 sm:$0xff]  }
  0x7c   :  { %1193 = vmatpush1.bf16.msra.mxu0 %v1713_v11  ;;  %1088 = vmatprep.subr.bf16.mxu1 %v1718_v12  ;;  %v1806_v11 = vld [vmem:[%s2054_s0 + $0x8] ss:$36 sps:$4 sm:$0xff]   ;;  %v1809_v12 = vld [vmem:[%s2054_s0 + $0x18] ss:$36 sps:$4 sm:$0xff]  }
  0x7d   :  { %1194 = vmatprep.subr.bf16.mxu0 %v1721_v13  ;;  %v1812_v13 = vld [vmem:[#allocation2 + $0x400] ss:$8 sps:$4 sm:$0xff]  }
  0x7e   :  { %1074 = vmatmul.mubr.bf16.gmra.mrb[4].mxu1 %v1792_v31  ;;  %v1841_v31 = vld [vmem:[#allocation2 + $0x474] ss:$8 sps:$4 sm:$0xff]  }
  0x7f   :  { %1089 = vmatpush1.bf16.msra.mxu1 %v1716_v14  ;;  %1180 = vmatmul.mubr.bf16.gmra.mrb[4].mxu0 %v1796_v33  ;;  %v1817_v14 = vld [vmem:[#allocation2 + $0x414] ss:$8 sps:$4 sm:$0xff]   ;;  %v1842_v33 = vld [vmem:[%s2054_s0 + $0x20] ss:$36 sps:$4 sm:$0xff]  }
  0x80   :  { %1195 = vmatpush1.bf16.msra.mxu0 %v1719_v15  ;;  %1090 = vmatprep.subr.bf16.mxu1 %v1724_v16  ;;  %v1818_v15 = vld [vmem:[%s2054_s0 + $0x54] ss:$36 sps:$4 sm:$0xff]   ;;  %v1820_v16 = vld [vmem:[%s2054_s0 + $0x64] ss:$36 sps:$4 sm:$0xff]  }
  0x81   :  { %1196 = vmatprep.subr.bf16.mxu0 %v1727_v17  ;;  %1116 = vmatprep.mubr.bf16.mxu1 %v1808_v41  ;;  %v1815_v17 = vld [vmem:[#allocation2 + $0x410] ss:$8 sps:$4 sm:$0xff]  }
  0x82   :  { %1222 = vmatprep.mubr.bf16.mxu0 %v1811_v43 }
  0x83   :  { %1091 = vmatpush1.bf16.msra.mxu1 %v1722_v18  ;;  %v1826_v18 = vld [vmem:[#allocation2 + $0x424] ss:$8 sps:$4 sm:$0xff]  }
  0x84   :  { %1197 = vmatpush1.bf16.msra.mxu0 %v1725_v19  ;;  %1092 = vmatprep.subr.bf16.mxu1 %v1730_v20  ;;  %v1822_v19 = vld [vmem:[%s2054_s0 + $0x50] ss:$36 sps:$4 sm:$0xff]   ;;  %v1823_v20 = vld [vmem:[%s2054_s0 + $0x60] ss:$36 sps:$4 sm:$0xff]  }
  0x85   :  { %1198 = vmatprep.subr.bf16.mxu0 %v1733_v21  ;;  %v1824_v21 = vld [vmem:[#allocation2 + $0x420] ss:$8 sps:$4 sm:$0xff]  }
  0x87   :  { %1093 = vmatpush1.bf16.msra.mxu1 %v1728_v22  ;;  %v1829_v22 = vld [vmem:[#allocation2 + $0x434] ss:$8 sps:$4 sm:$0xff]  }
  0x88   :  { %1199 = vmatpush1.bf16.msra.mxu0 %v1731_v23  ;;  %1094 = vmatprep.subr.bf16.mxu1 %v1736_v24  ;;  %v1827_v23 = vld [vmem:[#allocation2 + $0x430] ss:$8 sps:$4 sm:$0xff]   ;;  %v1832_v24 = vld [vmem:[#allocation2 + $0x444] ss:$8 sps:$4 sm:$0xff]  }
  0x89   :  { %1200 = vmatprep.subr.bf16.mxu0 %v1739_v25  ;;  %v1919_v25 = vmov 0  }
  0x8b   :  { %1095 = vmatpush1.bf16.msra.mxu1 %v1734_v26  ;;  %v1830_v26 = vld [vmem:[#allocation2 + $0x440] ss:$8 sps:$4 sm:$0xff]  }
  0x8c   :  { %1201 = vmatpush1.bf16.msra.mxu0 %v1737_v27  ;;  %1096 = vmatprep.subr.bf16.mxu1 %v1742_v28  ;;  %v1835_v27 = vld [vmem:[#allocation2 + $0x454] ss:$8 sps:$4 sm:$0xff]   ;;  %v1833_v28 = vld [vmem:[#allocation2 + $0x450] ss:$8 sps:$4 sm:$0xff]  }
  0x8d   :  { %1202 = vmatprep.subr.bf16.mxu0 %v1745_v32  ;;  %v1839_v32 = vld [vmem:[#allocation2 + $0x470] ss:$8 sps:$4 sm:$0xff]  }
  0x8f   :  { %1097 = vmatpush1.bf16.msra.mxu1 %v1740_v34  ;;  %v1843_v34 = vld [vmem:[%s2054_s0 + $0x68] ss:$36 sps:$4 sm:$0xff]  }
  0x90   :  { %1203 = vmatpush1.bf16.msra.mxu0 %v1743_v35  ;;  %1098 = vmatprep.subr.bf16.mxu1 %v1748_v36 }
  0x91   :  { %1204 = vmatprep.subr.bf16.mxu0 %v1751_v37 }
  0x93   :  { %1099 = vmatpush1.bf16.msra.mxu1 %v1746_v38 }
  0x94   :  { %1205 = vmatpush1.bf16.msra.mxu0 %v1749_v39  ;;  %1100 = vmatprep.subr.bf16.mxu1 %v1754_v40 }
  0x95   :  { %1206 = vmatprep.subr.bf16.mxu0 %v1757_v42 }
  0x97   :  { %1101 = vmatpush1.bf16.msra.mxu1 %v1752_v44 }
  0x98   :  { %1207 = vmatpush1.bf16.msra.mxu0 %v1755_v45  ;;  %1102 = vmatprep.subr.bf16.mxu1 %v1760_v46 }
  0x99   :  { %1208 = vmatprep.subr.bf16.mxu0 %v1763_v47 }
  0x9b   :  { %1103 = vmatpush1.bf16.msra.mxu1 %v1758_v48 }
  0x9c   :  { %1209 = vmatpush1.bf16.msra.mxu0 %v1761_v49  ;;  %1104 = vmatprep.subr.bf16.mxu1 %v1766_v50 }
  0x9d   :  { %1210 = vmatprep.subr.bf16.mxu0 %v1769_v51  ;;  %v1298_v51 = vlaneseq }
  0x9f   :  { %1105 = vmatpush1.bf16.msra.mxu1 %v1764_v52  ;;  %v1299_v52 = vshrl.u32 %v1298_v51, 7 }
  0xa0   :  { %1211 = vmatpush1.bf16.msra.mxu0 %v1767_v53  ;;  %1106 = vmatprep.subr.bf16.mxu1 %v1772_v54  ;;  %v1296_v54 = vld [vmem:[#allocation4] sm:$0x3] }
  0xa1   :  { %1212 = vmatprep.subr.bf16.mxu0 %v1775_v55  ;;  %v1300_v53 = vsub.s32 0, %v1299_v52  ;;  %v1304_v55 = vsub.s32 1, %v1299_v52 }
  0xa3   :  { %1107 = vmatpush1.bf16.msra.mxu1 %v1770_v56  ;;  %v1316_v56 = vld [vmem:[#allocation6] sm:$0x3] }
  0xa4   :  { %1213 = vmatpush1.bf16.msra.mxu0 %v1773_v57  ;;  %1108 = vmatprep.subr.bf16.mxu1 %v1778_v58  ;;  %v1301_v57 = vrot.slane %v1296_v54, %v1300_v53 }
  0xa5   :  { %1214 = vmatprep.subr.bf16.mxu0 %v1781_v59 }
  0xa7   :  { %1109 = vmatpush1.bf16.msra.mxu1 %v1776_v60  ;;  %v1305_v60 = vrot.slane %v1296_v54, %v1304_v55 }
  0xa8   :  { %1215 = vmatpush1.bf16.msra.mxu0 %v1779_v61  ;;  %1110 = vmatprep.subr.bf16.mxu1 %v1784_v62  ;;  %v1321_v62 = vrot.slane %v1316_v56, %v1300_v53 }
  0xa9   :  { %1216 = vmatprep.subr.bf16.mxu0 %v1787_v63 }
  0xab   :  { %1111 = vmatpush1.bf16.msra.mxu1 %v1782_v0 }
  0xac   :  { %1217 = vmatpush1.bf16.msra.mxu0 %v1785_v1  ;;  %1112 = vmatprep.subr.bf16.mxu1 %v1795_v2 }
  0xad   :  { %1218 = vmatprep.subr.bf16.mxu0 %v1799_v3  ;;  %v1325_v3 = vrot.slane %v1316_v56, %v1304_v55 }
  0xaf   :  { %1113 = vmatpush1.bf16.msra.mxu1 %v1793_v4 }
  0xb0   :  { %1219 = vmatpush1.bf16.msra.mxu0 %v1797_v5  ;;  %1114 = vmatprep.subr.bf16.mxu1 %v1802_v6 }
  0xb1   :  { %1220 = vmatprep.subr.bf16.mxu0 %v1805_v7 }
  0xb3   :  { %1115 = vmatpush1.bf16.msra.mxu1 %v1800_v8 }
  0xb4   :  { %1221 = vmatpush1.bf16.msra.mxu0 %v1803_v9  ;;  %1548 = vmatprep.subr.bf16.mxu1 %v1814_v10 }
  0xb5   :  { %1243 = vmatprep.subr.bf16.mxu0 %v1814_v10 }
  0xb6   :  { %1117 = vmatmul.mubr.bf16.vlgmr.msra.gmra.mrb[0].mxu1 %v1806_v11 }
  0xb7   :  { %1223 = vmatmul.mubr.bf16.vlgmr.msra.gmra.mrb[0].mxu0 %v1809_v12  ;;  %1556 = vmatpush1.bf16.msra.mxu1 %v1812_v13 }
  0xb8   :  { %1244 = vmatpush1.bf16.msra.mxu0 %v1812_v13  ;;  %1549 = vmatprep.subr.bf16.mxu1 %v1817_v14 }
  0xb9   :  { %1245 = vmatprep.subr.bf16.mxu0 %v1817_v14  ;;  %1126 = vmatprep.mubr.bf16.mxu1 %v1818_v15 }
  0xba   :  { %1232 = vmatprep.mubr.bf16.mxu0 %v1820_v16 }
  0xbb   :  { %1557 = vmatpush1.bf16.msra.mxu1 %v1815_v17 }
  0xbc   :  { %1246 = vmatpush1.bf16.msra.mxu0 %v1815_v17  ;;  %1550 = vmatprep.subr.bf16.mxu1 %v1826_v18 }
  0xbd   :  { %1247 = vmatprep.subr.bf16.mxu0 %v1826_v18 }
  0xbe   :  { %1127 = vmatmul.mubr.bf16.gmra.mrb[4].mxu1 %v1822_v19 }
  0xbf   :  { %1233 = vmatmul.mubr.bf16.gmra.mrb[4].mxu0 %v1823_v20  ;;  %1558 = vmatpush1.bf16.msra.mxu1 %v1824_v21 }
  0xc0   :  { %1248 = vmatpush1.bf16.msra.mxu0 %v1824_v21  ;;  %1551 = vmatprep.subr.bf16.mxu1 %v1829_v22 }
  0xc1   :  { %1249 = vmatprep.subr.bf16.mxu0 %v1829_v22  ;;  %1275 = vmatprep.mubr.bf16.mxu0 %v1919_v25 }
  0xc2   :  { %1285 = vmatprep.mubr.bf16.mxu1 %v1919_v25 }
  0xc3   :  { %1559 = vmatpush1.bf16.msra.mxu1 %v1827_v23 }
  0xc4   :  { %1250 = vmatpush1.bf16.msra.mxu0 %v1827_v23  ;;  %1552 = vmatprep.subr.bf16.mxu1 %v1832_v24 }
  0xc5   :  { %1251 = vmatprep.subr.bf16.mxu0 %v1832_v24 }
  0xc7   :  { %1560 = vmatpush1.bf16.msra.mxu1 %v1830_v26 }
  0xc8   :  { %1252 = vmatpush1.bf16.msra.mxu0 %v1830_v26  ;;  %1553 = vmatprep.subr.bf16.mxu1 %v1835_v27 }
  0xc9   :  { %1253 = vmatprep.subr.bf16.mxu0 %v1835_v27 }
  0xcb   :  { %1561 = vmatpush1.bf16.msra.mxu1 %v1833_v28 }
  0xcc   :  { %1254 = vmatpush1.bf16.msra.mxu0 %v1833_v28  ;;  %1554 = vmatprep.subr.bf16.mxu1 %v1838_v29 }
  0xcd   :  { %1255 = vmatprep.subr.bf16.mxu0 %v1838_v29 }
  0xcf   :  { %1562 = vmatpush1.bf16.msra.mxu1 %v1836_v30 }
  0xd0   :  { %1256 = vmatpush1.bf16.msra.mxu0 %v1836_v30  ;;  %1555 = vmatprep.subr.bf16.mxu1 %v1841_v31 }
  0xd1   :  { %1257 = vmatprep.subr.bf16.mxu0 %v1841_v31 }
  0xd3   :  { %1563 = vmatpush1.bf16.msra.mxu1 %v1839_v32 }
  0xd4   :  { %1258 = vmatpush1.bf16.msra.mxu0 %v1839_v32 }
  0xd6   :  { %1286 = vmatmul.mubr.bf16.vlgmr.msra.gmra.mrb[8].mxu1 %v1843_v34 }
  0xd7   :  { %1276 = vmatmul.mubr.bf16.vlgmr.msra.gmra.mrb[0].mxu0 %v1842_v33 }
 0x189   :  { %v1118_v35 = vpop.f32.mrb[0].mxu1 }
 0x18a   :  { %v1120_v36 = vpop.f32.mrb[1].mxu1 }
 0x18b   :  { %v1122_v37 = vpop.f32.mrb[2].mxu1 }
 0x18c   :  { %v1124_v38 = vpop.f32.mrb[3].mxu1 }
 0x191   :  { %v1128_v39 = vpop.f32.mrb[4].mxu1 }
 0x192   :  { %v1234_v40 = vpop.f32.mrb[4].mxu0  ;;  %v1130_v42 = vpop.f32.mrb[5].mxu1 }
 0x193   :  { %v1568_v41 = vadd.f32 %v1234_v40, %v1128_v39  ;;  %v1236_v43 = vpop.f32.mrb[5].mxu0  ;;  %v1132_v45 = vpop.f32.mrb[6].mxu1 }
 0x194   :  { %v1570_v44 = vadd.f32 %v1236_v43, %v1130_v42  ;;  %v1238_v46 = vpop.f32.mrb[6].mxu0  ;;  %v1134_v48 = vpop.f32.mrb[7].mxu1 }
 0x195   :  { %v1572_v47 = vadd.f32 %v1238_v46, %v1132_v45  ;;  %v1240_v49 = vpop.f32.mrb[7].mxu0 }
 0x196   :  { %v1574_v50 = vadd.f32 %v1240_v49, %v1134_v48 }
 0x1a9   :  { %v1287_v59 = vpop.f32.mrb[8].mxu1 }
 0x1aa   :  { %v1277_v58 = vpop.f32.mrb[0].mxu0  ;;  %v1569_v63 = vadd.f32 %v1568_v41, %v1287_v59  ;;  %v1289_v1 = vpop.f32.mrb[9].mxu1 }
 0x1ab   :  { %v1564_v61 = vadd.f32 %v1277_v58, %v1118_v35  ;;  %v1279_v0 = vpop.f32.mrb[1].mxu0  ;;  %v1571_v4 = vadd.f32 %v1570_v44, %v1289_v1  ;;  %v1291_v6 = vpop.f32.mrb[10].mxu1 }
 0x1ac   :  { %v1565_v2 = vadd.f32 %v1279_v0, %v1120_v36  ;;  %v1281_v5 = vpop.f32.mrb[2].mxu0  ;;  %v1312_v8 = vmul.f32 %v1569_v63, %v1301_v57  ;;  %v1573_v10 = vadd.f32 %v1572_v47, %v1291_v6  ;;  %v1293_v12 = vpop.f32.mrb[11].mxu1 }
 0x1ad   :  { %v1308_v7 = vmul.f32 %v1564_v61, %v1301_v57  ;;  %v1566_v9 = vadd.f32 %v1281_v5, %v1122_v37  ;;  %v1283_v11 = vpop.f32.mrb[3].mxu0  ;;  %v1313_v14 = vmul.f32 %v1571_v4, %v1305_v60  ;;  %v1575_v16 = vadd.f32 %v1574_v50, %v1293_v12 }
 0x1ae   :  { %v1309_v13 = vmul.f32 %v1565_v2, %v1305_v60  ;;  %v1567_v15 = vadd.f32 %v1283_v11, %v1124_v38  ;;  %v1332_v18 = vadd.f32 %v1321_v62, %v1312_v8  ;;  %v1314_v20 = vmul.f32 %v1573_v10, %v1301_v57 }
 0x1af   :  { %v1328_v17 = vadd.f32 %v1321_v62, %v1308_v7  ;;  %v1310_v19 = vmul.f32 %v1566_v9, %v1301_v57  ;;  %v1333_v22 = vadd.f32 %v1325_v3, %v1313_v14  ;;  %v1315_v24 = vmul.f32 %v1575_v16, %v1305_v60 }
 0x1b0   :  { %v1329_v21 = vadd.f32 %v1325_v3, %v1309_v13  ;;  %v1311_v23 = vmul.f32 %v1567_v15, %v1305_v60  ;;  %v1340_v26 = vmax.f32 %v1332_v18, 0.0  ;;  %v1334_v28 = vadd.f32 %v1321_v62, %v1314_v20 }
 0x1b1   :  { %v1336_v25 = vmax.f32 %v1328_v17, 0.0  ;;  %v1330_v27 = vadd.f32 %v1321_v62, %v1310_v19  ;;  %v1341_v30 = vmax.f32 %v1333_v22, 0.0  ;;  %v1335_v32 = vadd.f32 %v1325_v3, %v1315_v24 }
 0x1b2   :  { %v1337_v29 = vmax.f32 %v1329_v21, 0.0  ;;  %v1331_v31 = vadd.f32 %v1325_v3, %v1311_v23  ;;  %v1342_v34 = vmax.f32 %v1334_v28, 0.0 }
 0x1b3   :  { %v1338_v33 = vmax.f32 %v1330_v27, 0.0  ;;  %v1546_v36 = vpack.c.bf16 %v1341_v30, %v1340_v26  ;;  %v1343_v38 = vmax.f32 %v1335_v32, 0.0 }
 0x1b4   :  { %v1544_v35 = vpack.c.bf16 %v1337_v29, %v1336_v25  ;;  %v1339_v37 = vmax.f32 %v1331_v31, 0.0 }
 0x1b5   :  { %1370 = vst [vmem:[%s2058_s4 + $0x10] sm:$0xff] %v1546_v36  ;;  %v1547_v40 = vpack.c.bf16 %v1343_v38, %v1342_v34 }
 0x1b6   :  { %1368 = vst [vmem:[%s2058_s4] sm:$0xff] %v1544_v35  ;;  %v1545_v39 = vpack.c.bf16 %v1339_v37, %v1338_v33 }
 0x1b7   :  { %1371 = vst [vmem:[%s2058_s4 + $0x18] sm:$0xff] %v1547_v40 }
 0x1b8   :  { %1369 = vst [vmem:[%s2058_s4 + $0x8] sm:$0xff] %v1545_v39 }
 0x1b9   :  { %1376 = vsyncpa [#allocation3], 1 }
 0x1ba   :  { %1377 = vsyncpa [#allocation5], 1 }

// kernel: cropper_net_forward.9
= control target key start
LH: loop header
LB: loop body
LE: loop exit
PB: predicated region body
PF: predicated region fallthrough
CT: control target
= control target key end

     0   :  { %s4325_s0 = inlined_call_operand.vmem [shape: bf16[8,2304], index: 0, kind: input, shape index: {}]   ;;  %s4326_s1 = inlined_call_operand.hbm [shape: bf16[2304,512], index: 1, kind: input, shape index: {}]   ;;  %s4327_s2 = inlined_call_operand.hbm [shape: f32[1,512], index: 2, kind: input, shape index: {}]   ;;  %s4328_s3 = inlined_call_operand.hbm [shape: f32[1,512], index: 3, kind: input, shape index: {}]   ;;  %s4329_s4 = inlined_call_operand.vmem [shape: bf16[8,512], index: 4, kind: output, shape index: {}]  }
   0x1   :  { %4335 = sst [smem:[#allocation10_spill]] %s4326_s1 }
   0x2   :  { %4336 = sst [smem:[#allocation11_spill]] %s4327_s2 }
   0x3   :  { %9 = vsyncpa [#allocation3], 0 }
   0x4   :  { %11 = vsyncpa [#allocation3 + $0x1], 0 }
   0x5   :  { %12 = vsyncpa [#allocation5], 0 }
   0x6   :  { %14 = vsyncpa [#allocation5 + $0x1], 0  ;;  %s3753_s15 = smov 0   ;;  %s3755_s16 = smov 0  }
   0x7   :  { %s3757_s17 = smov 0   ;;  %s3759_s18 = smov 0  }
   0x8   :  { %s3761_s19 = smov 0   ;;  %s3763_s20 = smov 0  }
   0x9 LB: > { %s4331_s21 = sadd.s32 4294967295, %s3720_s20   ;;  %s29_s22 = sadd.s32 1, %s3716_s19  ;;  %s3720_s20 = sphi %s3763_s20, %s20_s20   ;;  %s3716_s19 = sphi %s3761_s19, %s4354_s19   ;;  %s3712_s18 = sphi %s3759_s18, %s4353_s18   ;;  %s3708_s17 = sphi %s3757_s17, %s4352_s17   ;;  %s3704_s16 = sphi %s3755_s16, %s4351_s16   ;;  %s3700_s15 = sphi %s3753_s15, %s4350_s15  }
   0xa   : > { %p30_p0 = scmp.ge.s32.totalorder %s29_s22, 2  ;;  %s65_s23 = sadd.s32 1, %s3708_s17 }
   0xb   : > { %p72_p1 = scmp.ne.s32.totalorder %s3708_s17, %s3704_s16  ;;  %p73_p2 = scmp.eq.s32.totalorder %s3720_s20, 0 }
   0xc   : > { %s4356_s22 = smov (%p30_p0, %s29_s22), 0  ;;  %p78_p4 = scmp.ne.s32.totalorder %s3704_s16, %s3700_s15 }
   0xd   : > { %4337 = sst [smem:[#allocation9_spill]] %s4356_s22  ;;  %p74_p3 = por %p73_p2, %p72_p1 }
   0xe   : > { %s62_s24 = ssub.s32 %s3716_s19, %s4356_s22  ;;  %p79_p5 = scmp.eq.s32.totalorder %s4331_s21, 0 }
   0xf   : > { %p63_p6 = scmp.eq.s32.totalorder %s62_s24, 0  ;;  %p3074_p8 = scmp.lt.s32.totalorder %s3720_s20, 2 }
  0x10   : > { %p3794_p7 = por %p79_p5, %p78_p4  ;;  %s3803_s27 = sand.u32 1, %s3708_s17  }
  0x11   : > { %s3800_s26 = scalar_select %p63_p6, %s3708_s17, %s65_s23  }
  0x12   : > { %s4338_s25 = scalar_select %p3794_p7, 1, 0 }
  0x13   : > { %p3805_p9 = pnand %p3074_p8, %p74_p3  ;;  %s3056_s29 = smul.u32 2304, %s3803_s27 }
  0x14   : > { %s211_s30 = sand.u32 1, %s3720_s20   ;;  %s4332_s7 = sshll.u32 %s3803_s27, 1 }
  0x15   : > { %s4339_s28 = scalar_select %p3805_p9, 1, 0 }
  0x16   : > { %s194_s5 = scalar_lea.vmem [#allocation2], %s3056_s29  ;;  %s3023_s8 = sshll.u32 %s3716_s19, 5 }
  0x17   : > { %s201_s6 = sshll.u32 %s194_s5, 4  ;;  %s215_s9 = scalar_lea.vmem [#allocation4], %s4332_s7  ;;  %s3812_s6 = int_to_ptr.vmem [resolvable:$true] %s201_s6 }
  0x18   : > { %s223_s10 = sshll.u32 %s215_s9, 4  ;;  %s4340_s2 = sld [smem:[#allocation11_spill]]  ;;  %s3824_s10 = int_to_ptr.vmem [resolvable:$true] %s223_s10 }
  0x19   : > { %s3826_s14 = scalar_lea.sflag [#allocation5], %s211_s30  ;;  %p3832_p11 = pneg %p3805_p9 }
  0x1e   : > { %s3822_s13 = scalar_lea.hbm %s4340_s2, %s3023_s8  ;;  %s3581_s5 = scalar_lea.hbm %s4340_s2, 64 }
  0x1f   : > { %s3576_s15 = scalar_lea.hbm %s3822_s13, 32  ;;  %p3582_p0 = scmp.lt.u32.totalorder %s3822_s13, %s4340_s2 }
  0x20   : > { %p3577_p10 = scmp.ne.s32.totalorder %s3822_s13, %s3576_s15  ;;  %p3583_p1 = scmp.lt.u32.totalorder %s3581_s5, %s3576_s15 }
  0x21   : > { %p3585_p3 = scmp.lt.u32.totalorder %s3576_s15, %s3822_s13 }
  0x22   : > { %p3579_p12 = pnand %p3832_p11, %p3577_p10  ;;  %p3584_p2 = por %p3583_p1, %p3582_p0 }
  0x24   : > { %p3580_p13 = pneg %p3579_p12  ;;  %p3586_p4 = por %p3585_p3, %p3584_p2 }
  0x26   : > { %p3587_p5 = pnand %p3586_p4, %p3580_p13 }
  0x28   : > { %3590 = shalt.err (!%p3587_p5)
}
  0x29   : > { %s3591_s30 = scalar_lea.vmem %s3824_s10, 32  ;;  %s3722_s12 = smov [#allocation4]  }
  0x2a   : > { %p3592_p6 = scmp.ne.s32.totalorder %s3824_s10, %s3591_s30  ;;  %s3596_s24 = sshll.u32 %s3722_s12, 4  ;;  %s3597_s24 = int_to_ptr.vmem [resolvable:$false] %s3596_s24 }
  0x2b   : > { %s3598_s29 = scalar_lea.vmem %s3597_s24, 64  ;;  %p3599_p12 = scmp.lt.s32.totalorder %s3824_s10, %s3597_s24 }
  0x2c   : > { %p3594_p8 = pnand %p3592_p6, %p3832_p11  ;;  %p3600_p7 = scmp.lt.s32.totalorder %s3598_s29, %s3591_s30 }
  0x2e   : > { %p3595_p10 = pneg %p3594_p8  ;;  %p3601_p0 = por %p3600_p7, %p3599_p12 }
  0x30   : > { %p3602_p1 = pnand %p3601_p0, %p3595_p10 }
  0x32   : > { %3605 = shalt.err (!%p3602_p1)
}
  0x33   : > { %3070 = dma.hbm_to_vmem [thread:$0]  (!%p3805_p9), %s3822_s13, 32, %s3824_s10, %s3826_s14  }
  0x34   : > { %s3861_s9 = scalar_lea.hbm %s4328_s3, %s3023_s8  ;;  %p2708_p7 = scmp.ge.s32.totalorder %s3720_s20, 1 }
  0x35   : > { %p247_p13 = scmp.lt.s32.totalorder %s3720_s20, 3  ;;  %s3022_s11 = sshll.u32 %s3716_s19, 7 }
  0x36   : > { %s4343_s1 = sld [smem:[#allocation10_spill]]  ;;  %s191_s10 = scalar_lea.sflag [#allocation3], %s3803_s27 }
  0x37   : > { %p3866_p2 = pnand %p2708_p7, %p247_p13 }
  0x39   : > { %s4342_s30 = scalar_select %p3866_p2, 1, 0 }
  0x3c   : > { %s3873_s29 = scalar_lea.hbm %s4343_s1, %s3022_s11  ;;  %s3611_s5 = scalar_lea.hbm %s4343_s1, 73728 }
  0x3d   : > { %s3606_s13 = scalar_lea.hbm %s3873_s29, 36864  ;;  %p3612_p6 = scmp.lt.u32.totalorder %s3873_s29, %s4343_s1 }
  0x3e   : > { %p3607_p3 = scmp.ne.s32.totalorder %s3873_s29, %s3606_s13  ;;  %p3613_p8 = scmp.lt.u32.totalorder %s3611_s5, %s3606_s13 }
  0x3f   : > { %p3615_p12 = scmp.lt.u32.totalorder %s3606_s13, %s3873_s29 }
  0x40   : > { %p3609_p4 = pnand %p3607_p3, %p3832_p11  ;;  %p3614_p10 = por %p3613_p8, %p3612_p6 }
  0x42   : > { %p3610_p5 = pneg %p3609_p4  ;;  %p3616_p0 = por %p3615_p12, %p3614_p10 }
  0x44   : > { %p3617_p1 = pnand %p3616_p0, %p3610_p5 }
  0x46   : > { %3620 = shalt.err (!%p3617_p1)
}
  0x47   : > { %s3621_s11 = scalar_lea.vmem %s3812_s6, 36864  ;;  %s3723_s12 = smov [#allocation2]  }
  0x48   : > { %p3622_p7 = scmp.ne.s32.totalorder %s3812_s6, %s3621_s11  ;;  %s3626_s24 = sshll.u32 %s3723_s12, 4  ;;  %s3627_s24 = int_to_ptr.vmem [resolvable:$false] %s3626_s24 }
  0x49   : > { %s3628_s21 = scalar_lea.vmem %s3627_s24, 73728  ;;  %p3629_p4 = scmp.lt.s32.totalorder %s3812_s6, %s3627_s24 }
  0x4a   : > { %p3624_p13 = pnand %p3622_p7, %p3832_p11  ;;  %p3630_p2 = scmp.lt.s32.totalorder %s3628_s21, %s3621_s11 }
  0x4c   : > { %p3625_p3 = pneg %p3624_p13  ;;  %p3631_p6 = por %p3630_p2, %p3629_p4 }
  0x4e   : > { %p3632_p8 = pnand %p3631_p6, %p3625_p3 }
  0x50   : > { %3635 = shalt.err (!%p3632_p8)
}
  0x51   : > { %s3724_s7 = smov 256   ;;  %s3725_s13 = smov 128  }
  0x52   : > { %s3726_s8 = smov 8   ;;  %s4344_s15 = sshll.u32 %s3803_s27, 1 }
  0x53   : > { %3067 = dma.hbm_to_vmem [thread:$0]  (!%p3805_p9), %s3873_s29, 36864, %s3812_s6, %s191_s10, %s3724_s7, %s3725_s13, %s3726_s8  }
  0x54   : > { %s234_s5 = scalar_lea.vmem [#allocation6], %s4344_s15  ;;  %s3636_s12 = scalar_lea.hbm %s3861_s9, 32 }
  0x55   : > { %s242_s11 = sshll.u32 %s234_s5, 4  ;;  %p3637_p2 = scmp.ne.s32.totalorder %s3861_s9, %s3636_s12  ;;  %s243_s11 = int_to_ptr.vmem [resolvable:$true] %s242_s11 }
  0x56   : > { %s3641_s1 = scalar_lea.hbm %s4328_s3, 64  ;;  %p3642_p12 = scmp.lt.u32.totalorder %s3861_s9, %s4328_s3 }
  0x57   : > { %p3639_p5 = pnand %p3637_p2, %p3832_p11  ;;  %p3643_p0 = scmp.lt.u32.totalorder %s3641_s1, %s3636_s12 }
  0x58   : > { %p3645_p7 = scmp.lt.u32.totalorder %s3636_s12, %s3861_s9 }
  0x59   : > { %p3640_p10 = pneg %p3639_p5  ;;  %p3644_p1 = por %p3643_p0, %p3642_p12 }
  0x5b   : > { %p3646_p13 = por %p3645_p7, %p3644_p1 }
  0x5d   : > { %p3647_p3 = pnand %p3646_p13, %p3640_p10 }
  0x5f   : > { %3650 = shalt.err (!%p3647_p3)
}
  0x60   : > { %s3651_s27 = scalar_lea.vmem %s243_s11, 32  ;;  %s3727_s6 = smov [#allocation6]  }
  0x61   : > { %p3652_p4 = scmp.ne.s32.totalorder %s243_s11, %s3651_s27  ;;  %s3656_s29 = sshll.u32 %s3727_s6, 4  ;;  %s3657_s29 = int_to_ptr.vmem [resolvable:$false] %s3656_s29 }
  0x62   : > { %s3658_s10 = scalar_lea.vmem %s3657_s29, 64  ;;  %p3659_p2 = scmp.lt.s32.totalorder %s243_s11, %s3657_s29 }
  0x63   : > { %p3654_p6 = pnand %p3652_p4, %p3832_p11  ;;  %p3660_p5 = scmp.lt.s32.totalorder %s3658_s10, %s3651_s27 }
  0x65   : > { %p3655_p8 = pneg %p3654_p6  ;;  %p3661_p9 = por %p3660_p5, %p3659_p2 }
  0x67   : > { %p3662_p0 = pnand %p3661_p9, %p3655_p8 }
  0x69   : > { %3665 = shalt.err (!%p3662_p0)
}
  0x6a   : > { %p4345_p12 = scmp.ne.s32.totalorder %s4339_s28, 0  ;;  %p4346_p10 = scmp.ne.s32.totalorder %s4342_s30, 0 }
  0x6b   : > { %s3922_s1 = sand.u32 (!%p4346_p10), 1, %s3704_s16   ;;  %p4347_p9 = scmp.ne.s32.totalorder (!%p4346_p10), %s4338_s25, 0 }
  0x6c   : > { %3073 = dma.hbm_to_vmem [thread:$0]  (!%p4345_p12), %s3861_s9, 32, %s243_s11, %s3826_s14  }
  0x6d   : > { %251 = sbr.rel (%p4346_p10) target bundleno = 667 (0x29b), region = 36  ;;  %s254_s22 = scalar_lea.sflag (!%p4346_p10), [#allocation3], %s3922_s1 }
  0x6e   : > { %s3057_s2 = smul.u32 (!%p4346_p10), 2304, %s3922_s1 }
  0x70   : > { %s3926_s23 = scalar_lea.vmem (!%p4346_p10), [#allocation2], %s3057_s2 }
  0x74   : > { %3691 = dma.done.wait (%p4347_p9), %s254_s22, 36864  }
  0x75   : > { %3693 = vsyncadd (%p4347_p9), %s254_s22, 4294930432  ;;  %s4348_s28 = sadd.s32 4294967295, %s3720_s20   ;;  %s2709_s9 = sshll.u32 %s3922_s1, 1 }
  0x76   : > { %s262_s14 = sand.u32 1, %s4348_s28   ;;  %s3937_s7 = scalar_lea.vmem [#allocation4], %s2709_s9 }
  0x77   : > { %s263_s30 = scalar_lea.sflag [#allocation5], %s262_s14 }
  0x78   : > { %3695 = dma.done.wait (%p4347_p9), %s263_s30, 64  }
  0x79   : > { %3697 = vsyncadd (%p4347_p9), %s263_s30, 4294967232  ;;  %v3126_v0 = vld [vmem:[%s3926_s23 + $0x4] ss:$8 sps:$4 sm:$0xff]   ;;  %v3130_v2 = vld [vmem:[%s3926_s23] ss:$8 sps:$4 sm:$0xff]   ;;  %s2711_s25 = sshll.u32 %s3712_s18, 1 }
  0x7a   : > { %v3128_v1 = vld [vmem:[%s3926_s23 + $0x404] ss:$8 sps:$4 sm:$0xff]   ;;  %2137 = vmatprep.subr.bf16.mxu1 %v3126_v0  ;;  %v3131_v3 = vld [vmem:[%s3926_s23 + $0x400] ss:$8 sps:$4 sm:$0xff]   ;;  %v3132_v4 = vld [vmem:[%s3926_s23 + $0x14] ss:$8 sps:$4 sm:$0xff]  }
  0x7b   : > { %2301 = vmatprep.subr.bf16.mxu0 %v3128_v1  ;;  %2138 = vmatpush1.bf16.msra.mxu1 %v3130_v2  ;;  %v3134_v5 = vld [vmem:[%s3926_s23 + $0x414] ss:$8 sps:$4 sm:$0xff]   ;;  %v3136_v6 = vld [vmem:[%s3926_s23 + $0x10] ss:$8 sps:$4 sm:$0xff]   ;;  %v3138_v8 = vld [vmem:[%s3926_s23 + $0x24] ss:$8 sps:$4 sm:$0xff]  }
  0x7c   : > { %2302 = vmatpush1.bf16.msra.mxu0 %v3131_v3  ;;  %2139 = vmatprep.subr.bf16.mxu1 %v3132_v4  ;;  %v3137_v7 = vld [vmem:[%s3926_s23 + $0x410] ss:$8 sps:$4 sm:$0xff]   ;;  %v3140_v9 = vld [vmem:[%s3926_s23 + $0x424] ss:$8 sps:$4 sm:$0xff]   ;;  %v3142_v10 = vld [vmem:[%s3926_s23 + $0x20] ss:$8 sps:$4 sm:$0xff]  }
  0x7d   : > { %2303 = vmatprep.subr.bf16.mxu0 %v3134_v5  ;;  %v3143_v11 = vld [vmem:[%s3926_s23 + $0x420] ss:$8 sps:$4 sm:$0xff]   ;;  %v3144_v12 = vld [vmem:[%s3926_s23 + $0x34] ss:$8 sps:$4 sm:$0xff]   ;;  %v3148_v14 = vld [vmem:[%s3926_s23 + $0x30] ss:$8 sps:$4 sm:$0xff]  }
  0x7e   : > { %v3146_v13 = vld [vmem:[%s3926_s23 + $0x434] ss:$8 sps:$4 sm:$0xff]   ;;  %v3149_v15 = vld [vmem:[%s3926_s23 + $0x430] ss:$8 sps:$4 sm:$0xff]   ;;  %v3150_v16 = vld [vmem:[%s3926_s23 + $0x44] ss:$8 sps:$4 sm:$0xff]  }
  0x7f   : > { %2140 = vmatpush1.bf16.msra.mxu1 %v3136_v6  ;;  %v3152_v17 = vld [vmem:[%s3926_s23 + $0x444] ss:$8 sps:$4 sm:$0xff]   ;;  %v3154_v18 = vld [vmem:[%s3926_s23 + $0x40] ss:$8 sps:$4 sm:$0xff]   ;;  %v3156_v20 = vld [vmem:[%s3926_s23 + $0x54] ss:$8 sps:$4 sm:$0xff]  }
  0x80   : > { %2304 = vmatpush1.bf16.msra.mxu0 %v3137_v7  ;;  %2141 = vmatprep.subr.bf16.mxu1 %v3138_v8  ;;  %v3155_v19 = vld [vmem:[%s3926_s23 + $0x440] ss:$8 sps:$4 sm:$0xff]   ;;  %v3158_v21 = vld [vmem:[%s3926_s23 + $0x454] ss:$8 sps:$4 sm:$0xff]   ;;  %v3160_v22 = vld [vmem:[%s3926_s23 + $0x50] ss:$8 sps:$4 sm:$0xff]  }
  0x81   : > { %2305 = vmatprep.subr.bf16.mxu0 %v3140_v9  ;;  %v3161_v23 = vld [vmem:[%s3926_s23 + $0x450] ss:$8 sps:$4 sm:$0xff]   ;;  %v3162_v24 = vld [vmem:[%s3926_s23 + $0x64] ss:$8 sps:$4 sm:$0xff]   ;;  %v3166_v26 = vld [vmem:[%s3926_s23 + $0x60] ss:$8 sps:$4 sm:$0xff]  }
  0x82   : > { %v3164_v25 = vld [vmem:[%s3926_s23 + $0x464] ss:$8 sps:$4 sm:$0xff]   ;;  %v3167_v27 = vld [vmem:[%s3926_s23 + $0x460] ss:$8 sps:$4 sm:$0xff]   ;;  %v3168_v28 = vld [vmem:[%s3926_s23 + $0x74] ss:$8 sps:$4 sm:$0xff]  }
  0x83   : > { %2142 = vmatpush1.bf16.msra.mxu1 %v3142_v10  ;;  %v3170_v29 = vld [vmem:[%s3926_s23 + $0x474] ss:$8 sps:$4 sm:$0xff]   ;;  %v3172_v30 = vld [vmem:[%s3926_s23 + $0x70] ss:$8 sps:$4 sm:$0xff]   ;;  %v3174_v32 = vld [vmem:[%s3926_s23 + $0x84] ss:$8 sps:$4 sm:$0xff]  }
  0x84   : > { %2306 = vmatpush1.bf16.msra.mxu0 %v3143_v11  ;;  %2143 = vmatprep.subr.bf16.mxu1 %v3144_v12  ;;  %v3173_v31 = vld [vmem:[%s3926_s23 + $0x470] ss:$8 sps:$4 sm:$0xff]   ;;  %v3176_v33 = vld [vmem:[%s3926_s23 + $0x484] ss:$8 sps:$4 sm:$0xff]   ;;  %v3178_v34 = vld [vmem:[%s3926_s23 + $0x80] ss:$8 sps:$4 sm:$0xff]  }
  0x85   : > { %2307 = vmatprep.subr.bf16.mxu0 %v3146_v13  ;;  %v3179_v35 = vld [vmem:[%s3926_s23 + $0x480] ss:$8 sps:$4 sm:$0xff]   ;;  %v3180_v36 = vld [vmem:[%s3926_s23 + $0x94] ss:$8 sps:$4 sm:$0xff]   ;;  %v3184_v38 = vld [vmem:[%s3926_s23 + $0x90] ss:$8 sps:$4 sm:$0xff]  }
  0x86   : > { %v3182_v37 = vld [vmem:[%s3926_s23 + $0x494] ss:$8 sps:$4 sm:$0xff]   ;;  %v3185_v39 = vld [vmem:[%s3926_s23 + $0x490] ss:$8 sps:$4 sm:$0xff]   ;;  %v3186_v40 = vld [vmem:[%s3926_s23 + $0xa4] ss:$8 sps:$4 sm:$0xff]  }
  0x87   : > { %2144 = vmatpush1.bf16.msra.mxu1 %v3148_v14  ;;  %v3188_v41 = vld [vmem:[%s3926_s23 + $0x4a4] ss:$8 sps:$4 sm:$0xff]   ;;  %v3190_v42 = vld [vmem:[%s3926_s23 + $0xa0] ss:$8 sps:$4 sm:$0xff]   ;;  %v3192_v44 = vld [vmem:[%s3926_s23 + $0xb4] ss:$8 sps:$4 sm:$0xff]  }
  0x88   : > { %2308 = vmatpush1.bf16.msra.mxu0 %v3149_v15  ;;  %2145 = vmatprep.subr.bf16.mxu1 %v3150_v16  ;;  %v3191_v43 = vld [vmem:[%s3926_s23 + $0x4a0] ss:$8 sps:$4 sm:$0xff]   ;;  %v3194_v45 = vld [vmem:[%s3926_s23 + $0x4b4] ss:$8 sps:$4 sm:$0xff]   ;;  %v3196_v47 = vld [vmem:[%s3926_s23 + $0xb0] ss:$8 sps:$4 sm:$0xff]  }
  0x89   : > { %2309 = vmatprep.subr.bf16.mxu0 %v3152_v17  ;;  %v337_v46 = vld [vmem:[%s4325_s0] sm:$0xff]  ;;  %v3197_v49 = vld [vmem:[%s3926_s23 + $0x4b0] ss:$8 sps:$4 sm:$0xff]   ;;  %v3204_v56 = vld [vmem:[%s3926_s23 + $0xd4] ss:$8 sps:$4 sm:$0xff]   ;;  %s275_s13 = scalar_lea.vmem [#allocation6], %s2709_s9 }
  0x8a   : > { %v2714_v48 = vcombine.high %v337_v46, %v337_v46  ;;  %v341_v50 = vld [vmem:[%s4325_s0 + $0x20] sm:$0xff]  ;;  %v3206_v57 = vld [vmem:[%s3926_s23 + $0x4d4] ss:$8 sps:$4 sm:$0xff]   ;;  %v3208_v58 = vld [vmem:[%s3926_s23 + $0xd0] ss:$8 sps:$4 sm:$0xff]   ;;  %v2713_v6 = vcombine.low %v337_v46, %v337_v46  ;;  %p330_p11 = scmp.lt.s32.totalorder %s2711_s25, 3 }
  0x8b   : > { %2146 = vmatpush1.bf16.msra.mxu1 %v3154_v18  ;;  %v3198_v51 = vld [vmem:[%s3926_s23 + $0xc4] ss:$8 sps:$4 sm:$0xff]   ;;  %v2722_v53 = vcombine.high %v341_v50, %v341_v50  ;;  %v3202_v54 = vld [vmem:[%s3926_s23 + $0xc0] ss:$8 sps:$4 sm:$0xff]   ;;  %v3209_v59 = vld [vmem:[%s3926_s23 + $0x4d0] ss:$8 sps:$4 sm:$0xff]   ;;  %v2721_v7 = vcombine.low %v341_v50, %v341_v50 }
  0x8c   : > { %2310 = vmatpush1.bf16.msra.mxu0 %v3155_v19  ;;  %2147 = vmatprep.subr.bf16.mxu1 %v3156_v20  ;;  %v3200_v52 = vld [vmem:[%s3926_s23 + $0x4c4] ss:$8 sps:$4 sm:$0xff]   ;;  %v3203_v55 = vld [vmem:[%s3926_s23 + $0x4c0] ss:$8 sps:$4 sm:$0xff]   ;;  %v3216_v0 = vld [vmem:[%s3926_s23 + $0xf4] ss:$8 sps:$4 sm:$0xff]  }
  0x8d   : > { %2311 = vmatprep.subr.bf16.mxu0 %v3158_v21  ;;  %2169 = vmatprep.mubr.bf16.mxu1 %v2714_v48  ;;  %v3210_v60 = vld [vmem:[%s3926_s23 + $0xe4] ss:$8 sps:$4 sm:$0xff]   ;;  %v3214_v62 = vld [vmem:[%s3926_s23 + $0xe0] ss:$8 sps:$4 sm:$0xff]   ;;  %v3218_v1 = vld [vmem:[%s3926_s23 + $0x4f4] ss:$8 sps:$4 sm:$0xff]  }
  0x8e   : > { %2333 = vmatprep.mubr.bf16.mxu0 %v2722_v53  ;;  %v3212_v61 = vld [vmem:[%s3926_s23 + $0x4e4] ss:$8 sps:$4 sm:$0xff]   ;;  %v3215_v63 = vld [vmem:[%s3926_s23 + $0x4e0] ss:$8 sps:$4 sm:$0xff]   ;;  %v3220_v2 = vld [vmem:[%s3926_s23 + $0xf0] ss:$8 sps:$4 sm:$0xff]  }
  0x8f   : > { %2148 = vmatpush1.bf16.msra.mxu1 %v3160_v22  ;;  %v3221_v3 = vld [vmem:[%s3926_s23 + $0x4f0] ss:$8 sps:$4 sm:$0xff]   ;;  %v3226_v4 = vld [vmem:[%s3926_s23 + $0x104] ss:$8 sps:$4 sm:$0xff]   ;;  %v3224_v8 = vld [vmem:[%s3926_s23 + $0x100] ss:$8 sps:$4 sm:$0xff]  }
  0x90   : > { %2312 = vmatpush1.bf16.msra.mxu0 %v3161_v23  ;;  %2149 = vmatprep.subr.bf16.mxu1 %v3162_v24  ;;  %v3231_v5 = vld [vmem:[%s3926_s23 + $0x504] ss:$8 sps:$4 sm:$0xff]   ;;  %v3229_v9 = vld [vmem:[%s3926_s23 + $0x500] ss:$8 sps:$4 sm:$0xff]   ;;  %v3234_v10 = vld [vmem:[%s3926_s23 + $0x114] ss:$8 sps:$4 sm:$0xff]  }
  0x91   : > { %2313 = vmatprep.subr.bf16.mxu0 %v3164_v25  ;;  %v3237_v11 = vld [vmem:[%s3926_s23 + $0x514] ss:$8 sps:$4 sm:$0xff]   ;;  %v3232_v12 = vld [vmem:[%s3926_s23 + $0x110] ss:$8 sps:$4 sm:$0xff]   ;;  %v3240_v14 = vld [vmem:[%s3926_s23 + $0x124] ss:$8 sps:$4 sm:$0xff]  }
  0x92   : > { %v3235_v13 = vld [vmem:[%s3926_s23 + $0x510] ss:$8 sps:$4 sm:$0xff]   ;;  %v3243_v15 = vld [vmem:[%s3926_s23 + $0x524] ss:$8 sps:$4 sm:$0xff]   ;;  %v3238_v16 = vld [vmem:[%s3926_s23 + $0x120] ss:$8 sps:$4 sm:$0xff]  }
  0x93   : > { %2150 = vmatpush1.bf16.msra.mxu1 %v3166_v26  ;;  %v3241_v17 = vld [vmem:[%s3926_s23 + $0x520] ss:$8 sps:$4 sm:$0xff]   ;;  %v3246_v18 = vld [vmem:[%s3926_s23 + $0x134] ss:$8 sps:$4 sm:$0xff]   ;;  %v3244_v20 = vld [vmem:[%s3926_s23 + $0x130] ss:$8 sps:$4 sm:$0xff]  }
  0x94   : > { %2314 = vmatpush1.bf16.msra.mxu0 %v3167_v27  ;;  %2151 = vmatprep.subr.bf16.mxu1 %v3168_v28  ;;  %v3249_v19 = vld [vmem:[%s3926_s23 + $0x534] ss:$8 sps:$4 sm:$0xff]   ;;  %v3247_v21 = vld [vmem:[%s3926_s23 + $0x530] ss:$8 sps:$4 sm:$0xff]   ;;  %v3252_v22 = vld [vmem:[%s3926_s23 + $0x144] ss:$8 sps:$4 sm:$0xff]  }
  0x95   : > { %2315 = vmatprep.subr.bf16.mxu0 %v3170_v29  ;;  %v3255_v23 = vld [vmem:[%s3926_s23 + $0x544] ss:$8 sps:$4 sm:$0xff]   ;;  %v3250_v24 = vld [vmem:[%s3926_s23 + $0x140] ss:$8 sps:$4 sm:$0xff]   ;;  %v3258_v26 = vld [vmem:[%s3926_s23 + $0x154] ss:$8 sps:$4 sm:$0xff]  }
  0x96   : > { %v3253_v25 = vld [vmem:[%s3926_s23 + $0x540] ss:$8 sps:$4 sm:$0xff]   ;;  %v3261_v27 = vld [vmem:[%s3926_s23 + $0x554] ss:$8 sps:$4 sm:$0xff]   ;;  %v3256_v28 = vld [vmem:[%s3926_s23 + $0x150] ss:$8 sps:$4 sm:$0xff]  }
  0x97   : > { %2152 = vmatpush1.bf16.msra.mxu1 %v3172_v30  ;;  %v3259_v29 = vld [vmem:[%s3926_s23 + $0x550] ss:$8 sps:$4 sm:$0xff]   ;;  %v3264_v30 = vld [vmem:[%s3926_s23 + $0x164] ss:$8 sps:$4 sm:$0xff]   ;;  %v3282_v46 = vld [vmem:[%s3926_s23 + $0x194] ss:$8 sps:$4 sm:$0xff]  }
  0x98   : > { %2316 = vmatpush1.bf16.msra.mxu0 %v3173_v31  ;;  %2153 = vmatprep.subr.bf16.mxu1 %v3174_v32  ;;  %v3267_v31 = vld [vmem:[%s3926_s23 + $0x564] ss:$8 sps:$4 sm:$0xff]   ;;  %v3280_v48 = vld [vmem:[%s3926_s23 + $0x190] ss:$8 sps:$4 sm:$0xff]   ;;  %v3289_v53 = vld [vmem:[%s3926_s23 + $0x5a0] ss:$8 sps:$4 sm:$0xff]  }
  0x99   : > { %2317 = vmatprep.subr.bf16.mxu0 %v3176_v33  ;;  %v4042_v32 = vld [vmem:[%s4325_s0 + $0x8] sm:$0xff]  ;;  %s4358_s25 = smov (!%p330_p11, %s2711_s25), 3 }
  0x9a   : > { %v3262_v33 = vld [vmem:[%s3926_s23 + $0x160] ss:$8 sps:$4 sm:$0xff]   ;;  %v3288_v50 = vld [vmem:[%s3926_s23 + $0x1a4] ss:$8 sps:$4 sm:$0xff]   ;;  %s2712_s18 = sshll.u32 %s4358_s25, 2 }
  0x9b   : > { %2154 = vmatpush1.bf16.msra.mxu1 %v3178_v34  ;;  %v3265_v34 = vld [vmem:[%s3926_s23 + $0x560] ss:$8 sps:$4 sm:$0xff]   ;;  %s335_s9 = scalar_lea.vmem %s4329_s4, %s2712_s18 }
  0x9c   : > { %2318 = vmatpush1.bf16.msra.mxu0 %v3179_v35  ;;  %2155 = vmatprep.subr.bf16.mxu1 %v3180_v36  ;;  %v2716_v35 = vcombine.high %v4042_v32, %v4042_v32  ;;  %v4051_v36 = vld [vmem:[%s4325_s0 + $0x28] sm:$0xff] }
  0x9d   : > { %2319 = vmatprep.subr.bf16.mxu0 %v3182_v37  ;;  %v3270_v37 = vld [vmem:[%s3926_s23 + $0x174] ss:$8 sps:$4 sm:$0xff]  }
  0x9f   : > { %2156 = vmatpush1.bf16.msra.mxu1 %v3184_v38  ;;  %v2724_v38 = vcombine.high %v4051_v36, %v4051_v36 }
  0xa0   : > { %2320 = vmatpush1.bf16.msra.mxu0 %v3185_v39  ;;  %2157 = vmatprep.subr.bf16.mxu1 %v3186_v40  ;;  %v3273_v39 = vld [vmem:[%s3926_s23 + $0x574] ss:$8 sps:$4 sm:$0xff]   ;;  %v3268_v40 = vld [vmem:[%s3926_s23 + $0x170] ss:$8 sps:$4 sm:$0xff]  }
  0xa1   : > { %2321 = vmatprep.subr.bf16.mxu0 %v3188_v41  ;;  %v3271_v41 = vld [vmem:[%s3926_s23 + $0x570] ss:$8 sps:$4 sm:$0xff]  }
  0xa3   : > { %2158 = vmatpush1.bf16.msra.mxu1 %v3190_v42  ;;  %v3276_v42 = vld [vmem:[%s3926_s23 + $0x184] ss:$8 sps:$4 sm:$0xff]  }
  0xa4   : > { %2322 = vmatpush1.bf16.msra.mxu0 %v3191_v43  ;;  %2159 = vmatprep.subr.bf16.mxu1 %v3192_v44  ;;  %v3279_v43 = vld [vmem:[%s3926_s23 + $0x584] ss:$8 sps:$4 sm:$0xff]   ;;  %v3274_v44 = vld [vmem:[%s3926_s23 + $0x180] ss:$8 sps:$4 sm:$0xff]  }
  0xa5   : > { %2323 = vmatprep.subr.bf16.mxu0 %v3194_v45  ;;  %v3277_v45 = vld [vmem:[%s3926_s23 + $0x580] ss:$8 sps:$4 sm:$0xff]  }
  0xa7   : > { %2160 = vmatpush1.bf16.msra.mxu1 %v3196_v47  ;;  %v3285_v47 = vld [vmem:[%s3926_s23 + $0x594] ss:$8 sps:$4 sm:$0xff]  }
  0xa8   : > { %2324 = vmatpush1.bf16.msra.mxu0 %v3197_v49  ;;  %2161 = vmatprep.subr.bf16.mxu1 %v3198_v51  ;;  %v3283_v49 = vld [vmem:[%s3926_s23 + $0x590] ss:$8 sps:$4 sm:$0xff]   ;;  %v3291_v51 = vld [vmem:[%s3926_s23 + $0x5a4] ss:$8 sps:$4 sm:$0xff]  }
  0xa9   : > { %2325 = vmatprep.subr.bf16.mxu0 %v3200_v52  ;;  %v3286_v52 = vld [vmem:[%s3926_s23 + $0x1a0] ss:$8 sps:$4 sm:$0xff]  }
  0xab   : > { %2162 = vmatpush1.bf16.msra.mxu1 %v3202_v54  ;;  %v3294_v54 = vld [vmem:[%s3926_s23 + $0x1b4] ss:$8 sps:$4 sm:$0xff]  }
  0xac   : > { %2326 = vmatpush1.bf16.msra.mxu0 %v3203_v55  ;;  %2163 = vmatprep.subr.bf16.mxu1 %v3204_v56  ;;  %v3297_v55 = vld [vmem:[%s3926_s23 + $0x5b4] ss:$8 sps:$4 sm:$0xff]   ;;  %v3292_v56 = vld [vmem:[%s3926_s23 + $0x1b0] ss:$8 sps:$4 sm:$0xff]  }
  0xad   : > { %2327 = vmatprep.subr.bf16.mxu0 %v3206_v57  ;;  %v3295_v57 = vld [vmem:[%s3926_s23 + $0x5b0] ss:$8 sps:$4 sm:$0xff]  }
  0xaf   : > { %2164 = vmatpush1.bf16.msra.mxu1 %v3208_v58  ;;  %v3300_v58 = vld [vmem:[%s3926_s23 + $0x1c4] ss:$8 sps:$4 sm:$0xff]  }
  0xb0   : > { %2328 = vmatpush1.bf16.msra.mxu0 %v3209_v59  ;;  %2165 = vmatprep.subr.bf16.mxu1 %v3210_v60  ;;  %v3303_v59 = vld [vmem:[%s3926_s23 + $0x5c4] ss:$8 sps:$4 sm:$0xff]   ;;  %v3298_v60 = vld [vmem:[%s3926_s23 + $0x1c0] ss:$8 sps:$4 sm:$0xff]  }
  0xb1   : > { %2329 = vmatprep.subr.bf16.mxu0 %v3212_v61  ;;  %v3301_v61 = vld [vmem:[%s3926_s23 + $0x5c0] ss:$8 sps:$4 sm:$0xff]  }
  0xb3   : > { %2166 = vmatpush1.bf16.msra.mxu1 %v3214_v62  ;;  %v3306_v62 = vld [vmem:[%s3926_s23 + $0x1d4] ss:$8 sps:$4 sm:$0xff]  }
  0xb4   : > { %2330 = vmatpush1.bf16.msra.mxu0 %v3215_v63  ;;  %2167 = vmatprep.subr.bf16.mxu1 %v3216_v0  ;;  %v3309_v63 = vld [vmem:[%s3926_s23 + $0x5d4] ss:$8 sps:$4 sm:$0xff]   ;;  %v3304_v0 = vld [vmem:[%s3926_s23 + $0x1d0] ss:$8 sps:$4 sm:$0xff]  }
  0xb5   : > { %2331 = vmatprep.subr.bf16.mxu0 %v3218_v1  ;;  %v3307_v1 = vld [vmem:[%s3926_s23 + $0x5d0] ss:$8 sps:$4 sm:$0xff]  }
  0xb7   : > { %2168 = vmatpush1.bf16.msra.mxu1 %v3220_v2  ;;  %v3312_v2 = vld [vmem:[%s3926_s23 + $0x1e4] ss:$8 sps:$4 sm:$0xff]  }
  0xb8   : > { %2332 = vmatpush1.bf16.msra.mxu0 %v3221_v3  ;;  %2178 = vmatprep.subr.bf16.mxu1 %v3226_v4  ;;  %v3315_v3 = vld [vmem:[%s3926_s23 + $0x5e4] ss:$8 sps:$4 sm:$0xff]   ;;  %v3310_v4 = vld [vmem:[%s3926_s23 + $0x1e0] ss:$8 sps:$4 sm:$0xff]  }
  0xb9   : > { %2342 = vmatprep.subr.bf16.mxu0 %v3231_v5  ;;  %v3313_v5 = vld [vmem:[%s3926_s23 + $0x5e0] ss:$8 sps:$4 sm:$0xff]  }
  0xba   : > { %2170 = vmatmul.mubr.bf16.vlgmr.msra.gmra.mrb[0].mxu1 %v2713_v6  ;;  %v3318_v6 = vld [vmem:[%s3926_s23 + $0x1f4] ss:$8 sps:$4 sm:$0xff]  }
  0xbb   : > { %2334 = vmatmul.mubr.bf16.vlgmr.msra.gmra.mrb[0].mxu0 %v2721_v7  ;;  %2179 = vmatpush1.bf16.msra.mxu1 %v3224_v8  ;;  %v3321_v7 = vld [vmem:[%s3926_s23 + $0x5f4] ss:$8 sps:$4 sm:$0xff]   ;;  %v3316_v8 = vld [vmem:[%s3926_s23 + $0x1f0] ss:$8 sps:$4 sm:$0xff]  }
  0xbc   : > { %2343 = vmatpush1.bf16.msra.mxu0 %v3229_v9  ;;  %2180 = vmatprep.subr.bf16.mxu1 %v3234_v10  ;;  %v3319_v9 = vld [vmem:[%s3926_s23 + $0x5f0] ss:$8 sps:$4 sm:$0xff]   ;;  %v3326_v10 = vld [vmem:[%s3926_s23 + $0x204] ss:$8 sps:$4 sm:$0xff]  }
  0xbd   : > { %2344 = vmatprep.subr.bf16.mxu0 %v3237_v11  ;;  %2210 = vmatprep.mubr.bf16.mxu1 %v2716_v35  ;;  %v3331_v11 = vld [vmem:[%s3926_s23 + $0x604] ss:$8 sps:$4 sm:$0xff]   ;;  %v3353_v35 = vld [vmem:[%s3926_s23 + $0x640] ss:$8 sps:$4 sm:$0xff]  }
  0xbe   : > { %2374 = vmatprep.mubr.bf16.mxu0 %v2724_v38  ;;  %v3356_v38 = vld [vmem:[%s3926_s23 + $0x250] ss:$8 sps:$4 sm:$0xff]  }
  0xbf   : > { %2181 = vmatpush1.bf16.msra.mxu1 %v3232_v12  ;;  %v2715_v12 = vcombine.low %v4042_v32, %v4042_v32  ;;  %v3352_v32 = vld [vmem:[%s3926_s23 + $0x244] ss:$8 sps:$4 sm:$0xff]  }
  0xc0   : > { %2345 = vmatpush1.bf16.msra.mxu0 %v3235_v13  ;;  %2182 = vmatprep.subr.bf16.mxu1 %v3240_v14  ;;  %v3324_v13 = vld [vmem:[%s3926_s23 + $0x200] ss:$8 sps:$4 sm:$0xff]   ;;  %v2723_v14 = vcombine.low %v4051_v36, %v4051_v36  ;;  %v3358_v36 = vld [vmem:[%s3926_s23 + $0x254] ss:$8 sps:$4 sm:$0xff]  }
  0xc1   : > { %2346 = vmatprep.subr.bf16.mxu0 %v3243_v15  ;;  %v3329_v15 = vld [vmem:[%s3926_s23 + $0x600] ss:$8 sps:$4 sm:$0xff]  }
  0xc3   : > { %2183 = vmatpush1.bf16.msra.mxu1 %v3238_v16  ;;  %v3334_v16 = vld [vmem:[%s3926_s23 + $0x214] ss:$8 sps:$4 sm:$0xff]  }
  0xc4   : > { %2347 = vmatpush1.bf16.msra.mxu0 %v3241_v17  ;;  %2184 = vmatprep.subr.bf16.mxu1 %v3246_v18  ;;  %v3337_v17 = vld [vmem:[%s3926_s23 + $0x614] ss:$8 sps:$4 sm:$0xff]  }
  0xc5   : > { %2348 = vmatprep.subr.bf16.mxu0 %v3249_v19  ;;  %v4104_v18 = vld [vmem:[%s4325_s0 + $0x10] sm:$0xff] }
  0xc6   : > { %v2718_v19 = vcombine.high %v4104_v18, %v4104_v18 }
  0xc7   : > { %2185 = vmatpush1.bf16.msra.mxu1 %v3244_v20  ;;  %v4111_v20 = vld [vmem:[%s4325_s0 + $0x30] sm:$0xff] }
  0xc8   : > { %2349 = vmatpush1.bf16.msra.mxu0 %v3247_v21  ;;  %2186 = vmatprep.subr.bf16.mxu1 %v3252_v22  ;;  %v3332_v21 = vld [vmem:[%s3926_s23 + $0x210] ss:$8 sps:$4 sm:$0xff]  }
  0xc9   : > { %2350 = vmatprep.subr.bf16.mxu0 %v3255_v23  ;;  %v3335_v22 = vld [vmem:[%s3926_s23 + $0x610] ss:$8 sps:$4 sm:$0xff]   ;;  %v2726_v23 = vcombine.high %v4111_v20, %v4111_v20 }
  0xcb   : > { %2187 = vmatpush1.bf16.msra.mxu1 %v3250_v24  ;;  %v3340_v24 = vld [vmem:[%s3926_s23 + $0x224] ss:$8 sps:$4 sm:$0xff]  }
  0xcc   : > { %2351 = vmatpush1.bf16.msra.mxu0 %v3253_v25  ;;  %2188 = vmatprep.subr.bf16.mxu1 %v3258_v26  ;;  %v3343_v25 = vld [vmem:[%s3926_s23 + $0x624] ss:$8 sps:$4 sm:$0xff]   ;;  %v3338_v26 = vld [vmem:[%s3926_s23 + $0x220] ss:$8 sps:$4 sm:$0xff]  }
  0xcd   : > { %2352 = vmatprep.subr.bf16.mxu0 %v3261_v27  ;;  %v3341_v27 = vld [vmem:[%s3926_s23 + $0x620] ss:$8 sps:$4 sm:$0xff]  }
  0xcf   : > { %2189 = vmatpush1.bf16.msra.mxu1 %v3256_v28  ;;  %v3346_v28 = vld [vmem:[%s3926_s23 + $0x234] ss:$8 sps:$4 sm:$0xff]  }
  0xd0   : > { %2353 = vmatpush1.bf16.msra.mxu0 %v3259_v29  ;;  %2190 = vmatprep.subr.bf16.mxu1 %v3264_v30  ;;  %v3349_v29 = vld [vmem:[%s3926_s23 + $0x634] ss:$8 sps:$4 sm:$0xff]   ;;  %v3344_v30 = vld [vmem:[%s3926_s23 + $0x230] ss:$8 sps:$4 sm:$0xff]  }
  0xd1   : > { %2354 = vmatprep.subr.bf16.mxu0 %v3267_v31  ;;  %v3347_v31 = vld [vmem:[%s3926_s23 + $0x630] ss:$8 sps:$4 sm:$0xff]  }
  0xd3   : > { %2191 = vmatpush1.bf16.msra.mxu1 %v3262_v33  ;;  %v3355_v33 = vld [vmem:[%s3926_s23 + $0x644] ss:$8 sps:$4 sm:$0xff]  }
  0xd4   : > { %2355 = vmatpush1.bf16.msra.mxu0 %v3265_v34  ;;  %2192 = vmatprep.subr.bf16.mxu1 %v3270_v37  ;;  %v3350_v34 = vld [vmem:[%s3926_s23 + $0x240] ss:$8 sps:$4 sm:$0xff]   ;;  %v3361_v37 = vld [vmem:[%s3926_s23 + $0x654] ss:$8 sps:$4 sm:$0xff]  }
  0xd5   : > { %2356 = vmatprep.subr.bf16.mxu0 %v3273_v39  ;;  %v3359_v39 = vld [vmem:[%s3926_s23 + $0x650] ss:$8 sps:$4 sm:$0xff]  }
  0xd7   : > { %2193 = vmatpush1.bf16.msra.mxu1 %v3268_v40  ;;  %v3364_v40 = vld [vmem:[%s3926_s23 + $0x264] ss:$8 sps:$4 sm:$0xff]  }
  0xd8   : > { %2357 = vmatpush1.bf16.msra.mxu0 %v3271_v41  ;;  %2194 = vmatprep.subr.bf16.mxu1 %v3276_v42  ;;  %v3367_v41 = vld [vmem:[%s3926_s23 + $0x664] ss:$8 sps:$4 sm:$0xff]   ;;  %v3362_v42 = vld [vmem:[%s3926_s23 + $0x260] ss:$8 sps:$4 sm:$0xff]  }
  0xd9   : > { %2358 = vmatprep.subr.bf16.mxu0 %v3279_v43  ;;  %v3365_v43 = vld [vmem:[%s3926_s23 + $0x660] ss:$8 sps:$4 sm:$0xff]  }
  0xdb   : > { %2195 = vmatpush1.bf16.msra.mxu1 %v3274_v44  ;;  %v3370_v44 = vld [vmem:[%s3926_s23 + $0x274] ss:$8 sps:$4 sm:$0xff]  }
  0xdc   : > { %2359 = vmatpush1.bf16.msra.mxu0 %v3277_v45  ;;  %2196 = vmatprep.subr.bf16.mxu1 %v3282_v46  ;;  %v3373_v45 = vld [vmem:[%s3926_s23 + $0x674] ss:$8 sps:$4 sm:$0xff]   ;;  %v3368_v46 = vld [vmem:[%s3926_s23 + $0x270] ss:$8 sps:$4 sm:$0xff]  }
  0xdd   : > { %2360 = vmatprep.subr.bf16.mxu0 %v3285_v47  ;;  %v3371_v47 = vld [vmem:[%s3926_s23 + $0x670] ss:$8 sps:$4 sm:$0xff]  }
  0xdf   : > { %2197 = vmatpush1.bf16.msra.mxu1 %v3280_v48  ;;  %v3376_v48 = vld [vmem:[%s3926_s23 + $0x284] ss:$8 sps:$4 sm:$0xff]  }
  0xe0   : > { %2361 = vmatpush1.bf16.msra.mxu0 %v3283_v49  ;;  %2198 = vmatprep.subr.bf16.mxu1 %v3288_v50  ;;  %v3379_v49 = vld [vmem:[%s3926_s23 + $0x684] ss:$8 sps:$4 sm:$0xff]   ;;  %v3374_v50 = vld [vmem:[%s3926_s23 + $0x280] ss:$8 sps:$4 sm:$0xff]  }
  0xe1   : > { %2362 = vmatprep.subr.bf16.mxu0 %v3291_v51  ;;  %v3377_v51 = vld [vmem:[%s3926_s23 + $0x680] ss:$8 sps:$4 sm:$0xff]  }
  0xe3   : > { %2199 = vmatpush1.bf16.msra.mxu1 %v3286_v52  ;;  %v3382_v52 = vld [vmem:[%s3926_s23 + $0x294] ss:$8 sps:$4 sm:$0xff]  }
  0xe4   : > { %2363 = vmatpush1.bf16.msra.mxu0 %v3289_v53  ;;  %2200 = vmatprep.subr.bf16.mxu1 %v3294_v54  ;;  %v3385_v53 = vld [vmem:[%s3926_s23 + $0x694] ss:$8 sps:$4 sm:$0xff]   ;;  %v3380_v54 = vld [vmem:[%s3926_s23 + $0x290] ss:$8 sps:$4 sm:$0xff]  }
  0xe5   : > { %2364 = vmatprep.subr.bf16.mxu0 %v3297_v55  ;;  %v3383_v55 = vld [vmem:[%s3926_s23 + $0x690] ss:$8 sps:$4 sm:$0xff]  }
  0xe7   : > { %2201 = vmatpush1.bf16.msra.mxu1 %v3292_v56  ;;  %v3388_v56 = vld [vmem:[%s3926_s23 + $0x2a4] ss:$8 sps:$4 sm:$0xff]  }
  0xe8   : > { %2365 = vmatpush1.bf16.msra.mxu0 %v3295_v57  ;;  %2202 = vmatprep.subr.bf16.mxu1 %v3300_v58  ;;  %v3391_v57 = vld [vmem:[%s3926_s23 + $0x6a4] ss:$8 sps:$4 sm:$0xff]   ;;  %v3386_v58 = vld [vmem:[%s3926_s23 + $0x2a0] ss:$8 sps:$4 sm:$0xff]  }
  0xe9   : > { %2366 = vmatprep.subr.bf16.mxu0 %v3303_v59  ;;  %v3389_v59 = vld [vmem:[%s3926_s23 + $0x6a0] ss:$8 sps:$4 sm:$0xff]  }
  0xeb   : > { %2203 = vmatpush1.bf16.msra.mxu1 %v3298_v60  ;;  %v3394_v60 = vld [vmem:[%s3926_s23 + $0x2b4] ss:$8 sps:$4 sm:$0xff]  }
  0xec   : > { %2367 = vmatpush1.bf16.msra.mxu0 %v3301_v61  ;;  %2204 = vmatprep.subr.bf16.mxu1 %v3306_v62  ;;  %v3397_v61 = vld [vmem:[%s3926_s23 + $0x6b4] ss:$8 sps:$4 sm:$0xff]   ;;  %v3392_v62 = vld [vmem:[%s3926_s23 + $0x2b0] ss:$8 sps:$4 sm:$0xff]  }
  0xed   : > { %2368 = vmatprep.subr.bf16.mxu0 %v3309_v63  ;;  %v3395_v63 = vld [vmem:[%s3926_s23 + $0x6b0] ss:$8 sps:$4 sm:$0xff]  }
  0xef   : > { %2205 = vmatpush1.bf16.msra.mxu1 %v3304_v0  ;;  %v3400_v0 = vld [vmem:[%s3926_s23 + $0x2c4] ss:$8 sps:$4 sm:$0xff]  }
  0xf0   : > { %2369 = vmatpush1.bf16.msra.mxu0 %v3307_v1  ;;  %2206 = vmatprep.subr.bf16.mxu1 %v3312_v2  ;;  %v3403_v1 = vld [vmem:[%s3926_s23 + $0x6c4] ss:$8 sps:$4 sm:$0xff]   ;;  %v3398_v2 = vld [vmem:[%s3926_s23 + $0x2c0] ss:$8 sps:$4 sm:$0xff]  }
  0xf1   : > { %2370 = vmatprep.subr.bf16.mxu0 %v3315_v3  ;;  %v3401_v3 = vld [vmem:[%s3926_s23 + $0x6c0] ss:$8 sps:$4 sm:$0xff]  }
  0xf3   : > { %2207 = vmatpush1.bf16.msra.mxu1 %v3310_v4  ;;  %v3406_v4 = vld [vmem:[%s3926_s23 + $0x2d4] ss:$8 sps:$4 sm:$0xff]  }
  0xf4   : > { %2371 = vmatpush1.bf16.msra.mxu0 %v3313_v5  ;;  %2208 = vmatprep.subr.bf16.mxu1 %v3318_v6  ;;  %v3409_v5 = vld [vmem:[%s3926_s23 + $0x6d4] ss:$8 sps:$4 sm:$0xff]   ;;  %v3404_v6 = vld [vmem:[%s3926_s23 + $0x2d0] ss:$8 sps:$4 sm:$0xff]  }
  0xf5   : > { %2372 = vmatprep.subr.bf16.mxu0 %v3321_v7  ;;  %v3407_v7 = vld [vmem:[%s3926_s23 + $0x6d0] ss:$8 sps:$4 sm:$0xff]  }
  0xf7   : > { %2209 = vmatpush1.bf16.msra.mxu1 %v3316_v8  ;;  %v3412_v8 = vld [vmem:[%s3926_s23 + $0x2e4] ss:$8 sps:$4 sm:$0xff]  }
  0xf8   : > { %2373 = vmatpush1.bf16.msra.mxu0 %v3319_v9  ;;  %2219 = vmatprep.subr.bf16.mxu1 %v3326_v10  ;;  %v3415_v9 = vld [vmem:[%s3926_s23 + $0x6e4] ss:$8 sps:$4 sm:$0xff]   ;;  %v3410_v10 = vld [vmem:[%s3926_s23 + $0x2e0] ss:$8 sps:$4 sm:$0xff]  }
  0xf9   : > { %2383 = vmatprep.subr.bf16.mxu0 %v3331_v11  ;;  %v3413_v11 = vld [vmem:[%s3926_s23 + $0x6e0] ss:$8 sps:$4 sm:$0xff]  }
  0xfa   : > { %2211 = vmatmul.mubr.bf16.vlgmr.msra.gmra.mrb[0].mxu1 %v2715_v12  ;;  %v3418_v12 = vld [vmem:[%s3926_s23 + $0x2f4] ss:$8 sps:$4 sm:$0xff]  }
  0xfb   : > { %2375 = vmatmul.mubr.bf16.vlgmr.msra.gmra.mrb[0].mxu0 %v2723_v14  ;;  %2220 = vmatpush1.bf16.msra.mxu1 %v3324_v13  ;;  %v3421_v13 = vld [vmem:[%s3926_s23 + $0x6f4] ss:$8 sps:$4 sm:$0xff]   ;;  %v3416_v14 = vld [vmem:[%s3926_s23 + $0x2f0] ss:$8 sps:$4 sm:$0xff]  }
  0xfc   : > { %2384 = vmatpush1.bf16.msra.mxu0 %v3329_v15  ;;  %2221 = vmatprep.subr.bf16.mxu1 %v3334_v16  ;;  %v3419_v15 = vld [vmem:[%s3926_s23 + $0x6f0] ss:$8 sps:$4 sm:$0xff]   ;;  %v3426_v16 = vld [vmem:[%s3926_s23 + $0x304] ss:$8 sps:$4 sm:$0xff]  }
  0xfd   : > { %2385 = vmatprep.subr.bf16.mxu0 %v3337_v17  ;;  %2251 = vmatprep.mubr.bf16.mxu1 %v2718_v19  ;;  %v3431_v17 = vld [vmem:[%s3926_s23 + $0x704] ss:$8 sps:$4 sm:$0xff]   ;;  %v3424_v19 = vld [vmem:[%s3926_s23 + $0x300] ss:$8 sps:$4 sm:$0xff]  }
  0xfe   : > { %2415 = vmatprep.mubr.bf16.mxu0 %v2726_v23  ;;  %v2725_v23 = vcombine.low %v4111_v20, %v4111_v20 }
  0xff   : > { %2222 = vmatpush1.bf16.msra.mxu1 %v3332_v21  ;;  %v3429_v21 = vld [vmem:[%s3926_s23 + $0x700] ss:$8 sps:$4 sm:$0xff]  }
 0x100   : > { %2386 = vmatpush1.bf16.msra.mxu0 %v3335_v22  ;;  %2223 = vmatprep.subr.bf16.mxu1 %v3340_v24  ;;  %v2717_v22 = vcombine.low %v4104_v18, %v4104_v18  ;;  %v4184_v24 = vld [vmem:[%s4325_s0 + $0x18] sm:$0xff] }
 0x101   : > { %2387 = vmatprep.subr.bf16.mxu0 %v3343_v25  ;;  %v4189_v25 = vld [vmem:[%s4325_s0 + $0x38] sm:$0xff]  ;;  %v2720_v20 = vcombine.high %v4184_v24, %v4184_v24 }
 0x102   : > { %v3434_v18 = vld [vmem:[%s3926_s23 + $0x314] ss:$8 sps:$4 sm:$0xff]  }
 0x103   : > { %2224 = vmatpush1.bf16.msra.mxu1 %v3338_v26  ;;  %v3437_v26 = vld [vmem:[%s3926_s23 + $0x714] ss:$8 sps:$4 sm:$0xff]  }
 0x104   : > { %2388 = vmatpush1.bf16.msra.mxu0 %v3341_v27  ;;  %2225 = vmatprep.subr.bf16.mxu1 %v3346_v28  ;;  %v2728_v27 = vcombine.high %v4189_v25, %v4189_v25  ;;  %v3432_v28 = vld [vmem:[%s3926_s23 + $0x310] ss:$8 sps:$4 sm:$0xff]  }
 0x105   : > { %2389 = vmatprep.subr.bf16.mxu0 %v3349_v29  ;;  %v3435_v29 = vld [vmem:[%s3926_s23 + $0x710] ss:$8 sps:$4 sm:$0xff]  }
 0x107   : > { %2226 = vmatpush1.bf16.msra.mxu1 %v3344_v30  ;;  %v3440_v30 = vld [vmem:[%s3926_s23 + $0x324] ss:$8 sps:$4 sm:$0xff]  }
 0x108   : > { %2390 = vmatpush1.bf16.msra.mxu0 %v3347_v31  ;;  %2227 = vmatprep.subr.bf16.mxu1 %v3352_v32  ;;  %v3443_v31 = vld [vmem:[%s3926_s23 + $0x724] ss:$8 sps:$4 sm:$0xff]   ;;  %v3438_v32 = vld [vmem:[%s3926_s23 + $0x320] ss:$8 sps:$4 sm:$0xff]  }
 0x109   : > { %2391 = vmatprep.subr.bf16.mxu0 %v3355_v33  ;;  %v3441_v33 = vld [vmem:[%s3926_s23 + $0x720] ss:$8 sps:$4 sm:$0xff]  }
 0x10b   : > { %2228 = vmatpush1.bf16.msra.mxu1 %v3350_v34  ;;  %v3446_v34 = vld [vmem:[%s3926_s23 + $0x334] ss:$8 sps:$4 sm:$0xff]  }
 0x10c   : > { %2392 = vmatpush1.bf16.msra.mxu0 %v3353_v35  ;;  %2229 = vmatprep.subr.bf16.mxu1 %v3358_v36  ;;  %v3449_v35 = vld [vmem:[%s3926_s23 + $0x734] ss:$8 sps:$4 sm:$0xff]   ;;  %v3444_v36 = vld [vmem:[%s3926_s23 + $0x330] ss:$8 sps:$4 sm:$0xff]  }
 0x10d   : > { %2393 = vmatprep.subr.bf16.mxu0 %v3361_v37  ;;  %v3447_v37 = vld [vmem:[%s3926_s23 + $0x730] ss:$8 sps:$4 sm:$0xff]  }
 0x10f   : > { %2230 = vmatpush1.bf16.msra.mxu1 %v3356_v38  ;;  %v3452_v38 = vld [vmem:[%s3926_s23 + $0x344] ss:$8 sps:$4 sm:$0xff]  }
 0x110   : > { %2394 = vmatpush1.bf16.msra.mxu0 %v3359_v39  ;;  %2231 = vmatprep.subr.bf16.mxu1 %v3364_v40  ;;  %v3455_v39 = vld [vmem:[%s3926_s23 + $0x744] ss:$8 sps:$4 sm:$0xff]   ;;  %v3450_v40 = vld [vmem:[%s3926_s23 + $0x340] ss:$8 sps:$4 sm:$0xff]  }
 0x111   : > { %2395 = vmatprep.subr.bf16.mxu0 %v3367_v41  ;;  %v3453_v41 = vld [vmem:[%s3926_s23 + $0x740] ss:$8 sps:$4 sm:$0xff]  }
 0x113   : > { %2232 = vmatpush1.bf16.msra.mxu1 %v3362_v42  ;;  %v3458_v42 = vld [vmem:[%s3926_s23 + $0x354] ss:$8 sps:$4 sm:$0xff]  }
 0x114   : > { %2396 = vmatpush1.bf16.msra.mxu0 %v3365_v43  ;;  %2233 = vmatprep.subr.bf16.mxu1 %v3370_v44  ;;  %v3461_v43 = vld [vmem:[%s3926_s23 + $0x754] ss:$8 sps:$4 sm:$0xff]   ;;  %v3456_v44 = vld [vmem:[%s3926_s23 + $0x350] ss:$8 sps:$4 sm:$0xff]  }
 0x115   : > { %2397 = vmatprep.subr.bf16.mxu0 %v3373_v45  ;;  %v3459_v45 = vld [vmem:[%s3926_s23 + $0x750] ss:$8 sps:$4 sm:$0xff]  }
 0x117   : > { %2234 = vmatpush1.bf16.msra.mxu1 %v3368_v46  ;;  %v3464_v46 = vld [vmem:[%s3926_s23 + $0x364] ss:$8 sps:$4 sm:$0xff]  }
 0x118   : > { %2398 = vmatpush1.bf16.msra.mxu0 %v3371_v47  ;;  %2235 = vmatprep.subr.bf16.mxu1 %v3376_v48  ;;  %v3467_v47 = vld [vmem:[%s3926_s23 + $0x764] ss:$8 sps:$4 sm:$0xff]   ;;  %v3462_v48 = vld [vmem:[%s3926_s23 + $0x360] ss:$8 sps:$4 sm:$0xff]  }
 0x119   : > { %2399 = vmatprep.subr.bf16.mxu0 %v3379_v49  ;;  %v3465_v49 = vld [vmem:[%s3926_s23 + $0x760] ss:$8 sps:$4 sm:$0xff]  }
 0x11b   : > { %2236 = vmatpush1.bf16.msra.mxu1 %v3374_v50  ;;  %v3470_v50 = vld [vmem:[%s3926_s23 + $0x374] ss:$8 sps:$4 sm:$0xff]  }
 0x11c   : > { %2400 = vmatpush1.bf16.msra.mxu0 %v3377_v51  ;;  %2237 = vmatprep.subr.bf16.mxu1 %v3382_v52  ;;  %v3473_v51 = vld [vmem:[%s3926_s23 + $0x774] ss:$8 sps:$4 sm:$0xff]   ;;  %v3468_v52 = vld [vmem:[%s3926_s23 + $0x370] ss:$8 sps:$4 sm:$0xff]  }
 0x11d   : > { %2401 = vmatprep.subr.bf16.mxu0 %v3385_v53  ;;  %v3471_v53 = vld [vmem:[%s3926_s23 + $0x770] ss:$8 sps:$4 sm:$0xff]  }
 0x11f   : > { %2238 = vmatpush1.bf16.msra.mxu1 %v3380_v54  ;;  %v3476_v54 = vld [vmem:[%s3926_s23 + $0x384] ss:$8 sps:$4 sm:$0xff]  }
 0x120   : > { %2402 = vmatpush1.bf16.msra.mxu0 %v3383_v55  ;;  %2239 = vmatprep.subr.bf16.mxu1 %v3388_v56  ;;  %v3479_v55 = vld [vmem:[%s3926_s23 + $0x784] ss:$8 sps:$4 sm:$0xff]   ;;  %v3474_v56 = vld [vmem:[%s3926_s23 + $0x380] ss:$8 sps:$4 sm:$0xff]  }
 0x121   : > { %2403 = vmatprep.subr.bf16.mxu0 %v3391_v57  ;;  %v3477_v57 = vld [vmem:[%s3926_s23 + $0x780] ss:$8 sps:$4 sm:$0xff]  }
 0x123   : > { %2240 = vmatpush1.bf16.msra.mxu1 %v3386_v58  ;;  %v3482_v58 = vld [vmem:[%s3926_s23 + $0x394] ss:$8 sps:$4 sm:$0xff]  }
 0x124   : > { %2404 = vmatpush1.bf16.msra.mxu0 %v3389_v59  ;;  %2241 = vmatprep.subr.bf16.mxu1 %v3394_v60  ;;  %v3485_v59 = vld [vmem:[%s3926_s23 + $0x794] ss:$8 sps:$4 sm:$0xff]   ;;  %v3480_v60 = vld [vmem:[%s3926_s23 + $0x390] ss:$8 sps:$4 sm:$0xff]  }
 0x125   : > { %2405 = vmatprep.subr.bf16.mxu0 %v3397_v61  ;;  %v3483_v61 = vld [vmem:[%s3926_s23 + $0x790] ss:$8 sps:$4 sm:$0xff]  }
 0x127   : > { %2242 = vmatpush1.bf16.msra.mxu1 %v3392_v62  ;;  %v3488_v62 = vld [vmem:[%s3926_s23 + $0x3a4] ss:$8 sps:$4 sm:$0xff]  }
 0x128   : > { %2406 = vmatpush1.bf16.msra.mxu0 %v3395_v63  ;;  %2243 = vmatprep.subr.bf16.mxu1 %v3400_v0  ;;  %v3491_v63 = vld [vmem:[%s3926_s23 + $0x7a4] ss:$8 sps:$4 sm:$0xff]   ;;  %v3486_v0 = vld [vmem:[%s3926_s23 + $0x3a0] ss:$8 sps:$4 sm:$0xff]  }
 0x129   : > { %2407 = vmatprep.subr.bf16.mxu0 %v3403_v1  ;;  %v3489_v1 = vld [vmem:[%s3926_s23 + $0x7a0] ss:$8 sps:$4 sm:$0xff]  }
 0x12b   : > { %2244 = vmatpush1.bf16.msra.mxu1 %v3398_v2  ;;  %v3494_v2 = vld [vmem:[%s3926_s23 + $0x3b4] ss:$8 sps:$4 sm:$0xff]  }
 0x12c   : > { %2408 = vmatpush1.bf16.msra.mxu0 %v3401_v3  ;;  %2245 = vmatprep.subr.bf16.mxu1 %v3406_v4  ;;  %v3497_v3 = vld [vmem:[%s3926_s23 + $0x7b4] ss:$8 sps:$4 sm:$0xff]   ;;  %v3492_v4 = vld [vmem:[%s3926_s23 + $0x3b0] ss:$8 sps:$4 sm:$0xff]  }
 0x12d   : > { %2409 = vmatprep.subr.bf16.mxu0 %v3409_v5  ;;  %v3495_v5 = vld [vmem:[%s3926_s23 + $0x7b0] ss:$8 sps:$4 sm:$0xff]  }
 0x12f   : > { %2246 = vmatpush1.bf16.msra.mxu1 %v3404_v6  ;;  %v3500_v6 = vld [vmem:[%s3926_s23 + $0x3c4] ss:$8 sps:$4 sm:$0xff]  }
 0x130   : > { %2410 = vmatpush1.bf16.msra.mxu0 %v3407_v7  ;;  %2247 = vmatprep.subr.bf16.mxu1 %v3412_v8  ;;  %v3503_v7 = vld [vmem:[%s3926_s23 + $0x7c4] ss:$8 sps:$4 sm:$0xff]   ;;  %v3498_v8 = vld [vmem:[%s3926_s23 + $0x3c0] ss:$8 sps:$4 sm:$0xff]  }
 0x131   : > { %2411 = vmatprep.subr.bf16.mxu0 %v3415_v9  ;;  %v3501_v9 = vld [vmem:[%s3926_s23 + $0x7c0] ss:$8 sps:$4 sm:$0xff]  }
 0x133   : > { %2248 = vmatpush1.bf16.msra.mxu1 %v3410_v10  ;;  %v3506_v10 = vld [vmem:[%s3926_s23 + $0x3d4] ss:$8 sps:$4 sm:$0xff]  }
 0x134   : > { %2412 = vmatpush1.bf16.msra.mxu0 %v3413_v11  ;;  %2249 = vmatprep.subr.bf16.mxu1 %v3418_v12  ;;  %v3509_v11 = vld [vmem:[%s3926_s23 + $0x7d4] ss:$8 sps:$4 sm:$0xff]   ;;  %v3504_v12 = vld [vmem:[%s3926_s23 + $0x3d0] ss:$8 sps:$4 sm:$0xff]  }
 0x135   : > { %2413 = vmatprep.subr.bf16.mxu0 %v3421_v13  ;;  %v3507_v13 = vld [vmem:[%s3926_s23 + $0x7d0] ss:$8 sps:$4 sm:$0xff]  }
 0x137   : > { %2250 = vmatpush1.bf16.msra.mxu1 %v3416_v14  ;;  %v3512_v14 = vld [vmem:[%s3926_s23 + $0x3e4] ss:$8 sps:$4 sm:$0xff]  }
 0x138   : > { %2414 = vmatpush1.bf16.msra.mxu0 %v3419_v15  ;;  %2260 = vmatprep.subr.bf16.mxu1 %v3426_v16  ;;  %v3515_v15 = vld [vmem:[%s3926_s23 + $0x7e4] ss:$8 sps:$4 sm:$0xff]   ;;  %v3510_v16 = vld [vmem:[%s3926_s23 + $0x3e0] ss:$8 sps:$4 sm:$0xff]  }
 0x139   : > { %2424 = vmatprep.subr.bf16.mxu0 %v3431_v17  ;;  %v3513_v17 = vld [vmem:[%s3926_s23 + $0x7e0] ss:$8 sps:$4 sm:$0xff]  }
 0x13a   : > { %2252 = vmatmul.mubr.bf16.vlgmr.msra.gmra.mrb[0].mxu1 %v2717_v22  ;;  %v3516_v22 = vld [vmem:[%s3926_s23 + $0x3f0] ss:$8 sps:$4 sm:$0xff]  }
 0x13b   : > { %2416 = vmatmul.mubr.bf16.vlgmr.msra.gmra.mrb[0].mxu0 %v2725_v23  ;;  %2261 = vmatpush1.bf16.msra.mxu1 %v3424_v19  ;;  %v3518_v19 = vld [vmem:[%s3926_s23 + $0x3f4] ss:$8 sps:$4 sm:$0xff]   ;;  %v3519_v23 = vld [vmem:[%s3926_s23 + $0x7f0] ss:$8 sps:$4 sm:$0xff]  }
 0x13c   : > { %2425 = vmatpush1.bf16.msra.mxu0 %v3429_v21  ;;  %2262 = vmatprep.subr.bf16.mxu1 %v3434_v18  ;;  %v3521_v21 = vld [vmem:[%s3926_s23 + $0x7f4] ss:$8 sps:$4 sm:$0xff]   ;;  %v3528_v18 = vld [vmem:[%s3926_s23 + $0x804] ss:$8 sps:$4 sm:$0xff]  }
 0x13d   : > { %2426 = vmatprep.subr.bf16.mxu0 %v3437_v26  ;;  %2292 = vmatprep.mubr.bf16.mxu1 %v2720_v20  ;;  %v4259_v26 = vld [vmem:[%s4325_s0 + $0x40] sm:$0xff]  ;;  %v2719_v20 = vcombine.low %v4184_v24, %v4184_v24  ;;  %v3529_v24 = vld [vmem:[%s3926_s23 + $0x810] ss:$8 sps:$4 sm:$0xff]  }
 0x13e   : > { %2456 = vmatprep.mubr.bf16.mxu0 %v2728_v27  ;;  %v2727_v27 = vcombine.low %v4189_v25, %v4189_v25  ;;  %v3534_v25 = vld [vmem:[%s3926_s23 + $0x824] ss:$8 sps:$4 sm:$0xff]  }
 0x13f   : > { %2263 = vmatpush1.bf16.msra.mxu1 %v3432_v28  ;;  %v3526_v28 = vld [vmem:[%s3926_s23 + $0x800] ss:$8 sps:$4 sm:$0xff]  }
 0x140   : > { %2427 = vmatpush1.bf16.msra.mxu0 %v3435_v29  ;;  %2264 = vmatprep.subr.bf16.mxu1 %v3440_v30  ;;  %v2730_v29 = vcombine.high %v4259_v26, %v4259_v26  ;;  %v3531_v30 = vld [vmem:[%s3926_s23 + $0x814] ss:$8 sps:$4 sm:$0xff]  }
 0x141   : > { %2428 = vmatprep.subr.bf16.mxu0 %v3443_v31  ;;  %v3532_v31 = vld [vmem:[%s3926_s23 + $0x820] ss:$8 sps:$4 sm:$0xff]  }
 0x143   : > { %2265 = vmatpush1.bf16.msra.mxu1 %v3438_v32  ;;  %v3537_v32 = vld [vmem:[%s3926_s23 + $0x834] ss:$8 sps:$4 sm:$0xff]  }
 0x144   : > { %2429 = vmatpush1.bf16.msra.mxu0 %v3441_v33  ;;  %2266 = vmatprep.subr.bf16.mxu1 %v3446_v34  ;;  %v3535_v33 = vld [vmem:[%s3926_s23 + $0x830] ss:$8 sps:$4 sm:$0xff]   ;;  %v3540_v34 = vld [vmem:[%s3926_s23 + $0x844] ss:$8 sps:$4 sm:$0xff]  }
 0x145   : > { %2430 = vmatprep.subr.bf16.mxu0 %v3449_v35  ;;  %v3538_v35 = vld [vmem:[%s3926_s23 + $0x840] ss:$8 sps:$4 sm:$0xff]  }
 0x147   : > { %2267 = vmatpush1.bf16.msra.mxu1 %v3444_v36  ;;  %v3543_v36 = vld [vmem:[%s3926_s23 + $0x854] ss:$8 sps:$4 sm:$0xff]  }
 0x148   : > { %2431 = vmatpush1.bf16.msra.mxu0 %v3447_v37  ;;  %2268 = vmatprep.subr.bf16.mxu1 %v3452_v38  ;;  %v3541_v37 = vld [vmem:[%s3926_s23 + $0x850] ss:$8 sps:$4 sm:$0xff]   ;;  %v3546_v38 = vld [vmem:[%s3926_s23 + $0x864] ss:$8 sps:$4 sm:$0xff]  }
 0x149   : > { %2432 = vmatprep.subr.bf16.mxu0 %v3455_v39  ;;  %v3544_v39 = vld [vmem:[%s3926_s23 + $0x860] ss:$8 sps:$4 sm:$0xff]  }
 0x14b   : > { %2269 = vmatpush1.bf16.msra.mxu1 %v3450_v40  ;;  %v3549_v40 = vld [vmem:[%s3926_s23 + $0x874] ss:$8 sps:$4 sm:$0xff]  }
 0x14c   : > { %2433 = vmatpush1.bf16.msra.mxu0 %v3453_v41  ;;  %2270 = vmatprep.subr.bf16.mxu1 %v3458_v42  ;;  %v3547_v41 = vld [vmem:[%s3926_s23 + $0x870] ss:$8 sps:$4 sm:$0xff]   ;;  %v3552_v42 = vld [vmem:[%s3926_s23 + $0x884] ss:$8 sps:$4 sm:$0xff]  }
 0x14d   : > { %2434 = vmatprep.subr.bf16.mxu0 %v3461_v43  ;;  %v3550_v43 = vld [vmem:[%s3926_s23 + $0x880] ss:$8 sps:$4 sm:$0xff]  }
 0x14f   : > { %2271 = vmatpush1.bf16.msra.mxu1 %v3456_v44  ;;  %v3555_v44 = vld [vmem:[%s3926_s23 + $0x894] ss:$8 sps:$4 sm:$0xff]  }
 0x150   : > { %2435 = vmatpush1.bf16.msra.mxu0 %v3459_v45  ;;  %2272 = vmatprep.subr.bf16.mxu1 %v3464_v46  ;;  %v3553_v45 = vld [vmem:[%s3926_s23 + $0x890] ss:$8 sps:$4 sm:$0xff]   ;;  %v3558_v46 = vld [vmem:[%s3926_s23 + $0x8a4] ss:$8 sps:$4 sm:$0xff]  }
 0x151   : > { %2436 = vmatprep.subr.bf16.mxu0 %v3467_v47  ;;  %v3556_v47 = vld [vmem:[%s3926_s23 + $0x8a0] ss:$8 sps:$4 sm:$0xff]  }
 0x153   : > { %2273 = vmatpush1.bf16.msra.mxu1 %v3462_v48  ;;  %v3561_v48 = vld [vmem:[%s3926_s23 + $0x8b4] ss:$8 sps:$4 sm:$0xff]  }
 0x154   : > { %2437 = vmatpush1.bf16.msra.mxu0 %v3465_v49  ;;  %2274 = vmatprep.subr.bf16.mxu1 %v3470_v50  ;;  %v3559_v49 = vld [vmem:[%s3926_s23 + $0x8b0] ss:$8 sps:$4 sm:$0xff]   ;;  %v3564_v50 = vld [vmem:[%s3926_s23 + $0x8c4] ss:$8 sps:$4 sm:$0xff]  }
 0x155   : > { %2438 = vmatprep.subr.bf16.mxu0 %v3473_v51  ;;  %v3562_v51 = vld [vmem:[%s3926_s23 + $0x8c0] ss:$8 sps:$4 sm:$0xff]  }
 0x157   : > { %2275 = vmatpush1.bf16.msra.mxu1 %v3468_v52  ;;  %v3567_v52 = vld [vmem:[%s3926_s23 + $0x8d4] ss:$8 sps:$4 sm:$0xff]  }
 0x158   : > { %2439 = vmatpush1.bf16.msra.mxu0 %v3471_v53  ;;  %2276 = vmatprep.subr.bf16.mxu1 %v3476_v54  ;;  %v3565_v53 = vld [vmem:[%s3926_s23 + $0x8d0] ss:$8 sps:$4 sm:$0xff]   ;;  %v3570_v54 = vld [vmem:[%s3926_s23 + $0x8e4] ss:$8 sps:$4 sm:$0xff]  }
 0x159   : > { %2440 = vmatprep.subr.bf16.mxu0 %v3479_v55  ;;  %v3568_v55 = vld [vmem:[%s3926_s23 + $0x8e0] ss:$8 sps:$4 sm:$0xff]  }
 0x15b   : > { %2277 = vmatpush1.bf16.msra.mxu1 %v3474_v56  ;;  %v3573_v56 = vld [vmem:[%s3926_s23 + $0x8f4] ss:$8 sps:$4 sm:$0xff]  }
 0x15c   : > { %2441 = vmatpush1.bf16.msra.mxu0 %v3477_v57  ;;  %2278 = vmatprep.subr.bf16.mxu1 %v3482_v58  ;;  %v3571_v57 = vld [vmem:[%s3926_s23 + $0x8f0] ss:$8 sps:$4 sm:$0xff]   ;;  %v2729_v58 = vcombine.low %v4259_v26, %v4259_v26 }
 0x15d   : > { %2442 = vmatprep.subr.bf16.mxu0 %v3485_v59 }
 0x15f   : > { %2279 = vmatpush1.bf16.msra.mxu1 %v3480_v60 }
 0x160   : > { %2443 = vmatpush1.bf16.msra.mxu0 %v3483_v61  ;;  %2280 = vmatprep.subr.bf16.mxu1 %v3488_v62 }
 0x161   : > { %2444 = vmatprep.subr.bf16.mxu0 %v3491_v63  ;;  %v2508_v63 = vlaneseq }
 0x163   : > { %2281 = vmatpush1.bf16.msra.mxu1 %v3486_v0  ;;  %v2509_v0 = vshrl.u32 %v2508_v63, 7 }
 0x164   : > { %2445 = vmatpush1.bf16.msra.mxu0 %v3489_v1  ;;  %2282 = vmatprep.subr.bf16.mxu1 %v3494_v2  ;;  %v2506_v2 = vld [vmem:[%s3937_s7] sm:$0x3] }
 0x165   : > { %2446 = vmatprep.subr.bf16.mxu0 %v3497_v3  ;;  %v2510_v1 = vsub.s32 0, %v2509_v0  ;;  %v2514_v3 = vsub.s32 1, %v2509_v0 }
 0x167   : > { %2283 = vmatpush1.bf16.msra.mxu1 %v3492_v4  ;;  %v2520_v4 = vld [vmem:[%s275_s13] sm:$0x3] }
 0x168   : > { %2447 = vmatpush1.bf16.msra.mxu0 %v3495_v5  ;;  %2284 = vmatprep.subr.bf16.mxu1 %v3500_v6  ;;  %v2511_v5 = vrot.slane %v2506_v2, %v2510_v1 }
 0x169   : > { %2448 = vmatprep.subr.bf16.mxu0 %v3503_v7  ;;  %v2515_v7 = vrot.slane %v2506_v2, %v2514_v3 }
 0x16b   : > { %2285 = vmatpush1.bf16.msra.mxu1 %v3498_v8 }
 0x16c   : > { %2449 = vmatpush1.bf16.msra.mxu0 %v3501_v9  ;;  %2286 = vmatprep.subr.bf16.mxu1 %v3506_v10  ;;  %v2525_v9 = vrot.slane %v2520_v4, %v2510_v1 }
 0x16d   : > { %2450 = vmatprep.subr.bf16.mxu0 %v3509_v11 }
 0x16f   : > { %2287 = vmatpush1.bf16.msra.mxu1 %v3504_v12  ;;  %v2529_v12 = vrot.slane %v2520_v4, %v2514_v3 }
 0x170   : > { %2451 = vmatpush1.bf16.msra.mxu0 %v3507_v13  ;;  %2288 = vmatprep.subr.bf16.mxu1 %v3512_v14 }
 0x171   : > { %2452 = vmatprep.subr.bf16.mxu0 %v3515_v15 }
 0x173   : > { %2289 = vmatpush1.bf16.msra.mxu1 %v3510_v16 }
 0x174   : > { %2453 = vmatpush1.bf16.msra.mxu0 %v3513_v17  ;;  %2290 = vmatprep.subr.bf16.mxu1 %v3518_v19 }
 0x175   : > { %2454 = vmatprep.subr.bf16.mxu0 %v3521_v21 }
 0x177   : > { %2291 = vmatpush1.bf16.msra.mxu1 %v3516_v22 }
 0x178   : > { %2455 = vmatpush1.bf16.msra.mxu0 %v3519_v23 }
 0x179   : > { %2465 = vmatprep.subr.bf16.mxu0 %v3528_v18 }
 0x17a   : > { %2293 = vmatmul.mubr.bf16.vlgmr.msra.gmra.mrb[0].mxu1 %v2719_v20 }
 0x17b   : > { %2457 = vmatmul.mubr.bf16.vlgmr.msra.gmra.mrb[0].mxu0 %v2727_v27 }
 0x17c   : > { %2466 = vmatpush1.bf16.msra.mxu0 %v3526_v28  ;;  %2497 = vmatprep.mubr.bf16.mxu0 %v2730_v29 }
 0x17d   : > { %2467 = vmatprep.subr.bf16.mxu0 %v3531_v30 }
 0x180   : > { %2468 = vmatpush1.bf16.msra.mxu0 %v3529_v24 }
 0x181   : > { %2469 = vmatprep.subr.bf16.mxu0 %v3534_v25 }
 0x184   : > { %2470 = vmatpush1.bf16.msra.mxu0 %v3532_v31 }
 0x185   : > { %2471 = vmatprep.subr.bf16.mxu0 %v3537_v32 }
 0x188   : > { %2472 = vmatpush1.bf16.msra.mxu0 %v3535_v33 }
 0x189   : > { %2473 = vmatprep.subr.bf16.mxu0 %v3540_v34 }
 0x18c   : > { %2474 = vmatpush1.bf16.msra.mxu0 %v3538_v35 }
 0x18d   : > { %2475 = vmatprep.subr.bf16.mxu0 %v3543_v36 }
 0x190   : > { %2476 = vmatpush1.bf16.msra.mxu0 %v3541_v37 }
 0x191   : > { %2477 = vmatprep.subr.bf16.mxu0 %v3546_v38 }
 0x194   : > { %2478 = vmatpush1.bf16.msra.mxu0 %v3544_v39 }
 0x195   : > { %2479 = vmatprep.subr.bf16.mxu0 %v3549_v40 }
 0x198   : > { %2480 = vmatpush1.bf16.msra.mxu0 %v3547_v41 }
 0x199   : > { %2481 = vmatprep.subr.bf16.mxu0 %v3552_v42 }
 0x19c   : > { %2482 = vmatpush1.bf16.msra.mxu0 %v3550_v43 }
 0x19d   : > { %2483 = vmatprep.subr.bf16.mxu0 %v3555_v44 }
 0x1a0   : > { %2484 = vmatpush1.bf16.msra.mxu0 %v3553_v45 }
 0x1a1   : > { %2485 = vmatprep.subr.bf16.mxu0 %v3558_v46 }
 0x1a4   : > { %2486 = vmatpush1.bf16.msra.mxu0 %v3556_v47 }
 0x1a5   : > { %2487 = vmatprep.subr.bf16.mxu0 %v3561_v48 }
 0x1a8   : > { %2488 = vmatpush1.bf16.msra.mxu0 %v3559_v49 }
 0x1a9   : > { %2489 = vmatprep.subr.bf16.mxu0 %v3564_v50 }
 0x1ac   : > { %2490 = vmatpush1.bf16.msra.mxu0 %v3562_v51 }
 0x1ad   : > { %2491 = vmatprep.subr.bf16.mxu0 %v3567_v52 }
 0x1b0   : > { %2492 = vmatpush1.bf16.msra.mxu0 %v3565_v53 }
 0x1b1   : > { %2493 = vmatprep.subr.bf16.mxu0 %v3570_v54 }
 0x1b4   : > { %2494 = vmatpush1.bf16.msra.mxu0 %v3568_v55 }
 0x1b5   : > { %2495 = vmatprep.subr.bf16.mxu0 %v3573_v56 }
 0x1b8   : > { %2496 = vmatpush1.bf16.msra.mxu0 %v3571_v57 }
 0x1bb   : > { %2498 = vmatmul.mubr.bf16.vlgmr.msra.gmra.mrb[0].mxu0 %v2729_v58 }
 0x24d   : > { %v2294_v59 = vpop.f32.mrb[0].mxu1 }
 0x24e   : > { %v2296_v60 = vpop.f32.mrb[1].mxu1 }
 0x24f   : > { %v2298_v61 = vpop.f32.mrb[2].mxu1 }
 0x250   : > { %v2299_v62 = vpop.f32.mrb[3].mxu1 }
 0x28e   : > { %v2499_v6 = vpop.f32.mrb[0].mxu0 }
 0x28f   : > { %v3026_v8 = vadd.f32 %v2499_v6, %v2294_v59  ;;  %v2501_v10 = vpop.f32.mrb[1].mxu0 }
 0x290   : > { %v3027_v11 = vadd.f32 %v2501_v10, %v2296_v60  ;;  %v2503_v13 = vpop.f32.mrb[2].mxu0 }
 0x291   : > { %v2518_v14 = vmul.f32 %v3026_v8, %v2511_v5  ;;  %v2504_v15 = vpop.f32.mrb[3].mxu0 }
 0x292   : > { %v2519_v16 = vmul.f32 %v3027_v11, %v2515_v7 }
 0x293   : > { %v2532_v17 = vadd.f32 %v2525_v9, %v2518_v14 }
 0x294   : > { %v2533_v19 = vadd.f32 %v2529_v12, %v2519_v16 }
 0x295   : > { %v2534_v21 = vmax.f32 %v2532_v17, 0.0 }
 0x296   : > { %v2535_v22 = vmax.f32 %v2533_v19, 0.0 }
 0x298   : > { %v3025_v23 = vpack.c.bf16 %v2535_v22, %v2534_v21 }
 0x29a   : > { %2544 = vst [vmem:[%s335_s9] sm:$0xff] %v3025_v23 }
 0x29b PF: > { %s20_s20 = sadd.s32 1, %s3720_s20   ;;  %s4349_s7 = sld [smem:[#allocation9_spill]] }
 0x29c   : > { %p17_p1 = scmp.ge.s32.totalorder %s20_s20, 4   ;;  %s4350_s15 = smov %s3704_s16 }
 0x29d   : > { %s4351_s16 = smov %s3708_s17  ;;  %s4352_s17 = smov %s3800_s26 }
 0x29e   : > { %s4353_s18 = smov %s3716_s19  ;;  %19 = sbr.rel (!%p17_p1) target bundleno = 9 (0x9), region = 103 }
 0x2a1   : > { %s4354_s19 = smov %s4349_s7 }
 0x2a5   :  { %2575 = vsyncpa [#allocation3], 1 }
 0x2a6   :  { %2577 = vsyncpa [#allocation3 + $0x1], 1 }
 0x2a7   :  { %2578 = vsyncpa [#allocation5], 1 }
 0x2a8   :  { %2580 = vsyncpa [#allocation5 + $0x1], 1 }

// kernel: cropper_net_forward.11
= control target key start
LH: loop header
LB: loop body
LE: loop exit
PB: predicated region body
PF: predicated region fallthrough
CT: control target
= control target key end

     0   :  { %vm3806_vm0 = vmmov 0   ;;  %vm2776_vm1 = vcmask 523264   ;;  %s4998_s1 = inlined_call_operand.vmem [shape: bf16[1024,512], index: 1, kind: input, shape index: {}]   ;;  %s4999_s0 = inlined_call_operand.vmem [shape: bf16[8,1024], index: 0, kind: input, shape index: {}]   ;;  %s5000_s3 = inlined_call_operand.vmem [shape: bf16[512,256], index: 3, kind: input, shape index: {}]   ;;  %s5001_s5 = inlined_call_operand.vmem [shape: bf16[256,128], index: 5, kind: input, shape index: {}]   ;;  %s5002_s2 = inlined_call_operand.vmem [shape: f32[1,512], index: 2, kind: input, shape index: {}]   ;;  %s5003_s7 = inlined_call_operand.vmem [shape: bf16[128,64], index: 7, kind: input, shape index: {}]   ;;  %s5004_s4 = inlined_call_operand.vmem [shape: f32[1,256], index: 4, kind: input, shape index: {}]   ;;  %s5005_s9 = inlined_call_operand.vmem [shape: bf16[64,128], index: 9, kind: input, shape index: {}]   ;;  %s5006_s6 = inlined_call_operand.vmem [shape: f32[1,128], index: 6, kind: input, shape index: {}]   ;;  %s5007_s8 = inlined_call_operand.vmem [shape: f32[1,64], index: 8, kind: input, shape index: {}]   ;;  %s5008_s10 = inlined_call_operand.vmem [shape: f32[1,128], index: 10, kind: input, shape index: {}]   ;;  %s5009_s11 = inlined_call_operand.vmem [shape: f32[8,128], index: 11, kind: output, shape index: {}]  }
   0x1   :  { %v3289_v0 = vld [vmem:[%s4998_s1 + $0x4] ss:$16 sps:$4 sm:$0xff]   ;;  %v3291_v1 = vld [vmem:[%s4998_s1 + $0xc] ss:$16 sps:$4 sm:$0xff]   ;;  %v3293_v2 = vld [vmem:[%s4998_s1] ss:$16 sps:$4 sm:$0xff]  }
   0x2   :  { %1629 = vmatprep.subr.bf16.mxu0 %v3289_v0  ;;  %v3294_v3 = vld [vmem:[%s4998_s1 + $0x8] ss:$16 sps:$4 sm:$0xff]   ;;  %1793 = vmatprep.subr.bf16.mxu1 %v3291_v1  ;;  %v3295_v4 = vld [vmem:[%s4998_s1 + $0x24] ss:$16 sps:$4 sm:$0xff]   ;;  %v3297_v5 = vld [vmem:[%s4998_s1 + $0x2c] ss:$16 sps:$4 sm:$0xff]  }
   0x3   :  { %1630 = vmatpush1.bf16.msra.mxu0 %v3293_v2  ;;  %1794 = vmatpush1.bf16.msra.mxu1 %v3294_v3  ;;  %v3299_v6 = vld [vmem:[%s4998_s1 + $0x20] ss:$16 sps:$4 sm:$0xff]   ;;  %v3300_v7 = vld [vmem:[%s4998_s1 + $0x28] ss:$16 sps:$4 sm:$0xff]   ;;  %v3301_v8 = vld [vmem:[%s4998_s1 + $0x44] ss:$16 sps:$4 sm:$0xff]  }
   0x4   :  { %1631 = vmatprep.subr.bf16.mxu0 %v3295_v4  ;;  %1795 = vmatprep.subr.bf16.mxu1 %v3297_v5  ;;  %v3303_v9 = vld [vmem:[%s4998_s1 + $0x4c] ss:$16 sps:$4 sm:$0xff]   ;;  %v3305_v10 = vld [vmem:[%s4998_s1 + $0x40] ss:$16 sps:$4 sm:$0xff]   ;;  %v3306_v11 = vld [vmem:[%s4998_s1 + $0x48] ss:$16 sps:$4 sm:$0xff]  }
   0x5   :  { %v3307_v12 = vld [vmem:[%s4998_s1 + $0x64] ss:$16 sps:$4 sm:$0xff]   ;;  %v3309_v13 = vld [vmem:[%s4998_s1 + $0x6c] ss:$16 sps:$4 sm:$0xff]   ;;  %v3311_v14 = vld [vmem:[%s4998_s1 + $0x60] ss:$16 sps:$4 sm:$0xff]  }
   0x6   :  { %v3312_v15 = vld [vmem:[%s4998_s1 + $0x68] ss:$16 sps:$4 sm:$0xff]   ;;  %v3313_v16 = vld [vmem:[%s4998_s1 + $0x84] ss:$16 sps:$4 sm:$0xff]   ;;  %v3315_v17 = vld [vmem:[%s4998_s1 + $0x8c] ss:$16 sps:$4 sm:$0xff]  }
   0x7   :  { %1632 = vmatpush1.bf16.msra.mxu0 %v3299_v6  ;;  %1796 = vmatpush1.bf16.msra.mxu1 %v3300_v7  ;;  %v3317_v18 = vld [vmem:[%s4998_s1 + $0x80] ss:$16 sps:$4 sm:$0xff]   ;;  %v3318_v19 = vld [vmem:[%s4998_s1 + $0x88] ss:$16 sps:$4 sm:$0xff]   ;;  %v3319_v20 = vld [vmem:[%s4998_s1 + $0xa4] ss:$16 sps:$4 sm:$0xff]  }
   0x8   :  { %1633 = vmatprep.subr.bf16.mxu0 %v3301_v8  ;;  %1797 = vmatprep.subr.bf16.mxu1 %v3303_v9  ;;  %v3321_v21 = vld [vmem:[%s4998_s1 + $0xac] ss:$16 sps:$4 sm:$0xff]   ;;  %v3323_v22 = vld [vmem:[%s4998_s1 + $0xa0] ss:$16 sps:$4 sm:$0xff]   ;;  %v3324_v23 = vld [vmem:[%s4998_s1 + $0xa8] ss:$16 sps:$4 sm:$0xff]  }
   0x9   :  { %v3325_v24 = vld [vmem:[%s4998_s1 + $0xc4] ss:$16 sps:$4 sm:$0xff]   ;;  %v3327_v25 = vld [vmem:[%s4998_s1 + $0xcc] ss:$16 sps:$4 sm:$0xff]   ;;  %v3329_v26 = vld [vmem:[%s4998_s1 + $0xc0] ss:$16 sps:$4 sm:$0xff]  }
   0xa   :  { %v3330_v27 = vld [vmem:[%s4998_s1 + $0xc8] ss:$16 sps:$4 sm:$0xff]   ;;  %v3331_v28 = vld [vmem:[%s4998_s1 + $0xe4] ss:$16 sps:$4 sm:$0xff]   ;;  %v3333_v29 = vld [vmem:[%s4998_s1 + $0xec] ss:$16 sps:$4 sm:$0xff]  }
   0xb   :  { %1634 = vmatpush1.bf16.msra.mxu0 %v3305_v10  ;;  %1798 = vmatpush1.bf16.msra.mxu1 %v3306_v11  ;;  %v3335_v30 = vld [vmem:[%s4998_s1 + $0xe0] ss:$16 sps:$4 sm:$0xff]   ;;  %v3336_v31 = vld [vmem:[%s4998_s1 + $0xe8] ss:$16 sps:$4 sm:$0xff]   ;;  %v3337_v32 = vld [vmem:[%s4998_s1 + $0x104] ss:$16 sps:$4 sm:$0xff]  }
   0xc   :  { %1635 = vmatprep.subr.bf16.mxu0 %v3307_v12  ;;  %1799 = vmatprep.subr.bf16.mxu1 %v3309_v13  ;;  %v3339_v33 = vld [vmem:[%s4998_s1 + $0x10c] ss:$16 sps:$4 sm:$0xff]   ;;  %v3341_v34 = vld [vmem:[%s4998_s1 + $0x100] ss:$16 sps:$4 sm:$0xff]   ;;  %v3342_v35 = vld [vmem:[%s4998_s1 + $0x108] ss:$16 sps:$4 sm:$0xff]  }
   0xd   :  { %v3343_v36 = vld [vmem:[%s4998_s1 + $0x124] ss:$16 sps:$4 sm:$0xff]   ;;  %v3345_v37 = vld [vmem:[%s4998_s1 + $0x12c] ss:$16 sps:$4 sm:$0xff]   ;;  %v3347_v38 = vld [vmem:[%s4998_s1 + $0x120] ss:$16 sps:$4 sm:$0xff]  }
   0xe   :  { %v3348_v39 = vld [vmem:[%s4998_s1 + $0x128] ss:$16 sps:$4 sm:$0xff]   ;;  %v3349_v40 = vld [vmem:[%s4998_s1 + $0x144] ss:$16 sps:$4 sm:$0xff]   ;;  %v3351_v41 = vld [vmem:[%s4998_s1 + $0x14c] ss:$16 sps:$4 sm:$0xff]  }
   0xf   :  { %1636 = vmatpush1.bf16.msra.mxu0 %v3311_v14  ;;  %1800 = vmatpush1.bf16.msra.mxu1 %v3312_v15  ;;  %v3353_v42 = vld [vmem:[%s4998_s1 + $0x140] ss:$16 sps:$4 sm:$0xff]   ;;  %v3354_v43 = vld [vmem:[%s4998_s1 + $0x148] ss:$16 sps:$4 sm:$0xff]   ;;  %v3355_v44 = vld [vmem:[%s4998_s1 + $0x164] ss:$16 sps:$4 sm:$0xff]  }
  0x10   :  { %1637 = vmatprep.subr.bf16.mxu0 %v3313_v16  ;;  %1801 = vmatprep.subr.bf16.mxu1 %v3315_v17  ;;  %v3357_v45 = vld [vmem:[%s4998_s1 + $0x16c] ss:$16 sps:$4 sm:$0xff]   ;;  %v39_v46 = vld [vmem:[%s4999_s0] sm:$0xff]  ;;  %v3360_v49 = vld [vmem:[%s4998_s1 + $0x168] ss:$16 sps:$4 sm:$0xff]  }
  0x11   :  { %v3359_v47 = vld [vmem:[%s4998_s1 + $0x160] ss:$16 sps:$4 sm:$0xff]   ;;  %v2826_v48 = vcombine.high %v39_v46, %v39_v46  ;;  %v3361_v50 = vld [vmem:[%s4998_s1 + $0x184] ss:$16 sps:$4 sm:$0xff]   ;;  %v3363_v51 = vld [vmem:[%s4998_s1 + $0x18c] ss:$16 sps:$4 sm:$0xff]   ;;  %v2825_v4 = vcombine.low %v39_v46, %v39_v46 }
  0x12   :  { %v3365_v52 = vld [vmem:[%s4998_s1 + $0x180] ss:$16 sps:$4 sm:$0xff]   ;;  %v3366_v53 = vld [vmem:[%s4998_s1 + $0x188] ss:$16 sps:$4 sm:$0xff]   ;;  %v3367_v54 = vld [vmem:[%s4998_s1 + $0x1a4] ss:$16 sps:$4 sm:$0xff]  }
  0x13   :  { %1638 = vmatpush1.bf16.msra.mxu0 %v3317_v18  ;;  %1802 = vmatpush1.bf16.msra.mxu1 %v3318_v19  ;;  %v3369_v55 = vld [vmem:[%s4998_s1 + $0x1ac] ss:$16 sps:$4 sm:$0xff]   ;;  %v3371_v56 = vld [vmem:[%s4998_s1 + $0x1a0] ss:$16 sps:$4 sm:$0xff]   ;;  %v3372_v57 = vld [vmem:[%s4998_s1 + $0x1a8] ss:$16 sps:$4 sm:$0xff]  }
  0x14   :  { %1639 = vmatprep.subr.bf16.mxu0 %v3319_v20  ;;  %1803 = vmatprep.subr.bf16.mxu1 %v3321_v21  ;;  %v3373_v58 = vld [vmem:[%s4998_s1 + $0x1c4] ss:$16 sps:$4 sm:$0xff]   ;;  %v3375_v59 = vld [vmem:[%s4998_s1 + $0x1cc] ss:$16 sps:$4 sm:$0xff]   ;;  %v3377_v60 = vld [vmem:[%s4998_s1 + $0x1c0] ss:$16 sps:$4 sm:$0xff]  }
  0x15   :  { %1661 = vmatprep.mubr.bf16.mxu0 %v2826_v48  ;;  %1825 = vmatprep.mubr.bf16.mxu1 %v2826_v48  ;;  %v3378_v61 = vld [vmem:[%s4998_s1 + $0x1c8] ss:$16 sps:$4 sm:$0xff]   ;;  %v3379_v62 = vld [vmem:[%s4998_s1 + $0x1e4] ss:$16 sps:$4 sm:$0xff]   ;;  %v3381_v63 = vld [vmem:[%s4998_s1 + $0x1ec] ss:$16 sps:$4 sm:$0xff]  }
  0x16   :  { %v3383_v0 = vld [vmem:[%s4998_s1 + $0x1e0] ss:$16 sps:$4 sm:$0xff]   ;;  %v3384_v1 = vld [vmem:[%s4998_s1 + $0x1e8] ss:$16 sps:$4 sm:$0xff]   ;;  %v3389_v2 = vld [vmem:[%s4998_s1 + $0x204] ss:$16 sps:$4 sm:$0xff]  }
  0x17   :  { %1640 = vmatpush1.bf16.msra.mxu0 %v3323_v22  ;;  %1804 = vmatpush1.bf16.msra.mxu1 %v3324_v23  ;;  %v3392_v3 = vld [vmem:[%s4998_s1 + $0x20c] ss:$16 sps:$4 sm:$0xff]   ;;  %v3387_v5 = vld [vmem:[%s4998_s1 + $0x200] ss:$16 sps:$4 sm:$0xff]   ;;  %v3390_v6 = vld [vmem:[%s4998_s1 + $0x208] ss:$16 sps:$4 sm:$0xff]  }
  0x18   :  { %1641 = vmatprep.subr.bf16.mxu0 %v3325_v24  ;;  %1805 = vmatprep.subr.bf16.mxu1 %v3327_v25  ;;  %v3395_v7 = vld [vmem:[%s4998_s1 + $0x224] ss:$16 sps:$4 sm:$0xff]   ;;  %v3398_v8 = vld [vmem:[%s4998_s1 + $0x22c] ss:$16 sps:$4 sm:$0xff]   ;;  %v3393_v9 = vld [vmem:[%s4998_s1 + $0x220] ss:$16 sps:$4 sm:$0xff]  }
  0x19   :  { %v3396_v10 = vld [vmem:[%s4998_s1 + $0x228] ss:$16 sps:$4 sm:$0xff]   ;;  %v3401_v11 = vld [vmem:[%s4998_s1 + $0x244] ss:$16 sps:$4 sm:$0xff]   ;;  %v3404_v12 = vld [vmem:[%s4998_s1 + $0x24c] ss:$16 sps:$4 sm:$0xff]  }
  0x1a   :  { %v3399_v13 = vld [vmem:[%s4998_s1 + $0x240] ss:$16 sps:$4 sm:$0xff]   ;;  %v3402_v14 = vld [vmem:[%s4998_s1 + $0x248] ss:$16 sps:$4 sm:$0xff]   ;;  %v3407_v15 = vld [vmem:[%s4998_s1 + $0x264] ss:$16 sps:$4 sm:$0xff]  }
  0x1b   :  { %1642 = vmatpush1.bf16.msra.mxu0 %v3329_v26  ;;  %1806 = vmatpush1.bf16.msra.mxu1 %v3330_v27  ;;  %v3410_v16 = vld [vmem:[%s4998_s1 + $0x26c] ss:$16 sps:$4 sm:$0xff]   ;;  %v3405_v17 = vld [vmem:[%s4998_s1 + $0x260] ss:$16 sps:$4 sm:$0xff]   ;;  %v3408_v18 = vld [vmem:[%s4998_s1 + $0x268] ss:$16 sps:$4 sm:$0xff]  }
  0x1c   :  { %1643 = vmatprep.subr.bf16.mxu0 %v3331_v28  ;;  %1807 = vmatprep.subr.bf16.mxu1 %v3333_v29  ;;  %v3413_v19 = vld [vmem:[%s4998_s1 + $0x284] ss:$16 sps:$4 sm:$0xff]   ;;  %v3416_v20 = vld [vmem:[%s4998_s1 + $0x28c] ss:$16 sps:$4 sm:$0xff]   ;;  %v3411_v21 = vld [vmem:[%s4998_s1 + $0x280] ss:$16 sps:$4 sm:$0xff]  }
  0x1d   :  { %v3414_v22 = vld [vmem:[%s4998_s1 + $0x288] ss:$16 sps:$4 sm:$0xff]   ;;  %v3419_v23 = vld [vmem:[%s4998_s1 + $0x2a4] ss:$16 sps:$4 sm:$0xff]   ;;  %v3422_v24 = vld [vmem:[%s4998_s1 + $0x2ac] ss:$16 sps:$4 sm:$0xff]  }
  0x1e   :  { %v3417_v25 = vld [vmem:[%s4998_s1 + $0x2a0] ss:$16 sps:$4 sm:$0xff]   ;;  %v3420_v26 = vld [vmem:[%s4998_s1 + $0x2a8] ss:$16 sps:$4 sm:$0xff]   ;;  %v3425_v27 = vld [vmem:[%s4998_s1 + $0x2c4] ss:$16 sps:$4 sm:$0xff]  }
  0x1f   :  { %1644 = vmatpush1.bf16.msra.mxu0 %v3335_v30  ;;  %1808 = vmatpush1.bf16.msra.mxu1 %v3336_v31  ;;  %v3428_v28 = vld [vmem:[%s4998_s1 + $0x2cc] ss:$16 sps:$4 sm:$0xff]   ;;  %v3423_v31 = vld [vmem:[%s4998_s1 + $0x2c0] ss:$16 sps:$4 sm:$0xff]   ;;  %v3450_v48 = vld [vmem:[%s4998_s1 + $0x348] ss:$16 sps:$4 sm:$0xff]  }
  0x20   :  { %1645 = vmatprep.subr.bf16.mxu0 %v3337_v32  ;;  %1809 = vmatprep.subr.bf16.mxu1 %v3339_v33  ;;  %v4143_v29 = vld [vmem:[%s4999_s0 + $0x8] sm:$0xff]  ;;  %v3431_v33 = vld [vmem:[%s4998_s1 + $0x2e4] ss:$16 sps:$4 sm:$0xff]  }
  0x21   :  { %v2828_v30 = vcombine.high %v4143_v29, %v4143_v29  ;;  %v3426_v32 = vld [vmem:[%s4998_s1 + $0x2c8] ss:$16 sps:$4 sm:$0xff]   ;;  %v3452_v46 = vld [vmem:[%s4998_s1 + $0x34c] ss:$16 sps:$4 sm:$0xff]  }
  0x23   :  { %1646 = vmatpush1.bf16.msra.mxu0 %v3341_v34  ;;  %1810 = vmatpush1.bf16.msra.mxu1 %v3342_v35  ;;  %v3434_v34 = vld [vmem:[%s4998_s1 + $0x2ec] ss:$16 sps:$4 sm:$0xff]   ;;  %v3429_v35 = vld [vmem:[%s4998_s1 + $0x2e0] ss:$16 sps:$4 sm:$0xff]  }
  0x24   :  { %1647 = vmatprep.subr.bf16.mxu0 %v3343_v36  ;;  %1811 = vmatprep.subr.bf16.mxu1 %v3345_v37  ;;  %v3432_v36 = vld [vmem:[%s4998_s1 + $0x2e8] ss:$16 sps:$4 sm:$0xff]   ;;  %v3437_v37 = vld [vmem:[%s4998_s1 + $0x304] ss:$16 sps:$4 sm:$0xff]  }
  0x27   :  { %1648 = vmatpush1.bf16.msra.mxu0 %v3347_v38  ;;  %1812 = vmatpush1.bf16.msra.mxu1 %v3348_v39  ;;  %v3440_v38 = vld [vmem:[%s4998_s1 + $0x30c] ss:$16 sps:$4 sm:$0xff]   ;;  %v3435_v39 = vld [vmem:[%s4998_s1 + $0x300] ss:$16 sps:$4 sm:$0xff]  }
  0x28   :  { %1649 = vmatprep.subr.bf16.mxu0 %v3349_v40  ;;  %1813 = vmatprep.subr.bf16.mxu1 %v3351_v41  ;;  %v3438_v40 = vld [vmem:[%s4998_s1 + $0x308] ss:$16 sps:$4 sm:$0xff]   ;;  %v3443_v41 = vld [vmem:[%s4998_s1 + $0x324] ss:$16 sps:$4 sm:$0xff]  }
  0x2b   :  { %1650 = vmatpush1.bf16.msra.mxu0 %v3353_v42  ;;  %1814 = vmatpush1.bf16.msra.mxu1 %v3354_v43  ;;  %v3446_v42 = vld [vmem:[%s4998_s1 + $0x32c] ss:$16 sps:$4 sm:$0xff]   ;;  %v3441_v43 = vld [vmem:[%s4998_s1 + $0x320] ss:$16 sps:$4 sm:$0xff]  }
  0x2c   :  { %1651 = vmatprep.subr.bf16.mxu0 %v3355_v44  ;;  %1815 = vmatprep.subr.bf16.mxu1 %v3357_v45  ;;  %v3444_v44 = vld [vmem:[%s4998_s1 + $0x328] ss:$16 sps:$4 sm:$0xff]   ;;  %v3449_v45 = vld [vmem:[%s4998_s1 + $0x344] ss:$16 sps:$4 sm:$0xff]  }
  0x2f   :  { %1652 = vmatpush1.bf16.msra.mxu0 %v3359_v47  ;;  %1816 = vmatpush1.bf16.msra.mxu1 %v3360_v49  ;;  %v3447_v47 = vld [vmem:[%s4998_s1 + $0x340] ss:$16 sps:$4 sm:$0xff]   ;;  %v3455_v49 = vld [vmem:[%s4998_s1 + $0x364] ss:$16 sps:$4 sm:$0xff]  }
  0x30   :  { %1653 = vmatprep.subr.bf16.mxu0 %v3361_v50  ;;  %1817 = vmatprep.subr.bf16.mxu1 %v3363_v51  ;;  %v3458_v50 = vld [vmem:[%s4998_s1 + $0x36c] ss:$16 sps:$4 sm:$0xff]   ;;  %v3453_v51 = vld [vmem:[%s4998_s1 + $0x360] ss:$16 sps:$4 sm:$0xff]  }
  0x33   :  { %1654 = vmatpush1.bf16.msra.mxu0 %v3365_v52  ;;  %1818 = vmatpush1.bf16.msra.mxu1 %v3366_v53  ;;  %v3456_v52 = vld [vmem:[%s4998_s1 + $0x368] ss:$16 sps:$4 sm:$0xff]   ;;  %v3461_v53 = vld [vmem:[%s4998_s1 + $0x384] ss:$16 sps:$4 sm:$0xff]  }
  0x34   :  { %1655 = vmatprep.subr.bf16.mxu0 %v3367_v54  ;;  %1819 = vmatprep.subr.bf16.mxu1 %v3369_v55  ;;  %v3464_v54 = vld [vmem:[%s4998_s1 + $0x38c] ss:$16 sps:$4 sm:$0xff]   ;;  %v3459_v55 = vld [vmem:[%s4998_s1 + $0x380] ss:$16 sps:$4 sm:$0xff]  }
  0x37   :  { %1656 = vmatpush1.bf16.msra.mxu0 %v3371_v56  ;;  %1820 = vmatpush1.bf16.msra.mxu1 %v3372_v57  ;;  %v3462_v56 = vld [vmem:[%s4998_s1 + $0x388] ss:$16 sps:$4 sm:$0xff]   ;;  %v3467_v57 = vld [vmem:[%s4998_s1 + $0x3a4] ss:$16 sps:$4 sm:$0xff]  }
  0x38   :  { %1657 = vmatprep.subr.bf16.mxu0 %v3373_v58  ;;  %1821 = vmatprep.subr.bf16.mxu1 %v3375_v59  ;;  %v3470_v58 = vld [vmem:[%s4998_s1 + $0x3ac] ss:$16 sps:$4 sm:$0xff]   ;;  %v3465_v59 = vld [vmem:[%s4998_s1 + $0x3a0] ss:$16 sps:$4 sm:$0xff]  }
  0x3b   :  { %1658 = vmatpush1.bf16.msra.mxu0 %v3377_v60  ;;  %1822 = vmatpush1.bf16.msra.mxu1 %v3378_v61  ;;  %v3468_v60 = vld [vmem:[%s4998_s1 + $0x3a8] ss:$16 sps:$4 sm:$0xff]   ;;  %v3473_v61 = vld [vmem:[%s4998_s1 + $0x3c4] ss:$16 sps:$4 sm:$0xff]  }
  0x3c   :  { %1659 = vmatprep.subr.bf16.mxu0 %v3379_v62  ;;  %1823 = vmatprep.subr.bf16.mxu1 %v3381_v63  ;;  %v3476_v62 = vld [vmem:[%s4998_s1 + $0x3cc] ss:$16 sps:$4 sm:$0xff]   ;;  %v3471_v63 = vld [vmem:[%s4998_s1 + $0x3c0] ss:$16 sps:$4 sm:$0xff]  }
  0x3f   :  { %1660 = vmatpush1.bf16.msra.mxu0 %v3383_v0  ;;  %1824 = vmatpush1.bf16.msra.mxu1 %v3384_v1  ;;  %v3474_v0 = vld [vmem:[%s4998_s1 + $0x3c8] ss:$16 sps:$4 sm:$0xff]   ;;  %v3479_v1 = vld [vmem:[%s4998_s1 + $0x3e4] ss:$16 sps:$4 sm:$0xff]  }
  0x40   :  { %1670 = vmatprep.subr.bf16.mxu0 %v3389_v2  ;;  %1834 = vmatprep.subr.bf16.mxu1 %v3392_v3  ;;  %v3482_v2 = vld [vmem:[%s4998_s1 + $0x3ec] ss:$16 sps:$4 sm:$0xff]   ;;  %v3477_v3 = vld [vmem:[%s4998_s1 + $0x3e0] ss:$16 sps:$4 sm:$0xff]  }
  0x42   :  { %1662 = vmatmul.mubr.bf16.vlgmr.msra.gmra.mrb[0].mxu0 %v2825_v4  ;;  %1826 = vmatmul.mubr.bf16.vlgmr.msra.gmra.mrb[0].mxu1 %v2825_v4  ;;  %v3480_v4 = vld [vmem:[%s4998_s1 + $0x3e8] ss:$16 sps:$4 sm:$0xff]  }
  0x43   :  { %1671 = vmatpush1.bf16.msra.mxu0 %v3387_v5  ;;  %1835 = vmatpush1.bf16.msra.mxu1 %v3390_v6  ;;  %v3487_v5 = vld [vmem:[%s4998_s1 + $0x404] ss:$16 sps:$4 sm:$0xff]   ;;  %v3490_v6 = vld [vmem:[%s4998_s1 + $0x40c] ss:$16 sps:$4 sm:$0xff]  }
  0x44   :  { %1672 = vmatprep.subr.bf16.mxu0 %v3395_v7  ;;  %1836 = vmatprep.subr.bf16.mxu1 %v3398_v8  ;;  %v2827_v7 = vcombine.low %v4143_v29, %v4143_v29  ;;  %v3485_v8 = vld [vmem:[%s4998_s1 + $0x400] ss:$16 sps:$4 sm:$0xff]   ;;  %v3520_v29 = vld [vmem:[%s4998_s1 + $0x4ac] ss:$16 sps:$4 sm:$0xff]  }
  0x45   :  { %1702 = vmatprep.mubr.bf16.mxu0 %v2828_v30  ;;  %1866 = vmatprep.mubr.bf16.mxu1 %v2828_v30  ;;  %v3515_v30 = vld [vmem:[%s4998_s1 + $0x4a0] ss:$16 sps:$4 sm:$0xff]  }
  0x47   :  { %1673 = vmatpush1.bf16.msra.mxu0 %v3393_v9  ;;  %1837 = vmatpush1.bf16.msra.mxu1 %v3396_v10  ;;  %v3488_v9 = vld [vmem:[%s4998_s1 + $0x408] ss:$16 sps:$4 sm:$0xff]   ;;  %v3493_v10 = vld [vmem:[%s4998_s1 + $0x424] ss:$16 sps:$4 sm:$0xff]  }
  0x48   :  { %1674 = vmatprep.subr.bf16.mxu0 %v3401_v11  ;;  %1838 = vmatprep.subr.bf16.mxu1 %v3404_v12  ;;  %v4281_v11 = vld [vmem:[%s4999_s0 + $0x10] sm:$0xff]  ;;  %v3496_v12 = vld [vmem:[%s4998_s1 + $0x42c] ss:$16 sps:$4 sm:$0xff]  }
  0x4b   :  { %1675 = vmatpush1.bf16.msra.mxu0 %v3399_v13  ;;  %1839 = vmatpush1.bf16.msra.mxu1 %v3402_v14  ;;  %v2830_v13 = vcombine.high %v4281_v11, %v4281_v11  ;;  %v3491_v14 = vld [vmem:[%s4998_s1 + $0x420] ss:$16 sps:$4 sm:$0xff]  }
  0x4c   :  { %1676 = vmatprep.subr.bf16.mxu0 %v3407_v15  ;;  %1840 = vmatprep.subr.bf16.mxu1 %v3410_v16  ;;  %v3494_v15 = vld [vmem:[%s4998_s1 + $0x428] ss:$16 sps:$4 sm:$0xff]   ;;  %v3499_v16 = vld [vmem:[%s4998_s1 + $0x444] ss:$16 sps:$4 sm:$0xff]  }
  0x4f   :  { %1677 = vmatpush1.bf16.msra.mxu0 %v3405_v17  ;;  %1841 = vmatpush1.bf16.msra.mxu1 %v3408_v18  ;;  %v3502_v17 = vld [vmem:[%s4998_s1 + $0x44c] ss:$16 sps:$4 sm:$0xff]   ;;  %v3497_v18 = vld [vmem:[%s4998_s1 + $0x440] ss:$16 sps:$4 sm:$0xff]  }
  0x50   :  { %1678 = vmatprep.subr.bf16.mxu0 %v3413_v19  ;;  %1842 = vmatprep.subr.bf16.mxu1 %v3416_v20  ;;  %v3500_v19 = vld [vmem:[%s4998_s1 + $0x448] ss:$16 sps:$4 sm:$0xff]   ;;  %v3505_v20 = vld [vmem:[%s4998_s1 + $0x464] ss:$16 sps:$4 sm:$0xff]  }
  0x53   :  { %1679 = vmatpush1.bf16.msra.mxu0 %v3411_v21  ;;  %1843 = vmatpush1.bf16.msra.mxu1 %v3414_v22  ;;  %v3508_v21 = vld [vmem:[%s4998_s1 + $0x46c] ss:$16 sps:$4 sm:$0xff]   ;;  %v3503_v22 = vld [vmem:[%s4998_s1 + $0x460] ss:$16 sps:$4 sm:$0xff]  }
  0x54   :  { %1680 = vmatprep.subr.bf16.mxu0 %v3419_v23  ;;  %1844 = vmatprep.subr.bf16.mxu1 %v3422_v24  ;;  %v3506_v23 = vld [vmem:[%s4998_s1 + $0x468] ss:$16 sps:$4 sm:$0xff]   ;;  %v3511_v24 = vld [vmem:[%s4998_s1 + $0x484] ss:$16 sps:$4 sm:$0xff]  }
  0x57   :  { %1681 = vmatpush1.bf16.msra.mxu0 %v3417_v25  ;;  %1845 = vmatpush1.bf16.msra.mxu1 %v3420_v26  ;;  %v3514_v25 = vld [vmem:[%s4998_s1 + $0x48c] ss:$16 sps:$4 sm:$0xff]   ;;  %v3509_v26 = vld [vmem:[%s4998_s1 + $0x480] ss:$16 sps:$4 sm:$0xff]  }
  0x58   :  { %1682 = vmatprep.subr.bf16.mxu0 %v3425_v27  ;;  %1846 = vmatprep.subr.bf16.mxu1 %v3428_v28  ;;  %v3512_v27 = vld [vmem:[%s4998_s1 + $0x488] ss:$16 sps:$4 sm:$0xff]   ;;  %v3517_v28 = vld [vmem:[%s4998_s1 + $0x4a4] ss:$16 sps:$4 sm:$0xff]  }
  0x5b   :  { %1683 = vmatpush1.bf16.msra.mxu0 %v3423_v31  ;;  %1847 = vmatpush1.bf16.msra.mxu1 %v3426_v32  ;;  %v3518_v31 = vld [vmem:[%s4998_s1 + $0x4a8] ss:$16 sps:$4 sm:$0xff]   ;;  %v3523_v32 = vld [vmem:[%s4998_s1 + $0x4c4] ss:$16 sps:$4 sm:$0xff]  }
  0x5c   :  { %1684 = vmatprep.subr.bf16.mxu0 %v3431_v33  ;;  %1848 = vmatprep.subr.bf16.mxu1 %v3434_v34  ;;  %v3526_v33 = vld [vmem:[%s4998_s1 + $0x4cc] ss:$16 sps:$4 sm:$0xff]   ;;  %v3521_v34 = vld [vmem:[%s4998_s1 + $0x4c0] ss:$16 sps:$4 sm:$0xff]  }
  0x5f   :  { %1685 = vmatpush1.bf16.msra.mxu0 %v3429_v35  ;;  %1849 = vmatpush1.bf16.msra.mxu1 %v3432_v36  ;;  %v3524_v35 = vld [vmem:[%s4998_s1 + $0x4c8] ss:$16 sps:$4 sm:$0xff]   ;;  %v3529_v36 = vld [vmem:[%s4998_s1 + $0x4e4] ss:$16 sps:$4 sm:$0xff]  }
  0x60   :  { %1686 = vmatprep.subr.bf16.mxu0 %v3437_v37  ;;  %1850 = vmatprep.subr.bf16.mxu1 %v3440_v38  ;;  %v3532_v37 = vld [vmem:[%s4998_s1 + $0x4ec] ss:$16 sps:$4 sm:$0xff]   ;;  %v3527_v38 = vld [vmem:[%s4998_s1 + $0x4e0] ss:$16 sps:$4 sm:$0xff]  }
  0x63   :  { %1687 = vmatpush1.bf16.msra.mxu0 %v3435_v39  ;;  %1851 = vmatpush1.bf16.msra.mxu1 %v3438_v40  ;;  %v3530_v39 = vld [vmem:[%s4998_s1 + $0x4e8] ss:$16 sps:$4 sm:$0xff]   ;;  %v3535_v40 = vld [vmem:[%s4998_s1 + $0x504] ss:$16 sps:$4 sm:$0xff]  }
  0x64   :  { %1688 = vmatprep.subr.bf16.mxu0 %v3443_v41  ;;  %1852 = vmatprep.subr.bf16.mxu1 %v3446_v42  ;;  %v3538_v41 = vld [vmem:[%s4998_s1 + $0x50c] ss:$16 sps:$4 sm:$0xff]   ;;  %v3533_v42 = vld [vmem:[%s4998_s1 + $0x500] ss:$16 sps:$4 sm:$0xff]  }
  0x67   :  { %1689 = vmatpush1.bf16.msra.mxu0 %v3441_v43  ;;  %1853 = vmatpush1.bf16.msra.mxu1 %v3444_v44  ;;  %v3536_v43 = vld [vmem:[%s4998_s1 + $0x508] ss:$16 sps:$4 sm:$0xff]   ;;  %v3541_v44 = vld [vmem:[%s4998_s1 + $0x524] ss:$16 sps:$4 sm:$0xff]  }
  0x68   :  { %1690 = vmatprep.subr.bf16.mxu0 %v3449_v45  ;;  %1854 = vmatprep.subr.bf16.mxu1 %v3452_v46  ;;  %v3544_v45 = vld [vmem:[%s4998_s1 + $0x52c] ss:$16 sps:$4 sm:$0xff]   ;;  %v3539_v46 = vld [vmem:[%s4998_s1 + $0x520] ss:$16 sps:$4 sm:$0xff]  }
  0x6b   :  { %1691 = vmatpush1.bf16.msra.mxu0 %v3447_v47  ;;  %1855 = vmatpush1.bf16.msra.mxu1 %v3450_v48  ;;  %v3542_v47 = vld [vmem:[%s4998_s1 + $0x528] ss:$16 sps:$4 sm:$0xff]   ;;  %v3547_v48 = vld [vmem:[%s4998_s1 + $0x544] ss:$16 sps:$4 sm:$0xff]  }
  0x6c   :  { %1692 = vmatprep.subr.bf16.mxu0 %v3455_v49  ;;  %1856 = vmatprep.subr.bf16.mxu1 %v3458_v50  ;;  %v3550_v49 = vld [vmem:[%s4998_s1 + $0x54c] ss:$16 sps:$4 sm:$0xff]   ;;  %v3545_v50 = vld [vmem:[%s4998_s1 + $0x540] ss:$16 sps:$4 sm:$0xff]  }
  0x6f   :  { %1693 = vmatpush1.bf16.msra.mxu0 %v3453_v51  ;;  %1857 = vmatpush1.bf16.msra.mxu1 %v3456_v52  ;;  %v3548_v51 = vld [vmem:[%s4998_s1 + $0x548] ss:$16 sps:$4 sm:$0xff]   ;;  %v3553_v52 = vld [vmem:[%s4998_s1 + $0x564] ss:$16 sps:$4 sm:$0xff]  }
  0x70   :  { %1694 = vmatprep.subr.bf16.mxu0 %v3461_v53  ;;  %1858 = vmatprep.subr.bf16.mxu1 %v3464_v54  ;;  %v3556_v53 = vld [vmem:[%s4998_s1 + $0x56c] ss:$16 sps:$4 sm:$0xff]   ;;  %v3551_v54 = vld [vmem:[%s4998_s1 + $0x560] ss:$16 sps:$4 sm:$0xff]  }
  0x73   :  { %1695 = vmatpush1.bf16.msra.mxu0 %v3459_v55  ;;  %1859 = vmatpush1.bf16.msra.mxu1 %v3462_v56  ;;  %v3554_v55 = vld [vmem:[%s4998_s1 + $0x568] ss:$16 sps:$4 sm:$0xff]   ;;  %v3559_v56 = vld [vmem:[%s4998_s1 + $0x584] ss:$16 sps:$4 sm:$0xff]  }
  0x74   :  { %1696 = vmatprep.subr.bf16.mxu0 %v3467_v57  ;;  %1860 = vmatprep.subr.bf16.mxu1 %v3470_v58  ;;  %v3562_v57 = vld [vmem:[%s4998_s1 + $0x58c] ss:$16 sps:$4 sm:$0xff]   ;;  %v3557_v58 = vld [vmem:[%s4998_s1 + $0x580] ss:$16 sps:$4 sm:$0xff]  }
  0x77   :  { %1697 = vmatpush1.bf16.msra.mxu0 %v3465_v59  ;;  %1861 = vmatpush1.bf16.msra.mxu1 %v3468_v60  ;;  %v3560_v59 = vld [vmem:[%s4998_s1 + $0x588] ss:$16 sps:$4 sm:$0xff]   ;;  %v3565_v60 = vld [vmem:[%s4998_s1 + $0x5a4] ss:$16 sps:$4 sm:$0xff]  }
  0x78   :  { %1698 = vmatprep.subr.bf16.mxu0 %v3473_v61  ;;  %1862 = vmatprep.subr.bf16.mxu1 %v3476_v62  ;;  %v3568_v61 = vld [vmem:[%s4998_s1 + $0x5ac] ss:$16 sps:$4 sm:$0xff]   ;;  %v3563_v62 = vld [vmem:[%s4998_s1 + $0x5a0] ss:$16 sps:$4 sm:$0xff]  }
  0x7b   :  { %1699 = vmatpush1.bf16.msra.mxu0 %v3471_v63  ;;  %1863 = vmatpush1.bf16.msra.mxu1 %v3474_v0  ;;  %v3566_v63 = vld [vmem:[%s4998_s1 + $0x5a8] ss:$16 sps:$4 sm:$0xff]   ;;  %v3571_v0 = vld [vmem:[%s4998_s1 + $0x5c4] ss:$16 sps:$4 sm:$0xff]  }
  0x7c   :  { %1700 = vmatprep.subr.bf16.mxu0 %v3479_v1  ;;  %1864 = vmatprep.subr.bf16.mxu1 %v3482_v2  ;;  %v3574_v1 = vld [vmem:[%s4998_s1 + $0x5cc] ss:$16 sps:$4 sm:$0xff]   ;;  %v3569_v2 = vld [vmem:[%s4998_s1 + $0x5c0] ss:$16 sps:$4 sm:$0xff]  }
  0x7f   :  { %1701 = vmatpush1.bf16.msra.mxu0 %v3477_v3  ;;  %1865 = vmatpush1.bf16.msra.mxu1 %v3480_v4  ;;  %v3572_v3 = vld [vmem:[%s4998_s1 + $0x5c8] ss:$16 sps:$4 sm:$0xff]   ;;  %v3577_v4 = vld [vmem:[%s4998_s1 + $0x5e4] ss:$16 sps:$4 sm:$0xff]  }
  0x80   :  { %1711 = vmatprep.subr.bf16.mxu0 %v3487_v5  ;;  %1875 = vmatprep.subr.bf16.mxu1 %v3490_v6  ;;  %v3580_v5 = vld [vmem:[%s4998_s1 + $0x5ec] ss:$16 sps:$4 sm:$0xff]   ;;  %v3575_v6 = vld [vmem:[%s4998_s1 + $0x5e0] ss:$16 sps:$4 sm:$0xff]  }
  0x82   :  { %1703 = vmatmul.mubr.bf16.vlgmr.msra.gmra.mrb[0].mxu0 %v2827_v7  ;;  %1867 = vmatmul.mubr.bf16.vlgmr.msra.gmra.mrb[0].mxu1 %v2827_v7  ;;  %v3578_v7 = vld [vmem:[%s4998_s1 + $0x5e8] ss:$16 sps:$4 sm:$0xff]  }
  0x83   :  { %1712 = vmatpush1.bf16.msra.mxu0 %v3485_v8  ;;  %1876 = vmatpush1.bf16.msra.mxu1 %v3488_v9  ;;  %v3585_v8 = vld [vmem:[%s4998_s1 + $0x604] ss:$16 sps:$4 sm:$0xff]   ;;  %v3588_v9 = vld [vmem:[%s4998_s1 + $0x60c] ss:$16 sps:$4 sm:$0xff]  }
  0x84   :  { %1713 = vmatprep.subr.bf16.mxu0 %v3493_v10  ;;  %1877 = vmatprep.subr.bf16.mxu1 %v3496_v12  ;;  %v3583_v10 = vld [vmem:[%s4998_s1 + $0x600] ss:$16 sps:$4 sm:$0xff]   ;;  %v3586_v12 = vld [vmem:[%s4998_s1 + $0x608] ss:$16 sps:$4 sm:$0xff]  }
  0x85   :  { %1743 = vmatprep.mubr.bf16.mxu0 %v2830_v13  ;;  %1907 = vmatprep.mubr.bf16.mxu1 %v2830_v13  ;;  %v4477_v13 = vld [vmem:[%s4999_s0 + $0x18] sm:$0xff] }
  0x87   :  { %1714 = vmatpush1.bf16.msra.mxu0 %v3491_v14  ;;  %1878 = vmatpush1.bf16.msra.mxu1 %v3494_v15  ;;  %v2829_v14 = vcombine.low %v4281_v11, %v4281_v11  ;;  %v3591_v15 = vld [vmem:[%s4998_s1 + $0x624] ss:$16 sps:$4 sm:$0xff]   ;;  %v3592_v11 = vld [vmem:[%s4998_s1 + $0x628] ss:$16 sps:$4 sm:$0xff]  }
  0x88   :  { %1715 = vmatprep.subr.bf16.mxu0 %v3499_v16  ;;  %1879 = vmatprep.subr.bf16.mxu1 %v3502_v17  ;;  %v3594_v16 = vld [vmem:[%s4998_s1 + $0x62c] ss:$16 sps:$4 sm:$0xff]   ;;  %v3589_v17 = vld [vmem:[%s4998_s1 + $0x620] ss:$16 sps:$4 sm:$0xff]  }
  0x8b   :  { %1716 = vmatpush1.bf16.msra.mxu0 %v3497_v18  ;;  %1880 = vmatpush1.bf16.msra.mxu1 %v3500_v19  ;;  %v2832_v18 = vcombine.high %v4477_v13, %v4477_v13  ;;  %v3597_v19 = vld [vmem:[%s4998_s1 + $0x644] ss:$16 sps:$4 sm:$0xff]  }
  0x8c   :  { %1717 = vmatprep.subr.bf16.mxu0 %v3505_v20  ;;  %1881 = vmatprep.subr.bf16.mxu1 %v3508_v21  ;;  %v3600_v20 = vld [vmem:[%s4998_s1 + $0x64c] ss:$16 sps:$4 sm:$0xff]   ;;  %v3595_v21 = vld [vmem:[%s4998_s1 + $0x640] ss:$16 sps:$4 sm:$0xff]  }
  0x8f   :  { %1718 = vmatpush1.bf16.msra.mxu0 %v3503_v22  ;;  %1882 = vmatpush1.bf16.msra.mxu1 %v3506_v23  ;;  %v3598_v22 = vld [vmem:[%s4998_s1 + $0x648] ss:$16 sps:$4 sm:$0xff]   ;;  %v3603_v23 = vld [vmem:[%s4998_s1 + $0x664] ss:$16 sps:$4 sm:$0xff]  }
  0x90   :  { %1719 = vmatprep.subr.bf16.mxu0 %v3511_v24  ;;  %1883 = vmatprep.subr.bf16.mxu1 %v3514_v25  ;;  %v3606_v24 = vld [vmem:[%s4998_s1 + $0x66c] ss:$16 sps:$4 sm:$0xff]   ;;  %v3601_v25 = vld [vmem:[%s4998_s1 + $0x660] ss:$16 sps:$4 sm:$0xff]  }
  0x93   :  { %1720 = vmatpush1.bf16.msra.mxu0 %v3509_v26  ;;  %1884 = vmatpush1.bf16.msra.mxu1 %v3512_v27  ;;  %v3604_v26 = vld [vmem:[%s4998_s1 + $0x668] ss:$16 sps:$4 sm:$0xff]   ;;  %v3609_v27 = vld [vmem:[%s4998_s1 + $0x684] ss:$16 sps:$4 sm:$0xff]  }
  0x94   :  { %1721 = vmatprep.subr.bf16.mxu0 %v3517_v28  ;;  %1885 = vmatprep.subr.bf16.mxu1 %v3520_v29  ;;  %v3612_v28 = vld [vmem:[%s4998_s1 + $0x68c] ss:$16 sps:$4 sm:$0xff]   ;;  %v3607_v29 = vld [vmem:[%s4998_s1 + $0x680] ss:$16 sps:$4 sm:$0xff]  }
  0x97   :  { %1722 = vmatpush1.bf16.msra.mxu0 %v3515_v30  ;;  %1886 = vmatpush1.bf16.msra.mxu1 %v3518_v31  ;;  %v3610_v30 = vld [vmem:[%s4998_s1 + $0x688] ss:$16 sps:$4 sm:$0xff]   ;;  %v3615_v31 = vld [vmem:[%s4998_s1 + $0x6a4] ss:$16 sps:$4 sm:$0xff]  }
  0x98   :  { %1723 = vmatprep.subr.bf16.mxu0 %v3523_v32  ;;  %1887 = vmatprep.subr.bf16.mxu1 %v3526_v33  ;;  %v3618_v32 = vld [vmem:[%s4998_s1 + $0x6ac] ss:$16 sps:$4 sm:$0xff]   ;;  %v3613_v33 = vld [vmem:[%s4998_s1 + $0x6a0] ss:$16 sps:$4 sm:$0xff]  }
  0x9b   :  { %1724 = vmatpush1.bf16.msra.mxu0 %v3521_v34  ;;  %1888 = vmatpush1.bf16.msra.mxu1 %v3524_v35  ;;  %v3616_v34 = vld [vmem:[%s4998_s1 + $0x6a8] ss:$16 sps:$4 sm:$0xff]   ;;  %v3621_v35 = vld [vmem:[%s4998_s1 + $0x6c4] ss:$16 sps:$4 sm:$0xff]  }
  0x9c   :  { %1725 = vmatprep.subr.bf16.mxu0 %v3529_v36  ;;  %1889 = vmatprep.subr.bf16.mxu1 %v3532_v37  ;;  %v3624_v36 = vld [vmem:[%s4998_s1 + $0x6cc] ss:$16 sps:$4 sm:$0xff]   ;;  %v3619_v37 = vld [vmem:[%s4998_s1 + $0x6c0] ss:$16 sps:$4 sm:$0xff]  }
  0x9f   :  { %1726 = vmatpush1.bf16.msra.mxu0 %v3527_v38  ;;  %1890 = vmatpush1.bf16.msra.mxu1 %v3530_v39  ;;  %v3622_v38 = vld [vmem:[%s4998_s1 + $0x6c8] ss:$16 sps:$4 sm:$0xff]   ;;  %v3627_v39 = vld [vmem:[%s4998_s1 + $0x6e4] ss:$16 sps:$4 sm:$0xff]  }
  0xa0   :  { %1727 = vmatprep.subr.bf16.mxu0 %v3535_v40  ;;  %1891 = vmatprep.subr.bf16.mxu1 %v3538_v41  ;;  %v3630_v40 = vld [vmem:[%s4998_s1 + $0x6ec] ss:$16 sps:$4 sm:$0xff]   ;;  %v3625_v41 = vld [vmem:[%s4998_s1 + $0x6e0] ss:$16 sps:$4 sm:$0xff]  }
  0xa3   :  { %1728 = vmatpush1.bf16.msra.mxu0 %v3533_v42  ;;  %1892 = vmatpush1.bf16.msra.mxu1 %v3536_v43  ;;  %v3628_v42 = vld [vmem:[%s4998_s1 + $0x6e8] ss:$16 sps:$4 sm:$0xff]   ;;  %v3633_v43 = vld [vmem:[%s4998_s1 + $0x704] ss:$16 sps:$4 sm:$0xff]  }
  0xa4   :  { %1729 = vmatprep.subr.bf16.mxu0 %v3541_v44  ;;  %1893 = vmatprep.subr.bf16.mxu1 %v3544_v45  ;;  %v3636_v44 = vld [vmem:[%s4998_s1 + $0x70c] ss:$16 sps:$4 sm:$0xff]   ;;  %v3631_v45 = vld [vmem:[%s4998_s1 + $0x700] ss:$16 sps:$4 sm:$0xff]  }
  0xa7   :  { %1730 = vmatpush1.bf16.msra.mxu0 %v3539_v46  ;;  %1894 = vmatpush1.bf16.msra.mxu1 %v3542_v47  ;;  %v3634_v46 = vld [vmem:[%s4998_s1 + $0x708] ss:$16 sps:$4 sm:$0xff]   ;;  %v3639_v47 = vld [vmem:[%s4998_s1 + $0x724] ss:$16 sps:$4 sm:$0xff]  }
  0xa8   :  { %1731 = vmatprep.subr.bf16.mxu0 %v3547_v48  ;;  %1895 = vmatprep.subr.bf16.mxu1 %v3550_v49  ;;  %v3642_v48 = vld [vmem:[%s4998_s1 + $0x72c] ss:$16 sps:$4 sm:$0xff]   ;;  %v3637_v49 = vld [vmem:[%s4998_s1 + $0x720] ss:$16 sps:$4 sm:$0xff]  }
  0xab   :  { %1732 = vmatpush1.bf16.msra.mxu0 %v3545_v50  ;;  %1896 = vmatpush1.bf16.msra.mxu1 %v3548_v51  ;;  %v3640_v50 = vld [vmem:[%s4998_s1 + $0x728] ss:$16 sps:$4 sm:$0xff]   ;;  %v3645_v51 = vld [vmem:[%s4998_s1 + $0x744] ss:$16 sps:$4 sm:$0xff]  }
  0xac   :  { %1733 = vmatprep.subr.bf16.mxu0 %v3553_v52  ;;  %1897 = vmatprep.subr.bf16.mxu1 %v3556_v53  ;;  %v3648_v52 = vld [vmem:[%s4998_s1 + $0x74c] ss:$16 sps:$4 sm:$0xff]   ;;  %v3643_v53 = vld [vmem:[%s4998_s1 + $0x740] ss:$16 sps:$4 sm:$0xff]  }
  0xaf   :  { %1734 = vmatpush1.bf16.msra.mxu0 %v3551_v54  ;;  %1898 = vmatpush1.bf16.msra.mxu1 %v3554_v55  ;;  %v3646_v54 = vld [vmem:[%s4998_s1 + $0x748] ss:$16 sps:$4 sm:$0xff]   ;;  %v3651_v55 = vld [vmem:[%s4998_s1 + $0x764] ss:$16 sps:$4 sm:$0xff]  }
  0xb0   :  { %1735 = vmatprep.subr.bf16.mxu0 %v3559_v56  ;;  %1899 = vmatprep.subr.bf16.mxu1 %v3562_v57  ;;  %v3654_v56 = vld [vmem:[%s4998_s1 + $0x76c] ss:$16 sps:$4 sm:$0xff]   ;;  %v3649_v57 = vld [vmem:[%s4998_s1 + $0x760] ss:$16 sps:$4 sm:$0xff]  }
  0xb3   :  { %1736 = vmatpush1.bf16.msra.mxu0 %v3557_v58  ;;  %1900 = vmatpush1.bf16.msra.mxu1 %v3560_v59  ;;  %v3652_v58 = vld [vmem:[%s4998_s1 + $0x768] ss:$16 sps:$4 sm:$0xff]   ;;  %v3657_v59 = vld [vmem:[%s4998_s1 + $0x784] ss:$16 sps:$4 sm:$0xff]  }
  0xb4   :  { %1737 = vmatprep.subr.bf16.mxu0 %v3565_v60  ;;  %1901 = vmatprep.subr.bf16.mxu1 %v3568_v61  ;;  %v3660_v60 = vld [vmem:[%s4998_s1 + $0x78c] ss:$16 sps:$4 sm:$0xff]   ;;  %v3655_v61 = vld [vmem:[%s4998_s1 + $0x780] ss:$16 sps:$4 sm:$0xff]  }
  0xb7   :  { %1738 = vmatpush1.bf16.msra.mxu0 %v3563_v62  ;;  %1902 = vmatpush1.bf16.msra.mxu1 %v3566_v63  ;;  %v3658_v62 = vld [vmem:[%s4998_s1 + $0x788] ss:$16 sps:$4 sm:$0xff]   ;;  %v3663_v63 = vld [vmem:[%s4998_s1 + $0x7a4] ss:$16 sps:$4 sm:$0xff]  }
  0xb8   :  { %1739 = vmatprep.subr.bf16.mxu0 %v3571_v0  ;;  %1903 = vmatprep.subr.bf16.mxu1 %v3574_v1  ;;  %v3666_v0 = vld [vmem:[%s4998_s1 + $0x7ac] ss:$16 sps:$4 sm:$0xff]   ;;  %v3661_v1 = vld [vmem:[%s4998_s1 + $0x7a0] ss:$16 sps:$4 sm:$0xff]  }
  0xbb   :  { %1740 = vmatpush1.bf16.msra.mxu0 %v3569_v2  ;;  %1904 = vmatpush1.bf16.msra.mxu1 %v3572_v3  ;;  %v3664_v2 = vld [vmem:[%s4998_s1 + $0x7a8] ss:$16 sps:$4 sm:$0xff]   ;;  %v3669_v3 = vld [vmem:[%s4998_s1 + $0x7c4] ss:$16 sps:$4 sm:$0xff]  }
  0xbc   :  { %1741 = vmatprep.subr.bf16.mxu0 %v3577_v4  ;;  %1905 = vmatprep.subr.bf16.mxu1 %v3580_v5  ;;  %v3672_v4 = vld [vmem:[%s4998_s1 + $0x7cc] ss:$16 sps:$4 sm:$0xff]   ;;  %v3667_v5 = vld [vmem:[%s4998_s1 + $0x7c0] ss:$16 sps:$4 sm:$0xff]  }
  0xbf   :  { %1742 = vmatpush1.bf16.msra.mxu0 %v3575_v6  ;;  %1906 = vmatpush1.bf16.msra.mxu1 %v3578_v7  ;;  %v3670_v6 = vld [vmem:[%s4998_s1 + $0x7c8] ss:$16 sps:$4 sm:$0xff]   ;;  %v3675_v7 = vld [vmem:[%s4998_s1 + $0x7e4] ss:$16 sps:$4 sm:$0xff]  }
  0xc0   :  { %1752 = vmatprep.subr.bf16.mxu0 %v3585_v8  ;;  %1916 = vmatprep.subr.bf16.mxu1 %v3588_v9  ;;  %v3678_v8 = vld [vmem:[%s4998_s1 + $0x7ec] ss:$16 sps:$4 sm:$0xff]   ;;  %v3673_v9 = vld [vmem:[%s4998_s1 + $0x7e0] ss:$16 sps:$4 sm:$0xff]  }
  0xc2   :  { %1744 = vmatmul.mubr.bf16.vlgmr.msra.gmra.mrb[0].mxu0 %v2829_v14  ;;  %1908 = vmatmul.mubr.bf16.vlgmr.msra.gmra.mrb[0].mxu1 %v2829_v14  ;;  %v2831_v14 = vcombine.low %v4477_v13, %v4477_v13  ;;  %v3689_v13 = vld [vmem:[%s5000_s3 + $0x24] ss:$8 sps:$4 sm:$0xff]  }
  0xc3   :  { %1753 = vmatpush1.bf16.msra.mxu0 %v3583_v10  ;;  %1917 = vmatpush1.bf16.msra.mxu1 %v3586_v12  ;;  %v3676_v10 = vld [vmem:[%s4998_s1 + $0x7e8] ss:$16 sps:$4 sm:$0xff]   ;;  %v3683_v12 = vld [vmem:[%s5000_s3 + $0x4] ss:$8 sps:$4 sm:$0xff]  }
  0xc4   :  { %1754 = vmatprep.subr.bf16.mxu0 %v3591_v15  ;;  %1918 = vmatprep.subr.bf16.mxu1 %v3594_v16  ;;  %v3681_v15 = vld [vmem:[%s5000_s3] ss:$8 sps:$4 sm:$0xff]   ;;  %v3686_v16 = vld [vmem:[%s5000_s3 + $0x14] ss:$8 sps:$4 sm:$0xff]  }
  0xc5   :  { %1784 = vmatprep.mubr.bf16.mxu0 %v2832_v18  ;;  %1948 = vmatprep.mubr.bf16.mxu1 %v2832_v18  ;;  %v3692_v18 = vld [vmem:[%s5000_s3 + $0x34] ss:$8 sps:$4 sm:$0xff]  }
  0xc7   :  { %1755 = vmatpush1.bf16.msra.mxu0 %v3589_v17  ;;  %1919 = vmatpush1.bf16.msra.mxu1 %v3592_v11  ;;  %v3684_v17 = vld [vmem:[%s5000_s3 + $0x10] ss:$8 sps:$4 sm:$0xff]   ;;  %v3687_v11 = vld [vmem:[%s5000_s3 + $0x20] ss:$8 sps:$4 sm:$0xff]  }
  0xc8   :  { %1756 = vmatprep.subr.bf16.mxu0 %v3597_v19  ;;  %1920 = vmatprep.subr.bf16.mxu1 %v3600_v20  ;;  %v3690_v19 = vld [vmem:[%s5000_s3 + $0x30] ss:$8 sps:$4 sm:$0xff]   ;;  %v3695_v20 = vld [vmem:[%s5000_s3 + $0x44] ss:$8 sps:$4 sm:$0xff]  }
  0xcb   :  { %1757 = vmatpush1.bf16.msra.mxu0 %v3595_v21  ;;  %1921 = vmatpush1.bf16.msra.mxu1 %v3598_v22  ;;  %v3693_v21 = vld [vmem:[%s5000_s3 + $0x40] ss:$8 sps:$4 sm:$0xff]   ;;  %v3698_v22 = vld [vmem:[%s5000_s3 + $0x54] ss:$8 sps:$4 sm:$0xff]  }
  0xcc   :  { %1758 = vmatprep.subr.bf16.mxu0 %v3603_v23  ;;  %1922 = vmatprep.subr.bf16.mxu1 %v3606_v24  ;;  %v3696_v23 = vld [vmem:[%s5000_s3 + $0x50] ss:$8 sps:$4 sm:$0xff]   ;;  %v3701_v24 = vld [vmem:[%s5000_s3 + $0x64] ss:$8 sps:$4 sm:$0xff]  }
  0xcf   :  { %1759 = vmatpush1.bf16.msra.mxu0 %v3601_v25  ;;  %1923 = vmatpush1.bf16.msra.mxu1 %v3604_v26  ;;  %v3699_v25 = vld [vmem:[%s5000_s3 + $0x60] ss:$8 sps:$4 sm:$0xff]   ;;  %v3704_v26 = vld [vmem:[%s5000_s3 + $0x74] ss:$8 sps:$4 sm:$0xff]  }
  0xd0   :  { %1760 = vmatprep.subr.bf16.mxu0 %v3609_v27  ;;  %1924 = vmatprep.subr.bf16.mxu1 %v3612_v28  ;;  %v3702_v27 = vld [vmem:[%s5000_s3 + $0x70] ss:$8 sps:$4 sm:$0xff]   ;;  %v3707_v28 = vld [vmem:[%s5000_s3 + $0x84] ss:$8 sps:$4 sm:$0xff]  }
  0xd3   :  { %1761 = vmatpush1.bf16.msra.mxu0 %v3607_v29  ;;  %1925 = vmatpush1.bf16.msra.mxu1 %v3610_v30  ;;  %v3705_v29 = vld [vmem:[%s5000_s3 + $0x80] ss:$8 sps:$4 sm:$0xff]   ;;  %v3710_v30 = vld [vmem:[%s5000_s3 + $0x94] ss:$8 sps:$4 sm:$0xff]  }
  0xd4   :  { %1762 = vmatprep.subr.bf16.mxu0 %v3615_v31  ;;  %1926 = vmatprep.subr.bf16.mxu1 %v3618_v32  ;;  %v3708_v31 = vld [vmem:[%s5000_s3 + $0x90] ss:$8 sps:$4 sm:$0xff]   ;;  %v3713_v32 = vld [vmem:[%s5000_s3 + $0xa4] ss:$8 sps:$4 sm:$0xff]  }
  0xd7   :  { %1763 = vmatpush1.bf16.msra.mxu0 %v3613_v33  ;;  %1927 = vmatpush1.bf16.msra.mxu1 %v3616_v34  ;;  %v3711_v33 = vld [vmem:[%s5000_s3 + $0xa0] ss:$8 sps:$4 sm:$0xff]   ;;  %v3716_v34 = vld [vmem:[%s5000_s3 + $0xb4] ss:$8 sps:$4 sm:$0xff]  }
  0xd8   :  { %1764 = vmatprep.subr.bf16.mxu0 %v3621_v35  ;;  %1928 = vmatprep.subr.bf16.mxu1 %v3624_v36  ;;  %v3714_v35 = vld [vmem:[%s5000_s3 + $0xb0] ss:$8 sps:$4 sm:$0xff]   ;;  %v3719_v36 = vld [vmem:[%s5000_s3 + $0xc4] ss:$8 sps:$4 sm:$0xff]  }
  0xdb   :  { %1765 = vmatpush1.bf16.msra.mxu0 %v3619_v37  ;;  %1929 = vmatpush1.bf16.msra.mxu1 %v3622_v38  ;;  %v3717_v37 = vld [vmem:[%s5000_s3 + $0xc0] ss:$8 sps:$4 sm:$0xff]   ;;  %v3722_v38 = vld [vmem:[%s5000_s3 + $0xd4] ss:$8 sps:$4 sm:$0xff]  }
  0xdc   :  { %1766 = vmatprep.subr.bf16.mxu0 %v3627_v39  ;;  %1930 = vmatprep.subr.bf16.mxu1 %v3630_v40  ;;  %v3720_v39 = vld [vmem:[%s5000_s3 + $0xd0] ss:$8 sps:$4 sm:$0xff]   ;;  %v3725_v40 = vld [vmem:[%s5000_s3 + $0xe4] ss:$8 sps:$4 sm:$0xff]  }
  0xdf   :  { %1767 = vmatpush1.bf16.msra.mxu0 %v3625_v41  ;;  %1931 = vmatpush1.bf16.msra.mxu1 %v3628_v42  ;;  %v3723_v41 = vld [vmem:[%s5000_s3 + $0xe0] ss:$8 sps:$4 sm:$0xff]   ;;  %v3728_v42 = vld [vmem:[%s5000_s3 + $0xf4] ss:$8 sps:$4 sm:$0xff]  }
  0xe0   :  { %1768 = vmatprep.subr.bf16.mxu0 %v3633_v43  ;;  %1932 = vmatprep.subr.bf16.mxu1 %v3636_v44  ;;  %v3726_v43 = vld [vmem:[%s5000_s3 + $0xf0] ss:$8 sps:$4 sm:$0xff]   ;;  %v3731_v44 = vld [vmem:[%s5000_s3 + $0x104] ss:$8 sps:$4 sm:$0xff]  }
  0xe3   :  { %1769 = vmatpush1.bf16.msra.mxu0 %v3631_v45  ;;  %1933 = vmatpush1.bf16.msra.mxu1 %v3634_v46  ;;  %v3777_v45 = vld [vmem:[%s5001_s5 + $0x40] sm:$0xff]  }
  0xe4   :  { %1770 = vmatprep.subr.bf16.mxu0 %v3639_v47  ;;  %1934 = vmatprep.subr.bf16.mxu1 %v3642_v48  ;;  %v3778_v46 = vld [vmem:[%s5001_s5] sm:$0xff]   ;;  %v3779_v47 = vld [vmem:[%s5001_s5 + $0x48] sm:$0xff]  }
  0xe5   :  { %v3780_v48 = vld [vmem:[%s5001_s5 + $0x8] sm:$0xff]  }
  0xe7   :  { %1771 = vmatpush1.bf16.msra.mxu0 %v3637_v49  ;;  %1935 = vmatpush1.bf16.msra.mxu1 %v3640_v50  ;;  %v3781_v49 = vld [vmem:[%s5001_s5 + $0x50] sm:$0xff]  }
  0xe8   :  { %1772 = vmatprep.subr.bf16.mxu0 %v3645_v51  ;;  %1936 = vmatprep.subr.bf16.mxu1 %v3648_v52  ;;  %v3782_v50 = vld [vmem:[%s5001_s5 + $0x10] sm:$0xff]   ;;  %v3783_v51 = vld [vmem:[%s5001_s5 + $0x58] sm:$0xff]  }
  0xe9   :  { %v3784_v52 = vld [vmem:[%s5001_s5 + $0x18] sm:$0xff]  }
  0xeb   :  { %1773 = vmatpush1.bf16.msra.mxu0 %v3643_v53  ;;  %1937 = vmatpush1.bf16.msra.mxu1 %v3646_v54  ;;  %v3785_v53 = vld [vmem:[%s5001_s5 + $0x60] sm:$0xff]  }
  0xec   :  { %1774 = vmatprep.subr.bf16.mxu0 %v3651_v55  ;;  %1938 = vmatprep.subr.bf16.mxu1 %v3654_v56  ;;  %v3786_v54 = vld [vmem:[%s5001_s5 + $0x20] sm:$0xff]   ;;  %v3787_v55 = vld [vmem:[%s5001_s5 + $0x68] sm:$0xff]  }
  0xed   :  { %v3788_v56 = vld [vmem:[%s5001_s5 + $0x28] sm:$0xff]  }
  0xef   :  { %1775 = vmatpush1.bf16.msra.mxu0 %v3649_v57  ;;  %1939 = vmatpush1.bf16.msra.mxu1 %v3652_v58  ;;  %v301_v57 = vlaneseq }
  0xf0   :  { %1776 = vmatprep.subr.bf16.mxu0 %v3657_v59  ;;  %1940 = vmatprep.subr.bf16.mxu1 %v3660_v60  ;;  %v4806_v60 = vld [vmem:[%s5002_s2] sm:$0xf] }
  0xf1   :  { %v4800_v58 = vshrl.u32 %v301_v57, 7  ;;  %v3791_v57 = vld [vmem:[%s5001_s5 + $0x78] sm:$0xff]  }
  0xf3   :  { %1777 = vmatpush1.bf16.msra.mxu0 %v3655_v61  ;;  %1941 = vmatpush1.bf16.msra.mxu1 %v3658_v62  ;;  %v303_v59 = vsub.s32 0, %v4800_v58  ;;  %v307_v61 = vsub.s32 1, %v4800_v58  ;;  %v315_v62 = vsub.s32 3, %v4800_v58 }
  0xf4   :  { %1778 = vmatprep.subr.bf16.mxu0 %v3663_v63  ;;  %1942 = vmatprep.subr.bf16.mxu1 %v3666_v0 }
  0xf5   :  { %v304_v63 = vrot.slane %v4806_v60, %v303_v59  ;;  %v308_v0 = vrot.slane %v4806_v60, %v307_v61 }
  0xf7   :  { %1779 = vmatpush1.bf16.msra.mxu0 %v3661_v1  ;;  %1943 = vmatpush1.bf16.msra.mxu1 %v3664_v2  ;;  %v316_v1 = vrot.slane %v4806_v60, %v315_v62  ;;  %v3805_v62 = vmov 0.0  }
  0xf8   :  { %1780 = vmatprep.subr.bf16.mxu0 %v3669_v3  ;;  %1944 = vmatprep.subr.bf16.mxu1 %v3672_v4 }
  0xfb   :  { %1781 = vmatpush1.bf16.msra.mxu0 %v3667_v5  ;;  %1945 = vmatpush1.bf16.msra.mxu1 %v3670_v6 }
  0xfc   :  { %1782 = vmatprep.subr.bf16.mxu0 %v3675_v7  ;;  %1946 = vmatprep.subr.bf16.mxu1 %v3678_v8 }
  0xff   :  { %1783 = vmatpush1.bf16.msra.mxu0 %v3673_v9  ;;  %1947 = vmatpush1.bf16.msra.mxu1 %v3676_v10 }
 0x100   :  { %2361 = vmatprep.subr.bf16.mxu0 %v3683_v12  ;;  %3185 = vmatprep.subr.bf16.mxu1 %v3777_v45  ;;  %v3770_v45 = vld [vmem:[%s5000_s3 + $0x1d4] ss:$8 sps:$4 sm:$0xff]  }
 0x102   :  { %1785 = vmatmul.mubr.bf16.vlgmr.msra.gmra.mrb[0].mxu0 %v2831_v14  ;;  %1949 = vmatmul.mubr.bf16.vlgmr.msra.gmra.mrb[0].mxu1 %v2831_v14 }
 0x103   :  { %2362 = vmatpush1.bf16.msra.mxu0 %v3681_v15  ;;  %3186 = vmatpush3.bf16.msra.mxu1 %v3778_v46  ;;  %v3768_v46 = vld [vmem:[%s5000_s3 + $0x1d0] ss:$8 sps:$4 sm:$0xff]  }
 0x104   :  { %2363 = vmatprep.subr.bf16.mxu0 %v3686_v16  ;;  %3187 = vmatprep.subr.bf16.mxu1 %v3779_v47 }
 0x107   :  { %2364 = vmatpush1.bf16.msra.mxu0 %v3684_v17  ;;  %3188 = vmatpush3.bf16.msra.mxu1 %v3780_v48  ;;  %v3773_v48 = vld [vmem:[%s5000_s3 + $0x1e4] ss:$8 sps:$4 sm:$0xff]  }
 0x108   :  { %2365 = vmatprep.subr.bf16.mxu0 %v3689_v13  ;;  %3189 = vmatprep.subr.bf16.mxu1 %v3781_v49  ;;  %v3771_v49 = vld [vmem:[%s5000_s3 + $0x1e0] ss:$8 sps:$4 sm:$0xff]  }
 0x10b   :  { %2366 = vmatpush1.bf16.msra.mxu0 %v3687_v11  ;;  %3190 = vmatpush3.bf16.msra.mxu1 %v3782_v50  ;;  %v3729_v11 = vld [vmem:[%s5000_s3 + $0x100] ss:$8 sps:$4 sm:$0xff]  }
 0x10c   :  { %2367 = vmatprep.subr.bf16.mxu0 %v3692_v18  ;;  %3191 = vmatprep.subr.bf16.mxu1 %v3783_v51  ;;  %v3776_v51 = vld [vmem:[%s5000_s3 + $0x1f4] ss:$8 sps:$4 sm:$0xff]  }
 0x10f   :  { %2368 = vmatpush1.bf16.msra.mxu0 %v3690_v19  ;;  %3192 = vmatpush3.bf16.msra.mxu1 %v3784_v52  ;;  %v3734_v19 = vld [vmem:[%s5000_s3 + $0x114] ss:$8 sps:$4 sm:$0xff]   ;;  %v3774_v52 = vld [vmem:[%s5000_s3 + $0x1f0] ss:$8 sps:$4 sm:$0xff]  }
 0x110   :  { %2369 = vmatprep.subr.bf16.mxu0 %v3695_v20  ;;  %3193 = vmatprep.subr.bf16.mxu1 %v3785_v53 }
 0x113   :  { %2370 = vmatpush1.bf16.msra.mxu0 %v3693_v21  ;;  %3194 = vmatpush3.bf16.msra.mxu1 %v3786_v54  ;;  %v3732_v21 = vld [vmem:[%s5000_s3 + $0x110] ss:$8 sps:$4 sm:$0xff]  }
 0x114   :  { %2371 = vmatprep.subr.bf16.mxu0 %v3698_v22  ;;  %3195 = vmatprep.subr.bf16.mxu1 %v3787_v55  ;;  %v3737_v22 = vld [vmem:[%s5000_s3 + $0x124] ss:$8 sps:$4 sm:$0xff]   ;;  %v3789_v55 = vld [vmem:[%s5001_s5 + $0x70] sm:$0xff]  }
 0x117   :  { %2372 = vmatpush1.bf16.msra.mxu0 %v3696_v23  ;;  %3196 = vmatpush3.bf16.msra.mxu1 %v3788_v56  ;;  %v3735_v23 = vld [vmem:[%s5000_s3 + $0x120] ss:$8 sps:$4 sm:$0xff]   ;;  %v3790_v56 = vld [vmem:[%s5001_s5 + $0x30] sm:$0xff]  }
 0x118   :  { %2373 = vmatprep.subr.bf16.mxu0 %v3701_v24  ;;  %v3740_v24 = vld [vmem:[%s5000_s3 + $0x134] ss:$8 sps:$4 sm:$0xff]   ;;  %3197 = vmatprep.subr.bf16.mxu1 %v3789_v55 }
 0x11b   :  { %2374 = vmatpush1.bf16.msra.mxu0 %v3699_v25  ;;  %v3738_v25 = vld [vmem:[%s5000_s3 + $0x130] ss:$8 sps:$4 sm:$0xff]   ;;  %3198 = vmatpush3.bf16.msra.mxu1 %v3790_v56 }
 0x11c   :  { %2375 = vmatprep.subr.bf16.mxu0 %v3704_v26  ;;  %v3743_v26 = vld [vmem:[%s5000_s3 + $0x144] ss:$8 sps:$4 sm:$0xff]   ;;  %3199 = vmatprep.subr.bf16.mxu1 %v3791_v57 }
 0x11f   :  { %2376 = vmatpush1.bf16.msra.mxu0 %v3702_v27  ;;  %v3741_v27 = vld [vmem:[%s5000_s3 + $0x140] ss:$8 sps:$4 sm:$0xff]  }
 0x120   :  { %2377 = vmatprep.subr.bf16.mxu0 %v3707_v28  ;;  %v3746_v28 = vld [vmem:[%s5000_s3 + $0x154] ss:$8 sps:$4 sm:$0xff]  }
 0x123   :  { %2378 = vmatpush1.bf16.msra.mxu0 %v3705_v29  ;;  %v3744_v29 = vld [vmem:[%s5000_s3 + $0x150] ss:$8 sps:$4 sm:$0xff]  }
 0x124   :  { %2379 = vmatprep.subr.bf16.mxu0 %v3710_v30  ;;  %v3749_v30 = vld [vmem:[%s5000_s3 + $0x164] ss:$8 sps:$4 sm:$0xff]  }
 0x127   :  { %2380 = vmatpush1.bf16.msra.mxu0 %v3708_v31  ;;  %v3747_v31 = vld [vmem:[%s5000_s3 + $0x160] ss:$8 sps:$4 sm:$0xff]  }
 0x128   :  { %2381 = vmatprep.subr.bf16.mxu0 %v3713_v32  ;;  %v3752_v32 = vld [vmem:[%s5000_s3 + $0x174] ss:$8 sps:$4 sm:$0xff]  }
 0x12b   :  { %2382 = vmatpush1.bf16.msra.mxu0 %v3711_v33  ;;  %v3750_v33 = vld [vmem:[%s5000_s3 + $0x170] ss:$8 sps:$4 sm:$0xff]  }
 0x12c   :  { %2383 = vmatprep.subr.bf16.mxu0 %v3716_v34  ;;  %v3755_v34 = vld [vmem:[%s5000_s3 + $0x184] ss:$8 sps:$4 sm:$0xff]  }
 0x12f   :  { %2384 = vmatpush1.bf16.msra.mxu0 %v3714_v35  ;;  %v3753_v35 = vld [vmem:[%s5000_s3 + $0x180] ss:$8 sps:$4 sm:$0xff]  }
 0x130   :  { %2385 = vmatprep.subr.bf16.mxu0 %v3719_v36  ;;  %v3758_v36 = vld [vmem:[%s5000_s3 + $0x194] ss:$8 sps:$4 sm:$0xff]  }
 0x133   :  { %2386 = vmatpush1.bf16.msra.mxu0 %v3717_v37  ;;  %v3756_v37 = vld [vmem:[%s5000_s3 + $0x190] ss:$8 sps:$4 sm:$0xff]  }
 0x134   :  { %2387 = vmatprep.subr.bf16.mxu0 %v3722_v38  ;;  %v3761_v38 = vld [vmem:[%s5000_s3 + $0x1a4] ss:$8 sps:$4 sm:$0xff]  }
 0x137   :  { %2388 = vmatpush1.bf16.msra.mxu0 %v3720_v39  ;;  %v3759_v39 = vld [vmem:[%s5000_s3 + $0x1a0] ss:$8 sps:$4 sm:$0xff]  }
 0x138   :  { %2389 = vmatprep.subr.bf16.mxu0 %v3725_v40  ;;  %v3764_v40 = vld [vmem:[%s5000_s3 + $0x1b4] ss:$8 sps:$4 sm:$0xff]  }
 0x13b   :  { %2390 = vmatpush1.bf16.msra.mxu0 %v3723_v41  ;;  %v3762_v41 = vld [vmem:[%s5000_s3 + $0x1b0] ss:$8 sps:$4 sm:$0xff]  }
 0x13c   :  { %2391 = vmatprep.subr.bf16.mxu0 %v3728_v42  ;;  %v3767_v42 = vld [vmem:[%s5000_s3 + $0x1c4] ss:$8 sps:$4 sm:$0xff]  }
 0x13f   :  { %2392 = vmatpush1.bf16.msra.mxu0 %v3726_v43  ;;  %v3765_v43 = vld [vmem:[%s5000_s3 + $0x1c0] ss:$8 sps:$4 sm:$0xff]  }
 0x140   :  { %2402 = vmatprep.subr.bf16.mxu0 %v3731_v44  ;;  %v311_v44 = vsub.s32 2, %v4800_v58  ;;  %v3794_v58 = vld [vmem:[%s5003_s7 + $0x8] sm:$0xff]  }
 0x142   :  { %v312_v47 = vrot.slane %v4806_v60, %v311_v44  ;;  %v3792_v60 = vld [vmem:[%s5001_s5 + $0x38] sm:$0xff]  }
 0x143   :  { %3200 = vmatpush3.bf16.msra.mxu1 %v3792_v60 }
 0x144   :  { %3221 = vmatprep.subr.bf16.mxu1 %v3805_v62 }
 0x1d5   :  { %v1786_v2 = vpop.f32.mrb[0].mxu0  ;;  %v4817_v3 = vpop.f32.mrb[0].mxu1 }
 0x1d6   :  { %v3253_v4 = vadd.f32 %v1786_v2, %v304_v63  ;;  %v1788_v5 = vpop.f32.mrb[1].mxu0  ;;  %v1952_v6 = vpop.f32.mrb[1].mxu1  ;;  %v3255_v50 = vadd.f32 %v4817_v3, %v312_v47  ;;  %v2029_v63 = vld [vmem:[%s5004_s4] sm:$0x3] }
 0x1d7   :  { %v3254_v7 = vadd.f32 %v1788_v5, %v308_v0  ;;  %v3256_v8 = vadd.f32 %v1952_v6, %v316_v1  ;;  %v1790_v9 = vpop.f32.mrb[2].mxu0  ;;  %v1954_v10 = vpop.f32.mrb[2].mxu1  ;;  %v2034_v0 = vrot.slane %v2029_v63, %v303_v59  ;;  %v2038_v1 = vrot.slane %v2029_v63, %v307_v61  ;;  %v3795_v59 = vld [vmem:[%s5003_s7 + $0x10] sm:$0xff]   ;;  %v3796_v61 = vld [vmem:[%s5003_s7 + $0x18] sm:$0xff]  }
 0x1d8   :  { %v1957_v12 = vmax.f32 %v3253_v4, 0.0  ;;  %v1791_v14 = vpop.f32.mrb[3].mxu0  ;;  %v1955_v15 = vpop.f32.mrb[3].mxu1  ;;  %v1959_v53 = vmax.f32 %v3255_v50, 0.0 }
 0x1d9   :  { %v1958_v16 = vmax.f32 %v3254_v7, 0.0  ;;  %v1960_v17 = vmax.f32 %v3256_v8, 0.0  ;;  %v3797_v15 = vld [vmem:[%s5003_s7 + $0x20] sm:$0xff]  }
 0x1da   :  { %v1961_v18 = vpack.c.bf16 %v1957_v12, %v1957_v12  ;;  %v1963_v54 = vpack.c.bf16 %v1959_v53, %v1959_v53  ;;  %v3793_v12 = vld [vmem:[%s5003_s7] sm:$0xff]  }
 0x1db   :  { %v1962_v13 = vpack.c.bf16 %v1958_v16, %v1958_v16  ;;  %v1964_v20 = vpack.c.bf16 %v1960_v17, %v1960_v17  ;;  %v3798_v16 = vld [vmem:[%s5003_s7 + $0x28] sm:$0xff]   ;;  %v3799_v17 = vld [vmem:[%s5003_s7 + $0x30] sm:$0xff]  }
 0x1dd   :  { %2393 = vmatprep.mubr.bf16.mxu0 %v1962_v13  ;;  %v3800_v13 = vld [vmem:[%s5003_s7 + $0x38] sm:$0xff]  }
 0x1de   :  { %2394 = vmatmul.mubr.bf16.vlgmr.msra.gmra.mrb[4].mxu0 %v1961_v18  ;;  %v3153_v18 = vld [vmem:[%s5006_s6] ss:$0 sm:$0xff] }
 0x1df   :  { %2403 = vmatpush1.bf16.msra.mxu0 %v3729_v11  ;;  %2434 = vmatprep.mubr.bf16.mxu0 %v1964_v20 }
 0x1e0   :  { %2404 = vmatprep.subr.bf16.mxu0 %v3734_v19 }
 0x1e3   :  { %2405 = vmatpush1.bf16.msra.mxu0 %v3732_v21 }
 0x1e4   :  { %2406 = vmatprep.subr.bf16.mxu0 %v3737_v22 }
 0x1e7   :  { %2407 = vmatpush1.bf16.msra.mxu0 %v3735_v23 }
 0x1e8   :  { %2408 = vmatprep.subr.bf16.mxu0 %v3740_v24 }
 0x1eb   :  { %2409 = vmatpush1.bf16.msra.mxu0 %v3738_v25  ;;  %v3801_v25 = vld [vmem:[%s5005_s9] sm:$0xff]  }
 0x1ec   :  { %2410 = vmatprep.subr.bf16.mxu0 %v3743_v26 }
 0x1ef   :  { %2411 = vmatpush1.bf16.msra.mxu0 %v3741_v27  ;;  %v3802_v27 = vld [vmem:[%s5005_s9 + $0x8] sm:$0xff]  }
 0x1f0   :  { %2412 = vmatprep.subr.bf16.mxu0 %v3746_v28  ;;  %v3803_v28 = vld [vmem:[%s5005_s9 + $0x10] sm:$0xff]  }
 0x1f3   :  { %2413 = vmatpush1.bf16.msra.mxu0 %v3744_v29  ;;  %v3804_v29 = vld [vmem:[%s5005_s9 + $0x18] sm:$0xff]  }
 0x1f4   :  { %2414 = vmatprep.subr.bf16.mxu0 %v3749_v30  ;;  %v3170_v30 = vld [vmem:[%s5007_s8] ss:$0 sm:$0xff] }
 0x1f7   :  { %2415 = vmatpush1.bf16.msra.mxu0 %v3747_v31 }
 0x1f8   :  { %2416 = vmatprep.subr.bf16.mxu0 %v3752_v32 }
 0x1fb   :  { %2417 = vmatpush1.bf16.msra.mxu0 %v3750_v33 }
 0x1fc   :  { %2418 = vmatprep.subr.bf16.mxu0 %v3755_v34 }
 0x1ff   :  { %2419 = vmatpush1.bf16.msra.mxu0 %v3753_v35 }
 0x200   :  { %2420 = vmatprep.subr.bf16.mxu0 %v3758_v36 }
 0x203   :  { %2421 = vmatpush1.bf16.msra.mxu0 %v3756_v37 }
 0x204   :  { %2422 = vmatprep.subr.bf16.mxu0 %v3761_v38  ;;  %v3179_v38 = vld [vmem:[%s5008_s10] ss:$0 sm:$0xff] }
 0x207   :  { %2423 = vmatpush1.bf16.msra.mxu0 %v3759_v39 }
 0x208   :  { %2424 = vmatprep.subr.bf16.mxu0 %v3764_v40 }
 0x20b   :  { %2425 = vmatpush1.bf16.msra.mxu0 %v3762_v41 }
 0x20c   :  { %2426 = vmatprep.subr.bf16.mxu0 %v3767_v42 }
 0x20f   :  { %2427 = vmatpush1.bf16.msra.mxu0 %v3765_v43 }
 0x210   :  { %2428 = vmatprep.subr.bf16.mxu0 %v3770_v45 }
 0x213   :  { %2429 = vmatpush1.bf16.msra.mxu0 %v3768_v46 }
 0x214   :  { %2430 = vmatprep.subr.bf16.mxu0 %v3773_v48 }
 0x217   :  { %2431 = vmatpush1.bf16.msra.mxu0 %v3771_v49 }
 0x218   :  { %2432 = vmatprep.subr.bf16.mxu0 %v3776_v51 }
 0x21b   :  { %2433 = vmatpush1.bf16.msra.mxu0 %v3774_v52 }
 0x21e   :  { %2435 = vmatmul.mubr.bf16.vlgmr.msra.gmra.mrb[4].mxu0 %v1963_v54 }
 0x2f1   :  { %v2436_v2 = vpop.f32.mrb[4].mxu0 }
 0x2f2   :  { %v3257_v3 = vadd.f32 %v2436_v2, %v2034_v0  ;;  %v2438_v4 = vpop.f32.mrb[5].mxu0 }
 0x2f3   :  { %v3258_v5 = vadd.f32 %v2438_v4, %v2038_v1  ;;  %v2440_v6 = vpop.f32.mrb[6].mxu0 }
 0x2f4   :  { %v2443_v7 = vmax.f32 %v3257_v3, 0.0  ;;  %v2441_v8 = vpop.f32.mrb[7].mxu0 }
 0x2f5   :  { %v2444_v9 = vmax.f32 %v3258_v5, 0.0 }
 0x2f6   :  { %v2445_v14 = vpack.c.bf16 %v2443_v7, %v2443_v7 }
 0x2f7   :  { %v2446_v10 = vpack.c.bf16 %v2444_v9, %v2444_v9 }
 0x2f9   :  { %2614 = vmatprep.mubr.bf16.mxu1 %v2446_v10 }
 0x2fa   :  { %2615 = vmatmul.mubr.bf16.vlgmr.msra.gmra.mrb[4].mxu1 %v2445_v14 }
 0x2fb   :  { %3222 = vmatpush3.bf16.msra.mxu1 %v3793_v12  ;;  %3237 = vmatprep.mubr.msk.bf16.mxu1 %vm3806_vm0, %v3805_v62 }
 0x2fc   :  { %3223 = vmatprep.subr.bf16.mxu1 %v3805_v62 }
 0x2ff   :  { %3224 = vmatpush3.bf16.msra.mxu1 %v3794_v58 }
 0x300   :  { %3225 = vmatprep.subr.bf16.mxu1 %v3805_v62 }
 0x303   :  { %3226 = vmatpush3.bf16.msra.mxu1 %v3795_v59 }
 0x304   :  { %3227 = vmatprep.subr.bf16.mxu1 %v3805_v62 }
 0x307   :  { %3228 = vmatpush3.bf16.msra.mxu1 %v3796_v61 }
 0x308   :  { %3229 = vmatprep.subr.bf16.mxu1 %v3805_v62 }
 0x30b   :  { %3230 = vmatpush3.bf16.msra.mxu1 %v3797_v15 }
 0x30c   :  { %3231 = vmatprep.subr.bf16.mxu1 %v3805_v62 }
 0x30f   :  { %3232 = vmatpush3.bf16.msra.mxu1 %v3798_v16 }
 0x310   :  { %3233 = vmatprep.subr.bf16.mxu1 %v3805_v62 }
 0x313   :  { %3234 = vmatpush3.bf16.msra.mxu1 %v3799_v17 }
 0x314   :  { %3235 = vmatprep.subr.bf16.mxu1 %v3805_v62 }
 0x317   :  { %3236 = vmatpush3.bf16.msra.mxu1 %v3800_v13 }
 0x318   :  { %3241 = vmatprep.subr.bf16.mxu1 %v3805_v62 }
 0x3cd   :  { %v3201_v11 = vpop.f32.mrb[4].mxu1 }
 0x3ce   :  { %v3202_v19 = vpop.f32.mrb[5].mxu1 }
 0x3cf   :  { %v3203_v20 = vadd.f32 %v3202_v19, %v3201_v11  ;;  %v3204_v21 = vpop.f32.mrb[6].mxu1 }
 0x3d0   :  { %v3205_v22 = vpop.f32.mrb[7].mxu1 }
 0x3d1   :  { %v2617_v23 = vadd.f32 %v3203_v20, %v3153_v18 }
 0x3d3   :  { %v2622_v24 = vmax.f32 %v2617_v23, 0.0 }
 0x3d5   :  { %v2623_v26 = vpack.c.bf16 %v2622_v24, %v2622_v24 }
 0x3d7   :  { %3238 = vmatmul.mubr.bf16.vlgmr.msra.gmra.mrb[8].mxu1 %v2623_v26 }
 0x3d8   :  { %3242 = vmatpush3.bf16.msra.mxu1 %v3801_v25  ;;  %3249 = vmatprep.mubr.msk.bf16.mxu1 %vm3806_vm0, %v3805_v62 }
 0x3d9   :  { %3243 = vmatprep.subr.bf16.mxu1 %v3805_v62 }
 0x3dc   :  { %3244 = vmatpush3.bf16.msra.mxu1 %v3802_v27 }
 0x3dd   :  { %3245 = vmatprep.subr.bf16.mxu1 %v3805_v62 }
 0x3e0   :  { %3246 = vmatpush3.bf16.msra.mxu1 %v3803_v28 }
 0x3e1   :  { %3247 = vmatprep.subr.bf16.mxu1 %v3805_v62 }
 0x3e4   :  { %3248 = vmatpush3.bf16.msra.mxu1 %v3804_v29 }
 0x4aa   :  { %v2729_v31 = vpop.f32.mrb[8].mxu1 }
 0x4ab   :  { %v2730_v32 = vadd.f32 %v3170_v30, %v2729_v31  ;;  %v3239_v33 = vpop.f32.mrb[9].mxu1 }
 0x4ac   :  { %v2732_v34 = vpop.f32.mrb[10].mxu1 }
 0x4ad   :  { %v2735_v35 = vmax.f32 %v2730_v32, 0.0  ;;  %v3240_v36 = vpop.f32.mrb[11].mxu1 }
 0x4af   :  { %v2736_v37 = vpack.c.bf16 %v2735_v35, %v2735_v35 }
 0x4b1   :  { %3250 = vmatmul.mubr.msk.bf16.vlgmr.msra.gmra.mrb[12].mxu1 %vm2776_vm1, %v2736_v37 }
 0x584   :  { %v2814_v39 = vpop.f32.mrb[12].mxu1 }
 0x585   :  { %v2815_v40 = vadd.f32 %v3179_v38, %v2814_v39  ;;  %v3251_v41 = vpop.f32.mrb[13].mxu1 }
 0x586   :  { %v2817_v42 = vpop.f32.mrb[14].mxu1 }
 0x587   :  { %2820 = vst [vmem:[%s5009_s11] sm:$0xff] %v2815_v40  ;;  %v3252_v43 = vpop.f32.mrb[15].mxu1 }

// kernel: cropper_net_forward.10
= control target key start
LH: loop header
LB: loop body
LE: loop exit
PB: predicated region body
PF: predicated region fallthrough
CT: control target
= control target key end

     0   :  { %s7655_s0 = inlined_call_operand.vmem [shape: bf16[8,4608], index: 0, kind: input, shape index: {}]   ;;  %s7656_s1 = inlined_call_operand.hbm [shape: bf16[4608,1024], index: 1, kind: input, shape index: {}]   ;;  %s7657_s2 = inlined_call_operand.hbm [shape: f32[1,1024], index: 2, kind: input, shape index: {}]   ;;  %s7658_s3 = inlined_call_operand.hbm [shape: f32[1,1024], index: 3, kind: input, shape index: {}]   ;;  %s7659_s4 = inlined_call_operand.vmem [shape: bf16[8,1024], index: 4, kind: output, shape index: {}]  }
   0x1   :  { %7665 = sst [smem:[#allocation10_spill]] %s7656_s1 }
   0x2   :  { %7666 = sst [smem:[#allocation11_spill]] %s7657_s2 }
   0x3   :  { %9 = vsyncpa [#allocation3], 0 }
   0x4   :  { %11 = vsyncpa [#allocation3 + $0x1], 0 }
   0x5   :  { %12 = vsyncpa [#allocation5], 0 }
   0x6   :  { %14 = vsyncpa [#allocation5 + $0x1], 0  ;;  %s6714_s15 = smov 0   ;;  %s6716_s16 = smov 0  }
   0x7   :  { %s6718_s17 = smov 0   ;;  %s6720_s18 = smov 0  }
   0x8   :  { %s6722_s19 = smov 0   ;;  %s6724_s20 = smov 0  }
   0x9 LB: > { %s7661_s21 = sadd.s32 4294967295, %s6681_s20   ;;  %s29_s22 = sadd.s32 1, %s6677_s19  ;;  %s6681_s20 = sphi %s6724_s20, %s20_s20   ;;  %s6677_s19 = sphi %s6722_s19, %s7684_s19   ;;  %s6673_s18 = sphi %s6720_s18, %s7683_s18   ;;  %s6669_s17 = sphi %s6718_s17, %s7682_s17   ;;  %s6665_s16 = sphi %s6716_s16, %s7681_s16   ;;  %s6661_s15 = sphi %s6714_s15, %s7680_s15  }
   0xa   : > { %p30_p0 = scmp.ge.s32.totalorder %s29_s22, 4  ;;  %s65_s23 = sadd.s32 1, %s6669_s17 }
   0xb   : > { %p72_p1 = scmp.ne.s32.totalorder %s6669_s17, %s6665_s16  ;;  %p73_p2 = scmp.eq.s32.totalorder %s6681_s20, 0 }
   0xc   : > { %s7686_s22 = smov (%p30_p0, %s29_s22), 0  ;;  %p78_p4 = scmp.ne.s32.totalorder %s6665_s16, %s6661_s15 }
   0xd   : > { %7667 = sst [smem:[#allocation9_spill]] %s7686_s22  ;;  %p74_p3 = por %p73_p2, %p72_p1 }
   0xe   : > { %s62_s24 = ssub.s32 %s6677_s19, %s7686_s22  ;;  %p79_p5 = scmp.eq.s32.totalorder %s7661_s21, 0 }
   0xf   : > { %p63_p6 = scmp.eq.s32.totalorder %s62_s24, 0  ;;  %p5585_p8 = scmp.lt.s32.totalorder %s6681_s20, 4 }
  0x10   : > { %p6755_p7 = por %p79_p5, %p78_p4  ;;  %s6764_s27 = sand.u32 1, %s6669_s17  }
  0x11   : > { %s6761_s26 = scalar_select %p63_p6, %s6669_s17, %s65_s23  }
  0x12   : > { %s7668_s25 = scalar_select %p6755_p7, 1, 0 }
  0x13   : > { %p6766_p9 = pnand %p5585_p8, %p74_p3  ;;  %s5567_s29 = smul.u32 4608, %s6764_s27 }
  0x14   : > { %s211_s30 = sand.u32 1, %s6681_s20   ;;  %s7662_s7 = sshll.u32 %s6764_s27, 1 }
  0x15   : > { %s7669_s28 = scalar_select %p6766_p9, 1, 0 }
  0x16   : > { %s194_s5 = scalar_lea.vmem [#allocation2], %s5567_s29  ;;  %s5498_s8 = sshll.u32 %s6677_s19, 5 }
  0x17   : > { %s201_s6 = sshll.u32 %s194_s5, 4  ;;  %s215_s9 = scalar_lea.vmem [#allocation4], %s7662_s7  ;;  %s6773_s6 = int_to_ptr.vmem [resolvable:$true] %s201_s6 }
  0x18   : > { %s223_s10 = sshll.u32 %s215_s9, 4  ;;  %s7670_s2 = sld [smem:[#allocation11_spill]]  ;;  %s6785_s10 = int_to_ptr.vmem [resolvable:$true] %s223_s10 }
  0x19   : > { %s6787_s14 = scalar_lea.sflag [#allocation5], %s211_s30  ;;  %p6793_p11 = pneg %p6766_p9 }
  0x1e   : > { %s6783_s13 = scalar_lea.hbm %s7670_s2, %s5498_s8  ;;  %s6542_s5 = scalar_lea.hbm %s7670_s2, 128 }
  0x1f   : > { %s6537_s15 = scalar_lea.hbm %s6783_s13, 32  ;;  %p6543_p0 = scmp.lt.u32.totalorder %s6783_s13, %s7670_s2 }
  0x20   : > { %p6538_p10 = scmp.ne.s32.totalorder %s6783_s13, %s6537_s15  ;;  %p6544_p1 = scmp.lt.u32.totalorder %s6542_s5, %s6537_s15 }
  0x21   : > { %p6546_p3 = scmp.lt.u32.totalorder %s6537_s15, %s6783_s13 }
  0x22   : > { %p6540_p12 = pnand %p6793_p11, %p6538_p10  ;;  %p6545_p2 = por %p6544_p1, %p6543_p0 }
  0x24   : > { %p6541_p13 = pneg %p6540_p12  ;;  %p6547_p4 = por %p6546_p3, %p6545_p2 }
  0x26   : > { %p6548_p5 = pnand %p6547_p4, %p6541_p13 }
  0x28   : > { %6551 = shalt.err (!%p6548_p5)
}
  0x29   : > { %s6552_s30 = scalar_lea.vmem %s6785_s10, 32  ;;  %s6683_s12 = smov [#allocation4]  }
  0x2a   : > { %p6553_p6 = scmp.ne.s32.totalorder %s6785_s10, %s6552_s30  ;;  %s6557_s24 = sshll.u32 %s6683_s12, 4  ;;  %s6558_s24 = int_to_ptr.vmem [resolvable:$false] %s6557_s24 }
  0x2b   : > { %s6559_s29 = scalar_lea.vmem %s6558_s24, 64  ;;  %p6560_p12 = scmp.lt.s32.totalorder %s6785_s10, %s6558_s24 }
  0x2c   : > { %p6555_p8 = pnand %p6553_p6, %p6793_p11  ;;  %p6561_p7 = scmp.lt.s32.totalorder %s6559_s29, %s6552_s30 }
  0x2e   : > { %p6556_p10 = pneg %p6555_p8  ;;  %p6562_p0 = por %p6561_p7, %p6560_p12 }
  0x30   : > { %p6563_p1 = pnand %p6562_p0, %p6556_p10 }
  0x32   : > { %6566 = shalt.err (!%p6563_p1)
}
  0x33   : > { %5581 = dma.hbm_to_vmem [thread:$0]  (!%p6766_p9), %s6783_s13, 32, %s6785_s10, %s6787_s14  }
  0x34   : > { %s6822_s9 = scalar_lea.hbm %s7658_s3, %s5498_s8  ;;  %p4877_p7 = scmp.ge.s32.totalorder %s6681_s20, 1 }
  0x35   : > { %p247_p13 = scmp.lt.s32.totalorder %s6681_s20, 5  ;;  %s5497_s11 = sshll.u32 %s6677_s19, 7 }
  0x36   : > { %s7673_s1 = sld [smem:[#allocation10_spill]]  ;;  %s191_s10 = scalar_lea.sflag [#allocation3], %s6764_s27 }
  0x37   : > { %p6827_p2 = pnand %p4877_p7, %p247_p13 }
  0x39   : > { %s7672_s30 = scalar_select %p6827_p2, 1, 0 }
  0x3c   : > { %s6834_s29 = scalar_lea.hbm %s7673_s1, %s5497_s11  ;;  %s6572_s5 = scalar_lea.hbm %s7673_s1, 294912 }
  0x3d   : > { %s6567_s13 = scalar_lea.hbm %s6834_s29, 73728  ;;  %p6573_p6 = scmp.lt.u32.totalorder %s6834_s29, %s7673_s1 }
  0x3e   : > { %p6568_p3 = scmp.ne.s32.totalorder %s6834_s29, %s6567_s13  ;;  %p6574_p8 = scmp.lt.u32.totalorder %s6572_s5, %s6567_s13 }
  0x3f   : > { %p6576_p12 = scmp.lt.u32.totalorder %s6567_s13, %s6834_s29 }
  0x40   : > { %p6570_p4 = pnand %p6568_p3, %p6793_p11  ;;  %p6575_p10 = por %p6574_p8, %p6573_p6 }
  0x42   : > { %p6571_p5 = pneg %p6570_p4  ;;  %p6577_p0 = por %p6576_p12, %p6575_p10 }
  0x44   : > { %p6578_p1 = pnand %p6577_p0, %p6571_p5 }
  0x46   : > { %6581 = shalt.err (!%p6578_p1)
}
  0x47   : > { %s6582_s11 = scalar_lea.vmem %s6773_s6, 73728  ;;  %s6684_s12 = smov [#allocation2]  }
  0x48   : > { %p6583_p7 = scmp.ne.s32.totalorder %s6773_s6, %s6582_s11  ;;  %s6587_s24 = sshll.u32 %s6684_s12, 4  ;;  %s6588_s24 = int_to_ptr.vmem [resolvable:$false] %s6587_s24 }
  0x49   : > { %s6589_s21 = scalar_lea.vmem %s6588_s24, 147456  ;;  %p6590_p4 = scmp.lt.s32.totalorder %s6773_s6, %s6588_s24 }
  0x4a   : > { %p6585_p13 = pnand %p6583_p7, %p6793_p11  ;;  %p6591_p2 = scmp.lt.s32.totalorder %s6589_s21, %s6582_s11 }
  0x4c   : > { %p6586_p3 = pneg %p6585_p13  ;;  %p6592_p6 = por %p6591_p2, %p6590_p4 }
  0x4e   : > { %p6593_p8 = pnand %p6592_p6, %p6586_p3 }
  0x50   : > { %6596 = shalt.err (!%p6593_p8)
}
  0x51   : > { %s6685_s7 = smov 512   ;;  %s6686_s13 = smov 128  }
  0x52   : > { %s6687_s8 = smov 8   ;;  %s7674_s15 = sshll.u32 %s6764_s27, 1 }
  0x53   : > { %5578 = dma.hbm_to_vmem [thread:$0]  (!%p6766_p9), %s6834_s29, 73728, %s6773_s6, %s191_s10, %s6685_s7, %s6686_s13, %s6687_s8  }
  0x54   : > { %s234_s5 = scalar_lea.vmem [#allocation6], %s7674_s15  ;;  %s6597_s12 = scalar_lea.hbm %s6822_s9, 32 }
  0x55   : > { %s242_s11 = sshll.u32 %s234_s5, 4  ;;  %p6598_p2 = scmp.ne.s32.totalorder %s6822_s9, %s6597_s12  ;;  %s243_s11 = int_to_ptr.vmem [resolvable:$true] %s242_s11 }
  0x56   : > { %s6602_s1 = scalar_lea.hbm %s7658_s3, 128  ;;  %p6603_p12 = scmp.lt.u32.totalorder %s6822_s9, %s7658_s3 }
  0x57   : > { %p6600_p5 = pnand %p6598_p2, %p6793_p11  ;;  %p6604_p0 = scmp.lt.u32.totalorder %s6602_s1, %s6597_s12 }
  0x58   : > { %p6606_p7 = scmp.lt.u32.totalorder %s6597_s12, %s6822_s9 }
  0x59   : > { %p6601_p10 = pneg %p6600_p5  ;;  %p6605_p1 = por %p6604_p0, %p6603_p12 }
  0x5b   : > { %p6607_p13 = por %p6606_p7, %p6605_p1 }
  0x5d   : > { %p6608_p3 = pnand %p6607_p13, %p6601_p10 }
  0x5f   : > { %6611 = shalt.err (!%p6608_p3)
}
  0x60   : > { %s6612_s27 = scalar_lea.vmem %s243_s11, 32  ;;  %s6688_s6 = smov [#allocation6]  }
  0x61   : > { %p6613_p4 = scmp.ne.s32.totalorder %s243_s11, %s6612_s27  ;;  %s6617_s29 = sshll.u32 %s6688_s6, 4  ;;  %s6618_s29 = int_to_ptr.vmem [resolvable:$false] %s6617_s29 }
  0x62   : > { %s6619_s10 = scalar_lea.vmem %s6618_s29, 64  ;;  %p6620_p2 = scmp.lt.s32.totalorder %s243_s11, %s6618_s29 }
  0x63   : > { %p6615_p6 = pnand %p6613_p4, %p6793_p11  ;;  %p6621_p5 = scmp.lt.s32.totalorder %s6619_s10, %s6612_s27 }
  0x65   : > { %p6616_p8 = pneg %p6615_p6  ;;  %p6622_p9 = por %p6621_p5, %p6620_p2 }
  0x67   : > { %p6623_p0 = pnand %p6622_p9, %p6616_p8 }
  0x69   : > { %6626 = shalt.err (!%p6623_p0)
}
  0x6a   : > { %p7675_p12 = scmp.ne.s32.totalorder %s7669_s28, 0  ;;  %p7676_p10 = scmp.ne.s32.totalorder %s7672_s30, 0 }
  0x6b   : > { %s6883_s1 = sand.u32 (!%p7676_p10), 1, %s6665_s16   ;;  %p7677_p9 = scmp.ne.s32.totalorder (!%p7676_p10), %s7668_s25, 0 }
  0x6c   : > { %5584 = dma.hbm_to_vmem [thread:$0]  (!%p7675_p12), %s6822_s9, 32, %s243_s11, %s6787_s14  }
  0x6d   : > { %251 = sbr.rel (%p7676_p10) target bundleno = 923 (0x39b), region = 36  ;;  %s254_s22 = scalar_lea.sflag (!%p7676_p10), [#allocation3], %s6883_s1 }
  0x6e   : > { %s5568_s2 = smul.u32 (!%p7676_p10), 4608, %s6883_s1 }
  0x70   : > { %s6887_s23 = scalar_lea.vmem (!%p7676_p10), [#allocation2], %s5568_s2 }
  0x74   : > { %6652 = dma.done.wait (%p7677_p9), %s254_s22, 73728  }
  0x75   : > { %6654 = vsyncadd (%p7677_p9), %s254_s22, 4294893568  ;;  %s7678_s28 = sadd.s32 4294967295, %s6681_s20   ;;  %s4878_s9 = sshll.u32 %s6883_s1, 1 }
  0x76   : > { %s262_s14 = sand.u32 1, %s7678_s28   ;;  %s6898_s7 = scalar_lea.vmem [#allocation4], %s4878_s9 }
  0x77   : > { %s263_s30 = scalar_lea.sflag [#allocation5], %s262_s14 }
  0x78   : > { %6656 = dma.done.wait (%p7677_p9), %s263_s30, 64  }
  0x79   : > { %6658 = vsyncadd (%p7677_p9), %s263_s30, 4294967232  ;;  %v5637_v0 = vld [vmem:[%s6887_s23 + $0x4] ss:$8 sps:$4 sm:$0xff]   ;;  %v5641_v2 = vld [vmem:[%s6887_s23] ss:$8 sps:$4 sm:$0xff]   ;;  %s4880_s25 = sshll.u32 %s6673_s18, 1 }
  0x7a   : > { %v5639_v1 = vld [vmem:[%s6887_s23 + $0x904] ss:$8 sps:$4 sm:$0xff]   ;;  %3937 = vmatprep.subr.bf16.mxu1 %v5637_v0  ;;  %v5642_v3 = vld [vmem:[%s6887_s23 + $0x900] ss:$8 sps:$4 sm:$0xff]   ;;  %v5643_v4 = vld [vmem:[%s6887_s23 + $0x14] ss:$8 sps:$4 sm:$0xff]  }
  0x7b   : > { %4306 = vmatprep.subr.bf16.mxu0 %v5639_v1  ;;  %3938 = vmatpush1.bf16.msra.mxu1 %v5641_v2  ;;  %v5645_v5 = vld [vmem:[%s6887_s23 + $0x914] ss:$8 sps:$4 sm:$0xff]   ;;  %v5647_v6 = vld [vmem:[%s6887_s23 + $0x10] ss:$8 sps:$4 sm:$0xff]   ;;  %v5649_v8 = vld [vmem:[%s6887_s23 + $0x24] ss:$8 sps:$4 sm:$0xff]  }
  0x7c   : > { %4307 = vmatpush1.bf16.msra.mxu0 %v5642_v3  ;;  %3939 = vmatprep.subr.bf16.mxu1 %v5643_v4  ;;  %v5648_v7 = vld [vmem:[%s6887_s23 + $0x910] ss:$8 sps:$4 sm:$0xff]   ;;  %v5651_v9 = vld [vmem:[%s6887_s23 + $0x924] ss:$8 sps:$4 sm:$0xff]   ;;  %v5653_v10 = vld [vmem:[%s6887_s23 + $0x20] ss:$8 sps:$4 sm:$0xff]  }
  0x7d   : > { %4308 = vmatprep.subr.bf16.mxu0 %v5645_v5  ;;  %v5654_v11 = vld [vmem:[%s6887_s23 + $0x920] ss:$8 sps:$4 sm:$0xff]   ;;  %v5655_v12 = vld [vmem:[%s6887_s23 + $0x34] ss:$8 sps:$4 sm:$0xff]   ;;  %v5659_v14 = vld [vmem:[%s6887_s23 + $0x30] ss:$8 sps:$4 sm:$0xff]  }
  0x7e   : > { %v5657_v13 = vld [vmem:[%s6887_s23 + $0x934] ss:$8 sps:$4 sm:$0xff]   ;;  %v5660_v15 = vld [vmem:[%s6887_s23 + $0x930] ss:$8 sps:$4 sm:$0xff]   ;;  %v5661_v16 = vld [vmem:[%s6887_s23 + $0x44] ss:$8 sps:$4 sm:$0xff]  }
  0x7f   : > { %3940 = vmatpush1.bf16.msra.mxu1 %v5647_v6  ;;  %v5663_v17 = vld [vmem:[%s6887_s23 + $0x944] ss:$8 sps:$4 sm:$0xff]   ;;  %v5665_v18 = vld [vmem:[%s6887_s23 + $0x40] ss:$8 sps:$4 sm:$0xff]   ;;  %v5667_v20 = vld [vmem:[%s6887_s23 + $0x54] ss:$8 sps:$4 sm:$0xff]  }
  0x80   : > { %4309 = vmatpush1.bf16.msra.mxu0 %v5648_v7  ;;  %3941 = vmatprep.subr.bf16.mxu1 %v5649_v8  ;;  %v5666_v19 = vld [vmem:[%s6887_s23 + $0x940] ss:$8 sps:$4 sm:$0xff]   ;;  %v5669_v21 = vld [vmem:[%s6887_s23 + $0x954] ss:$8 sps:$4 sm:$0xff]   ;;  %v5671_v22 = vld [vmem:[%s6887_s23 + $0x50] ss:$8 sps:$4 sm:$0xff]  }
  0x81   : > { %4310 = vmatprep.subr.bf16.mxu0 %v5651_v9  ;;  %v5672_v23 = vld [vmem:[%s6887_s23 + $0x950] ss:$8 sps:$4 sm:$0xff]   ;;  %v5673_v24 = vld [vmem:[%s6887_s23 + $0x64] ss:$8 sps:$4 sm:$0xff]   ;;  %v5677_v26 = vld [vmem:[%s6887_s23 + $0x60] ss:$8 sps:$4 sm:$0xff]  }
  0x82   : > { %v5675_v25 = vld [vmem:[%s6887_s23 + $0x964] ss:$8 sps:$4 sm:$0xff]   ;;  %v5678_v27 = vld [vmem:[%s6887_s23 + $0x960] ss:$8 sps:$4 sm:$0xff]   ;;  %v5679_v28 = vld [vmem:[%s6887_s23 + $0x74] ss:$8 sps:$4 sm:$0xff]  }
  0x83   : > { %3942 = vmatpush1.bf16.msra.mxu1 %v5653_v10  ;;  %v5681_v29 = vld [vmem:[%s6887_s23 + $0x974] ss:$8 sps:$4 sm:$0xff]   ;;  %v5683_v30 = vld [vmem:[%s6887_s23 + $0x70] ss:$8 sps:$4 sm:$0xff]   ;;  %v5685_v32 = vld [vmem:[%s6887_s23 + $0x84] ss:$8 sps:$4 sm:$0xff]  }
  0x84   : > { %4311 = vmatpush1.bf16.msra.mxu0 %v5654_v11  ;;  %3943 = vmatprep.subr.bf16.mxu1 %v5655_v12  ;;  %v5684_v31 = vld [vmem:[%s6887_s23 + $0x970] ss:$8 sps:$4 sm:$0xff]   ;;  %v5687_v33 = vld [vmem:[%s6887_s23 + $0x984] ss:$8 sps:$4 sm:$0xff]   ;;  %v5689_v34 = vld [vmem:[%s6887_s23 + $0x80] ss:$8 sps:$4 sm:$0xff]  }
  0x85   : > { %4312 = vmatprep.subr.bf16.mxu0 %v5657_v13  ;;  %v5690_v35 = vld [vmem:[%s6887_s23 + $0x980] ss:$8 sps:$4 sm:$0xff]   ;;  %v5691_v36 = vld [vmem:[%s6887_s23 + $0x94] ss:$8 sps:$4 sm:$0xff]   ;;  %v5695_v38 = vld [vmem:[%s6887_s23 + $0x90] ss:$8 sps:$4 sm:$0xff]  }
  0x86   : > { %v5693_v37 = vld [vmem:[%s6887_s23 + $0x994] ss:$8 sps:$4 sm:$0xff]   ;;  %v5696_v39 = vld [vmem:[%s6887_s23 + $0x990] ss:$8 sps:$4 sm:$0xff]   ;;  %v5697_v40 = vld [vmem:[%s6887_s23 + $0xa4] ss:$8 sps:$4 sm:$0xff]  }
  0x87   : > { %3944 = vmatpush1.bf16.msra.mxu1 %v5659_v14  ;;  %v5699_v41 = vld [vmem:[%s6887_s23 + $0x9a4] ss:$8 sps:$4 sm:$0xff]   ;;  %v5701_v42 = vld [vmem:[%s6887_s23 + $0xa0] ss:$8 sps:$4 sm:$0xff]   ;;  %v5703_v44 = vld [vmem:[%s6887_s23 + $0xb4] ss:$8 sps:$4 sm:$0xff]  }
  0x88   : > { %4313 = vmatpush1.bf16.msra.mxu0 %v5660_v15  ;;  %3945 = vmatprep.subr.bf16.mxu1 %v5661_v16  ;;  %v5702_v43 = vld [vmem:[%s6887_s23 + $0x9a0] ss:$8 sps:$4 sm:$0xff]   ;;  %v5705_v45 = vld [vmem:[%s6887_s23 + $0x9b4] ss:$8 sps:$4 sm:$0xff]   ;;  %v5707_v47 = vld [vmem:[%s6887_s23 + $0xb0] ss:$8 sps:$4 sm:$0xff]  }
  0x89   : > { %4314 = vmatprep.subr.bf16.mxu0 %v5663_v17  ;;  %v337_v46 = vld [vmem:[%s7655_s0] sm:$0xff]  ;;  %v5708_v49 = vld [vmem:[%s6887_s23 + $0x9b0] ss:$8 sps:$4 sm:$0xff]   ;;  %v346_v50 = vld [vmem:[%s7655_s0 + $0x48] sm:$0xff]  ;;  %p330_p11 = scmp.lt.s32.totalorder %s4880_s25, 7 }
  0x8a   : > { %v4883_v48 = vcombine.high %v337_v46, %v337_v46  ;;  %v5709_v51 = vld [vmem:[%s6887_s23 + $0xc4] ss:$8 sps:$4 sm:$0xff]   ;;  %v4901_v53 = vcombine.high %v346_v50, %v346_v50  ;;  %v5713_v54 = vld [vmem:[%s6887_s23 + $0xc0] ss:$8 sps:$4 sm:$0xff]   ;;  %v5715_v56 = vld [vmem:[%s6887_s23 + $0xd4] ss:$8 sps:$4 sm:$0xff]   ;;  %v4882_v6 = vcombine.low %v337_v46, %v337_v46  ;;  %v4900_v7 = vcombine.low %v346_v50, %v346_v50 }
  0x8b   : > { %3946 = vmatpush1.bf16.msra.mxu1 %v5665_v18  ;;  %v5711_v52 = vld [vmem:[%s6887_s23 + $0x9c4] ss:$8 sps:$4 sm:$0xff]   ;;  %v5714_v55 = vld [vmem:[%s6887_s23 + $0x9c0] ss:$8 sps:$4 sm:$0xff]   ;;  %v5717_v57 = vld [vmem:[%s6887_s23 + $0x9d4] ss:$8 sps:$4 sm:$0xff]  }
  0x8c   : > { %4315 = vmatpush1.bf16.msra.mxu0 %v5666_v19  ;;  %3947 = vmatprep.subr.bf16.mxu1 %v5667_v20  ;;  %v5719_v58 = vld [vmem:[%s6887_s23 + $0xd0] ss:$8 sps:$4 sm:$0xff]   ;;  %v5721_v60 = vld [vmem:[%s6887_s23 + $0xe4] ss:$8 sps:$4 sm:$0xff]   ;;  %v5725_v62 = vld [vmem:[%s6887_s23 + $0xe0] ss:$8 sps:$4 sm:$0xff]  }
  0x8d   : > { %4316 = vmatprep.subr.bf16.mxu0 %v5669_v21  ;;  %3969 = vmatprep.mubr.bf16.mxu1 %v4883_v48  ;;  %v5720_v59 = vld [vmem:[%s6887_s23 + $0x9d0] ss:$8 sps:$4 sm:$0xff]   ;;  %v5723_v61 = vld [vmem:[%s6887_s23 + $0x9e4] ss:$8 sps:$4 sm:$0xff]   ;;  %v5726_v63 = vld [vmem:[%s6887_s23 + $0x9e0] ss:$8 sps:$4 sm:$0xff]  }
  0x8e   : > { %4338 = vmatprep.mubr.bf16.mxu0 %v4901_v53  ;;  %v5727_v0 = vld [vmem:[%s6887_s23 + $0xf4] ss:$8 sps:$4 sm:$0xff]   ;;  %v5731_v2 = vld [vmem:[%s6887_s23 + $0xf0] ss:$8 sps:$4 sm:$0xff]   ;;  %v5737_v4 = vld [vmem:[%s6887_s23 + $0x104] ss:$8 sps:$4 sm:$0xff]  }
  0x8f   : > { %3948 = vmatpush1.bf16.msra.mxu1 %v5671_v22  ;;  %v5729_v1 = vld [vmem:[%s6887_s23 + $0x9f4] ss:$8 sps:$4 sm:$0xff]   ;;  %v5732_v3 = vld [vmem:[%s6887_s23 + $0x9f0] ss:$8 sps:$4 sm:$0xff]   ;;  %v5742_v5 = vld [vmem:[%s6887_s23 + $0xa04] ss:$8 sps:$4 sm:$0xff]  }
  0x90   : > { %4317 = vmatpush1.bf16.msra.mxu0 %v5672_v23  ;;  %3949 = vmatprep.subr.bf16.mxu1 %v5673_v24  ;;  %v5735_v8 = vld [vmem:[%s6887_s23 + $0x100] ss:$8 sps:$4 sm:$0xff]   ;;  %v5745_v10 = vld [vmem:[%s6887_s23 + $0x114] ss:$8 sps:$4 sm:$0xff]   ;;  %v5743_v12 = vld [vmem:[%s6887_s23 + $0x110] ss:$8 sps:$4 sm:$0xff]  }
  0x91   : > { %4318 = vmatprep.subr.bf16.mxu0 %v5675_v25  ;;  %v5740_v9 = vld [vmem:[%s6887_s23 + $0xa00] ss:$8 sps:$4 sm:$0xff]   ;;  %v5748_v11 = vld [vmem:[%s6887_s23 + $0xa14] ss:$8 sps:$4 sm:$0xff]   ;;  %v5746_v13 = vld [vmem:[%s6887_s23 + $0xa10] ss:$8 sps:$4 sm:$0xff]  }
  0x92   : > { %v5751_v14 = vld [vmem:[%s6887_s23 + $0x124] ss:$8 sps:$4 sm:$0xff]   ;;  %v5749_v16 = vld [vmem:[%s6887_s23 + $0x120] ss:$8 sps:$4 sm:$0xff]   ;;  %v5757_v18 = vld [vmem:[%s6887_s23 + $0x134] ss:$8 sps:$4 sm:$0xff]  }
  0x93   : > { %3950 = vmatpush1.bf16.msra.mxu1 %v5677_v26  ;;  %v5754_v15 = vld [vmem:[%s6887_s23 + $0xa24] ss:$8 sps:$4 sm:$0xff]   ;;  %v5752_v17 = vld [vmem:[%s6887_s23 + $0xa20] ss:$8 sps:$4 sm:$0xff]   ;;  %v5760_v19 = vld [vmem:[%s6887_s23 + $0xa34] ss:$8 sps:$4 sm:$0xff]  }
  0x94   : > { %4319 = vmatpush1.bf16.msra.mxu0 %v5678_v27  ;;  %3951 = vmatprep.subr.bf16.mxu1 %v5679_v28  ;;  %v5755_v20 = vld [vmem:[%s6887_s23 + $0x130] ss:$8 sps:$4 sm:$0xff]   ;;  %v5763_v22 = vld [vmem:[%s6887_s23 + $0x144] ss:$8 sps:$4 sm:$0xff]   ;;  %v5761_v24 = vld [vmem:[%s6887_s23 + $0x140] ss:$8 sps:$4 sm:$0xff]  }
  0x95   : > { %4320 = vmatprep.subr.bf16.mxu0 %v5681_v29  ;;  %v5758_v21 = vld [vmem:[%s6887_s23 + $0xa30] ss:$8 sps:$4 sm:$0xff]   ;;  %v5766_v23 = vld [vmem:[%s6887_s23 + $0xa44] ss:$8 sps:$4 sm:$0xff]   ;;  %v5764_v25 = vld [vmem:[%s6887_s23 + $0xa40] ss:$8 sps:$4 sm:$0xff]  }
  0x96   : > { %v5769_v26 = vld [vmem:[%s6887_s23 + $0x154] ss:$8 sps:$4 sm:$0xff]   ;;  %v5767_v28 = vld [vmem:[%s6887_s23 + $0x150] ss:$8 sps:$4 sm:$0xff]   ;;  %v5799_v50 = vld [vmem:[%s6887_s23 + $0x1a4] ss:$8 sps:$4 sm:$0xff]  }
  0x97   : > { %3952 = vmatpush1.bf16.msra.mxu1 %v5683_v30  ;;  %v5772_v27 = vld [vmem:[%s6887_s23 + $0xa54] ss:$8 sps:$4 sm:$0xff]   ;;  %v5770_v29 = vld [vmem:[%s6887_s23 + $0xa50] ss:$8 sps:$4 sm:$0xff]   ;;  %v5775_v30 = vld [vmem:[%s6887_s23 + $0x164] ss:$8 sps:$4 sm:$0xff]  }
  0x98   : > { %4321 = vmatpush1.bf16.msra.mxu0 %v5684_v31  ;;  %3953 = vmatprep.subr.bf16.mxu1 %v5685_v32  ;;  %v5778_v31 = vld [vmem:[%s6887_s23 + $0xa64] ss:$8 sps:$4 sm:$0xff]   ;;  %v5793_v46 = vld [vmem:[%s6887_s23 + $0x194] ss:$8 sps:$4 sm:$0xff]   ;;  %v5791_v48 = vld [vmem:[%s6887_s23 + $0x190] ss:$8 sps:$4 sm:$0xff]  }
  0x99   : > { %4322 = vmatprep.subr.bf16.mxu0 %v5687_v33  ;;  %v7003_v32 = vld [vmem:[%s7655_s0 + $0x8] sm:$0xff]  ;;  %s7688_s25 = smov (!%p330_p11, %s4880_s25), 7 }
  0x9a   : > { %v5773_v33 = vld [vmem:[%s6887_s23 + $0x160] ss:$8 sps:$4 sm:$0xff]   ;;  %s4881_s18 = sshll.u32 %s7688_s25, 2 }
  0x9b   : > { %3954 = vmatpush1.bf16.msra.mxu1 %v5689_v34  ;;  %v5776_v34 = vld [vmem:[%s6887_s23 + $0xa60] ss:$8 sps:$4 sm:$0xff]  }
  0x9c   : > { %4323 = vmatpush1.bf16.msra.mxu0 %v5690_v35  ;;  %3955 = vmatprep.subr.bf16.mxu1 %v5691_v36  ;;  %v4885_v35 = vcombine.high %v7003_v32, %v7003_v32  ;;  %v7012_v36 = vld [vmem:[%s7655_s0 + $0x50] sm:$0xff]  ;;  %v5800_v53 = vld [vmem:[%s6887_s23 + $0xaa0] ss:$8 sps:$4 sm:$0xff]  }
  0x9d   : > { %4324 = vmatprep.subr.bf16.mxu0 %v5693_v37  ;;  %v5781_v37 = vld [vmem:[%s6887_s23 + $0x174] ss:$8 sps:$4 sm:$0xff]  }
  0x9f   : > { %3956 = vmatpush1.bf16.msra.mxu1 %v5695_v38  ;;  %v4903_v38 = vcombine.high %v7012_v36, %v7012_v36 }
  0xa0   : > { %4325 = vmatpush1.bf16.msra.mxu0 %v5696_v39  ;;  %3957 = vmatprep.subr.bf16.mxu1 %v5697_v40  ;;  %v5784_v39 = vld [vmem:[%s6887_s23 + $0xa74] ss:$8 sps:$4 sm:$0xff]   ;;  %v5779_v40 = vld [vmem:[%s6887_s23 + $0x170] ss:$8 sps:$4 sm:$0xff]  }
  0xa1   : > { %4326 = vmatprep.subr.bf16.mxu0 %v5699_v41  ;;  %v5782_v41 = vld [vmem:[%s6887_s23 + $0xa70] ss:$8 sps:$4 sm:$0xff]  }
  0xa3   : > { %3958 = vmatpush1.bf16.msra.mxu1 %v5701_v42  ;;  %v5787_v42 = vld [vmem:[%s6887_s23 + $0x184] ss:$8 sps:$4 sm:$0xff]  }
  0xa4   : > { %4327 = vmatpush1.bf16.msra.mxu0 %v5702_v43  ;;  %3959 = vmatprep.subr.bf16.mxu1 %v5703_v44  ;;  %v5790_v43 = vld [vmem:[%s6887_s23 + $0xa84] ss:$8 sps:$4 sm:$0xff]   ;;  %v5785_v44 = vld [vmem:[%s6887_s23 + $0x180] ss:$8 sps:$4 sm:$0xff]  }
  0xa5   : > { %4328 = vmatprep.subr.bf16.mxu0 %v5705_v45  ;;  %v5788_v45 = vld [vmem:[%s6887_s23 + $0xa80] ss:$8 sps:$4 sm:$0xff]  }
  0xa7   : > { %3960 = vmatpush1.bf16.msra.mxu1 %v5707_v47  ;;  %v5796_v47 = vld [vmem:[%s6887_s23 + $0xa94] ss:$8 sps:$4 sm:$0xff]  }
  0xa8   : > { %4329 = vmatpush1.bf16.msra.mxu0 %v5708_v49  ;;  %3961 = vmatprep.subr.bf16.mxu1 %v5709_v51  ;;  %v5794_v49 = vld [vmem:[%s6887_s23 + $0xa90] ss:$8 sps:$4 sm:$0xff]   ;;  %v5802_v51 = vld [vmem:[%s6887_s23 + $0xaa4] ss:$8 sps:$4 sm:$0xff]  }
  0xa9   : > { %4330 = vmatprep.subr.bf16.mxu0 %v5711_v52  ;;  %v5797_v52 = vld [vmem:[%s6887_s23 + $0x1a0] ss:$8 sps:$4 sm:$0xff]  }
  0xab   : > { %3962 = vmatpush1.bf16.msra.mxu1 %v5713_v54  ;;  %v5805_v54 = vld [vmem:[%s6887_s23 + $0x1b4] ss:$8 sps:$4 sm:$0xff]  }
  0xac   : > { %4331 = vmatpush1.bf16.msra.mxu0 %v5714_v55  ;;  %3963 = vmatprep.subr.bf16.mxu1 %v5715_v56  ;;  %v5808_v55 = vld [vmem:[%s6887_s23 + $0xab4] ss:$8 sps:$4 sm:$0xff]   ;;  %v5803_v56 = vld [vmem:[%s6887_s23 + $0x1b0] ss:$8 sps:$4 sm:$0xff]  }
  0xad   : > { %4332 = vmatprep.subr.bf16.mxu0 %v5717_v57  ;;  %v5806_v57 = vld [vmem:[%s6887_s23 + $0xab0] ss:$8 sps:$4 sm:$0xff]  }
  0xaf   : > { %3964 = vmatpush1.bf16.msra.mxu1 %v5719_v58  ;;  %v5811_v58 = vld [vmem:[%s6887_s23 + $0x1c4] ss:$8 sps:$4 sm:$0xff]  }
  0xb0   : > { %4333 = vmatpush1.bf16.msra.mxu0 %v5720_v59  ;;  %3965 = vmatprep.subr.bf16.mxu1 %v5721_v60  ;;  %v5814_v59 = vld [vmem:[%s6887_s23 + $0xac4] ss:$8 sps:$4 sm:$0xff]   ;;  %v5809_v60 = vld [vmem:[%s6887_s23 + $0x1c0] ss:$8 sps:$4 sm:$0xff]  }
  0xb1   : > { %4334 = vmatprep.subr.bf16.mxu0 %v5723_v61  ;;  %v5812_v61 = vld [vmem:[%s6887_s23 + $0xac0] ss:$8 sps:$4 sm:$0xff]  }
  0xb3   : > { %3966 = vmatpush1.bf16.msra.mxu1 %v5725_v62  ;;  %v5817_v62 = vld [vmem:[%s6887_s23 + $0x1d4] ss:$8 sps:$4 sm:$0xff]  }
  0xb4   : > { %4335 = vmatpush1.bf16.msra.mxu0 %v5726_v63  ;;  %3967 = vmatprep.subr.bf16.mxu1 %v5727_v0  ;;  %v5820_v63 = vld [vmem:[%s6887_s23 + $0xad4] ss:$8 sps:$4 sm:$0xff]   ;;  %v5815_v0 = vld [vmem:[%s6887_s23 + $0x1d0] ss:$8 sps:$4 sm:$0xff]  }
  0xb5   : > { %4336 = vmatprep.subr.bf16.mxu0 %v5729_v1  ;;  %v5818_v1 = vld [vmem:[%s6887_s23 + $0xad0] ss:$8 sps:$4 sm:$0xff]  }
  0xb7   : > { %3968 = vmatpush1.bf16.msra.mxu1 %v5731_v2  ;;  %v5823_v2 = vld [vmem:[%s6887_s23 + $0x1e4] ss:$8 sps:$4 sm:$0xff]  }
  0xb8   : > { %4337 = vmatpush1.bf16.msra.mxu0 %v5732_v3  ;;  %3978 = vmatprep.subr.bf16.mxu1 %v5737_v4  ;;  %v5826_v3 = vld [vmem:[%s6887_s23 + $0xae4] ss:$8 sps:$4 sm:$0xff]   ;;  %v5821_v4 = vld [vmem:[%s6887_s23 + $0x1e0] ss:$8 sps:$4 sm:$0xff]  }
  0xb9   : > { %4347 = vmatprep.subr.bf16.mxu0 %v5742_v5  ;;  %v5824_v5 = vld [vmem:[%s6887_s23 + $0xae0] ss:$8 sps:$4 sm:$0xff]  }
  0xba   : > { %3970 = vmatmul.mubr.bf16.vlgmr.msra.gmra.mrb[0].mxu1 %v4882_v6  ;;  %v5829_v6 = vld [vmem:[%s6887_s23 + $0x1f4] ss:$8 sps:$4 sm:$0xff]  }
  0xbb   : > { %4339 = vmatmul.mubr.bf16.vlgmr.msra.gmra.mrb[0].mxu0 %v4900_v7  ;;  %3979 = vmatpush1.bf16.msra.mxu1 %v5735_v8  ;;  %v5832_v7 = vld [vmem:[%s6887_s23 + $0xaf4] ss:$8 sps:$4 sm:$0xff]   ;;  %v5827_v8 = vld [vmem:[%s6887_s23 + $0x1f0] ss:$8 sps:$4 sm:$0xff]  }
  0xbc   : > { %4348 = vmatpush1.bf16.msra.mxu0 %v5740_v9  ;;  %3980 = vmatprep.subr.bf16.mxu1 %v5745_v10  ;;  %v5830_v9 = vld [vmem:[%s6887_s23 + $0xaf0] ss:$8 sps:$4 sm:$0xff]   ;;  %v5837_v10 = vld [vmem:[%s6887_s23 + $0x204] ss:$8 sps:$4 sm:$0xff]  }
  0xbd   : > { %4349 = vmatprep.subr.bf16.mxu0 %v5748_v11  ;;  %4010 = vmatprep.mubr.bf16.mxu1 %v4885_v35  ;;  %v5842_v11 = vld [vmem:[%s6887_s23 + $0xb04] ss:$8 sps:$4 sm:$0xff]   ;;  %v5864_v35 = vld [vmem:[%s6887_s23 + $0xb40] ss:$8 sps:$4 sm:$0xff]  }
  0xbe   : > { %4379 = vmatprep.mubr.bf16.mxu0 %v4903_v38  ;;  %v5867_v38 = vld [vmem:[%s6887_s23 + $0x250] ss:$8 sps:$4 sm:$0xff]  }
  0xbf   : > { %3981 = vmatpush1.bf16.msra.mxu1 %v5743_v12  ;;  %v4884_v12 = vcombine.low %v7003_v32, %v7003_v32  ;;  %v5863_v32 = vld [vmem:[%s6887_s23 + $0x244] ss:$8 sps:$4 sm:$0xff]  }
  0xc0   : > { %4350 = vmatpush1.bf16.msra.mxu0 %v5746_v13  ;;  %3982 = vmatprep.subr.bf16.mxu1 %v5751_v14  ;;  %v5835_v13 = vld [vmem:[%s6887_s23 + $0x200] ss:$8 sps:$4 sm:$0xff]   ;;  %v4902_v14 = vcombine.low %v7012_v36, %v7012_v36  ;;  %v5869_v36 = vld [vmem:[%s6887_s23 + $0x254] ss:$8 sps:$4 sm:$0xff]  }
  0xc1   : > { %4351 = vmatprep.subr.bf16.mxu0 %v5754_v15  ;;  %v5840_v15 = vld [vmem:[%s6887_s23 + $0xb00] ss:$8 sps:$4 sm:$0xff]  }
  0xc3   : > { %3983 = vmatpush1.bf16.msra.mxu1 %v5749_v16  ;;  %v5845_v16 = vld [vmem:[%s6887_s23 + $0x214] ss:$8 sps:$4 sm:$0xff]  }
  0xc4   : > { %4352 = vmatpush1.bf16.msra.mxu0 %v5752_v17  ;;  %3984 = vmatprep.subr.bf16.mxu1 %v5757_v18  ;;  %v5848_v17 = vld [vmem:[%s6887_s23 + $0xb14] ss:$8 sps:$4 sm:$0xff]  }
  0xc5   : > { %4353 = vmatprep.subr.bf16.mxu0 %v5760_v19  ;;  %v7065_v18 = vld [vmem:[%s7655_s0 + $0x10] sm:$0xff] }
  0xc6   : > { %v4887_v19 = vcombine.high %v7065_v18, %v7065_v18 }
  0xc7   : > { %3985 = vmatpush1.bf16.msra.mxu1 %v5755_v20  ;;  %v7072_v20 = vld [vmem:[%s7655_s0 + $0x58] sm:$0xff] }
  0xc8   : > { %4354 = vmatpush1.bf16.msra.mxu0 %v5758_v21  ;;  %3986 = vmatprep.subr.bf16.mxu1 %v5763_v22  ;;  %v5843_v21 = vld [vmem:[%s6887_s23 + $0x210] ss:$8 sps:$4 sm:$0xff]  }
  0xc9   : > { %4355 = vmatprep.subr.bf16.mxu0 %v5766_v23  ;;  %v5846_v22 = vld [vmem:[%s6887_s23 + $0xb10] ss:$8 sps:$4 sm:$0xff]   ;;  %v4905_v23 = vcombine.high %v7072_v20, %v7072_v20 }
  0xcb   : > { %3987 = vmatpush1.bf16.msra.mxu1 %v5761_v24  ;;  %v5851_v24 = vld [vmem:[%s6887_s23 + $0x224] ss:$8 sps:$4 sm:$0xff]  }
  0xcc   : > { %4356 = vmatpush1.bf16.msra.mxu0 %v5764_v25  ;;  %3988 = vmatprep.subr.bf16.mxu1 %v5769_v26  ;;  %v5854_v25 = vld [vmem:[%s6887_s23 + $0xb24] ss:$8 sps:$4 sm:$0xff]   ;;  %v5849_v26 = vld [vmem:[%s6887_s23 + $0x220] ss:$8 sps:$4 sm:$0xff]  }
  0xcd   : > { %4357 = vmatprep.subr.bf16.mxu0 %v5772_v27  ;;  %v5852_v27 = vld [vmem:[%s6887_s23 + $0xb20] ss:$8 sps:$4 sm:$0xff]  }
  0xcf   : > { %3989 = vmatpush1.bf16.msra.mxu1 %v5767_v28  ;;  %v5857_v28 = vld [vmem:[%s6887_s23 + $0x234] ss:$8 sps:$4 sm:$0xff]  }
  0xd0   : > { %4358 = vmatpush1.bf16.msra.mxu0 %v5770_v29  ;;  %3990 = vmatprep.subr.bf16.mxu1 %v5775_v30  ;;  %v5860_v29 = vld [vmem:[%s6887_s23 + $0xb34] ss:$8 sps:$4 sm:$0xff]   ;;  %v5855_v30 = vld [vmem:[%s6887_s23 + $0x230] ss:$8 sps:$4 sm:$0xff]  }
  0xd1   : > { %4359 = vmatprep.subr.bf16.mxu0 %v5778_v31  ;;  %v5858_v31 = vld [vmem:[%s6887_s23 + $0xb30] ss:$8 sps:$4 sm:$0xff]  }
  0xd3   : > { %3991 = vmatpush1.bf16.msra.mxu1 %v5773_v33  ;;  %v5866_v33 = vld [vmem:[%s6887_s23 + $0xb44] ss:$8 sps:$4 sm:$0xff]  }
  0xd4   : > { %4360 = vmatpush1.bf16.msra.mxu0 %v5776_v34  ;;  %3992 = vmatprep.subr.bf16.mxu1 %v5781_v37  ;;  %v5861_v34 = vld [vmem:[%s6887_s23 + $0x240] ss:$8 sps:$4 sm:$0xff]   ;;  %v5872_v37 = vld [vmem:[%s6887_s23 + $0xb54] ss:$8 sps:$4 sm:$0xff]  }
  0xd5   : > { %4361 = vmatprep.subr.bf16.mxu0 %v5784_v39  ;;  %v5870_v39 = vld [vmem:[%s6887_s23 + $0xb50] ss:$8 sps:$4 sm:$0xff]  }
  0xd7   : > { %3993 = vmatpush1.bf16.msra.mxu1 %v5779_v40  ;;  %v5875_v40 = vld [vmem:[%s6887_s23 + $0x264] ss:$8 sps:$4 sm:$0xff]  }
  0xd8   : > { %4362 = vmatpush1.bf16.msra.mxu0 %v5782_v41  ;;  %3994 = vmatprep.subr.bf16.mxu1 %v5787_v42  ;;  %v5878_v41 = vld [vmem:[%s6887_s23 + $0xb64] ss:$8 sps:$4 sm:$0xff]   ;;  %v5873_v42 = vld [vmem:[%s6887_s23 + $0x260] ss:$8 sps:$4 sm:$0xff]  }
  0xd9   : > { %4363 = vmatprep.subr.bf16.mxu0 %v5790_v43  ;;  %v5876_v43 = vld [vmem:[%s6887_s23 + $0xb60] ss:$8 sps:$4 sm:$0xff]  }
  0xdb   : > { %3995 = vmatpush1.bf16.msra.mxu1 %v5785_v44  ;;  %v5881_v44 = vld [vmem:[%s6887_s23 + $0x274] ss:$8 sps:$4 sm:$0xff]  }
  0xdc   : > { %4364 = vmatpush1.bf16.msra.mxu0 %v5788_v45  ;;  %3996 = vmatprep.subr.bf16.mxu1 %v5793_v46  ;;  %v5884_v45 = vld [vmem:[%s6887_s23 + $0xb74] ss:$8 sps:$4 sm:$0xff]   ;;  %v5879_v46 = vld [vmem:[%s6887_s23 + $0x270] ss:$8 sps:$4 sm:$0xff]  }
  0xdd   : > { %4365 = vmatprep.subr.bf16.mxu0 %v5796_v47  ;;  %v5882_v47 = vld [vmem:[%s6887_s23 + $0xb70] ss:$8 sps:$4 sm:$0xff]  }
  0xdf   : > { %3997 = vmatpush1.bf16.msra.mxu1 %v5791_v48  ;;  %v5887_v48 = vld [vmem:[%s6887_s23 + $0x284] ss:$8 sps:$4 sm:$0xff]  }
  0xe0   : > { %4366 = vmatpush1.bf16.msra.mxu0 %v5794_v49  ;;  %3998 = vmatprep.subr.bf16.mxu1 %v5799_v50  ;;  %v5890_v49 = vld [vmem:[%s6887_s23 + $0xb84] ss:$8 sps:$4 sm:$0xff]   ;;  %v5885_v50 = vld [vmem:[%s6887_s23 + $0x280] ss:$8 sps:$4 sm:$0xff]  }
  0xe1   : > { %4367 = vmatprep.subr.bf16.mxu0 %v5802_v51  ;;  %v5888_v51 = vld [vmem:[%s6887_s23 + $0xb80] ss:$8 sps:$4 sm:$0xff]  }
  0xe3   : > { %3999 = vmatpush1.bf16.msra.mxu1 %v5797_v52  ;;  %v5893_v52 = vld [vmem:[%s6887_s23 + $0x294] ss:$8 sps:$4 sm:$0xff]  }
  0xe4   : > { %4368 = vmatpush1.bf16.msra.mxu0 %v5800_v53  ;;  %4000 = vmatprep.subr.bf16.mxu1 %v5805_v54  ;;  %v5896_v53 = vld [vmem:[%s6887_s23 + $0xb94] ss:$8 sps:$4 sm:$0xff]   ;;  %v5891_v54 = vld [vmem:[%s6887_s23 + $0x290] ss:$8 sps:$4 sm:$0xff]  }
  0xe5   : > { %4369 = vmatprep.subr.bf16.mxu0 %v5808_v55  ;;  %v5894_v55 = vld [vmem:[%s6887_s23 + $0xb90] ss:$8 sps:$4 sm:$0xff]  }
  0xe7   : > { %4001 = vmatpush1.bf16.msra.mxu1 %v5803_v56  ;;  %v5899_v56 = vld [vmem:[%s6887_s23 + $0x2a4] ss:$8 sps:$4 sm:$0xff]  }
  0xe8   : > { %4370 = vmatpush1.bf16.msra.mxu0 %v5806_v57  ;;  %4002 = vmatprep.subr.bf16.mxu1 %v5811_v58  ;;  %v5902_v57 = vld [vmem:[%s6887_s23 + $0xba4] ss:$8 sps:$4 sm:$0xff]   ;;  %v5897_v58 = vld [vmem:[%s6887_s23 + $0x2a0] ss:$8 sps:$4 sm:$0xff]  }
  0xe9   : > { %4371 = vmatprep.subr.bf16.mxu0 %v5814_v59  ;;  %v5900_v59 = vld [vmem:[%s6887_s23 + $0xba0] ss:$8 sps:$4 sm:$0xff]  }
  0xeb   : > { %4003 = vmatpush1.bf16.msra.mxu1 %v5809_v60  ;;  %v5905_v60 = vld [vmem:[%s6887_s23 + $0x2b4] ss:$8 sps:$4 sm:$0xff]  }
  0xec   : > { %4372 = vmatpush1.bf16.msra.mxu0 %v5812_v61  ;;  %4004 = vmatprep.subr.bf16.mxu1 %v5817_v62  ;;  %v5908_v61 = vld [vmem:[%s6887_s23 + $0xbb4] ss:$8 sps:$4 sm:$0xff]   ;;  %v5903_v62 = vld [vmem:[%s6887_s23 + $0x2b0] ss:$8 sps:$4 sm:$0xff]  }
  0xed   : > { %4373 = vmatprep.subr.bf16.mxu0 %v5820_v63  ;;  %v5906_v63 = vld [vmem:[%s6887_s23 + $0xbb0] ss:$8 sps:$4 sm:$0xff]  }
  0xef   : > { %4005 = vmatpush1.bf16.msra.mxu1 %v5815_v0  ;;  %v5911_v0 = vld [vmem:[%s6887_s23 + $0x2c4] ss:$8 sps:$4 sm:$0xff]  }
  0xf0   : > { %4374 = vmatpush1.bf16.msra.mxu0 %v5818_v1  ;;  %4006 = vmatprep.subr.bf16.mxu1 %v5823_v2  ;;  %v5914_v1 = vld [vmem:[%s6887_s23 + $0xbc4] ss:$8 sps:$4 sm:$0xff]   ;;  %v5909_v2 = vld [vmem:[%s6887_s23 + $0x2c0] ss:$8 sps:$4 sm:$0xff]  }
  0xf1   : > { %4375 = vmatprep.subr.bf16.mxu0 %v5826_v3  ;;  %v5912_v3 = vld [vmem:[%s6887_s23 + $0xbc0] ss:$8 sps:$4 sm:$0xff]  }
  0xf3   : > { %4007 = vmatpush1.bf16.msra.mxu1 %v5821_v4  ;;  %v5917_v4 = vld [vmem:[%s6887_s23 + $0x2d4] ss:$8 sps:$4 sm:$0xff]  }
  0xf4   : > { %4376 = vmatpush1.bf16.msra.mxu0 %v5824_v5  ;;  %4008 = vmatprep.subr.bf16.mxu1 %v5829_v6  ;;  %v5920_v5 = vld [vmem:[%s6887_s23 + $0xbd4] ss:$8 sps:$4 sm:$0xff]   ;;  %v5915_v6 = vld [vmem:[%s6887_s23 + $0x2d0] ss:$8 sps:$4 sm:$0xff]  }
  0xf5   : > { %4377 = vmatprep.subr.bf16.mxu0 %v5832_v7  ;;  %v5918_v7 = vld [vmem:[%s6887_s23 + $0xbd0] ss:$8 sps:$4 sm:$0xff]  }
  0xf7   : > { %4009 = vmatpush1.bf16.msra.mxu1 %v5827_v8  ;;  %v5923_v8 = vld [vmem:[%s6887_s23 + $0x2e4] ss:$8 sps:$4 sm:$0xff]  }
  0xf8   : > { %4378 = vmatpush1.bf16.msra.mxu0 %v5830_v9  ;;  %4019 = vmatprep.subr.bf16.mxu1 %v5837_v10  ;;  %v5926_v9 = vld [vmem:[%s6887_s23 + $0xbe4] ss:$8 sps:$4 sm:$0xff]   ;;  %v5921_v10 = vld [vmem:[%s6887_s23 + $0x2e0] ss:$8 sps:$4 sm:$0xff]  }
  0xf9   : > { %4388 = vmatprep.subr.bf16.mxu0 %v5842_v11  ;;  %v5924_v11 = vld [vmem:[%s6887_s23 + $0xbe0] ss:$8 sps:$4 sm:$0xff]  }
  0xfa   : > { %4011 = vmatmul.mubr.bf16.vlgmr.msra.gmra.mrb[0].mxu1 %v4884_v12  ;;  %v5929_v12 = vld [vmem:[%s6887_s23 + $0x2f4] ss:$8 sps:$4 sm:$0xff]  }
  0xfb   : > { %4380 = vmatmul.mubr.bf16.vlgmr.msra.gmra.mrb[0].mxu0 %v4902_v14  ;;  %4020 = vmatpush1.bf16.msra.mxu1 %v5835_v13  ;;  %v5932_v13 = vld [vmem:[%s6887_s23 + $0xbf4] ss:$8 sps:$4 sm:$0xff]   ;;  %v5927_v14 = vld [vmem:[%s6887_s23 + $0x2f0] ss:$8 sps:$4 sm:$0xff]  }
  0xfc   : > { %4389 = vmatpush1.bf16.msra.mxu0 %v5840_v15  ;;  %4021 = vmatprep.subr.bf16.mxu1 %v5845_v16  ;;  %v5930_v15 = vld [vmem:[%s6887_s23 + $0xbf0] ss:$8 sps:$4 sm:$0xff]   ;;  %v5937_v16 = vld [vmem:[%s6887_s23 + $0x304] ss:$8 sps:$4 sm:$0xff]  }
  0xfd   : > { %4390 = vmatprep.subr.bf16.mxu0 %v5848_v17  ;;  %4051 = vmatprep.mubr.bf16.mxu1 %v4887_v19  ;;  %v5942_v17 = vld [vmem:[%s6887_s23 + $0xc04] ss:$8 sps:$4 sm:$0xff]   ;;  %v5935_v19 = vld [vmem:[%s6887_s23 + $0x300] ss:$8 sps:$4 sm:$0xff]  }
  0xfe   : > { %4420 = vmatprep.mubr.bf16.mxu0 %v4905_v23  ;;  %v4904_v23 = vcombine.low %v7072_v20, %v7072_v20 }
  0xff   : > { %4022 = vmatpush1.bf16.msra.mxu1 %v5843_v21  ;;  %v5940_v21 = vld [vmem:[%s6887_s23 + $0xc00] ss:$8 sps:$4 sm:$0xff]  }
 0x100   : > { %4391 = vmatpush1.bf16.msra.mxu0 %v5846_v22  ;;  %4023 = vmatprep.subr.bf16.mxu1 %v5851_v24  ;;  %v4886_v22 = vcombine.low %v7065_v18, %v7065_v18  ;;  %v7145_v24 = vld [vmem:[%s7655_s0 + $0x18] sm:$0xff] }
 0x101   : > { %4392 = vmatprep.subr.bf16.mxu0 %v5854_v25  ;;  %v7150_v25 = vld [vmem:[%s7655_s0 + $0x60] sm:$0xff]  ;;  %v5948_v18 = vld [vmem:[%s6887_s23 + $0xc14] ss:$8 sps:$4 sm:$0xff]   ;;  %v4889_v20 = vcombine.high %v7145_v24, %v7145_v24 }
 0x103   : > { %4024 = vmatpush1.bf16.msra.mxu1 %v5849_v26  ;;  %v5945_v26 = vld [vmem:[%s6887_s23 + $0x314] ss:$8 sps:$4 sm:$0xff]  }
 0x104   : > { %4393 = vmatpush1.bf16.msra.mxu0 %v5852_v27  ;;  %4025 = vmatprep.subr.bf16.mxu1 %v5857_v28  ;;  %v4907_v27 = vcombine.high %v7150_v25, %v7150_v25  ;;  %v5943_v28 = vld [vmem:[%s6887_s23 + $0x310] ss:$8 sps:$4 sm:$0xff]  }
 0x105   : > { %4394 = vmatprep.subr.bf16.mxu0 %v5860_v29  ;;  %v5946_v29 = vld [vmem:[%s6887_s23 + $0xc10] ss:$8 sps:$4 sm:$0xff]  }
 0x107   : > { %4026 = vmatpush1.bf16.msra.mxu1 %v5855_v30  ;;  %v5951_v30 = vld [vmem:[%s6887_s23 + $0x324] ss:$8 sps:$4 sm:$0xff]  }
 0x108   : > { %4395 = vmatpush1.bf16.msra.mxu0 %v5858_v31  ;;  %4027 = vmatprep.subr.bf16.mxu1 %v5863_v32  ;;  %v5954_v31 = vld [vmem:[%s6887_s23 + $0xc24] ss:$8 sps:$4 sm:$0xff]   ;;  %v5949_v32 = vld [vmem:[%s6887_s23 + $0x320] ss:$8 sps:$4 sm:$0xff]  }
 0x109   : > { %4396 = vmatprep.subr.bf16.mxu0 %v5866_v33  ;;  %v5952_v33 = vld [vmem:[%s6887_s23 + $0xc20] ss:$8 sps:$4 sm:$0xff]  }
 0x10b   : > { %4028 = vmatpush1.bf16.msra.mxu1 %v5861_v34  ;;  %v5957_v34 = vld [vmem:[%s6887_s23 + $0x334] ss:$8 sps:$4 sm:$0xff]  }
 0x10c   : > { %4397 = vmatpush1.bf16.msra.mxu0 %v5864_v35  ;;  %4029 = vmatprep.subr.bf16.mxu1 %v5869_v36  ;;  %v5960_v35 = vld [vmem:[%s6887_s23 + $0xc34] ss:$8 sps:$4 sm:$0xff]   ;;  %v5955_v36 = vld [vmem:[%s6887_s23 + $0x330] ss:$8 sps:$4 sm:$0xff]  }
 0x10d   : > { %4398 = vmatprep.subr.bf16.mxu0 %v5872_v37  ;;  %v5958_v37 = vld [vmem:[%s6887_s23 + $0xc30] ss:$8 sps:$4 sm:$0xff]  }
 0x10f   : > { %4030 = vmatpush1.bf16.msra.mxu1 %v5867_v38  ;;  %v5963_v38 = vld [vmem:[%s6887_s23 + $0x344] ss:$8 sps:$4 sm:$0xff]  }
 0x110   : > { %4399 = vmatpush1.bf16.msra.mxu0 %v5870_v39  ;;  %4031 = vmatprep.subr.bf16.mxu1 %v5875_v40  ;;  %v5966_v39 = vld [vmem:[%s6887_s23 + $0xc44] ss:$8 sps:$4 sm:$0xff]   ;;  %v5961_v40 = vld [vmem:[%s6887_s23 + $0x340] ss:$8 sps:$4 sm:$0xff]  }
 0x111   : > { %4400 = vmatprep.subr.bf16.mxu0 %v5878_v41  ;;  %v5964_v41 = vld [vmem:[%s6887_s23 + $0xc40] ss:$8 sps:$4 sm:$0xff]  }
 0x113   : > { %4032 = vmatpush1.bf16.msra.mxu1 %v5873_v42  ;;  %v5969_v42 = vld [vmem:[%s6887_s23 + $0x354] ss:$8 sps:$4 sm:$0xff]  }
 0x114   : > { %4401 = vmatpush1.bf16.msra.mxu0 %v5876_v43  ;;  %4033 = vmatprep.subr.bf16.mxu1 %v5881_v44  ;;  %v5972_v43 = vld [vmem:[%s6887_s23 + $0xc54] ss:$8 sps:$4 sm:$0xff]   ;;  %v5967_v44 = vld [vmem:[%s6887_s23 + $0x350] ss:$8 sps:$4 sm:$0xff]  }
 0x115   : > { %4402 = vmatprep.subr.bf16.mxu0 %v5884_v45  ;;  %v5970_v45 = vld [vmem:[%s6887_s23 + $0xc50] ss:$8 sps:$4 sm:$0xff]  }
 0x117   : > { %4034 = vmatpush1.bf16.msra.mxu1 %v5879_v46  ;;  %v5975_v46 = vld [vmem:[%s6887_s23 + $0x364] ss:$8 sps:$4 sm:$0xff]  }
 0x118   : > { %4403 = vmatpush1.bf16.msra.mxu0 %v5882_v47  ;;  %4035 = vmatprep.subr.bf16.mxu1 %v5887_v48  ;;  %v5978_v47 = vld [vmem:[%s6887_s23 + $0xc64] ss:$8 sps:$4 sm:$0xff]   ;;  %v5973_v48 = vld [vmem:[%s6887_s23 + $0x360] ss:$8 sps:$4 sm:$0xff]  }
 0x119   : > { %4404 = vmatprep.subr.bf16.mxu0 %v5890_v49  ;;  %v5976_v49 = vld [vmem:[%s6887_s23 + $0xc60] ss:$8 sps:$4 sm:$0xff]  }
 0x11b   : > { %4036 = vmatpush1.bf16.msra.mxu1 %v5885_v50  ;;  %v5981_v50 = vld [vmem:[%s6887_s23 + $0x374] ss:$8 sps:$4 sm:$0xff]  }
 0x11c   : > { %4405 = vmatpush1.bf16.msra.mxu0 %v5888_v51  ;;  %4037 = vmatprep.subr.bf16.mxu1 %v5893_v52  ;;  %v5984_v51 = vld [vmem:[%s6887_s23 + $0xc74] ss:$8 sps:$4 sm:$0xff]   ;;  %v5979_v52 = vld [vmem:[%s6887_s23 + $0x370] ss:$8 sps:$4 sm:$0xff]  }
 0x11d   : > { %4406 = vmatprep.subr.bf16.mxu0 %v5896_v53  ;;  %v5982_v53 = vld [vmem:[%s6887_s23 + $0xc70] ss:$8 sps:$4 sm:$0xff]  }
 0x11f   : > { %4038 = vmatpush1.bf16.msra.mxu1 %v5891_v54  ;;  %v5987_v54 = vld [vmem:[%s6887_s23 + $0x384] ss:$8 sps:$4 sm:$0xff]  }
 0x120   : > { %4407 = vmatpush1.bf16.msra.mxu0 %v5894_v55  ;;  %4039 = vmatprep.subr.bf16.mxu1 %v5899_v56  ;;  %v5990_v55 = vld [vmem:[%s6887_s23 + $0xc84] ss:$8 sps:$4 sm:$0xff]   ;;  %v5985_v56 = vld [vmem:[%s6887_s23 + $0x380] ss:$8 sps:$4 sm:$0xff]  }
 0x121   : > { %4408 = vmatprep.subr.bf16.mxu0 %v5902_v57  ;;  %v5988_v57 = vld [vmem:[%s6887_s23 + $0xc80] ss:$8 sps:$4 sm:$0xff]  }
 0x123   : > { %4040 = vmatpush1.bf16.msra.mxu1 %v5897_v58  ;;  %v5993_v58 = vld [vmem:[%s6887_s23 + $0x394] ss:$8 sps:$4 sm:$0xff]  }
 0x124   : > { %4409 = vmatpush1.bf16.msra.mxu0 %v5900_v59  ;;  %4041 = vmatprep.subr.bf16.mxu1 %v5905_v60  ;;  %v5996_v59 = vld [vmem:[%s6887_s23 + $0xc94] ss:$8 sps:$4 sm:$0xff]   ;;  %v5991_v60 = vld [vmem:[%s6887_s23 + $0x390] ss:$8 sps:$4 sm:$0xff]  }
 0x125   : > { %4410 = vmatprep.subr.bf16.mxu0 %v5908_v61  ;;  %v5994_v61 = vld [vmem:[%s6887_s23 + $0xc90] ss:$8 sps:$4 sm:$0xff]  }
 0x127   : > { %4042 = vmatpush1.bf16.msra.mxu1 %v5903_v62  ;;  %v5999_v62 = vld [vmem:[%s6887_s23 + $0x3a4] ss:$8 sps:$4 sm:$0xff]  }
 0x128   : > { %4411 = vmatpush1.bf16.msra.mxu0 %v5906_v63  ;;  %4043 = vmatprep.subr.bf16.mxu1 %v5911_v0  ;;  %v6002_v63 = vld [vmem:[%s6887_s23 + $0xca4] ss:$8 sps:$4 sm:$0xff]   ;;  %v5997_v0 = vld [vmem:[%s6887_s23 + $0x3a0] ss:$8 sps:$4 sm:$0xff]  }
 0x129   : > { %4412 = vmatprep.subr.bf16.mxu0 %v5914_v1  ;;  %v6000_v1 = vld [vmem:[%s6887_s23 + $0xca0] ss:$8 sps:$4 sm:$0xff]  }
 0x12b   : > { %4044 = vmatpush1.bf16.msra.mxu1 %v5909_v2  ;;  %v6005_v2 = vld [vmem:[%s6887_s23 + $0x3b4] ss:$8 sps:$4 sm:$0xff]  }
 0x12c   : > { %4413 = vmatpush1.bf16.msra.mxu0 %v5912_v3  ;;  %4045 = vmatprep.subr.bf16.mxu1 %v5917_v4  ;;  %v6008_v3 = vld [vmem:[%s6887_s23 + $0xcb4] ss:$8 sps:$4 sm:$0xff]   ;;  %v6003_v4 = vld [vmem:[%s6887_s23 + $0x3b0] ss:$8 sps:$4 sm:$0xff]  }
 0x12d   : > { %4414 = vmatprep.subr.bf16.mxu0 %v5920_v5  ;;  %v6006_v5 = vld [vmem:[%s6887_s23 + $0xcb0] ss:$8 sps:$4 sm:$0xff]  }
 0x12f   : > { %4046 = vmatpush1.bf16.msra.mxu1 %v5915_v6  ;;  %v6011_v6 = vld [vmem:[%s6887_s23 + $0x3c4] ss:$8 sps:$4 sm:$0xff]  }
 0x130   : > { %4415 = vmatpush1.bf16.msra.mxu0 %v5918_v7  ;;  %4047 = vmatprep.subr.bf16.mxu1 %v5923_v8  ;;  %v6014_v7 = vld [vmem:[%s6887_s23 + $0xcc4] ss:$8 sps:$4 sm:$0xff]   ;;  %v6009_v8 = vld [vmem:[%s6887_s23 + $0x3c0] ss:$8 sps:$4 sm:$0xff]  }
 0x131   : > { %4416 = vmatprep.subr.bf16.mxu0 %v5926_v9  ;;  %v6012_v9 = vld [vmem:[%s6887_s23 + $0xcc0] ss:$8 sps:$4 sm:$0xff]  }
 0x133   : > { %4048 = vmatpush1.bf16.msra.mxu1 %v5921_v10  ;;  %v6017_v10 = vld [vmem:[%s6887_s23 + $0x3d4] ss:$8 sps:$4 sm:$0xff]  }
 0x134   : > { %4417 = vmatpush1.bf16.msra.mxu0 %v5924_v11  ;;  %4049 = vmatprep.subr.bf16.mxu1 %v5929_v12  ;;  %v6020_v11 = vld [vmem:[%s6887_s23 + $0xcd4] ss:$8 sps:$4 sm:$0xff]   ;;  %v6015_v12 = vld [vmem:[%s6887_s23 + $0x3d0] ss:$8 sps:$4 sm:$0xff]  }
 0x135   : > { %4418 = vmatprep.subr.bf16.mxu0 %v5932_v13  ;;  %v6018_v13 = vld [vmem:[%s6887_s23 + $0xcd0] ss:$8 sps:$4 sm:$0xff]  }
 0x137   : > { %4050 = vmatpush1.bf16.msra.mxu1 %v5927_v14  ;;  %v6023_v14 = vld [vmem:[%s6887_s23 + $0x3e4] ss:$8 sps:$4 sm:$0xff]  }
 0x138   : > { %4419 = vmatpush1.bf16.msra.mxu0 %v5930_v15  ;;  %4060 = vmatprep.subr.bf16.mxu1 %v5937_v16  ;;  %v6026_v15 = vld [vmem:[%s6887_s23 + $0xce4] ss:$8 sps:$4 sm:$0xff]   ;;  %v6021_v16 = vld [vmem:[%s6887_s23 + $0x3e0] ss:$8 sps:$4 sm:$0xff]  }
 0x139   : > { %4429 = vmatprep.subr.bf16.mxu0 %v5942_v17  ;;  %v6024_v17 = vld [vmem:[%s6887_s23 + $0xce0] ss:$8 sps:$4 sm:$0xff]  }
 0x13a   : > { %4052 = vmatmul.mubr.bf16.vlgmr.msra.gmra.mrb[0].mxu1 %v4886_v22  ;;  %v6027_v22 = vld [vmem:[%s6887_s23 + $0x3f0] ss:$8 sps:$4 sm:$0xff]  }
 0x13b   : > { %4421 = vmatmul.mubr.bf16.vlgmr.msra.gmra.mrb[0].mxu0 %v4904_v23  ;;  %4061 = vmatpush1.bf16.msra.mxu1 %v5935_v19  ;;  %v6029_v19 = vld [vmem:[%s6887_s23 + $0x3f4] ss:$8 sps:$4 sm:$0xff]   ;;  %v6030_v23 = vld [vmem:[%s6887_s23 + $0xcf0] ss:$8 sps:$4 sm:$0xff]  }
 0x13c   : > { %4430 = vmatpush1.bf16.msra.mxu0 %v5940_v21  ;;  %4062 = vmatprep.subr.bf16.mxu1 %v5945_v26  ;;  %v6032_v21 = vld [vmem:[%s6887_s23 + $0xcf4] ss:$8 sps:$4 sm:$0xff]   ;;  %v6037_v26 = vld [vmem:[%s6887_s23 + $0x404] ss:$8 sps:$4 sm:$0xff]  }
 0x13d   : > { %4431 = vmatprep.subr.bf16.mxu0 %v5948_v18  ;;  %4092 = vmatprep.mubr.bf16.mxu1 %v4889_v20  ;;  %v6042_v18 = vld [vmem:[%s6887_s23 + $0xd04] ss:$8 sps:$4 sm:$0xff]  }
 0x13e   : > { %4461 = vmatprep.mubr.bf16.mxu0 %v4907_v27  ;;  %v7221_v20 = vld [vmem:[%s7655_s0 + $0x20] sm:$0xff]  ;;  %v4888_v27 = vcombine.low %v7145_v24, %v7145_v24  ;;  %v6048_v24 = vld [vmem:[%s6887_s23 + $0xd14] ss:$8 sps:$4 sm:$0xff]  }
 0x13f   : > { %4063 = vmatpush1.bf16.msra.mxu1 %v5943_v28  ;;  %v4906_v28 = vcombine.low %v7150_v25, %v7150_v25  ;;  %v4891_v25 = vcombine.high %v7221_v20, %v7221_v20 }
 0x140   : > { %4432 = vmatpush1.bf16.msra.mxu0 %v5946_v29  ;;  %4064 = vmatprep.subr.bf16.mxu1 %v5951_v30  ;;  %v7230_v29 = vld [vmem:[%s7655_s0 + $0x68] sm:$0xff] }
 0x141   : > { %4433 = vmatprep.subr.bf16.mxu0 %v5954_v31  ;;  %v6035_v30 = vld [vmem:[%s6887_s23 + $0x400] ss:$8 sps:$4 sm:$0xff]  }
 0x142   : > { %v6040_v31 = vld [vmem:[%s6887_s23 + $0xd00] ss:$8 sps:$4 sm:$0xff]  }
 0x143   : > { %4065 = vmatpush1.bf16.msra.mxu1 %v5949_v32  ;;  %v6045_v32 = vld [vmem:[%s6887_s23 + $0x414] ss:$8 sps:$4 sm:$0xff]  }
 0x144   : > { %4434 = vmatpush1.bf16.msra.mxu0 %v5952_v33  ;;  %4066 = vmatprep.subr.bf16.mxu1 %v5957_v34  ;;  %v4909_v33 = vcombine.high %v7230_v29, %v7230_v29  ;;  %v6043_v34 = vld [vmem:[%s6887_s23 + $0x410] ss:$8 sps:$4 sm:$0xff]  }
 0x145   : > { %4435 = vmatprep.subr.bf16.mxu0 %v5960_v35  ;;  %v6046_v35 = vld [vmem:[%s6887_s23 + $0xd10] ss:$8 sps:$4 sm:$0xff]  }
 0x147   : > { %4067 = vmatpush1.bf16.msra.mxu1 %v5955_v36  ;;  %v6051_v36 = vld [vmem:[%s6887_s23 + $0x424] ss:$8 sps:$4 sm:$0xff]  }
 0x148   : > { %4436 = vmatpush1.bf16.msra.mxu0 %v5958_v37  ;;  %4068 = vmatprep.subr.bf16.mxu1 %v5963_v38  ;;  %v6054_v37 = vld [vmem:[%s6887_s23 + $0xd24] ss:$8 sps:$4 sm:$0xff]   ;;  %v6049_v38 = vld [vmem:[%s6887_s23 + $0x420] ss:$8 sps:$4 sm:$0xff]  }
 0x149   : > { %4437 = vmatprep.subr.bf16.mxu0 %v5966_v39  ;;  %v6052_v39 = vld [vmem:[%s6887_s23 + $0xd20] ss:$8 sps:$4 sm:$0xff]  }
 0x14b   : > { %4069 = vmatpush1.bf16.msra.mxu1 %v5961_v40  ;;  %v6057_v40 = vld [vmem:[%s6887_s23 + $0x434] ss:$8 sps:$4 sm:$0xff]  }
 0x14c   : > { %4438 = vmatpush1.bf16.msra.mxu0 %v5964_v41  ;;  %4070 = vmatprep.subr.bf16.mxu1 %v5969_v42  ;;  %v6060_v41 = vld [vmem:[%s6887_s23 + $0xd34] ss:$8 sps:$4 sm:$0xff]   ;;  %v6055_v42 = vld [vmem:[%s6887_s23 + $0x430] ss:$8 sps:$4 sm:$0xff]  }
 0x14d   : > { %4439 = vmatprep.subr.bf16.mxu0 %v5972_v43  ;;  %v6058_v43 = vld [vmem:[%s6887_s23 + $0xd30] ss:$8 sps:$4 sm:$0xff]  }
 0x14f   : > { %4071 = vmatpush1.bf16.msra.mxu1 %v5967_v44  ;;  %v6063_v44 = vld [vmem:[%s6887_s23 + $0x444] ss:$8 sps:$4 sm:$0xff]  }
 0x150   : > { %4440 = vmatpush1.bf16.msra.mxu0 %v5970_v45  ;;  %4072 = vmatprep.subr.bf16.mxu1 %v5975_v46  ;;  %v6066_v45 = vld [vmem:[%s6887_s23 + $0xd44] ss:$8 sps:$4 sm:$0xff]   ;;  %v6061_v46 = vld [vmem:[%s6887_s23 + $0x440] ss:$8 sps:$4 sm:$0xff]  }
 0x151   : > { %4441 = vmatprep.subr.bf16.mxu0 %v5978_v47  ;;  %v6064_v47 = vld [vmem:[%s6887_s23 + $0xd40] ss:$8 sps:$4 sm:$0xff]  }
 0x153   : > { %4073 = vmatpush1.bf16.msra.mxu1 %v5973_v48  ;;  %v6069_v48 = vld [vmem:[%s6887_s23 + $0x454] ss:$8 sps:$4 sm:$0xff]  }
 0x154   : > { %4442 = vmatpush1.bf16.msra.mxu0 %v5976_v49  ;;  %4074 = vmatprep.subr.bf16.mxu1 %v5981_v50  ;;  %v6072_v49 = vld [vmem:[%s6887_s23 + $0xd54] ss:$8 sps:$4 sm:$0xff]   ;;  %v6067_v50 = vld [vmem:[%s6887_s23 + $0x450] ss:$8 sps:$4 sm:$0xff]  }
 0x155   : > { %4443 = vmatprep.subr.bf16.mxu0 %v5984_v51  ;;  %v6070_v51 = vld [vmem:[%s6887_s23 + $0xd50] ss:$8 sps:$4 sm:$0xff]  }
 0x157   : > { %4075 = vmatpush1.bf16.msra.mxu1 %v5979_v52  ;;  %v6075_v52 = vld [vmem:[%s6887_s23 + $0x464] ss:$8 sps:$4 sm:$0xff]  }
 0x158   : > { %4444 = vmatpush1.bf16.msra.mxu0 %v5982_v53  ;;  %4076 = vmatprep.subr.bf16.mxu1 %v5987_v54  ;;  %v6078_v53 = vld [vmem:[%s6887_s23 + $0xd64] ss:$8 sps:$4 sm:$0xff]   ;;  %v6073_v54 = vld [vmem:[%s6887_s23 + $0x460] ss:$8 sps:$4 sm:$0xff]  }
 0x159   : > { %4445 = vmatprep.subr.bf16.mxu0 %v5990_v55  ;;  %v6076_v55 = vld [vmem:[%s6887_s23 + $0xd60] ss:$8 sps:$4 sm:$0xff]  }
 0x15b   : > { %4077 = vmatpush1.bf16.msra.mxu1 %v5985_v56  ;;  %v6081_v56 = vld [vmem:[%s6887_s23 + $0x474] ss:$8 sps:$4 sm:$0xff]  }
 0x15c   : > { %4446 = vmatpush1.bf16.msra.mxu0 %v5988_v57  ;;  %4078 = vmatprep.subr.bf16.mxu1 %v5993_v58  ;;  %v6084_v57 = vld [vmem:[%s6887_s23 + $0xd74] ss:$8 sps:$4 sm:$0xff]   ;;  %v6079_v58 = vld [vmem:[%s6887_s23 + $0x470] ss:$8 sps:$4 sm:$0xff]  }
 0x15d   : > { %4447 = vmatprep.subr.bf16.mxu0 %v5996_v59  ;;  %v6082_v59 = vld [vmem:[%s6887_s23 + $0xd70] ss:$8 sps:$4 sm:$0xff]  }
 0x15f   : > { %4079 = vmatpush1.bf16.msra.mxu1 %v5991_v60  ;;  %v6087_v60 = vld [vmem:[%s6887_s23 + $0x484] ss:$8 sps:$4 sm:$0xff]  }
 0x160   : > { %4448 = vmatpush1.bf16.msra.mxu0 %v5994_v61  ;;  %4080 = vmatprep.subr.bf16.mxu1 %v5999_v62  ;;  %v6090_v61 = vld [vmem:[%s6887_s23 + $0xd84] ss:$8 sps:$4 sm:$0xff]   ;;  %v6085_v62 = vld [vmem:[%s6887_s23 + $0x480] ss:$8 sps:$4 sm:$0xff]  }
 0x161   : > { %4449 = vmatprep.subr.bf16.mxu0 %v6002_v63  ;;  %v6088_v63 = vld [vmem:[%s6887_s23 + $0xd80] ss:$8 sps:$4 sm:$0xff]  }
 0x163   : > { %4081 = vmatpush1.bf16.msra.mxu1 %v5997_v0  ;;  %v6093_v0 = vld [vmem:[%s6887_s23 + $0x494] ss:$8 sps:$4 sm:$0xff]  }
 0x164   : > { %4450 = vmatpush1.bf16.msra.mxu0 %v6000_v1  ;;  %4082 = vmatprep.subr.bf16.mxu1 %v6005_v2  ;;  %v6096_v1 = vld [vmem:[%s6887_s23 + $0xd94] ss:$8 sps:$4 sm:$0xff]   ;;  %v6091_v2 = vld [vmem:[%s6887_s23 + $0x490] ss:$8 sps:$4 sm:$0xff]  }
 0x165   : > { %4451 = vmatprep.subr.bf16.mxu0 %v6008_v3  ;;  %v6094_v3 = vld [vmem:[%s6887_s23 + $0xd90] ss:$8 sps:$4 sm:$0xff]  }
 0x167   : > { %4083 = vmatpush1.bf16.msra.mxu1 %v6003_v4  ;;  %v6099_v4 = vld [vmem:[%s6887_s23 + $0x4a4] ss:$8 sps:$4 sm:$0xff]  }
 0x168   : > { %4452 = vmatpush1.bf16.msra.mxu0 %v6006_v5  ;;  %4084 = vmatprep.subr.bf16.mxu1 %v6011_v6  ;;  %v6102_v5 = vld [vmem:[%s6887_s23 + $0xda4] ss:$8 sps:$4 sm:$0xff]   ;;  %v6097_v6 = vld [vmem:[%s6887_s23 + $0x4a0] ss:$8 sps:$4 sm:$0xff]  }
 0x169   : > { %4453 = vmatprep.subr.bf16.mxu0 %v6014_v7  ;;  %v6100_v7 = vld [vmem:[%s6887_s23 + $0xda0] ss:$8 sps:$4 sm:$0xff]  }
 0x16b   : > { %4085 = vmatpush1.bf16.msra.mxu1 %v6009_v8  ;;  %v6105_v8 = vld [vmem:[%s6887_s23 + $0x4b4] ss:$8 sps:$4 sm:$0xff]  }
 0x16c   : > { %4454 = vmatpush1.bf16.msra.mxu0 %v6012_v9  ;;  %4086 = vmatprep.subr.bf16.mxu1 %v6017_v10  ;;  %v6108_v9 = vld [vmem:[%s6887_s23 + $0xdb4] ss:$8 sps:$4 sm:$0xff]   ;;  %v6103_v10 = vld [vmem:[%s6887_s23 + $0x4b0] ss:$8 sps:$4 sm:$0xff]  }
 0x16d   : > { %4455 = vmatprep.subr.bf16.mxu0 %v6020_v11  ;;  %v6106_v11 = vld [vmem:[%s6887_s23 + $0xdb0] ss:$8 sps:$4 sm:$0xff]  }
 0x16f   : > { %4087 = vmatpush1.bf16.msra.mxu1 %v6015_v12  ;;  %v6111_v12 = vld [vmem:[%s6887_s23 + $0x4c4] ss:$8 sps:$4 sm:$0xff]  }
 0x170   : > { %4456 = vmatpush1.bf16.msra.mxu0 %v6018_v13  ;;  %4088 = vmatprep.subr.bf16.mxu1 %v6023_v14  ;;  %v6114_v13 = vld [vmem:[%s6887_s23 + $0xdc4] ss:$8 sps:$4 sm:$0xff]   ;;  %v6109_v14 = vld [vmem:[%s6887_s23 + $0x4c0] ss:$8 sps:$4 sm:$0xff]  }
 0x171   : > { %4457 = vmatprep.subr.bf16.mxu0 %v6026_v15  ;;  %v6112_v15 = vld [vmem:[%s6887_s23 + $0xdc0] ss:$8 sps:$4 sm:$0xff]  }
 0x173   : > { %4089 = vmatpush1.bf16.msra.mxu1 %v6021_v16  ;;  %v6117_v16 = vld [vmem:[%s6887_s23 + $0x4d4] ss:$8 sps:$4 sm:$0xff]  }
 0x174   : > { %4458 = vmatpush1.bf16.msra.mxu0 %v6024_v17  ;;  %4090 = vmatprep.subr.bf16.mxu1 %v6029_v19  ;;  %v6120_v17 = vld [vmem:[%s6887_s23 + $0xdd4] ss:$8 sps:$4 sm:$0xff]   ;;  %v6115_v19 = vld [vmem:[%s6887_s23 + $0x4d0] ss:$8 sps:$4 sm:$0xff]  }
 0x175   : > { %4459 = vmatprep.subr.bf16.mxu0 %v6032_v21  ;;  %v6118_v21 = vld [vmem:[%s6887_s23 + $0xdd0] ss:$8 sps:$4 sm:$0xff]  }
 0x177   : > { %4091 = vmatpush1.bf16.msra.mxu1 %v6027_v22  ;;  %v6123_v22 = vld [vmem:[%s6887_s23 + $0x4e4] ss:$8 sps:$4 sm:$0xff]  }
 0x178   : > { %4460 = vmatpush1.bf16.msra.mxu0 %v6030_v23  ;;  %4101 = vmatprep.subr.bf16.mxu1 %v6037_v26  ;;  %v6126_v23 = vld [vmem:[%s6887_s23 + $0xde4] ss:$8 sps:$4 sm:$0xff]   ;;  %v6121_v26 = vld [vmem:[%s6887_s23 + $0x4e0] ss:$8 sps:$4 sm:$0xff]  }
 0x179   : > { %4470 = vmatprep.subr.bf16.mxu0 %v6042_v18  ;;  %v6124_v18 = vld [vmem:[%s6887_s23 + $0xde0] ss:$8 sps:$4 sm:$0xff]  }
 0x17a   : > { %4093 = vmatmul.mubr.bf16.vlgmr.msra.gmra.mrb[0].mxu1 %v4888_v27  ;;  %v6129_v27 = vld [vmem:[%s6887_s23 + $0x4f4] ss:$8 sps:$4 sm:$0xff]  }
 0x17b   : > { %4462 = vmatmul.mubr.bf16.vlgmr.msra.gmra.mrb[0].mxu0 %v4906_v28  ;;  %4102 = vmatpush1.bf16.msra.mxu1 %v6035_v30  ;;  %v6132_v28 = vld [vmem:[%s6887_s23 + $0xdf4] ss:$8 sps:$4 sm:$0xff]   ;;  %v6127_v30 = vld [vmem:[%s6887_s23 + $0x4f0] ss:$8 sps:$4 sm:$0xff]  }
 0x17c   : > { %4471 = vmatpush1.bf16.msra.mxu0 %v6040_v31  ;;  %4103 = vmatprep.subr.bf16.mxu1 %v6045_v32  ;;  %v6130_v31 = vld [vmem:[%s6887_s23 + $0xdf0] ss:$8 sps:$4 sm:$0xff]   ;;  %v6137_v32 = vld [vmem:[%s6887_s23 + $0x504] ss:$8 sps:$4 sm:$0xff]  }
 0x17d   : > { %4472 = vmatprep.subr.bf16.mxu0 %v6048_v24  ;;  %4133 = vmatprep.mubr.bf16.mxu1 %v4891_v25  ;;  %v6142_v24 = vld [vmem:[%s6887_s23 + $0xe04] ss:$8 sps:$4 sm:$0xff]  }
 0x17e   : > { %4502 = vmatprep.mubr.bf16.mxu0 %v4909_v33  ;;  %v7303_v25 = vld [vmem:[%s7655_s0 + $0x28] sm:$0xff]  ;;  %v7308_v33 = vld [vmem:[%s7655_s0 + $0x70] sm:$0xff] }
 0x17f   : > { %4104 = vmatpush1.bf16.msra.mxu1 %v6043_v34  ;;  %v4890_v34 = vcombine.low %v7221_v20, %v7221_v20  ;;  %v4911_v20 = vcombine.high %v7308_v33, %v7308_v33 }
 0x180   : > { %4473 = vmatpush1.bf16.msra.mxu0 %v6046_v35  ;;  %4105 = vmatprep.subr.bf16.mxu1 %v6051_v36  ;;  %v4908_v35 = vcombine.low %v7230_v29, %v7230_v29  ;;  %v6135_v36 = vld [vmem:[%s6887_s23 + $0x500] ss:$8 sps:$4 sm:$0xff]   ;;  %v6143_v29 = vld [vmem:[%s6887_s23 + $0x510] ss:$8 sps:$4 sm:$0xff]  }
 0x181   : > { %4474 = vmatprep.subr.bf16.mxu0 %v6054_v37  ;;  %v6140_v37 = vld [vmem:[%s6887_s23 + $0xe00] ss:$8 sps:$4 sm:$0xff]  }
 0x183   : > { %4106 = vmatpush1.bf16.msra.mxu1 %v6049_v38  ;;  %v6145_v38 = vld [vmem:[%s6887_s23 + $0x514] ss:$8 sps:$4 sm:$0xff]  }
 0x184   : > { %4475 = vmatpush1.bf16.msra.mxu0 %v6052_v39  ;;  %4107 = vmatprep.subr.bf16.mxu1 %v6057_v40  ;;  %v6148_v39 = vld [vmem:[%s6887_s23 + $0xe14] ss:$8 sps:$4 sm:$0xff]   ;;  %v4893_v40 = vcombine.high %v7303_v25, %v7303_v25 }
 0x185   : > { %4476 = vmatprep.subr.bf16.mxu0 %v6060_v41  ;;  %v6146_v41 = vld [vmem:[%s6887_s23 + $0xe10] ss:$8 sps:$4 sm:$0xff]  }
 0x187   : > { %4108 = vmatpush1.bf16.msra.mxu1 %v6055_v42  ;;  %v6151_v42 = vld [vmem:[%s6887_s23 + $0x524] ss:$8 sps:$4 sm:$0xff]  }
 0x188   : > { %4477 = vmatpush1.bf16.msra.mxu0 %v6058_v43  ;;  %4109 = vmatprep.subr.bf16.mxu1 %v6063_v44  ;;  %v6154_v43 = vld [vmem:[%s6887_s23 + $0xe24] ss:$8 sps:$4 sm:$0xff]   ;;  %v6149_v44 = vld [vmem:[%s6887_s23 + $0x520] ss:$8 sps:$4 sm:$0xff]  }
 0x189   : > { %4478 = vmatprep.subr.bf16.mxu0 %v6066_v45  ;;  %v6152_v45 = vld [vmem:[%s6887_s23 + $0xe20] ss:$8 sps:$4 sm:$0xff]  }
 0x18b   : > { %4110 = vmatpush1.bf16.msra.mxu1 %v6061_v46  ;;  %v6157_v46 = vld [vmem:[%s6887_s23 + $0x534] ss:$8 sps:$4 sm:$0xff]  }
 0x18c   : > { %4479 = vmatpush1.bf16.msra.mxu0 %v6064_v47  ;;  %4111 = vmatprep.subr.bf16.mxu1 %v6069_v48  ;;  %v6160_v47 = vld [vmem:[%s6887_s23 + $0xe34] ss:$8 sps:$4 sm:$0xff]   ;;  %v6155_v48 = vld [vmem:[%s6887_s23 + $0x530] ss:$8 sps:$4 sm:$0xff]  }
 0x18d   : > { %4480 = vmatprep.subr.bf16.mxu0 %v6072_v49  ;;  %v6158_v49 = vld [vmem:[%s6887_s23 + $0xe30] ss:$8 sps:$4 sm:$0xff]  }
 0x18f   : > { %4112 = vmatpush1.bf16.msra.mxu1 %v6067_v50  ;;  %v6163_v50 = vld [vmem:[%s6887_s23 + $0x544] ss:$8 sps:$4 sm:$0xff]  }
 0x190   : > { %4481 = vmatpush1.bf16.msra.mxu0 %v6070_v51  ;;  %4113 = vmatprep.subr.bf16.mxu1 %v6075_v52  ;;  %v6166_v51 = vld [vmem:[%s6887_s23 + $0xe44] ss:$8 sps:$4 sm:$0xff]   ;;  %v6161_v52 = vld [vmem:[%s6887_s23 + $0x540] ss:$8 sps:$4 sm:$0xff]  }
 0x191   : > { %4482 = vmatprep.subr.bf16.mxu0 %v6078_v53  ;;  %v6164_v53 = vld [vmem:[%s6887_s23 + $0xe40] ss:$8 sps:$4 sm:$0xff]  }
 0x193   : > { %4114 = vmatpush1.bf16.msra.mxu1 %v6073_v54  ;;  %v6169_v54 = vld [vmem:[%s6887_s23 + $0x554] ss:$8 sps:$4 sm:$0xff]  }
 0x194   : > { %4483 = vmatpush1.bf16.msra.mxu0 %v6076_v55  ;;  %4115 = vmatprep.subr.bf16.mxu1 %v6081_v56  ;;  %v6172_v55 = vld [vmem:[%s6887_s23 + $0xe54] ss:$8 sps:$4 sm:$0xff]   ;;  %v6167_v56 = vld [vmem:[%s6887_s23 + $0x550] ss:$8 sps:$4 sm:$0xff]  }
 0x195   : > { %4484 = vmatprep.subr.bf16.mxu0 %v6084_v57  ;;  %v6170_v57 = vld [vmem:[%s6887_s23 + $0xe50] ss:$8 sps:$4 sm:$0xff]  }
 0x197   : > { %4116 = vmatpush1.bf16.msra.mxu1 %v6079_v58  ;;  %v6175_v58 = vld [vmem:[%s6887_s23 + $0x564] ss:$8 sps:$4 sm:$0xff]  }
 0x198   : > { %4485 = vmatpush1.bf16.msra.mxu0 %v6082_v59  ;;  %4117 = vmatprep.subr.bf16.mxu1 %v6087_v60  ;;  %v6178_v59 = vld [vmem:[%s6887_s23 + $0xe64] ss:$8 sps:$4 sm:$0xff]   ;;  %v6173_v60 = vld [vmem:[%s6887_s23 + $0x560] ss:$8 sps:$4 sm:$0xff]  }
 0x199   : > { %4486 = vmatprep.subr.bf16.mxu0 %v6090_v61  ;;  %v6176_v61 = vld [vmem:[%s6887_s23 + $0xe60] ss:$8 sps:$4 sm:$0xff]  }
 0x19b   : > { %4118 = vmatpush1.bf16.msra.mxu1 %v6085_v62  ;;  %v6181_v62 = vld [vmem:[%s6887_s23 + $0x574] ss:$8 sps:$4 sm:$0xff]  }
 0x19c   : > { %4487 = vmatpush1.bf16.msra.mxu0 %v6088_v63  ;;  %4119 = vmatprep.subr.bf16.mxu1 %v6093_v0  ;;  %v6184_v63 = vld [vmem:[%s6887_s23 + $0xe74] ss:$8 sps:$4 sm:$0xff]   ;;  %v6179_v0 = vld [vmem:[%s6887_s23 + $0x570] ss:$8 sps:$4 sm:$0xff]  }
 0x19d   : > { %4488 = vmatprep.subr.bf16.mxu0 %v6096_v1  ;;  %v6182_v1 = vld [vmem:[%s6887_s23 + $0xe70] ss:$8 sps:$4 sm:$0xff]  }
 0x19f   : > { %4120 = vmatpush1.bf16.msra.mxu1 %v6091_v2  ;;  %v6187_v2 = vld [vmem:[%s6887_s23 + $0x584] ss:$8 sps:$4 sm:$0xff]  }
 0x1a0   : > { %4489 = vmatpush1.bf16.msra.mxu0 %v6094_v3  ;;  %4121 = vmatprep.subr.bf16.mxu1 %v6099_v4  ;;  %v6190_v3 = vld [vmem:[%s6887_s23 + $0xe84] ss:$8 sps:$4 sm:$0xff]   ;;  %v6185_v4 = vld [vmem:[%s6887_s23 + $0x580] ss:$8 sps:$4 sm:$0xff]  }
 0x1a1   : > { %4490 = vmatprep.subr.bf16.mxu0 %v6102_v5  ;;  %v6188_v5 = vld [vmem:[%s6887_s23 + $0xe80] ss:$8 sps:$4 sm:$0xff]  }
 0x1a3   : > { %4122 = vmatpush1.bf16.msra.mxu1 %v6097_v6  ;;  %v6193_v6 = vld [vmem:[%s6887_s23 + $0x594] ss:$8 sps:$4 sm:$0xff]  }
 0x1a4   : > { %4491 = vmatpush1.bf16.msra.mxu0 %v6100_v7  ;;  %4123 = vmatprep.subr.bf16.mxu1 %v6105_v8  ;;  %v6196_v7 = vld [vmem:[%s6887_s23 + $0xe94] ss:$8 sps:$4 sm:$0xff]   ;;  %v6191_v8 = vld [vmem:[%s6887_s23 + $0x590] ss:$8 sps:$4 sm:$0xff]  }
 0x1a5   : > { %4492 = vmatprep.subr.bf16.mxu0 %v6108_v9  ;;  %v6194_v9 = vld [vmem:[%s6887_s23 + $0xe90] ss:$8 sps:$4 sm:$0xff]  }
 0x1a7   : > { %4124 = vmatpush1.bf16.msra.mxu1 %v6103_v10  ;;  %v6199_v10 = vld [vmem:[%s6887_s23 + $0x5a4] ss:$8 sps:$4 sm:$0xff]  }
 0x1a8   : > { %4493 = vmatpush1.bf16.msra.mxu0 %v6106_v11  ;;  %4125 = vmatprep.subr.bf16.mxu1 %v6111_v12  ;;  %v6202_v11 = vld [vmem:[%s6887_s23 + $0xea4] ss:$8 sps:$4 sm:$0xff]   ;;  %v6197_v12 = vld [vmem:[%s6887_s23 + $0x5a0] ss:$8 sps:$4 sm:$0xff]  }
 0x1a9   : > { %4494 = vmatprep.subr.bf16.mxu0 %v6114_v13  ;;  %v6200_v13 = vld [vmem:[%s6887_s23 + $0xea0] ss:$8 sps:$4 sm:$0xff]  }
 0x1ab   : > { %4126 = vmatpush1.bf16.msra.mxu1 %v6109_v14  ;;  %v6205_v14 = vld [vmem:[%s6887_s23 + $0x5b4] ss:$8 sps:$4 sm:$0xff]  }
 0x1ac   : > { %4495 = vmatpush1.bf16.msra.mxu0 %v6112_v15  ;;  %4127 = vmatprep.subr.bf16.mxu1 %v6117_v16  ;;  %v6208_v15 = vld [vmem:[%s6887_s23 + $0xeb4] ss:$8 sps:$4 sm:$0xff]   ;;  %v6203_v16 = vld [vmem:[%s6887_s23 + $0x5b0] ss:$8 sps:$4 sm:$0xff]  }
 0x1ad   : > { %4496 = vmatprep.subr.bf16.mxu0 %v6120_v17  ;;  %v6206_v17 = vld [vmem:[%s6887_s23 + $0xeb0] ss:$8 sps:$4 sm:$0xff]  }
 0x1af   : > { %4128 = vmatpush1.bf16.msra.mxu1 %v6115_v19  ;;  %v6211_v19 = vld [vmem:[%s6887_s23 + $0x5c4] ss:$8 sps:$4 sm:$0xff]  }
 0x1b0   : > { %4497 = vmatpush1.bf16.msra.mxu0 %v6118_v21  ;;  %4129 = vmatprep.subr.bf16.mxu1 %v6123_v22  ;;  %v6214_v21 = vld [vmem:[%s6887_s23 + $0xec4] ss:$8 sps:$4 sm:$0xff]   ;;  %v6209_v22 = vld [vmem:[%s6887_s23 + $0x5c0] ss:$8 sps:$4 sm:$0xff]  }
 0x1b1   : > { %4498 = vmatprep.subr.bf16.mxu0 %v6126_v23  ;;  %v6212_v23 = vld [vmem:[%s6887_s23 + $0xec0] ss:$8 sps:$4 sm:$0xff]  }
 0x1b3   : > { %4130 = vmatpush1.bf16.msra.mxu1 %v6121_v26  ;;  %v6217_v26 = vld [vmem:[%s6887_s23 + $0x5d4] ss:$8 sps:$4 sm:$0xff]  }
 0x1b4   : > { %4499 = vmatpush1.bf16.msra.mxu0 %v6124_v18  ;;  %4131 = vmatprep.subr.bf16.mxu1 %v6129_v27  ;;  %v6220_v18 = vld [vmem:[%s6887_s23 + $0xed4] ss:$8 sps:$4 sm:$0xff]   ;;  %v6215_v27 = vld [vmem:[%s6887_s23 + $0x5d0] ss:$8 sps:$4 sm:$0xff]  }
 0x1b5   : > { %4500 = vmatprep.subr.bf16.mxu0 %v6132_v28  ;;  %v6218_v28 = vld [vmem:[%s6887_s23 + $0xed0] ss:$8 sps:$4 sm:$0xff]  }
 0x1b7   : > { %4132 = vmatpush1.bf16.msra.mxu1 %v6127_v30  ;;  %v6223_v30 = vld [vmem:[%s6887_s23 + $0x5e4] ss:$8 sps:$4 sm:$0xff]  }
 0x1b8   : > { %4501 = vmatpush1.bf16.msra.mxu0 %v6130_v31  ;;  %4142 = vmatprep.subr.bf16.mxu1 %v6137_v32  ;;  %v6226_v31 = vld [vmem:[%s6887_s23 + $0xee4] ss:$8 sps:$4 sm:$0xff]   ;;  %v6221_v32 = vld [vmem:[%s6887_s23 + $0x5e0] ss:$8 sps:$4 sm:$0xff]  }
 0x1b9   : > { %4511 = vmatprep.subr.bf16.mxu0 %v6142_v24  ;;  %v6224_v24 = vld [vmem:[%s6887_s23 + $0xee0] ss:$8 sps:$4 sm:$0xff]  }
 0x1ba   : > { %4134 = vmatmul.mubr.bf16.vlgmr.msra.gmra.mrb[0].mxu1 %v4890_v34  ;;  %v6229_v34 = vld [vmem:[%s6887_s23 + $0x5f4] ss:$8 sps:$4 sm:$0xff]  }
 0x1bb   : > { %4503 = vmatmul.mubr.bf16.vlgmr.msra.gmra.mrb[0].mxu0 %v4908_v35  ;;  %4143 = vmatpush1.bf16.msra.mxu1 %v6135_v36  ;;  %v6232_v35 = vld [vmem:[%s6887_s23 + $0xef4] ss:$8 sps:$4 sm:$0xff]   ;;  %v6227_v36 = vld [vmem:[%s6887_s23 + $0x5f0] ss:$8 sps:$4 sm:$0xff]  }
 0x1bc   : > { %4512 = vmatpush1.bf16.msra.mxu0 %v6140_v37  ;;  %4144 = vmatprep.subr.bf16.mxu1 %v6145_v38  ;;  %v6230_v37 = vld [vmem:[%s6887_s23 + $0xef0] ss:$8 sps:$4 sm:$0xff]   ;;  %v6237_v38 = vld [vmem:[%s6887_s23 + $0x604] ss:$8 sps:$4 sm:$0xff]  }
 0x1bd   : > { %4513 = vmatprep.subr.bf16.mxu0 %v6148_v39  ;;  %4174 = vmatprep.mubr.bf16.mxu1 %v4893_v40  ;;  %v6242_v39 = vld [vmem:[%s6887_s23 + $0xf04] ss:$8 sps:$4 sm:$0xff]   ;;  %v4892_v40 = vcombine.low %v7303_v25, %v7303_v25  ;;  %v6240_v25 = vld [vmem:[%s6887_s23 + $0xf00] ss:$8 sps:$4 sm:$0xff]  }
 0x1be   : > { %4543 = vmatprep.mubr.bf16.mxu0 %v4911_v20  ;;  %v4910_v20 = vcombine.low %v7308_v33, %v7308_v33  ;;  %v6245_v33 = vld [vmem:[%s6887_s23 + $0x614] ss:$8 sps:$4 sm:$0xff]  }
 0x1bf   : > { %4145 = vmatpush1.bf16.msra.mxu1 %v6143_v29  ;;  %v7389_v29 = vld [vmem:[%s7655_s0 + $0x30] sm:$0xff] }
 0x1c0   : > { %4514 = vmatpush1.bf16.msra.mxu0 %v6146_v41  ;;  %4146 = vmatprep.subr.bf16.mxu1 %v6151_v42  ;;  %v7394_v41 = vld [vmem:[%s7655_s0 + $0x78] sm:$0xff]  ;;  %v6235_v42 = vld [vmem:[%s6887_s23 + $0x600] ss:$8 sps:$4 sm:$0xff]  }
 0x1c1   : > { %4515 = vmatprep.subr.bf16.mxu0 %v6154_v43  ;;  %v6248_v43 = vld [vmem:[%s6887_s23 + $0xf14] ss:$8 sps:$4 sm:$0xff]  }
 0x1c3   : > { %4147 = vmatpush1.bf16.msra.mxu1 %v6149_v44  ;;  %v4895_v44 = vcombine.high %v7389_v29, %v7389_v29 }
 0x1c4   : > { %4516 = vmatpush1.bf16.msra.mxu0 %v6152_v45  ;;  %4148 = vmatprep.subr.bf16.mxu1 %v6157_v46  ;;  %v4913_v45 = vcombine.high %v7394_v41, %v7394_v41  ;;  %v6243_v46 = vld [vmem:[%s6887_s23 + $0x610] ss:$8 sps:$4 sm:$0xff]  }
 0x1c5   : > { %4517 = vmatprep.subr.bf16.mxu0 %v6160_v47  ;;  %v6246_v47 = vld [vmem:[%s6887_s23 + $0xf10] ss:$8 sps:$4 sm:$0xff]  }
 0x1c7   : > { %4149 = vmatpush1.bf16.msra.mxu1 %v6155_v48  ;;  %v6251_v48 = vld [vmem:[%s6887_s23 + $0x624] ss:$8 sps:$4 sm:$0xff]  }
 0x1c8   : > { %4518 = vmatpush1.bf16.msra.mxu0 %v6158_v49  ;;  %4150 = vmatprep.subr.bf16.mxu1 %v6163_v50  ;;  %v6254_v49 = vld [vmem:[%s6887_s23 + $0xf24] ss:$8 sps:$4 sm:$0xff]   ;;  %v6249_v50 = vld [vmem:[%s6887_s23 + $0x620] ss:$8 sps:$4 sm:$0xff]  }
 0x1c9   : > { %4519 = vmatprep.subr.bf16.mxu0 %v6166_v51  ;;  %v6252_v51 = vld [vmem:[%s6887_s23 + $0xf20] ss:$8 sps:$4 sm:$0xff]  }
 0x1cb   : > { %4151 = vmatpush1.bf16.msra.mxu1 %v6161_v52  ;;  %v6257_v52 = vld [vmem:[%s6887_s23 + $0x634] ss:$8 sps:$4 sm:$0xff]  }
 0x1cc   : > { %4520 = vmatpush1.bf16.msra.mxu0 %v6164_v53  ;;  %4152 = vmatprep.subr.bf16.mxu1 %v6169_v54  ;;  %v6260_v53 = vld [vmem:[%s6887_s23 + $0xf34] ss:$8 sps:$4 sm:$0xff]   ;;  %v6255_v54 = vld [vmem:[%s6887_s23 + $0x630] ss:$8 sps:$4 sm:$0xff]  }
 0x1cd   : > { %4521 = vmatprep.subr.bf16.mxu0 %v6172_v55  ;;  %v6258_v55 = vld [vmem:[%s6887_s23 + $0xf30] ss:$8 sps:$4 sm:$0xff]  }
 0x1cf   : > { %4153 = vmatpush1.bf16.msra.mxu1 %v6167_v56  ;;  %v6263_v56 = vld [vmem:[%s6887_s23 + $0x644] ss:$8 sps:$4 sm:$0xff]  }
 0x1d0   : > { %4522 = vmatpush1.bf16.msra.mxu0 %v6170_v57  ;;  %4154 = vmatprep.subr.bf16.mxu1 %v6175_v58  ;;  %v6266_v57 = vld [vmem:[%s6887_s23 + $0xf44] ss:$8 sps:$4 sm:$0xff]   ;;  %v6261_v58 = vld [vmem:[%s6887_s23 + $0x640] ss:$8 sps:$4 sm:$0xff]  }
 0x1d1   : > { %4523 = vmatprep.subr.bf16.mxu0 %v6178_v59  ;;  %v6264_v59 = vld [vmem:[%s6887_s23 + $0xf40] ss:$8 sps:$4 sm:$0xff]  }
 0x1d3   : > { %4155 = vmatpush1.bf16.msra.mxu1 %v6173_v60  ;;  %v6269_v60 = vld [vmem:[%s6887_s23 + $0x654] ss:$8 sps:$4 sm:$0xff]  }
 0x1d4   : > { %4524 = vmatpush1.bf16.msra.mxu0 %v6176_v61  ;;  %4156 = vmatprep.subr.bf16.mxu1 %v6181_v62  ;;  %v6272_v61 = vld [vmem:[%s6887_s23 + $0xf54] ss:$8 sps:$4 sm:$0xff]   ;;  %v6267_v62 = vld [vmem:[%s6887_s23 + $0x650] ss:$8 sps:$4 sm:$0xff]  }
 0x1d5   : > { %4525 = vmatprep.subr.bf16.mxu0 %v6184_v63  ;;  %v6270_v63 = vld [vmem:[%s6887_s23 + $0xf50] ss:$8 sps:$4 sm:$0xff]  }
 0x1d7   : > { %4157 = vmatpush1.bf16.msra.mxu1 %v6179_v0  ;;  %v6275_v0 = vld [vmem:[%s6887_s23 + $0x664] ss:$8 sps:$4 sm:$0xff]  }
 0x1d8   : > { %4526 = vmatpush1.bf16.msra.mxu0 %v6182_v1  ;;  %4158 = vmatprep.subr.bf16.mxu1 %v6187_v2  ;;  %v6278_v1 = vld [vmem:[%s6887_s23 + $0xf64] ss:$8 sps:$4 sm:$0xff]   ;;  %v6273_v2 = vld [vmem:[%s6887_s23 + $0x660] ss:$8 sps:$4 sm:$0xff]  }
 0x1d9   : > { %4527 = vmatprep.subr.bf16.mxu0 %v6190_v3  ;;  %v6276_v3 = vld [vmem:[%s6887_s23 + $0xf60] ss:$8 sps:$4 sm:$0xff]  }
 0x1db   : > { %4159 = vmatpush1.bf16.msra.mxu1 %v6185_v4  ;;  %v6281_v4 = vld [vmem:[%s6887_s23 + $0x674] ss:$8 sps:$4 sm:$0xff]  }
 0x1dc   : > { %4528 = vmatpush1.bf16.msra.mxu0 %v6188_v5  ;;  %4160 = vmatprep.subr.bf16.mxu1 %v6193_v6  ;;  %v6284_v5 = vld [vmem:[%s6887_s23 + $0xf74] ss:$8 sps:$4 sm:$0xff]   ;;  %v6279_v6 = vld [vmem:[%s6887_s23 + $0x670] ss:$8 sps:$4 sm:$0xff]  }
 0x1dd   : > { %4529 = vmatprep.subr.bf16.mxu0 %v6196_v7  ;;  %v6282_v7 = vld [vmem:[%s6887_s23 + $0xf70] ss:$8 sps:$4 sm:$0xff]  }
 0x1df   : > { %4161 = vmatpush1.bf16.msra.mxu1 %v6191_v8  ;;  %v6287_v8 = vld [vmem:[%s6887_s23 + $0x684] ss:$8 sps:$4 sm:$0xff]  }
 0x1e0   : > { %4530 = vmatpush1.bf16.msra.mxu0 %v6194_v9  ;;  %4162 = vmatprep.subr.bf16.mxu1 %v6199_v10  ;;  %v6290_v9 = vld [vmem:[%s6887_s23 + $0xf84] ss:$8 sps:$4 sm:$0xff]   ;;  %v6285_v10 = vld [vmem:[%s6887_s23 + $0x680] ss:$8 sps:$4 sm:$0xff]  }
 0x1e1   : > { %4531 = vmatprep.subr.bf16.mxu0 %v6202_v11  ;;  %v6288_v11 = vld [vmem:[%s6887_s23 + $0xf80] ss:$8 sps:$4 sm:$0xff]  }
 0x1e3   : > { %4163 = vmatpush1.bf16.msra.mxu1 %v6197_v12  ;;  %v6293_v12 = vld [vmem:[%s6887_s23 + $0x694] ss:$8 sps:$4 sm:$0xff]  }
 0x1e4   : > { %4532 = vmatpush1.bf16.msra.mxu0 %v6200_v13  ;;  %4164 = vmatprep.subr.bf16.mxu1 %v6205_v14  ;;  %v6296_v13 = vld [vmem:[%s6887_s23 + $0xf94] ss:$8 sps:$4 sm:$0xff]   ;;  %v6291_v14 = vld [vmem:[%s6887_s23 + $0x690] ss:$8 sps:$4 sm:$0xff]  }
 0x1e5   : > { %4533 = vmatprep.subr.bf16.mxu0 %v6208_v15  ;;  %v6294_v15 = vld [vmem:[%s6887_s23 + $0xf90] ss:$8 sps:$4 sm:$0xff]  }
 0x1e7   : > { %4165 = vmatpush1.bf16.msra.mxu1 %v6203_v16  ;;  %v6299_v16 = vld [vmem:[%s6887_s23 + $0x6a4] ss:$8 sps:$4 sm:$0xff]  }
 0x1e8   : > { %4534 = vmatpush1.bf16.msra.mxu0 %v6206_v17  ;;  %4166 = vmatprep.subr.bf16.mxu1 %v6211_v19  ;;  %v6302_v17 = vld [vmem:[%s6887_s23 + $0xfa4] ss:$8 sps:$4 sm:$0xff]   ;;  %v6297_v19 = vld [vmem:[%s6887_s23 + $0x6a0] ss:$8 sps:$4 sm:$0xff]  }
 0x1e9   : > { %4535 = vmatprep.subr.bf16.mxu0 %v6214_v21  ;;  %v6300_v21 = vld [vmem:[%s6887_s23 + $0xfa0] ss:$8 sps:$4 sm:$0xff]  }
 0x1eb   : > { %4167 = vmatpush1.bf16.msra.mxu1 %v6209_v22  ;;  %v6305_v22 = vld [vmem:[%s6887_s23 + $0x6b4] ss:$8 sps:$4 sm:$0xff]  }
 0x1ec   : > { %4536 = vmatpush1.bf16.msra.mxu0 %v6212_v23  ;;  %4168 = vmatprep.subr.bf16.mxu1 %v6217_v26  ;;  %v6308_v23 = vld [vmem:[%s6887_s23 + $0xfb4] ss:$8 sps:$4 sm:$0xff]   ;;  %v6303_v26 = vld [vmem:[%s6887_s23 + $0x6b0] ss:$8 sps:$4 sm:$0xff]  }
 0x1ed   : > { %4537 = vmatprep.subr.bf16.mxu0 %v6220_v18  ;;  %v6306_v18 = vld [vmem:[%s6887_s23 + $0xfb0] ss:$8 sps:$4 sm:$0xff]  }
 0x1ef   : > { %4169 = vmatpush1.bf16.msra.mxu1 %v6215_v27  ;;  %v6311_v27 = vld [vmem:[%s6887_s23 + $0x6c4] ss:$8 sps:$4 sm:$0xff]  }
 0x1f0   : > { %4538 = vmatpush1.bf16.msra.mxu0 %v6218_v28  ;;  %4170 = vmatprep.subr.bf16.mxu1 %v6223_v30  ;;  %v6314_v28 = vld [vmem:[%s6887_s23 + $0xfc4] ss:$8 sps:$4 sm:$0xff]   ;;  %v6309_v30 = vld [vmem:[%s6887_s23 + $0x6c0] ss:$8 sps:$4 sm:$0xff]  }
 0x1f1   : > { %4539 = vmatprep.subr.bf16.mxu0 %v6226_v31  ;;  %v6312_v31 = vld [vmem:[%s6887_s23 + $0xfc0] ss:$8 sps:$4 sm:$0xff]  }
 0x1f3   : > { %4171 = vmatpush1.bf16.msra.mxu1 %v6221_v32  ;;  %v6317_v32 = vld [vmem:[%s6887_s23 + $0x6d4] ss:$8 sps:$4 sm:$0xff]  }
 0x1f4   : > { %4540 = vmatpush1.bf16.msra.mxu0 %v6224_v24  ;;  %4172 = vmatprep.subr.bf16.mxu1 %v6229_v34  ;;  %v6320_v24 = vld [vmem:[%s6887_s23 + $0xfd4] ss:$8 sps:$4 sm:$0xff]   ;;  %v6315_v34 = vld [vmem:[%s6887_s23 + $0x6d0] ss:$8 sps:$4 sm:$0xff]  }
 0x1f5   : > { %4541 = vmatprep.subr.bf16.mxu0 %v6232_v35  ;;  %v6318_v35 = vld [vmem:[%s6887_s23 + $0xfd0] ss:$8 sps:$4 sm:$0xff]  }
 0x1f7   : > { %4173 = vmatpush1.bf16.msra.mxu1 %v6227_v36  ;;  %v6323_v36 = vld [vmem:[%s6887_s23 + $0x6e4] ss:$8 sps:$4 sm:$0xff]  }
 0x1f8   : > { %4542 = vmatpush1.bf16.msra.mxu0 %v6230_v37  ;;  %4183 = vmatprep.subr.bf16.mxu1 %v6237_v38  ;;  %v6326_v37 = vld [vmem:[%s6887_s23 + $0xfe4] ss:$8 sps:$4 sm:$0xff]   ;;  %v6321_v38 = vld [vmem:[%s6887_s23 + $0x6e0] ss:$8 sps:$4 sm:$0xff]  }
 0x1f9   : > { %4552 = vmatprep.subr.bf16.mxu0 %v6242_v39  ;;  %v6324_v39 = vld [vmem:[%s6887_s23 + $0xfe0] ss:$8 sps:$4 sm:$0xff]  }
 0x1fa   : > { %4175 = vmatmul.mubr.bf16.vlgmr.msra.gmra.mrb[0].mxu1 %v4892_v40  ;;  %v6329_v40 = vld [vmem:[%s6887_s23 + $0x6f4] ss:$8 sps:$4 sm:$0xff]  }
 0x1fb   : > { %4544 = vmatmul.mubr.bf16.vlgmr.msra.gmra.mrb[0].mxu0 %v4910_v20  ;;  %4184 = vmatpush1.bf16.msra.mxu1 %v6235_v42  ;;  %v6332_v20 = vld [vmem:[%s6887_s23 + $0xff4] ss:$8 sps:$4 sm:$0xff]   ;;  %v6327_v42 = vld [vmem:[%s6887_s23 + $0x6f0] ss:$8 sps:$4 sm:$0xff]  }
 0x1fc   : > { %4553 = vmatpush1.bf16.msra.mxu0 %v6240_v25  ;;  %4185 = vmatprep.subr.bf16.mxu1 %v6245_v33  ;;  %v6330_v25 = vld [vmem:[%s6887_s23 + $0xff0] ss:$8 sps:$4 sm:$0xff]   ;;  %v6337_v33 = vld [vmem:[%s6887_s23 + $0x704] ss:$8 sps:$4 sm:$0xff]  }
 0x1fd   : > { %4554 = vmatprep.subr.bf16.mxu0 %v6248_v43  ;;  %4215 = vmatprep.mubr.bf16.mxu1 %v4895_v44  ;;  %v6342_v43 = vld [vmem:[%s6887_s23 + $0x1004] ss:$8 sps:$4 sm:$0xff]   ;;  %v4894_v44 = vcombine.low %v7389_v29, %v7389_v29  ;;  %v6340_v29 = vld [vmem:[%s6887_s23 + $0x1000] ss:$8 sps:$4 sm:$0xff]  }
 0x1fe   : > { %4584 = vmatprep.mubr.bf16.mxu0 %v4913_v45  ;;  %v4912_v45 = vcombine.low %v7394_v41, %v7394_v41  ;;  %v6345_v41 = vld [vmem:[%s6887_s23 + $0x714] ss:$8 sps:$4 sm:$0xff]  }
 0x1ff   : > { %4186 = vmatpush1.bf16.msra.mxu1 %v6243_v46  ;;  %v7471_v46 = vld [vmem:[%s7655_s0 + $0x38] sm:$0xff] }
 0x200   : > { %4555 = vmatpush1.bf16.msra.mxu0 %v6246_v47  ;;  %4187 = vmatprep.subr.bf16.mxu1 %v6251_v48  ;;  %v7476_v47 = vld [vmem:[%s7655_s0 + $0x80] sm:$0xff] }
 0x201   : > { %4556 = vmatprep.subr.bf16.mxu0 %v6254_v49  ;;  %v6335_v48 = vld [vmem:[%s6887_s23 + $0x700] ss:$8 sps:$4 sm:$0xff]   ;;  %v6348_v49 = vld [vmem:[%s6887_s23 + $0x1014] ss:$8 sps:$4 sm:$0xff]  }
 0x203   : > { %4188 = vmatpush1.bf16.msra.mxu1 %v6249_v50  ;;  %v4897_v50 = vcombine.high %v7471_v46, %v7471_v46 }
 0x204   : > { %4557 = vmatpush1.bf16.msra.mxu0 %v6252_v51  ;;  %4189 = vmatprep.subr.bf16.mxu1 %v6257_v52  ;;  %v4915_v51 = vcombine.high %v7476_v47, %v7476_v47  ;;  %v6343_v52 = vld [vmem:[%s6887_s23 + $0x710] ss:$8 sps:$4 sm:$0xff]  }
 0x205   : > { %4558 = vmatprep.subr.bf16.mxu0 %v6260_v53  ;;  %v6346_v53 = vld [vmem:[%s6887_s23 + $0x1010] ss:$8 sps:$4 sm:$0xff]  }
 0x207   : > { %4190 = vmatpush1.bf16.msra.mxu1 %v6255_v54  ;;  %v6351_v54 = vld [vmem:[%s6887_s23 + $0x724] ss:$8 sps:$4 sm:$0xff]  }
 0x208   : > { %4559 = vmatpush1.bf16.msra.mxu0 %v6258_v55  ;;  %4191 = vmatprep.subr.bf16.mxu1 %v6263_v56  ;;  %v6354_v55 = vld [vmem:[%s6887_s23 + $0x1024] ss:$8 sps:$4 sm:$0xff]   ;;  %v6349_v56 = vld [vmem:[%s6887_s23 + $0x720] ss:$8 sps:$4 sm:$0xff]  }
 0x209   : > { %4560 = vmatprep.subr.bf16.mxu0 %v6266_v57  ;;  %v6352_v57 = vld [vmem:[%s6887_s23 + $0x1020] ss:$8 sps:$4 sm:$0xff]  }
 0x20b   : > { %4192 = vmatpush1.bf16.msra.mxu1 %v6261_v58  ;;  %v6357_v58 = vld [vmem:[%s6887_s23 + $0x734] ss:$8 sps:$4 sm:$0xff]  }
 0x20c   : > { %4561 = vmatpush1.bf16.msra.mxu0 %v6264_v59  ;;  %4193 = vmatprep.subr.bf16.mxu1 %v6269_v60  ;;  %v6360_v59 = vld [vmem:[%s6887_s23 + $0x1034] ss:$8 sps:$4 sm:$0xff]   ;;  %v6355_v60 = vld [vmem:[%s6887_s23 + $0x730] ss:$8 sps:$4 sm:$0xff]  }
 0x20d   : > { %4562 = vmatprep.subr.bf16.mxu0 %v6272_v61  ;;  %v6358_v61 = vld [vmem:[%s6887_s23 + $0x1030] ss:$8 sps:$4 sm:$0xff]  }
 0x20f   : > { %4194 = vmatpush1.bf16.msra.mxu1 %v6267_v62  ;;  %v6363_v62 = vld [vmem:[%s6887_s23 + $0x744] ss:$8 sps:$4 sm:$0xff]  }
 0x210   : > { %4563 = vmatpush1.bf16.msra.mxu0 %v6270_v63  ;;  %4195 = vmatprep.subr.bf16.mxu1 %v6275_v0  ;;  %v6366_v63 = vld [vmem:[%s6887_s23 + $0x1044] ss:$8 sps:$4 sm:$0xff]   ;;  %v6361_v0 = vld [vmem:[%s6887_s23 + $0x740] ss:$8 sps:$4 sm:$0xff]  }
 0x211   : > { %4564 = vmatprep.subr.bf16.mxu0 %v6278_v1  ;;  %v6364_v1 = vld [vmem:[%s6887_s23 + $0x1040] ss:$8 sps:$4 sm:$0xff]  }
 0x213   : > { %4196 = vmatpush1.bf16.msra.mxu1 %v6273_v2  ;;  %v6369_v2 = vld [vmem:[%s6887_s23 + $0x754] ss:$8 sps:$4 sm:$0xff]  }
 0x214   : > { %4565 = vmatpush1.bf16.msra.mxu0 %v6276_v3  ;;  %4197 = vmatprep.subr.bf16.mxu1 %v6281_v4  ;;  %v6372_v3 = vld [vmem:[%s6887_s23 + $0x1054] ss:$8 sps:$4 sm:$0xff]   ;;  %v6367_v4 = vld [vmem:[%s6887_s23 + $0x750] ss:$8 sps:$4 sm:$0xff]  }
 0x215   : > { %4566 = vmatprep.subr.bf16.mxu0 %v6284_v5  ;;  %v6370_v5 = vld [vmem:[%s6887_s23 + $0x1050] ss:$8 sps:$4 sm:$0xff]  }
 0x217   : > { %4198 = vmatpush1.bf16.msra.mxu1 %v6279_v6  ;;  %v6375_v6 = vld [vmem:[%s6887_s23 + $0x764] ss:$8 sps:$4 sm:$0xff]  }
 0x218   : > { %4567 = vmatpush1.bf16.msra.mxu0 %v6282_v7  ;;  %4199 = vmatprep.subr.bf16.mxu1 %v6287_v8  ;;  %v6378_v7 = vld [vmem:[%s6887_s23 + $0x1064] ss:$8 sps:$4 sm:$0xff]   ;;  %v6373_v8 = vld [vmem:[%s6887_s23 + $0x760] ss:$8 sps:$4 sm:$0xff]  }
 0x219   : > { %4568 = vmatprep.subr.bf16.mxu0 %v6290_v9  ;;  %v6376_v9 = vld [vmem:[%s6887_s23 + $0x1060] ss:$8 sps:$4 sm:$0xff]  }
 0x21b   : > { %4200 = vmatpush1.bf16.msra.mxu1 %v6285_v10  ;;  %v6381_v10 = vld [vmem:[%s6887_s23 + $0x774] ss:$8 sps:$4 sm:$0xff]  }
 0x21c   : > { %4569 = vmatpush1.bf16.msra.mxu0 %v6288_v11  ;;  %4201 = vmatprep.subr.bf16.mxu1 %v6293_v12  ;;  %v6384_v11 = vld [vmem:[%s6887_s23 + $0x1074] ss:$8 sps:$4 sm:$0xff]   ;;  %v6379_v12 = vld [vmem:[%s6887_s23 + $0x770] ss:$8 sps:$4 sm:$0xff]  }
 0x21d   : > { %4570 = vmatprep.subr.bf16.mxu0 %v6296_v13  ;;  %v6382_v13 = vld [vmem:[%s6887_s23 + $0x1070] ss:$8 sps:$4 sm:$0xff]  }
 0x21f   : > { %4202 = vmatpush1.bf16.msra.mxu1 %v6291_v14  ;;  %v6387_v14 = vld [vmem:[%s6887_s23 + $0x784] ss:$8 sps:$4 sm:$0xff]  }
 0x220   : > { %4571 = vmatpush1.bf16.msra.mxu0 %v6294_v15  ;;  %4203 = vmatprep.subr.bf16.mxu1 %v6299_v16  ;;  %v6390_v15 = vld [vmem:[%s6887_s23 + $0x1084] ss:$8 sps:$4 sm:$0xff]   ;;  %v6385_v16 = vld [vmem:[%s6887_s23 + $0x780] ss:$8 sps:$4 sm:$0xff]  }
 0x221   : > { %4572 = vmatprep.subr.bf16.mxu0 %v6302_v17  ;;  %v6388_v17 = vld [vmem:[%s6887_s23 + $0x1080] ss:$8 sps:$4 sm:$0xff]  }
 0x223   : > { %4204 = vmatpush1.bf16.msra.mxu1 %v6297_v19  ;;  %v6393_v19 = vld [vmem:[%s6887_s23 + $0x794] ss:$8 sps:$4 sm:$0xff]  }
 0x224   : > { %4573 = vmatpush1.bf16.msra.mxu0 %v6300_v21  ;;  %4205 = vmatprep.subr.bf16.mxu1 %v6305_v22  ;;  %v6396_v21 = vld [vmem:[%s6887_s23 + $0x1094] ss:$8 sps:$4 sm:$0xff]   ;;  %v6391_v22 = vld [vmem:[%s6887_s23 + $0x790] ss:$8 sps:$4 sm:$0xff]  }
 0x225   : > { %4574 = vmatprep.subr.bf16.mxu0 %v6308_v23  ;;  %v6394_v23 = vld [vmem:[%s6887_s23 + $0x1090] ss:$8 sps:$4 sm:$0xff]  }
 0x227   : > { %4206 = vmatpush1.bf16.msra.mxu1 %v6303_v26  ;;  %v6399_v26 = vld [vmem:[%s6887_s23 + $0x7a4] ss:$8 sps:$4 sm:$0xff]  }
 0x228   : > { %4575 = vmatpush1.bf16.msra.mxu0 %v6306_v18  ;;  %4207 = vmatprep.subr.bf16.mxu1 %v6311_v27  ;;  %v6402_v18 = vld [vmem:[%s6887_s23 + $0x10a4] ss:$8 sps:$4 sm:$0xff]   ;;  %v6397_v27 = vld [vmem:[%s6887_s23 + $0x7a0] ss:$8 sps:$4 sm:$0xff]  }
 0x229   : > { %4576 = vmatprep.subr.bf16.mxu0 %v6314_v28  ;;  %v6400_v28 = vld [vmem:[%s6887_s23 + $0x10a0] ss:$8 sps:$4 sm:$0xff]  }
 0x22b   : > { %4208 = vmatpush1.bf16.msra.mxu1 %v6309_v30  ;;  %v6405_v30 = vld [vmem:[%s6887_s23 + $0x7b4] ss:$8 sps:$4 sm:$0xff]  }
 0x22c   : > { %4577 = vmatpush1.bf16.msra.mxu0 %v6312_v31  ;;  %4209 = vmatprep.subr.bf16.mxu1 %v6317_v32  ;;  %v6408_v31 = vld [vmem:[%s6887_s23 + $0x10b4] ss:$8 sps:$4 sm:$0xff]   ;;  %v6403_v32 = vld [vmem:[%s6887_s23 + $0x7b0] ss:$8 sps:$4 sm:$0xff]  }
 0x22d   : > { %4578 = vmatprep.subr.bf16.mxu0 %v6320_v24  ;;  %v6406_v24 = vld [vmem:[%s6887_s23 + $0x10b0] ss:$8 sps:$4 sm:$0xff]  }
 0x22f   : > { %4210 = vmatpush1.bf16.msra.mxu1 %v6315_v34  ;;  %v6411_v34 = vld [vmem:[%s6887_s23 + $0x7c4] ss:$8 sps:$4 sm:$0xff]  }
 0x230   : > { %4579 = vmatpush1.bf16.msra.mxu0 %v6318_v35  ;;  %4211 = vmatprep.subr.bf16.mxu1 %v6323_v36  ;;  %v6414_v35 = vld [vmem:[%s6887_s23 + $0x10c4] ss:$8 sps:$4 sm:$0xff]   ;;  %v6409_v36 = vld [vmem:[%s6887_s23 + $0x7c0] ss:$8 sps:$4 sm:$0xff]  }
 0x231   : > { %4580 = vmatprep.subr.bf16.mxu0 %v6326_v37  ;;  %v6412_v37 = vld [vmem:[%s6887_s23 + $0x10c0] ss:$8 sps:$4 sm:$0xff]  }
 0x233   : > { %4212 = vmatpush1.bf16.msra.mxu1 %v6321_v38  ;;  %v6417_v38 = vld [vmem:[%s6887_s23 + $0x7d4] ss:$8 sps:$4 sm:$0xff]  }
 0x234   : > { %4581 = vmatpush1.bf16.msra.mxu0 %v6324_v39  ;;  %4213 = vmatprep.subr.bf16.mxu1 %v6329_v40  ;;  %v6420_v39 = vld [vmem:[%s6887_s23 + $0x10d4] ss:$8 sps:$4 sm:$0xff]   ;;  %v6415_v40 = vld [vmem:[%s6887_s23 + $0x7d0] ss:$8 sps:$4 sm:$0xff]  }
 0x235   : > { %4582 = vmatprep.subr.bf16.mxu0 %v6332_v20  ;;  %v6418_v20 = vld [vmem:[%s6887_s23 + $0x10d0] ss:$8 sps:$4 sm:$0xff]  }
 0x237   : > { %4214 = vmatpush1.bf16.msra.mxu1 %v6327_v42  ;;  %v6423_v42 = vld [vmem:[%s6887_s23 + $0x7e4] ss:$8 sps:$4 sm:$0xff]  }
 0x238   : > { %4583 = vmatpush1.bf16.msra.mxu0 %v6330_v25  ;;  %4224 = vmatprep.subr.bf16.mxu1 %v6337_v33  ;;  %v6426_v25 = vld [vmem:[%s6887_s23 + $0x10e4] ss:$8 sps:$4 sm:$0xff]   ;;  %v6421_v33 = vld [vmem:[%s6887_s23 + $0x7e0] ss:$8 sps:$4 sm:$0xff]  }
 0x239   : > { %4593 = vmatprep.subr.bf16.mxu0 %v6342_v43  ;;  %v6424_v43 = vld [vmem:[%s6887_s23 + $0x10e0] ss:$8 sps:$4 sm:$0xff]  }
 0x23a   : > { %4216 = vmatmul.mubr.bf16.vlgmr.msra.gmra.mrb[0].mxu1 %v4894_v44  ;;  %v6429_v44 = vld [vmem:[%s6887_s23 + $0x7f4] ss:$8 sps:$4 sm:$0xff]  }
 0x23b   : > { %4585 = vmatmul.mubr.bf16.vlgmr.msra.gmra.mrb[0].mxu0 %v4912_v45  ;;  %4225 = vmatpush1.bf16.msra.mxu1 %v6335_v48  ;;  %v6432_v45 = vld [vmem:[%s6887_s23 + $0x10f4] ss:$8 sps:$4 sm:$0xff]   ;;  %v6427_v48 = vld [vmem:[%s6887_s23 + $0x7f0] ss:$8 sps:$4 sm:$0xff]  }
 0x23c   : > { %4594 = vmatpush1.bf16.msra.mxu0 %v6340_v29  ;;  %4226 = vmatprep.subr.bf16.mxu1 %v6345_v41  ;;  %v6430_v29 = vld [vmem:[%s6887_s23 + $0x10f0] ss:$8 sps:$4 sm:$0xff]   ;;  %v6437_v41 = vld [vmem:[%s6887_s23 + $0x804] ss:$8 sps:$4 sm:$0xff]  }
 0x23d   : > { %4595 = vmatprep.subr.bf16.mxu0 %v6348_v49  ;;  %4256 = vmatprep.mubr.bf16.mxu1 %v4897_v50  ;;  %v6442_v49 = vld [vmem:[%s6887_s23 + $0x1104] ss:$8 sps:$4 sm:$0xff]   ;;  %v4896_v50 = vcombine.low %v7471_v46, %v7471_v46  ;;  %v6440_v46 = vld [vmem:[%s6887_s23 + $0x1100] ss:$8 sps:$4 sm:$0xff]  }
 0x23e   : > { %4625 = vmatprep.mubr.bf16.mxu0 %v4915_v51  ;;  %v4914_v51 = vcombine.low %v7476_v47, %v7476_v47  ;;  %v6445_v47 = vld [vmem:[%s6887_s23 + $0x814] ss:$8 sps:$4 sm:$0xff]  }
 0x23f   : > { %4227 = vmatpush1.bf16.msra.mxu1 %v6343_v52  ;;  %v7553_v52 = vld [vmem:[%s7655_s0 + $0x40] sm:$0xff] }
 0x240   : > { %4596 = vmatpush1.bf16.msra.mxu0 %v6346_v53  ;;  %4228 = vmatprep.subr.bf16.mxu1 %v6351_v54  ;;  %v7558_v53 = vld [vmem:[%s7655_s0 + $0x88] sm:$0xff] }
 0x241   : > { %4597 = vmatprep.subr.bf16.mxu0 %v6354_v55  ;;  %v6435_v54 = vld [vmem:[%s6887_s23 + $0x800] ss:$8 sps:$4 sm:$0xff]   ;;  %v6448_v55 = vld [vmem:[%s6887_s23 + $0x1114] ss:$8 sps:$4 sm:$0xff]  }
 0x243   : > { %4229 = vmatpush1.bf16.msra.mxu1 %v6349_v56  ;;  %v4899_v56 = vcombine.high %v7553_v52, %v7553_v52 }
 0x244   : > { %4598 = vmatpush1.bf16.msra.mxu0 %v6352_v57  ;;  %4230 = vmatprep.subr.bf16.mxu1 %v6357_v58  ;;  %v4917_v57 = vcombine.high %v7558_v53, %v7558_v53  ;;  %v6443_v58 = vld [vmem:[%s6887_s23 + $0x810] ss:$8 sps:$4 sm:$0xff]  }
 0x245   : > { %4599 = vmatprep.subr.bf16.mxu0 %v6360_v59  ;;  %v6446_v59 = vld [vmem:[%s6887_s23 + $0x1110] ss:$8 sps:$4 sm:$0xff]  }
 0x247   : > { %4231 = vmatpush1.bf16.msra.mxu1 %v6355_v60  ;;  %v6451_v60 = vld [vmem:[%s6887_s23 + $0x824] ss:$8 sps:$4 sm:$0xff]  }
 0x248   : > { %4600 = vmatpush1.bf16.msra.mxu0 %v6358_v61  ;;  %4232 = vmatprep.subr.bf16.mxu1 %v6363_v62  ;;  %v6454_v61 = vld [vmem:[%s6887_s23 + $0x1124] ss:$8 sps:$4 sm:$0xff]   ;;  %v6449_v62 = vld [vmem:[%s6887_s23 + $0x820] ss:$8 sps:$4 sm:$0xff]  }
 0x249   : > { %4601 = vmatprep.subr.bf16.mxu0 %v6366_v63  ;;  %v6452_v63 = vld [vmem:[%s6887_s23 + $0x1120] ss:$8 sps:$4 sm:$0xff]  }
 0x24b   : > { %4233 = vmatpush1.bf16.msra.mxu1 %v6361_v0  ;;  %v6457_v0 = vld [vmem:[%s6887_s23 + $0x834] ss:$8 sps:$4 sm:$0xff]  }
 0x24c   : > { %4602 = vmatpush1.bf16.msra.mxu0 %v6364_v1  ;;  %4234 = vmatprep.subr.bf16.mxu1 %v6369_v2  ;;  %v6460_v1 = vld [vmem:[%s6887_s23 + $0x1134] ss:$8 sps:$4 sm:$0xff]   ;;  %v6455_v2 = vld [vmem:[%s6887_s23 + $0x830] ss:$8 sps:$4 sm:$0xff]  }
 0x24d   : > { %4603 = vmatprep.subr.bf16.mxu0 %v6372_v3  ;;  %v6458_v3 = vld [vmem:[%s6887_s23 + $0x1130] ss:$8 sps:$4 sm:$0xff]  }
 0x24f   : > { %4235 = vmatpush1.bf16.msra.mxu1 %v6367_v4  ;;  %v6463_v4 = vld [vmem:[%s6887_s23 + $0x844] ss:$8 sps:$4 sm:$0xff]  }
 0x250   : > { %4604 = vmatpush1.bf16.msra.mxu0 %v6370_v5  ;;  %4236 = vmatprep.subr.bf16.mxu1 %v6375_v6  ;;  %v6466_v5 = vld [vmem:[%s6887_s23 + $0x1144] ss:$8 sps:$4 sm:$0xff]   ;;  %v6461_v6 = vld [vmem:[%s6887_s23 + $0x840] ss:$8 sps:$4 sm:$0xff]  }
 0x251   : > { %4605 = vmatprep.subr.bf16.mxu0 %v6378_v7  ;;  %v6464_v7 = vld [vmem:[%s6887_s23 + $0x1140] ss:$8 sps:$4 sm:$0xff]  }
 0x253   : > { %4237 = vmatpush1.bf16.msra.mxu1 %v6373_v8  ;;  %v6469_v8 = vld [vmem:[%s6887_s23 + $0x854] ss:$8 sps:$4 sm:$0xff]  }
 0x254   : > { %4606 = vmatpush1.bf16.msra.mxu0 %v6376_v9  ;;  %4238 = vmatprep.subr.bf16.mxu1 %v6381_v10  ;;  %v6472_v9 = vld [vmem:[%s6887_s23 + $0x1154] ss:$8 sps:$4 sm:$0xff]   ;;  %v6467_v10 = vld [vmem:[%s6887_s23 + $0x850] ss:$8 sps:$4 sm:$0xff]  }
 0x255   : > { %4607 = vmatprep.subr.bf16.mxu0 %v6384_v11  ;;  %v6470_v11 = vld [vmem:[%s6887_s23 + $0x1150] ss:$8 sps:$4 sm:$0xff]  }
 0x257   : > { %4239 = vmatpush1.bf16.msra.mxu1 %v6379_v12  ;;  %v6475_v12 = vld [vmem:[%s6887_s23 + $0x864] ss:$8 sps:$4 sm:$0xff]  }
 0x258   : > { %4608 = vmatpush1.bf16.msra.mxu0 %v6382_v13  ;;  %4240 = vmatprep.subr.bf16.mxu1 %v6387_v14  ;;  %v6478_v13 = vld [vmem:[%s6887_s23 + $0x1164] ss:$8 sps:$4 sm:$0xff]   ;;  %v6473_v14 = vld [vmem:[%s6887_s23 + $0x860] ss:$8 sps:$4 sm:$0xff]  }
 0x259   : > { %4609 = vmatprep.subr.bf16.mxu0 %v6390_v15  ;;  %v6476_v15 = vld [vmem:[%s6887_s23 + $0x1160] ss:$8 sps:$4 sm:$0xff]  }
 0x25b   : > { %4241 = vmatpush1.bf16.msra.mxu1 %v6385_v16  ;;  %v6481_v16 = vld [vmem:[%s6887_s23 + $0x874] ss:$8 sps:$4 sm:$0xff]  }
 0x25c   : > { %4610 = vmatpush1.bf16.msra.mxu0 %v6388_v17  ;;  %4242 = vmatprep.subr.bf16.mxu1 %v6393_v19  ;;  %v6484_v17 = vld [vmem:[%s6887_s23 + $0x1174] ss:$8 sps:$4 sm:$0xff]   ;;  %v6479_v19 = vld [vmem:[%s6887_s23 + $0x870] ss:$8 sps:$4 sm:$0xff]  }
 0x25d   : > { %4611 = vmatprep.subr.bf16.mxu0 %v6396_v21  ;;  %v6482_v21 = vld [vmem:[%s6887_s23 + $0x1170] ss:$8 sps:$4 sm:$0xff]  }
 0x25f   : > { %4243 = vmatpush1.bf16.msra.mxu1 %v6391_v22  ;;  %v6487_v22 = vld [vmem:[%s6887_s23 + $0x884] ss:$8 sps:$4 sm:$0xff]  }
 0x260   : > { %4612 = vmatpush1.bf16.msra.mxu0 %v6394_v23  ;;  %4244 = vmatprep.subr.bf16.mxu1 %v6399_v26  ;;  %v6490_v23 = vld [vmem:[%s6887_s23 + $0x1184] ss:$8 sps:$4 sm:$0xff]   ;;  %v6485_v26 = vld [vmem:[%s6887_s23 + $0x880] ss:$8 sps:$4 sm:$0xff]  }
 0x261   : > { %4613 = vmatprep.subr.bf16.mxu0 %v6402_v18  ;;  %v6488_v18 = vld [vmem:[%s6887_s23 + $0x1180] ss:$8 sps:$4 sm:$0xff]  }
 0x263   : > { %4245 = vmatpush1.bf16.msra.mxu1 %v6397_v27  ;;  %v6493_v27 = vld [vmem:[%s6887_s23 + $0x894] ss:$8 sps:$4 sm:$0xff]  }
 0x264   : > { %4614 = vmatpush1.bf16.msra.mxu0 %v6400_v28  ;;  %4246 = vmatprep.subr.bf16.mxu1 %v6405_v30  ;;  %v6496_v28 = vld [vmem:[%s6887_s23 + $0x1194] ss:$8 sps:$4 sm:$0xff]   ;;  %v6491_v30 = vld [vmem:[%s6887_s23 + $0x890] ss:$8 sps:$4 sm:$0xff]  }
 0x265   : > { %4615 = vmatprep.subr.bf16.mxu0 %v6408_v31  ;;  %v6494_v31 = vld [vmem:[%s6887_s23 + $0x1190] ss:$8 sps:$4 sm:$0xff]  }
 0x267   : > { %4247 = vmatpush1.bf16.msra.mxu1 %v6403_v32  ;;  %v6499_v32 = vld [vmem:[%s6887_s23 + $0x8a4] ss:$8 sps:$4 sm:$0xff]  }
 0x268   : > { %4616 = vmatpush1.bf16.msra.mxu0 %v6406_v24  ;;  %4248 = vmatprep.subr.bf16.mxu1 %v6411_v34  ;;  %v6502_v24 = vld [vmem:[%s6887_s23 + $0x11a4] ss:$8 sps:$4 sm:$0xff]   ;;  %v6497_v34 = vld [vmem:[%s6887_s23 + $0x8a0] ss:$8 sps:$4 sm:$0xff]  }
 0x269   : > { %4617 = vmatprep.subr.bf16.mxu0 %v6414_v35  ;;  %v6500_v35 = vld [vmem:[%s6887_s23 + $0x11a0] ss:$8 sps:$4 sm:$0xff]  }
 0x26b   : > { %4249 = vmatpush1.bf16.msra.mxu1 %v6409_v36  ;;  %v6505_v36 = vld [vmem:[%s6887_s23 + $0x8b4] ss:$8 sps:$4 sm:$0xff]  }
 0x26c   : > { %4618 = vmatpush1.bf16.msra.mxu0 %v6412_v37  ;;  %4250 = vmatprep.subr.bf16.mxu1 %v6417_v38  ;;  %v6508_v37 = vld [vmem:[%s6887_s23 + $0x11b4] ss:$8 sps:$4 sm:$0xff]   ;;  %v6503_v38 = vld [vmem:[%s6887_s23 + $0x8b0] ss:$8 sps:$4 sm:$0xff]  }
 0x26d   : > { %4619 = vmatprep.subr.bf16.mxu0 %v6420_v39  ;;  %v6506_v39 = vld [vmem:[%s6887_s23 + $0x11b0] ss:$8 sps:$4 sm:$0xff]  }
 0x26f   : > { %4251 = vmatpush1.bf16.msra.mxu1 %v6415_v40  ;;  %v6511_v40 = vld [vmem:[%s6887_s23 + $0x8c4] ss:$8 sps:$4 sm:$0xff]  }
 0x270   : > { %4620 = vmatpush1.bf16.msra.mxu0 %v6418_v20  ;;  %4252 = vmatprep.subr.bf16.mxu1 %v6423_v42  ;;  %v6514_v20 = vld [vmem:[%s6887_s23 + $0x11c4] ss:$8 sps:$4 sm:$0xff]   ;;  %v6509_v42 = vld [vmem:[%s6887_s23 + $0x8c0] ss:$8 sps:$4 sm:$0xff]  }
 0x271   : > { %4621 = vmatprep.subr.bf16.mxu0 %v6426_v25  ;;  %v6512_v25 = vld [vmem:[%s6887_s23 + $0x11c0] ss:$8 sps:$4 sm:$0xff]  }
 0x273   : > { %4253 = vmatpush1.bf16.msra.mxu1 %v6421_v33  ;;  %v6517_v33 = vld [vmem:[%s6887_s23 + $0x8d4] ss:$8 sps:$4 sm:$0xff]  }
 0x274   : > { %4622 = vmatpush1.bf16.msra.mxu0 %v6424_v43  ;;  %4254 = vmatprep.subr.bf16.mxu1 %v6429_v44  ;;  %v6520_v43 = vld [vmem:[%s6887_s23 + $0x11d4] ss:$8 sps:$4 sm:$0xff]   ;;  %v6515_v44 = vld [vmem:[%s6887_s23 + $0x8d0] ss:$8 sps:$4 sm:$0xff]  }
 0x275   : > { %4623 = vmatprep.subr.bf16.mxu0 %v6432_v45  ;;  %v6518_v45 = vld [vmem:[%s6887_s23 + $0x11d0] ss:$8 sps:$4 sm:$0xff]  }
 0x277   : > { %4255 = vmatpush1.bf16.msra.mxu1 %v6427_v48  ;;  %v6523_v48 = vld [vmem:[%s6887_s23 + $0x8e4] ss:$8 sps:$4 sm:$0xff]  }
 0x278   : > { %4624 = vmatpush1.bf16.msra.mxu0 %v6430_v29  ;;  %4265 = vmatprep.subr.bf16.mxu1 %v6437_v41  ;;  %v6526_v29 = vld [vmem:[%s6887_s23 + $0x11e4] ss:$8 sps:$4 sm:$0xff]   ;;  %v6521_v41 = vld [vmem:[%s6887_s23 + $0x8e0] ss:$8 sps:$4 sm:$0xff]  }
 0x279   : > { %4634 = vmatprep.subr.bf16.mxu0 %v6442_v49  ;;  %v6524_v49 = vld [vmem:[%s6887_s23 + $0x11e0] ss:$8 sps:$4 sm:$0xff]  }
 0x27a   : > { %4257 = vmatmul.mubr.bf16.vlgmr.msra.gmra.mrb[0].mxu1 %v4896_v50  ;;  %v6529_v50 = vld [vmem:[%s6887_s23 + $0x8f4] ss:$8 sps:$4 sm:$0xff]  }
 0x27b   : > { %4626 = vmatmul.mubr.bf16.vlgmr.msra.gmra.mrb[0].mxu0 %v4914_v51  ;;  %4266 = vmatpush1.bf16.msra.mxu1 %v6435_v54  ;;  %v6532_v51 = vld [vmem:[%s6887_s23 + $0x11f4] ss:$8 sps:$4 sm:$0xff]   ;;  %v6527_v54 = vld [vmem:[%s6887_s23 + $0x8f0] ss:$8 sps:$4 sm:$0xff]  }
 0x27c   : > { %4635 = vmatpush1.bf16.msra.mxu0 %v6440_v46  ;;  %4267 = vmatprep.subr.bf16.mxu1 %v6445_v47  ;;  %v6530_v46 = vld [vmem:[%s6887_s23 + $0x11f0] ss:$8 sps:$4 sm:$0xff]   ;;  %v4898_v47 = vcombine.low %v7553_v52, %v7553_v52  ;;  %s275_s23 = scalar_lea.vmem [#allocation6], %s4878_s9 }
 0x27d   : > { %4636 = vmatprep.subr.bf16.mxu0 %v6448_v55  ;;  %4297 = vmatprep.mubr.bf16.mxu1 %v4899_v56  ;;  %v4916_v55 = vcombine.low %v7558_v53, %v7558_v53  ;;  %v4677_v56 = vlaneseq }
 0x27e   : > { %4666 = vmatprep.mubr.bf16.mxu0 %v4917_v57 }
 0x27f   : > { %4268 = vmatpush1.bf16.msra.mxu1 %v6443_v58  ;;  %v4678_v57 = vshrl.u32 %v4677_v56, 7 }
 0x280   : > { %4637 = vmatpush1.bf16.msra.mxu0 %v6446_v59  ;;  %4269 = vmatprep.subr.bf16.mxu1 %v6451_v60  ;;  %v4675_v59 = vld [vmem:[%s6898_s7] sm:$0x3]  ;;  %s335_s7 = scalar_lea.vmem %s7659_s4, %s4881_s18 }
 0x281   : > { %4638 = vmatprep.subr.bf16.mxu0 %v6454_v61  ;;  %v4679_v58 = vsub.s32 0, %v4678_v57  ;;  %v4683_v60 = vsub.s32 1, %v4678_v57  ;;  %v4689_v61 = vld [vmem:[%s275_s23] sm:$0x3] }
 0x283   : > { %4270 = vmatpush1.bf16.msra.mxu1 %v6449_v62  ;;  %v4680_v62 = vrot.slane %v4675_v59, %v4679_v58  ;;  %v4694_v53 = vrot.slane %v4689_v61, %v4679_v58 }
 0x284   : > { %4639 = vmatpush1.bf16.msra.mxu0 %v6452_v63  ;;  %4271 = vmatprep.subr.bf16.mxu1 %v6457_v0  ;;  %v4684_v0 = vrot.slane %v4675_v59, %v4683_v60 }
 0x285   : > { %4640 = vmatprep.subr.bf16.mxu0 %v6460_v1 }
 0x287   : > { %4272 = vmatpush1.bf16.msra.mxu1 %v6455_v2 }
 0x288   : > { %4641 = vmatpush1.bf16.msra.mxu0 %v6458_v3  ;;  %4273 = vmatprep.subr.bf16.mxu1 %v6463_v4 }
 0x289   : > { %4642 = vmatprep.subr.bf16.mxu0 %v6466_v5  ;;  %v4698_v5 = vrot.slane %v4689_v61, %v4683_v60 }
 0x28b   : > { %4274 = vmatpush1.bf16.msra.mxu1 %v6461_v6 }
 0x28c   : > { %4643 = vmatpush1.bf16.msra.mxu0 %v6464_v7  ;;  %4275 = vmatprep.subr.bf16.mxu1 %v6469_v8 }
 0x28d   : > { %4644 = vmatprep.subr.bf16.mxu0 %v6472_v9 }
 0x28f   : > { %4276 = vmatpush1.bf16.msra.mxu1 %v6467_v10 }
 0x290   : > { %4645 = vmatpush1.bf16.msra.mxu0 %v6470_v11  ;;  %4277 = vmatprep.subr.bf16.mxu1 %v6475_v12 }
 0x291   : > { %4646 = vmatprep.subr.bf16.mxu0 %v6478_v13 }
 0x293   : > { %4278 = vmatpush1.bf16.msra.mxu1 %v6473_v14 }
 0x294   : > { %4647 = vmatpush1.bf16.msra.mxu0 %v6476_v15  ;;  %4279 = vmatprep.subr.bf16.mxu1 %v6481_v16 }
 0x295   : > { %4648 = vmatprep.subr.bf16.mxu0 %v6484_v17 }
 0x297   : > { %4280 = vmatpush1.bf16.msra.mxu1 %v6479_v19 }
 0x298   : > { %4649 = vmatpush1.bf16.msra.mxu0 %v6482_v21  ;;  %4281 = vmatprep.subr.bf16.mxu1 %v6487_v22 }
 0x299   : > { %4650 = vmatprep.subr.bf16.mxu0 %v6490_v23 }
 0x29b   : > { %4282 = vmatpush1.bf16.msra.mxu1 %v6485_v26 }
 0x29c   : > { %4651 = vmatpush1.bf16.msra.mxu0 %v6488_v18  ;;  %4283 = vmatprep.subr.bf16.mxu1 %v6493_v27 }
 0x29d   : > { %4652 = vmatprep.subr.bf16.mxu0 %v6496_v28 }
 0x29f   : > { %4284 = vmatpush1.bf16.msra.mxu1 %v6491_v30 }
 0x2a0   : > { %4653 = vmatpush1.bf16.msra.mxu0 %v6494_v31  ;;  %4285 = vmatprep.subr.bf16.mxu1 %v6499_v32 }
 0x2a1   : > { %4654 = vmatprep.subr.bf16.mxu0 %v6502_v24 }
 0x2a3   : > { %4286 = vmatpush1.bf16.msra.mxu1 %v6497_v34 }
 0x2a4   : > { %4655 = vmatpush1.bf16.msra.mxu0 %v6500_v35  ;;  %4287 = vmatprep.subr.bf16.mxu1 %v6505_v36 }
 0x2a5   : > { %4656 = vmatprep.subr.bf16.mxu0 %v6508_v37 }
 0x2a7   : > { %4288 = vmatpush1.bf16.msra.mxu1 %v6503_v38 }
 0x2a8   : > { %4657 = vmatpush1.bf16.msra.mxu0 %v6506_v39  ;;  %4289 = vmatprep.subr.bf16.mxu1 %v6511_v40 }
 0x2a9   : > { %4658 = vmatprep.subr.bf16.mxu0 %v6514_v20 }
 0x2ab   : > { %4290 = vmatpush1.bf16.msra.mxu1 %v6509_v42 }
 0x2ac   : > { %4659 = vmatpush1.bf16.msra.mxu0 %v6512_v25  ;;  %4291 = vmatprep.subr.bf16.mxu1 %v6517_v33 }
 0x2ad   : > { %4660 = vmatprep.subr.bf16.mxu0 %v6520_v43 }
 0x2af   : > { %4292 = vmatpush1.bf16.msra.mxu1 %v6515_v44 }
 0x2b0   : > { %4661 = vmatpush1.bf16.msra.mxu0 %v6518_v45  ;;  %4293 = vmatprep.subr.bf16.mxu1 %v6523_v48 }
 0x2b1   : > { %4662 = vmatprep.subr.bf16.mxu0 %v6526_v29 }
 0x2b3   : > { %4294 = vmatpush1.bf16.msra.mxu1 %v6521_v41 }
 0x2b4   : > { %4663 = vmatpush1.bf16.msra.mxu0 %v6524_v49  ;;  %4295 = vmatprep.subr.bf16.mxu1 %v6529_v50 }
 0x2b5   : > { %4664 = vmatprep.subr.bf16.mxu0 %v6532_v51 }
 0x2b7   : > { %4296 = vmatpush1.bf16.msra.mxu1 %v6527_v54 }
 0x2b8   : > { %4665 = vmatpush1.bf16.msra.mxu0 %v6530_v46 }
 0x2ba   : > { %4298 = vmatmul.mubr.bf16.vlgmr.msra.gmra.mrb[0].mxu1 %v4898_v47 }
 0x2bb   : > { %4667 = vmatmul.mubr.bf16.vlgmr.msra.gmra.mrb[0].mxu0 %v4916_v55 }
 0x38d   : > { %v4299_v63 = vpop.f32.mrb[0].mxu1 }
 0x38e   : > { %v4668_v52 = vpop.f32.mrb[0].mxu0  ;;  %v4301_v2 = vpop.f32.mrb[1].mxu1 }
 0x38f   : > { %v5501_v1 = vadd.f32 %v4668_v52, %v4299_v63  ;;  %v4670_v3 = vpop.f32.mrb[1].mxu0  ;;  %v4303_v6 = vpop.f32.mrb[2].mxu1 }
 0x390   : > { %v5502_v4 = vadd.f32 %v4670_v3, %v4301_v2  ;;  %v4672_v7 = vpop.f32.mrb[2].mxu0  ;;  %v4304_v9 = vpop.f32.mrb[3].mxu1 }
 0x391   : > { %v4687_v8 = vmul.f32 %v5501_v1, %v4680_v62  ;;  %v4673_v10 = vpop.f32.mrb[3].mxu0 }
 0x392   : > { %v4688_v11 = vmul.f32 %v5502_v4, %v4684_v0 }
 0x393   : > { %v4701_v12 = vadd.f32 %v4694_v53, %v4687_v8 }
 0x394   : > { %v4702_v13 = vadd.f32 %v4698_v5, %v4688_v11 }
 0x395   : > { %v4703_v14 = vmax.f32 %v4701_v12, 0.0 }
 0x396   : > { %v4704_v15 = vmax.f32 %v4702_v13, 0.0 }
 0x398   : > { %v5500_v16 = vpack.c.bf16 %v4704_v15, %v4703_v14 }
 0x39a   : > { %4713 = vst [vmem:[%s335_s7] sm:$0xff] %v5500_v16 }
 0x39b PF: > { %s20_s20 = sadd.s32 1, %s6681_s20   ;;  %s7679_s13 = sld [smem:[#allocation9_spill]] }
 0x39c   : > { %p17_p1 = scmp.ge.s32.totalorder %s20_s20, 6   ;;  %s7680_s15 = smov %s6665_s16 }
 0x39d   : > { %s7681_s16 = smov %s6669_s17  ;;  %s7682_s17 = smov %s6761_s26 }
 0x39e   : > { %s7683_s18 = smov %s6677_s19  ;;  %19 = sbr.rel (!%p17_p1) target bundleno = 9 (0x9), region = 103 }
 0x3a1   : > { %s7684_s19 = smov %s7679_s13 }
 0x3a5   :  { %4744 = vsyncpa [#allocation3], 1 }
 0x3a6   :  { %4746 = vsyncpa [#allocation3 + $0x1], 1 }
 0x3a7   :  { %4747 = vsyncpa [#allocation5], 1 }
 0x3a8   :  { %4749 = vsyncpa [#allocation5 + $0x1], 1 }

</bundles_post_ra>
